<compile_context>
chip_gen: v7x
topology: tpu7x:2x2x1
jax: 0.10.0
libtpu: 0.0.40
codegen_flags: <defaults>
</compile_context>

<pallas_src>
import functools

import jax
import jax.numpy as jnp
from jax.experimental import pallas as pl
from jax.experimental.pallas import tpu as pltpu

_LANES = 128  # bins live on the lane axis; lanes >= n_bins are dead


def _ece_bin_stats_kernel(x_ref, t_ref, out_ref, *, n_bins, n_rows, tile_rows):
    i = pl.program_id(0)

    x = x_ref[...].astype(jnp.float32)          # (TN, C) logits
    t = t_ref[...]                              # (TN, 1) int32 labels
    c = x.shape[-1]

    # Row-validity for the (possibly) ragged last block.  Sanitize pad rows
    # BEFORE exp so undefined pad data cannot produce NaN/Inf that survives.
    row = jax.lax.broadcasted_iota(jnp.int32, (tile_rows, 1), 0)
    valid = (i * tile_rows + row) < n_rows                         # (TN, 1) bool
    x = jnp.where(valid, x, 0.0)

    # Confidence = max_c softmax(x)_c = 1 / sum_c exp(x_c - max_c).
    m = jnp.max(x, axis=-1, keepdims=True)                         # (TN, 1)
    sum_exp = jnp.sum(jnp.exp(x - m), axis=-1, keepdims=True)      # (TN, 1)
    conf = 1.0 / sum_exp                                           # (TN, 1)

    # Prediction = first index attaining the max logit; accuracy vs. label.
    cls = jax.lax.broadcasted_iota(jnp.int32, x.shape, 1)          # (TN, C)
    pred = jnp.min(jnp.where(x == m, cls, jnp.int32(c)),
                   axis=-1, keepdims=True)                         # (TN, 1)
    acc = (pred == t).astype(jnp.float32)                          # (TN, 1)

    # Bin id per row: bin b = (b/n_bins, (b+1)/n_bins]  ->  ceil(conf*n)-1.
    # Invalid rows are routed to dead lane `n_bins` (< _LANES) so they never
    # contribute to lanes [0, n_bins); no (TN, 128) validity mask needed.
    bin_id = jnp.ceil(conf * float(n_bins)).astype(jnp.int32) - 1
    bin_id = jnp.clip(bin_id, 0, n_bins - 1)
    bin_id = jnp.where(valid, bin_id, jnp.int32(n_bins))           # (TN, 1)

    lane = jax.lax.broadcasted_iota(jnp.int32, (tile_rows, _LANES), 1)
    onehot = (lane == bin_id).astype(jnp.float32)                  # (TN, 128)

    counts = jnp.sum(onehot, axis=0, keepdims=True)                # (1, 128)
    conf_sum = jnp.sum(onehot * conf, axis=0, keepdims=True)       # (1, 128)
    acc_sum = jnp.sum(onehot * acc, axis=0, keepdims=True)         # (1, 128)

    stats = jnp.concatenate(
        [counts, conf_sum, acc_sum, jnp.zeros((5, _LANES), jnp.float32)], axis=0)
    out_ref[...] = stats[None, :, :]                               # (1, 8, 128)


def _round_up(v, m):
    return ((v + m - 1) // m) * m


def _choose_tile_rows(n, c, itemsize):
    """Pick a sublane-aligned row tile sized against a conservative VMEM budget."""
    sub = 16 if itemsize < 4 else 8                 # bf16/fp16 sublane packing
    lane_c = _round_up(c, _LANES)
    # Double-buffered pipeline inputs per row (lane-padded logits + labels).
    vmem_row_in = 2 * (lane_c * itemsize + _LANES * 4)
    # Allowance for in-kernel f32 intermediates (upcast x, one-hot, weighted).
    vmem_row_work = 6 * _LANES * 4
    vmem_budget = 16 * 1024 * 1024                  # well under 32 MiB scoped limit
    tn = vmem_budget // (vmem_row_in + vmem_row_work)
    tn = max(sub, min(4096, tn))
    tn = min(tn, _round_up(n, sub))
    tn = max(sub, (tn // sub) * sub)

    num_tiles = pl.cdiv(n, tn)
    if num_tiles == 1 and n > 2 * sub:
        # v7x has two TensorCores: prefer two half-size tiles over one tile.
        tn = max(sub, _round_up(pl.cdiv(n, 2), sub))
        num_tiles = pl.cdiv(n, tn)
    return int(tn), int(num_tiles)


def ece_loss(logits, labels, *, n_bins=15):
    """ECELoss forward. logits: (N, C) float (f32 or bf16), labels: (N,) int.

    Returns shape (1,), matching the PyTorch module.
    """
    assert logits.ndim == 2 and labels.ndim == 1
    assert 0 < n_bins < _LANES
    n, c = logits.shape
    tn, num_tiles = _choose_tile_rows(n, c, logits.dtype.itemsize)

    t = labels.reshape(-1, 1).astype(jnp.int32)

    kernel = functools.partial(
        _ece_bin_stats_kernel,
        n_bins=int(n_bins), n_rows=int(n), tile_rows=int(tn))

    stats = pl.pallas_call(
        kernel,
        out_shape=jax.ShapeDtypeStruct((num_tiles, 8, _LANES), jnp.float32),
        grid_spec=pltpu.PrefetchScalarGridSpec(
            num_scalar_prefetch=0,
            grid=(num_tiles,),
            in_specs=[
                pl.BlockSpec((tn, c), lambda i: (i, 0)),   # no class-axis padding
                pl.BlockSpec((tn, 1), lambda i: (i, 0)),   # labels
            ],
            out_specs=pl.BlockSpec((1, 8, _LANES), lambda i: (i, 0, 0)),
        ),
        compiler_params=pltpu.CompilerParams(
            dimension_semantics=("parallel",),
            vmem_limit_bytes=32 * 1024 * 1024),
    )(logits, t)

    # Tiny finish on 3 x n_bins numbers (parallel partials, combined in wrapper).
    totals = jnp.sum(stats, axis=0)                 # (8, 128)
    counts = totals[0, :n_bins]
    conf_sums = totals[1, :n_bins]
    acc_sums = totals[2, :n_bins]
    prop = counts / float(n)
    denom = jnp.maximum(counts, 1.0)                # guards empty bins (torch skips them)
    gap = jnp.abs(conf_sums / denom - acc_sums / denom)
    ece = jnp.sum(jnp.where(counts > 0, gap * prop, 0.0))
    return jnp.reshape(ece, (1,))


def _reference_ece(logits, labels, *, n_bins=15):
    """Pure-JAX reference mirroring the PyTorch ECELoss.forward."""
    sm = jax.nn.softmax(logits.astype(jnp.float32), axis=1)
    conf = jnp.max(sm, axis=1)
    pred = jnp.argmax(sm, axis=1)
    acc = (pred == labels).astype(jnp.float32)

    bins = jnp.arange(n_bins, dtype=jnp.float32)
    lowers = bins / float(n_bins)
    uppers = (bins + 1.0) / float(n_bins)
    in_bin = (conf[:, None] > lowers[None, :]) & (conf[:, None] <= uppers[None, :])
    in_f = in_bin.astype(jnp.float32)

    counts = in_f.sum(axis=0)
    prop = counts / conf.shape[0]
    denom = jnp.maximum(counts, 1.0)
    avg_conf = (in_f * conf[:, None]).sum(axis=0) / denom
    avg_acc = (in_f * acc[:, None]).sum(axis=0) / denom
    ece = jnp.sum(jnp.where(counts > 0, jnp.abs(avg_conf - avg_acc) * prop, 0.0))
    return jnp.reshape(ece, (1,))


if __name__ == "__main__":
    key = jax.random.PRNGKey(0)
    kx, kt = jax.random.split(key)

    N, C = 1000, 10   # ragged vs. the chosen row tile (exercises masking + 2-tile split)
    logits = 2.0 * jax.random.normal(kx, (N, C), dtype=jnp.float32)
    labels = jax.random.randint(kt, (N,), 0, C, dtype=jnp.int32)

    out = ece_loss(logits, labels, n_bins=15)
    out = jax.block_until_ready(out)

    ref = _reference_ece(logits, labels, n_bins=15)
    assert jnp.allclose(out, ref, rtol=1e-4, atol=1e-5), (out, ref)

    # TODO(synk): the data-dependent `prop_in_bin.item() > 0` Python branch is
    # replaced by masked arithmetic (identical result, no dynamic control flow).
    print("KERNEL_OK")
</pallas_src>

<mosaic_0001>
module attributes {stable_mosaic.version = 11 : i64} {
  func.func @_ece_bin_stats_kernel(%arg0: i32, %arg1: memref<504x10xf32, #tpu.memory_space<vmem>>, %arg2: memref<504x1xi32, #tpu.memory_space<vmem>>, %arg3: memref<1x8x128xf32, #tpu.memory_space<vmem>>) attributes {dimension_semantics = [#tpu.dimension_semantics<parallel>], iteration_bounds = array<i64: 2>, scalar_prefetch = 0 : i64, scratch_operands = 0 : i64, tpu.core_type = #tpu.core_type<tc>, window_params = [{transform_indices = @transform_0, window_bounds = array<i64: 504, 10>}, {transform_indices = @transform_1, window_bounds = array<i64: 504, 1>}, {transform_indices = @transform_2, window_bounds = array<i64: 1, 8, 128>}]} {
    %c0 = arith.constant 0 : index
    %c0_0 = arith.constant 0 : index
    %0 = vector.load %arg1[%c0, %c0_0] : memref<504x10xf32, #tpu.memory_space<vmem>>, vector<504x10xf32>
    %c0_1 = arith.constant 0 : index
    %c0_2 = arith.constant 0 : index
    %1 = vector.load %arg2[%c0_1, %c0_2] : memref<504x1xi32, #tpu.memory_space<vmem>>, vector<504x1xi32>
    %2 = tpu.iota {dimensions = array<i32: 0>} : vector<504x1xi32>
    %c504_i32 = arith.constant 504 : i32
    %3 = arith.muli %arg0, %c504_i32 : i32
    %4 = vector.broadcast %3 : i32 to vector<504x1xi32>
    %5 = arith.addi %4, %2 : vector<504x1xi32>
    %c1000_i32 = arith.constant 1000 : i32
    %6 = vector.broadcast %c1000_i32 : i32 to vector<504x1xi32>
    %7 = arith.cmpi slt, %5, %6 : vector<504x1xi32>
    %cst = arith.constant 0.000000e+00 : f32
    %8 = vector.shape_cast %7 : vector<504x1xi1> to vector<504x1xi1>
    %9 = vector.broadcast %8 : vector<504x1xi1> to vector<504x10xi1>
    %10 = vector.broadcast %cst : f32 to vector<504x10xf32>
    %11 = arith.select %9, %0, %10 : vector<504x10xi1>, vector<504x10xf32>
    %cst_3 = arith.constant dense<0xFF800000> : vector<504xf32>
    %12 = vector.multi_reduction <maximumf>, %11, %cst_3 [1] : vector<504x10xf32> to vector<504xf32>
    %13 = vector.shape_cast %12 : vector<504xf32> to vector<504x1xf32>
    %14 = vector.broadcast %13 : vector<504x1xf32> to vector<504x10xf32>
    %15 = arith.subf %11, %14 : vector<504x10xf32>
    %16 = math.exp %15 : vector<504x10xf32>
    %cst_4 = arith.constant dense<0.000000e+00> : vector<504xf32>
    %17 = vector.multi_reduction <add>, %16, %cst_4 [1] : vector<504x10xf32> to vector<504xf32>
    %18 = vector.shape_cast %17 : vector<504xf32> to vector<504x1xf32>
    %cst_5 = arith.constant 1.000000e+00 : f32
    %19 = vector.broadcast %cst_5 : f32 to vector<504x1xf32>
    %20 = arith.divf %19, %18 : vector<504x1xf32>
    %21 = tpu.iota {dimensions = array<i32: 1>} : vector<504x10xi32>
    %22 = vector.broadcast %13 : vector<504x1xf32> to vector<504x10xf32>
    %23 = arith.cmpf oeq, %11, %22 : vector<504x10xf32>
    %c10_i32 = arith.constant 10 : i32
    %24 = vector.broadcast %c10_i32 : i32 to vector<504x10xi32>
    %25 = arith.select %23, %21, %24 : vector<504x10xi1>, vector<504x10xi32>
    %cst_6 = arith.constant dense<2147483647> : vector<504xi32>
    %26 = vector.multi_reduction <minsi>, %25, %cst_6 [1] : vector<504x10xi32> to vector<504xi32>
    %27 = vector.shape_cast %26 : vector<504xi32> to vector<504x1xi32>
    %28 = arith.cmpi eq, %27, %1 : vector<504x1xi32>
    %29 = arith.extui %28 : vector<504x1xi1> to vector<504x1xi32>
    %30 = arith.sitofp %29 : vector<504x1xi32> to vector<504x1xf32>
    %cst_7 = arith.constant 1.500000e+01 : f32
    %31 = vector.broadcast %cst_7 : f32 to vector<504x1xf32>
    %32 = arith.mulf %20, %31 : vector<504x1xf32>
    %33 = math.ceil %32 : vector<504x1xf32>
    %34 = arith.fptosi %33 : vector<504x1xf32> to vector<504x1xi32>
    %c1_i32 = arith.constant 1 : i32
    %35 = vector.broadcast %c1_i32 : i32 to vector<504x1xi32>
    %36 = arith.subi %34, %35 : vector<504x1xi32>
    %c0_i32 = arith.constant 0 : i32
    %c14_i32 = arith.constant 14 : i32
    %37 = vector.broadcast %c0_i32 : i32 to vector<504x1xi32>
    %38 = arith.maxsi %37, %36 : vector<504x1xi32>
    %39 = vector.broadcast %c14_i32 : i32 to vector<504x1xi32>
    %40 = arith.minsi %39, %38 : vector<504x1xi32>
    %c15_i32 = arith.constant 15 : i32
    %41 = vector.broadcast %c15_i32 : i32 to vector<504x1xi32>
    %42 = arith.select %7, %40, %41 : vector<504x1xi1>, vector<504x1xi32>
    %43 = tpu.iota {dimensions = array<i32: 1>} : vector<504x128xi32>
    %44 = vector.broadcast %42 : vector<504x1xi32> to vector<504x128xi32>
    %45 = arith.cmpi eq, %43, %44 : vector<504x128xi32>
    %46 = arith.extui %45 : vector<504x128xi1> to vector<504x128xi32>
    %47 = arith.sitofp %46 : vector<504x128xi32> to vector<504x128xf32>
    %cst_8 = arith.constant dense<0.000000e+00> : vector<128xf32>
    %48 = vector.multi_reduction <add>, %47, %cst_8 [0] : vector<504x128xf32> to vector<128xf32>
    %49 = vector.shape_cast %48 : vector<128xf32> to vector<1x128xf32>
    %50 = vector.broadcast %20 : vector<504x1xf32> to vector<504x128xf32>
    %51 = arith.mulf %47, %50 : vector<504x128xf32>
    %cst_9 = arith.constant dense<0.000000e+00> : vector<128xf32>
    %52 = vector.multi_reduction <add>, %51, %cst_9 [0] : vector<504x128xf32> to vector<128xf32>
    %53 = vector.shape_cast %52 : vector<128xf32> to vector<1x128xf32>
    %54 = vector.broadcast %30 : vector<504x1xf32> to vector<504x128xf32>
    %55 = arith.mulf %47, %54 : vector<504x128xf32>
    %cst_10 = arith.constant dense<0.000000e+00> : vector<128xf32>
    %56 = vector.multi_reduction <add>, %55, %cst_10 [0] : vector<504x128xf32> to vector<128xf32>
    %57 = vector.shape_cast %56 : vector<128xf32> to vector<1x128xf32>
    %cst_11 = arith.constant 0.000000e+00 : f32
    %58 = vector.broadcast %cst_11 : f32 to vector<5x128xf32>
    %59 = tpu.concatenate %49, %53, %57, %58 in 0 : vector<1x128xf32>, vector<1x128xf32>, vector<1x128xf32>, vector<5x128xf32> -> vector<8x128xf32>
    %60 = vector.shape_cast %59 : vector<8x128xf32> to vector<1x8x128xf32>
    %c0_12 = arith.constant 0 : index
    %c0_13 = arith.constant 0 : index
    %c0_14 = arith.constant 0 : index
    %61 = vector.load %arg3[%c0_12, %c0_13, %c0_14] : memref<1x8x128xf32, #tpu.memory_space<vmem>>, vector<1x8x128xf32>
    tpu.vector_store %arg3[%c0_12, %c0_13, %c0_14], %60 {strides = array<i32>} : memref<1x8x128xf32, #tpu.memory_space<vmem>>, vector<1x8x128xf32>,
    return
  }
  func.func @transform_0(%arg0: i32) -> (i32, i32) {
    %c0_i32 = arith.constant 0 : i32
    %c0_i32_0 = arith.constant 0 : i32
    return %arg0, %c0_i32 : i32, i32
  }
  func.func @transform_1(%arg0: i32) -> (i32, i32) {
    %c0_i32 = arith.constant 0 : i32
    %c0_i32_0 = arith.constant 0 : i32
    return %arg0, %c0_i32 : i32, i32
  }
  func.func @transform_2(%arg0: i32) -> (i32, i32, i32) {
    %c0_i32 = arith.constant 0 : i32
    %c0_i32_0 = arith.constant 0 : i32
    %c0_i32_1 = arith.constant 0 : i32
    return %arg0, %c0_i32, %c0_i32_0 : i32, i32, i32
  }
}

</mosaic_0001>

<bundles_post_ra>
// kernel: tpu_custom_call.1
= control target key start
LH: loop header
LB: loop body
LE: loop exit
PB: predicated region body
PF: predicated region fallthrough
CT: control target
= control target key end

     0   :  { %7 = vsyncpa [#allocation3], 0  ;;  %s8765_s0 = inlined_call_operand.vmem [shape: f32[1000,10], index: 0, kind: input, shape index: {}]   ;;  %s8766_s1 = inlined_call_operand.vmem [shape: s32[1000,1], index: 1, kind: input, shape index: {}]   ;;  %s8767_s2 = inlined_call_operand.hbm [shape: f32[2,8,128], index: 2, kind: output, shape index: {}]  }
   0x1   :  { %9 = vsyncpa [#allocation3 + $0x1], 0  ;;  %s4870_s9 = smov 0   ;;  %s4872_s10 = smov 0  }
   0x2   :  { %s4874_s11 = smov 0   ;;  %s4876_s12 = smov 0  }
   0x3 LB: > { %s4891_s13 = sadd.s32 4294967295, %s4850_s12   ;;  %s4162_s14 = sadd.s32 4294967294, %s4850_s12   ;;  %s4850_s12 = sphi %s4876_s12, %s10059_s12   ;;  %s4846_s11 = sphi %s4874_s11, %s10058_s11   ;;  %s4842_s10 = sphi %s4872_s10, %s10057_s10   ;;  %s4838_s9 = sphi %s4870_s9, %s10056_s9  }
   0x4   : > { %s4895_s15 = sadd.s32 1, %s4850_s12   ;;  %s74_s16 = sadd.s32 1, %s4846_s11 }
   0x5   : > { %s71_s17 = ssub.s32 %s4850_s12, %s4895_s15  ;;  %p84_p0 = scmp.ne.s32.totalorder %s4846_s11, %s4842_s10 }
   0x6   : > { %p72_p1 = scmp.eq.s32.totalorder %s71_s17, 0  ;;  %p85_p2 = scmp.eq.s32.totalorder %s4891_s13, 1 }
   0x7   : > { %p90_p3 = scmp.ne.s32.totalorder %s4842_s10, %s4838_s9  ;;  %p91_p4 = scmp.eq.s32.totalorder %s4162_s14, 1 }
   0x8   : > { %s4906_s18 = scalar_select %p72_p1, %s4846_s11, %s74_s16  }
   0x9   : > { %p4908_p5 = por %p85_p2, %p84_p0  ;;  %p4912_p6 = por %p91_p4, %p90_p3 }
   0xa   : > { %p4165_p7 = scmp.ge.s32.totalorder %s4850_s12, 1  ;;  %p143_p8 = scmp.lt.s32.totalorder %s4850_s12, 3 }
   0xc   : > { %p144_p9 = pnand %p4165_p7, %p143_p8 }
   0xe   : > { %147 = sbr.rel (%p144_p9) target bundleno = 1034 (0x40a), region = 28 }
  0x15   : > { %s178_s21 = smul.u32 63, %s4891_s13  ;;  %v8779_v0 = vlaneseq  ;;  %vm713_vm1 = vcmask 80896   ;;  %s175_s30 = sand.u32 1, %s4842_s10  }
  0x16   : > { %s396_s22 = smul.u32 504, %s4891_s13  ;;  %s4166_s3 = sshll.u32 %s175_s30, 3 }
  0x17   : > { %p183_p10 = scmp.lt.s32.totalorder %s178_s21, 124  ;;  %v4921_v1 = vshrl.u32 %v8779_v0, 7  ;;  %s4359_s4 = sshll.u32 %s4891_s13, 7 }
  0x18   : > { %v4923_v2 = vstv %s396_s22  ;;  %s177_s5 = scalar_lea.vmem [#allocation2], %s4166_s3  ;;  %s8723_s14 = scalar_lea.hbm %s8767_s2, %s4359_s4 }
  0x19   : > { %s10061_s21 = smov (!%p183_p10, %s178_s21), 124  ;;  %v4929_v3 = vadd.s32 %v4923_v2, %v4921_v1  ;;  %v335_v4 = vadd.s32 16, %v4921_v1  ;;  %v334_v5 = vadd.s32 8, %v4921_v1  ;;  %v336_v6 = vadd.s32 24, %v4921_v1  ;;  %s4091_s6 = sshll.u32 %s177_s5, 4  ;;  %s8725_s6 = int_to_ptr.vmem [resolvable:$true] %s4091_s6 }
  0x1a   : > { %v337_v7 = vadd.s32 32, %v4921_v1  ;;  %v338_v8 = vadd.s32 40, %v4921_v1  ;;  %v339_v9 = vadd.s32 48, %v4921_v1  ;;  %v340_v10 = vadd.s32 56, %v4921_v1  ;;  %s4167_s23 = sshll.u32 %s10061_s21, 3  ;;  %s4078_s16 = scalar_lea.sflag [#allocation3], %s175_s30 }
  0x1b   : > { %9188 = vst [vmem:[#allocation5_spill] sm:$0xff] %v4929_v3  ;;  %vm461_vm0 = vcmp.lt.s32.totalorder %v4929_v3, 1000  ;;  %v4941_v11 = vadd.s32 %v4923_v2, %v335_v4  ;;  %v4944_v12 = vadd.s32 %v4923_v2, %v334_v5  ;;  %v4947_v13 = vadd.s32 %v4923_v2, %v336_v6  ;;  %s4954_s26 = scalar_lea.vmem %s8765_s0, %s4167_s23  ;;  %s8097_s29 = scalar_lea.vmem %s8766_s1, %s4167_s23 }
  0x1c   : > { %v4957_v14 = vadd.s32 %v4923_v2, %v337_v7  ;;  %v4960_v15 = vadd.s32 %v4923_v2, %v338_v8  ;;  %v206_v16 = vld [vmem:[%s4954_s26] sm:$0xff]  ;;  %v208_v17 = vld [vmem:[%s4954_s26 + $0x10] sm:$0xff]  ;;  %v207_v18 = vld [vmem:[%s4954_s26 + $0x8] sm:$0xff]  ;;  %v4969_v19 = vadd.s32 %v4923_v2, %v339_v9  ;;  %v4985_v24 = vadd.s32 %v4923_v2, %v340_v10  ;;  %s4788_s13 = scalar_lea.vmem %s8725_s6, 128  ;;  %s4854_s17 = smov [#allocation2]  }
  0x1d   : > { %9189 = vst [vmem:[#allocation6_spill] sm:$0xff] %v4941_v11  ;;  %9190 = vst [vmem:[#allocation7_spill] sm:$0xff] %v4944_v12  ;;  %vm463_vm2 = vcmp.lt.s32.totalorder %v4941_v11, 1000  ;;  %vm462_vm3 = vcmp.lt.s32.totalorder %v4944_v12, 1000  ;;  %vm464_vm4 = vcmp.lt.s32.totalorder %v4947_v13, 1000  ;;  %v4973_v20 = vsel %vm461_vm0, %v206_v16, 0.0  ;;  %p4789_p11 = scmp.ne.s32.totalorder %s8725_s6, %s4788_s13 }
  0x1e   : > { %9191 = vst [vmem:[#allocation8_spill] sm:$0xff] %v4947_v13  ;;  %9192 = vst [vmem:[#allocation9_spill] sm:$0xff] %v4957_v14  ;;  %v4977_v21 = vsel %vm463_vm2, %v208_v17, 0.0  ;;  %v4981_v22 = vsel %vm462_vm3, %v207_v18, 0.0  ;;  %v209_v23 = vld [vmem:[%s4954_s26 + $0x18] sm:$0xff]  ;;  %v714_v25 = vsel %vm713_vm1, %v4973_v20, -inf }
  0x1f   : > { %9193 = vst [vmem:[#allocation10_spill] sm:$0xff] %v4960_v15  ;;  %9194 = vst [vmem:[#allocation11_spill] sm:$0xff] %v4969_v19  ;;  %v720_v26 = vsel %vm713_vm1, %v4977_v21, -inf  ;;  %v4993_v27 = vsel %vm464_vm4, %v209_v23, 0.0  ;;  %v210_v28 = vld [vmem:[%s4954_s26 + $0x20] sm:$0xff]  ;;  %vm465_vm5 = vcmp.lt.s32.totalorder %v4957_v14, 1000  ;;  %715 = vmax.xlane.f32.xlu0 %v714_v25  ;;  %p4790_p12 = pnand %p4789_p11, %p4908_p5 }
  0x20   : > { %9195 = vst [vmem:[#allocation12_spill] sm:$0xff] %v4985_v24  ;;  %v211_v29 = vld [vmem:[%s4954_s26 + $0x28] sm:$0xff]  ;;  %721 = vmax.xlane.f32.xlu1 %v720_v26  ;;  %vm466_vm6 = vcmp.lt.s32.totalorder %v4960_v15, 1000  ;;  %v717_v30 = vsel %vm713_vm1, %v4981_v22, -inf  ;;  %v723_v31 = vsel %vm713_vm1, %v4993_v27, -inf  ;;  %v5005_v32 = vsel %vm465_vm5, %v210_v28, 0.0 }
  0x21   : > { %v5009_v33 = vsel %vm466_vm6, %v211_v29, 0.0  ;;  %vm8776_vm7 = vcmp.lt.s32.totalorder %v4969_v19, 1000  ;;  %v341_v34 = vadd.s32 64, %v4921_v1  ;;  %v212_v35 = vld [vmem:[%s4954_s26 + $0x30] sm:$0xff]  ;;  %v213_v36 = vld [vmem:[%s4954_s26 + $0x38] sm:$0xff]  ;;  %vm8774_vm8 = vcmp.lt.s32.totalorder %v4985_v24, 1000  ;;  %p4791_p13 = pneg %p4790_p12 }
  0x22   : > { %v342_v37 = vadd.s32 72, %v4921_v1  ;;  %v343_v38 = vadd.s32 80, %v4921_v1  ;;  %v344_v39 = vadd.s32 88, %v4921_v1  ;;  %v726_v41 = vsel %vm713_vm1, %v5005_v32, -inf  ;;  %v214_v48 = vld [vmem:[%s4954_s26 + $0x40] sm:$0xff]  ;;  %v215_v49 = vld [vmem:[%s4954_s26 + $0x48] sm:$0xff] }
  0x23   : > { %718 = vmax.xlane.f32.xlu0 %v717_v30  ;;  %v5020_v40 = vadd.s32 %v4923_v2, %v341_v34  ;;  %v729_v42 = vsel %vm713_vm1, %v5009_v33, -inf  ;;  %v5031_v44 = vsel %vm8776_vm7, %v212_v35, 0.0  ;;  %v5035_v45 = vsel %vm8774_vm8, %v213_v36, 0.0  ;;  %v216_v58 = vld [vmem:[%s4954_s26 + $0x50] sm:$0xff]  ;;  %v217_v59 = vld [vmem:[%s4954_s26 + $0x58] sm:$0xff]  ;;  %v218_v8 = vld [vmem:[%s4954_s26 + $0x60] sm:$0xff] }
  0x24   : > { %724 = vmax.xlane.f32.xlu1 %v723_v31  ;;  %v5027_v43 = vadd.s32 %v4923_v2, %v342_v37  ;;  %v345_v46 = vadd.s32 96, %v4921_v1  ;;  %v346_v47 = vadd.s32 104, %v4921_v1  ;;  %v5044_v50 = vadd.s32 %v4923_v2, %v343_v38  ;;  %v219_v9 = vld [vmem:[%s4954_s26 + $0x68] sm:$0xff]  ;;  %v220_v26 = vld [vmem:[%s4954_s26 + $0x70] sm:$0xff]  ;;  %v221_v28 = vld [vmem:[%s4954_s26 + $0x78] sm:$0xff]  ;;  %s4792_s21 = sshll.u32 %s4854_s17, 4  ;;  %s4793_s21 = int_to_ptr.vmem [resolvable:$false] %s4792_s21 }
  0x25   : > { %9196 = vst [vmem:[#allocation13_spill] sm:$0xff] %v5020_v40  ;;  %vm8772_vm9 = vcmp.lt.s32.totalorder %v5020_v40, 1000  ;;  %v5047_v51 = vadd.s32 %v4923_v2, %v344_v39  ;;  %v732_v52 = vsel %vm713_vm1, %v5031_v44, -inf  ;;  %v735_v53 = vsel %vm713_vm1, %v5035_v45, -inf  ;;  %v241_v24 = vld [vmem:[%s4954_s26 + $0x118] sm:$0xff]  ;;  %v251_v14 = vld [vmem:[%s4954_s26 + $0x168] sm:$0xff]  ;;  %p4795_p0 = scmp.lt.s32.totalorder %s8725_s6, %s4793_s21 }
  0x26   : > { %9197 = vst [vmem:[#allocation14_spill] sm:$0xff] %v5027_v43  ;;  %vm8770_vm10 = vcmp.lt.s32.totalorder %v5027_v43, 1000  ;;  %9198 = vst [vmem:[#allocation15_spill] sm:$0xff] %v5044_v50  ;;  %v5055_v54 = vsel %vm8772_vm9, %v214_v48, 0.0  ;;  %v347_v56 = vadd.s32 112, %v4921_v1  ;;  %v348_v57 = vadd.s32 120, %v4921_v1 }
  0x27   : > { %9199 = vst [vmem:[#allocation16_spill] sm:$0xff] %v5047_v51  ;;  %727 = vmax.xlane.f32.xlu0 %v726_v41  ;;  %v5059_v55 = vsel %vm8770_vm10, %v215_v49, 0.0  ;;  %vm471_vm11 = vcmp.lt.s32.totalorder %v5044_v50, 1000  ;;  %vm8768_vm12 = vcmp.lt.s32.totalorder %v5047_v51, 1000  ;;  %v5068_v60 = vadd.s32 %v4923_v2, %v345_v46  ;;  %v223_v46 = vld [vmem:[%s4954_s26 + $0x88] sm:$0xff]  ;;  %v237_v51 = vld [vmem:[%s4954_s26 + $0xf8] sm:$0xff] }
  0x28   : > { %730 = vmax.xlane.f32.xlu1 %v729_v42  ;;  %v5071_v61 = vadd.s32 %v4923_v2, %v346_v47  ;;  %v738_v62 = vsel %vm713_vm1, %v5055_v54, -inf  ;;  %v741_v63 = vsel %vm713_vm1, %v5059_v55, -inf  ;;  %v5079_v4 = vsel %vm471_vm11, %v216_v58, 0.0  ;;  %v222_v42 = vld [vmem:[%s4954_s26 + $0x80] sm:$0xff]  ;;  %v245_v19 = vld [vmem:[%s4954_s26 + $0x138] sm:$0xff]  ;;  %v255_v12 = vld [vmem:[%s4954_s26 + $0x188] sm:$0xff] }
  0x29   : > { %9200 = vst [vmem:[#allocation17_spill] sm:$0xff] %v5068_v60  ;;  %v5083_v5 = vsel %vm8768_vm12, %v217_v59, 0.0  ;;  %v5086_v6 = vadd.s32 %v4923_v2, %v347_v56  ;;  %v5089_v7 = vadd.s32 %v4923_v2, %v348_v57  ;;  %vm9036_vm13 = vcmp.lt.s32.totalorder %v5068_v60, 1000  ;;  %v224_v59 = vld [vmem:[%s4954_s26 + $0x90] sm:$0xff]  ;;  %s4794_s22 = scalar_lea.vmem %s4793_s21, 256 }
  0x2a   : > { %9201 = vst [vmem:[#allocation18_spill] sm:$0xff] %v5071_v61  ;;  %9202 = vst [vmem:[#allocation19_spill] sm:$0xff] %v5083_v5  ;;  %vm8769_vm14 = vcmp.lt.s32.totalorder %v5071_v61, 1000  ;;  %v349_v10 = vadd.s32 128, %v4921_v1  ;;  %v350_v16 = vadd.s32 136, %v4921_v1  ;;  %v744_v17 = vsel %vm713_vm1, %v5079_v4, -inf  ;;  %p4796_p1 = scmp.lt.s32.totalorder %s4794_s22, %s4788_s13 }
  0x2b   : > { %733 = vmax.xlane.f32.xlu0 %v732_v52  ;;  %9203 = vst [vmem:[#allocation20_spill] sm:$0xff] %v5086_v6  ;;  %9204 = vst [vmem:[#allocation21_spill] sm:$0xff] %v5089_v7  ;;  %v747_v18 = vsel %vm713_vm1, %v5083_v5, -inf  ;;  %v5103_v23 = vsel %vm9036_vm13, %v218_v8, 0.0  ;;  %v5107_v25 = vsel %vm8769_vm14, %v219_v9, 0.0  ;;  %vm9035_vm15 = vcmp.lt.s32.totalorder %v5086_v6, 1000 }
  0x2c   : > { %736 = vmax.xlane.f32.xlu1 %v735_v53  ;;  %9205 = vst [vmem:[#allocation22_spill] sm:$0xff] %v5107_v25  ;;  %vm8771_vm12 = vcmp.lt.s32.totalorder %v5089_v7, 1000  ;;  %v5114_v29 = vadd.s32 %v4923_v2, %v349_v10  ;;  %v5117_v30 = vadd.s32 %v4923_v2, %v350_v16  ;;  %v351_v31 = vadd.s32 144, %v4921_v1  ;;  %v247_v6 = vld [vmem:[%s4954_s26 + $0x148] sm:$0xff]  ;;  %p4797_p2 = por %p4796_p1, %p4795_p0 }
  0x2d   : > { %v352_v34 = vadd.s32 152, %v4921_v1  ;;  %v750_v35 = vsel %vm713_vm1, %v5103_v23, -inf  ;;  %v753_v36 = vsel %vm713_vm1, %v5107_v25, -inf  ;;  %v5127_v37 = vsel %vm9035_vm15, %v220_v26, 0.0  ;;  %v226_v26 = vld [vmem:[%s4954_s26 + $0xa0] sm:$0xff] }
  0x2e   : > { %9206 = vst [vmem:[#allocation23_spill] sm:$0xff] %v5114_v29  ;;  %9207 = vst [vmem:[#allocation24_spill] sm:$0xff] %v5117_v30  ;;  %v5131_v38 = vsel %vm8771_vm12, %v221_v28, 0.0  ;;  %v353_v39 = vadd.s32 160, %v4921_v1  ;;  %v354_v41 = vadd.s32 168, %v4921_v1  ;;  %vm9027_vm14 = vcmp.lt.s32.totalorder %v5114_v29, 1000  ;;  %p4798_p3 = pnand %p4797_p2, %p4791_p13 }
  0x2f   : > { %739 = vmax.xlane.f32.xlu0 %v738_v62  ;;  %9208 = vst [vmem:[#allocation25_spill] sm:$0xff] %v5131_v38  ;;  %vm8773_vm10 = vcmp.lt.s32.totalorder %v5117_v30, 1000  ;;  %v5140_v47 = vadd.s32 %v4923_v2, %v351_v31  ;;  %v5143_v48 = vadd.s32 %v4923_v2, %v352_v34  ;;  %v756_v49 = vsel %vm713_vm1, %v5127_v37, -inf  ;;  %v225_v62 = vld [vmem:[%s4954_s26 + $0x98] sm:$0xff]  ;;  %v227_v28 = vld [vmem:[%s4954_s26 + $0xa8] sm:$0xff] }
  0x30   : > { %742 = vmax.xlane.f32.xlu1 %v741_v63  ;;  %v759_v52 = vsel %vm713_vm1, %v5131_v38, -inf  ;;  %v5151_v53 = vsel %vm9027_vm14, %v222_v42, 0.0  ;;  %v5155_v56 = vsel %vm8773_vm10, %v223_v46, 0.0  ;;  %v5158_v57 = vadd.s32 %v4923_v2, %v353_v39  ;;  %v235_v30 = vld [vmem:[%s4954_s26 + $0xe8] sm:$0xff] }
  0x31   : > { %9209 = vst [vmem:[#allocation26_spill] sm:$0xff] %v5140_v47  ;;  %9210 = vst [vmem:[#allocation27_spill] sm:$0xff] %v5143_v48  ;;  %v355_v58 = vadd.s32 176, %v4921_v1  ;;  %vm9020_vm12 = vcmp.lt.s32.totalorder %v5140_v47, 1000  ;;  %vm8775_vm9 = vcmp.lt.s32.totalorder %v5143_v48, 1000  ;;  %v5166_v63 = vadd.s32 %v4923_v2, %v354_v41 }
  0x32   : > { %9211 = vst [vmem:[#allocation28_spill] sm:$0xff] %v5155_v56  ;;  %9212 = vst [vmem:[#allocation29_spill] sm:$0xff] %v5158_v57  ;;  %v356_v8 = vadd.s32 184, %v4921_v1  ;;  %v762_v9 = vsel %vm713_vm1, %v5151_v53, -inf  ;;  %v765_v10 = vsel %vm713_vm1, %v5155_v56, -inf  ;;  %v5175_v16 = vsel %vm9020_vm12, %v224_v59, 0.0 }
  0x33   : > { %745 = vmax.xlane.f32.xlu0 %v744_v17  ;;  %9213 = vst [vmem:[#allocation30_spill] sm:$0xff] %v5166_v63  ;;  %v5179_v17 = vsel %vm8775_vm9, %v225_v62, 0.0  ;;  %vm8778_vm10 = vcmp.lt.s32.totalorder %v5158_v57, 1000  ;;  %vm8777_vm8 = vcmp.lt.s32.totalorder %v5166_v63, 1000  ;;  %v357_v34 = vadd.s32 192, %v4921_v1 }
  0x34   : > { %748 = vmax.xlane.f32.xlu1 %v747_v18  ;;  %9214 = vst [vmem:[#allocation31_spill] sm:$0xff] %v5179_v17  ;;  %v5183_v18 = vadd.s32 %v4923_v2, %v355_v58  ;;  %v5189_v31 = vadd.s32 %v4923_v2, %v356_v8  ;;  %v771_v39 = vsel %vm713_vm1, %v5179_v17, -inf  ;;  %v5199_v41 = vsel %vm8778_vm10, %v226_v26, 0.0 }
  0x35   : > { %v5203_v42 = vsel %vm8777_vm8, %v227_v28, 0.0  ;;  %v359_v46 = vadd.s32 208, %v4921_v1  ;;  %v5211_v58 = vadd.s32 %v4923_v2, %v357_v34  ;;  %v360_v62 = vadd.s32 216, %v4921_v1 }
  0x36   : > { %9215 = vst [vmem:[#allocation32_spill] sm:$0xff] %v5183_v18  ;;  %9216 = vst [vmem:[#allocation33_spill] sm:$0xff] %v5189_v31  ;;  %vm8782_vm9 = vcmp.lt.s32.totalorder %v5183_v18, 1000  ;;  %vm8781_vm7 = vcmp.lt.s32.totalorder %v5189_v31, 1000  ;;  %v774_v8 = vsel %vm713_vm1, %v5199_v41, -inf  ;;  %v361_v34 = vadd.s32 224, %v4921_v1 }
  0x37   : > { %751 = vmax.xlane.f32.xlu0 %v750_v35  ;;  %v358_v35 = vadd.s32 200, %v4921_v1  ;;  %9217 = vst [vmem:[#allocation34_spill] sm:$0xff] %v5203_v42  ;;  %9218 = vst [vmem:[#allocation35_spill] sm:$0xff] %v5211_v58  ;;  %v5230_v28 = vadd.s32 %v4923_v2, %v359_v46  ;;  %vm8788_vm8 = vcmp.lt.s32.totalorder %v5211_v58, 1000 }
  0x38   : > { %754 = vmax.xlane.f32.xlu1 %v753_v36  ;;  %v768_v36 = vsel %vm713_vm1, %v5175_v16, -inf }
  0x39   : > { %v5214_v59 = vadd.s32 %v4923_v2, %v358_v35  ;;  %9222 = vst [vmem:[#allocation39_spill] sm:$0xff] %v5230_v28  ;;  %v230_v35 = vld [vmem:[%s4954_s26 + $0xc0] sm:$0xff] }
  0x3a   : > { %v5247_v0 = vsel %vm8788_vm8, %v230_v35, 0.0  ;;  %v363_v35 = vadd.s32 240, %v4921_v1 }
  0x3b   : > { %757 = vmax.xlane.f32.xlu0 %v756_v49  ;;  %v228_v49 = vld [vmem:[%s4954_s26 + $0xb0] sm:$0xff]  ;;  %9219 = vst [vmem:[#allocation36_spill] sm:$0xff] %v5214_v59  ;;  %vm8786_vm10 = vcmp.lt.s32.totalorder %v5214_v59, 1000  ;;  %v364_v59 = vadd.s32 248, %v4921_v1 }
  0x3c   : > { %760 = vmax.xlane.f32.xlu1 %v759_v52  ;;  %v229_v52 = vld [vmem:[%s4954_s26 + $0xb8] sm:$0xff]  ;;  %v5283_v7 = vadd.s32 %v4923_v2, %v363_v35 }
  0x3d   : > { %v5227_v26 = vsel %vm8781_vm7, %v229_v52, 0.0  ;;  %vm8795_vm7 = vcmp.lt.s32.totalorder %v5230_v28, 1000 }
  0x3e   : > { %9221 = vst [vmem:[#allocation38_spill] sm:$0xff] %v5227_v26  ;;  %v783_v52 = vsel %vm713_vm1, %v5227_v26, -inf  ;;  %9227 = vst [vmem:[#allocation44_spill] sm:$0xff] %v5283_v7 }
  0x3f   : > { %763 = vmax.xlane.f32.xlu0 %v762_v9  ;;  %v777_v9 = vsel %vm713_vm1, %v5203_v42, -inf }
  0x40   : > { %766 = vmax.xlane.f32.xlu1 %v765_v10  ;;  %v5223_v10 = vsel %vm8782_vm9, %v228_v49, 0.0  ;;  %v362_v49 = vadd.s32 232, %v4921_v1 }
  0x41   : > { %9220 = vst [vmem:[#allocation37_spill] sm:$0xff] %v5223_v10  ;;  %v780_v46 = vsel %vm713_vm1, %v5223_v10, -inf }
  0x42   : > { %v5261_v63 = vadd.s32 %v4923_v2, %v362_v49 }
  0x43   : > { %769 = vmax.xlane.f32.xlu0 %v768_v36  ;;  %v231_v36 = vld [vmem:[%s4954_s26 + $0xc8] sm:$0xff] }
  0x44   : > { %772 = vmax.xlane.f32.xlu1 %v771_v39  ;;  %v5238_v39 = vadd.s32 %v4923_v2, %v360_v62  ;;  %v5251_v31 = vsel %vm8786_vm10, %v231_v36, 0.0  ;;  %v5255_v62 = vadd.s32 %v4923_v2, %v361_v34  ;;  %9226 = vst [vmem:[#allocation43_spill] sm:$0xff] %v5261_v63  ;;  %v786_v36 = vsel %vm713_vm1, %v5247_v0, -inf }
  0x45   : > { %9224 = vst [vmem:[#allocation41_spill] sm:$0xff] %v5251_v31  ;;  %v789_v34 = vsel %vm713_vm1, %v5251_v31, -inf  ;;  %vm8799_vm8 = vcmp.lt.s32.totalorder %v5261_v63, 1000  ;;  %v368_v63 = vadd.s32 280, %v4921_v1 }
  0x46   : > { %9223 = vst [vmem:[#allocation40_spill] sm:$0xff] %v5238_v39  ;;  %9225 = vst [vmem:[#allocation42_spill] sm:$0xff] %v5255_v62  ;;  %vm8793_vm9 = vcmp.lt.s32.totalorder %v5238_v39, 1000  ;;  %vm8800_vm10 = vcmp.lt.s32.totalorder %v5255_v62, 1000  ;;  %v366_v39 = vadd.s32 264, %v4921_v1  ;;  %v5299_v35 = vsel %vm8799_vm8, %v235_v30, 0.0 }
  0x47   : > { %775 = vmax.xlane.f32.xlu0 %v774_v8  ;;  %v232_v8 = vld [vmem:[%s4954_s26 + $0xd0] sm:$0xff] }
  0x48   : > { %778 = vmax.xlane.f32.xlu1 %v777_v9  ;;  %v233_v9 = vld [vmem:[%s4954_s26 + $0xd8] sm:$0xff]  ;;  %v5271_v48 = vsel %vm8795_vm7, %v232_v8, 0.0  ;;  %v5286_v8 = vadd.s32 %v4923_v2, %v364_v59 }
  0x49   : > { %v5275_v49 = vsel %vm8793_vm9, %v233_v9, 0.0  ;;  %v792_v9 = vsel %vm713_vm1, %v5271_v48, -inf  ;;  %vm8807_vm9 = vcmp.lt.s32.totalorder %v5283_v7, 1000 }
  0x4a   : > { %9228 = vst [vmem:[#allocation45_spill] sm:$0xff] %v5286_v8  ;;  %v795_v61 = vsel %vm713_vm1, %v5275_v49, -inf  ;;  %vm8805_vm7 = vcmp.lt.s32.totalorder %v5286_v8, 1000  ;;  %v370_v8 = vadd.s32 296, %v4921_v1 }
  0x4b   : > { %781 = vmax.xlane.f32.xlu0 %v780_v46  ;;  %v365_v46 = vadd.s32 256, %v4921_v1  ;;  %v5323_v58 = vsel %vm8805_vm7, %v237_v51, 0.0 }
  0x4c   : > { %784 = vmax.xlane.f32.xlu1 %v783_v52  ;;  %v234_v52 = vld [vmem:[%s4954_s26 + $0xe0] sm:$0xff]  ;;  %9231 = vst [vmem:[#allocation48_spill] sm:$0xff] %v5323_v58  ;;  %v807_v7 = vsel %vm713_vm1, %v5323_v58, -inf }
  0x4d   : > { %v5295_v28 = vsel %vm8800_vm10, %v234_v52, 0.0  ;;  %v5302_v59 = vadd.s32 %v4923_v2, %v365_v46  ;;  %v5310_v52 = vadd.s32 %v4923_v2, %v366_v39  ;;  %v801_v46 = vsel %vm713_vm1, %v5299_v35, -inf }
  0x4e   : > { %v798_v30 = vsel %vm713_vm1, %v5295_v28, -inf  ;;  %v369_v39 = vadd.s32 288, %v4921_v1 }
  0x4f   : > { %787 = vmax.xlane.f32.xlu0 %v786_v36  ;;  %9229 = vst [vmem:[#allocation46_spill] sm:$0xff] %v5302_v59  ;;  %v367_v36 = vadd.s32 272, %v4921_v1  ;;  %9230 = vst [vmem:[#allocation47_spill] sm:$0xff] %v5310_v52  ;;  %vm8812_vm8 = vcmp.lt.s32.totalorder %v5302_v59, 1000  ;;  %vm8811_vm10 = vcmp.lt.s32.totalorder %v5310_v52, 1000  ;;  %v372_v52 = vadd.s32 312, %v4921_v1 }
  0x50   : > { %790 = vmax.xlane.f32.xlu1 %v789_v34  ;;  %v236_v34 = vld [vmem:[%s4954_s26 + $0xf0] sm:$0xff] }
  0x51   : > { %v5319_v62 = vsel %vm8807_vm9, %v236_v34, 0.0  ;;  %v5331_v43 = vadd.s32 %v4923_v2, %v367_v36  ;;  %v5334_v34 = vadd.s32 %v4923_v2, %v368_v63  ;;  %v5350_v63 = vadd.s32 %v4923_v2, %v369_v39 }
  0x52   : > { %v804_v51 = vsel %vm713_vm1, %v5319_v62, -inf  ;;  %v5381_v57 = vadd.s32 %v4923_v2, %v372_v52 }
  0x53   : > { %793 = vmax.xlane.f32.xlu0 %v792_v9  ;;  %v239_v9 = vld [vmem:[%s4954_s26 + $0x108] sm:$0xff]  ;;  %9232 = vst [vmem:[#allocation49_spill] sm:$0xff] %v5331_v43  ;;  %9233 = vst [vmem:[#allocation50_spill] sm:$0xff] %v5334_v34  ;;  %vm8818_vm7 = vcmp.lt.s32.totalorder %v5331_v43, 1000  ;;  %vm8816_vm9 = vcmp.lt.s32.totalorder %v5334_v34, 1000  ;;  %v374_v34 = vadd.s32 328, %v4921_v1 }
  0x54   : > { %796 = vmax.xlane.f32.xlu1 %v795_v61  ;;  %v238_v61 = vld [vmem:[%s4954_s26 + $0x100] sm:$0xff]  ;;  %v5347_v36 = vsel %vm8811_vm10, %v239_v9, 0.0  ;;  %9235 = vst [vmem:[#allocation52_spill] sm:$0xff] %v5350_v63  ;;  %v5371_v18 = vsel %vm8816_vm9, %v241_v24, 0.0  ;;  %vm8825_vm10 = vcmp.lt.s32.totalorder %v5350_v63, 1000  ;;  %9238 = vst [vmem:[#allocation55_spill] sm:$0xff] %v5381_v57 }
  0x55   : > { %v5343_v40 = vsel %vm8812_vm8, %v238_v61, 0.0  ;;  %9234 = vst [vmem:[#allocation51_spill] sm:$0xff] %v5347_v36  ;;  %v5358_v61 = vadd.s32 %v4923_v2, %v370_v8  ;;  %v813_v9 = vsel %vm713_vm1, %v5347_v36, -inf }
  0x56   : > { %v810_v39 = vsel %vm713_vm1, %v5343_v40, -inf }
  0x57   : > { %799 = vmax.xlane.f32.xlu0 %v798_v30  ;;  %v371_v30 = vadd.s32 304, %v4921_v1  ;;  %9236 = vst [vmem:[#allocation53_spill] sm:$0xff] %v5358_v61  ;;  %vm8823_vm8 = vcmp.lt.s32.totalorder %v5358_v61, 1000  ;;  %v376_v61 = vadd.s32 344, %v4921_v1 }
  0x58   : > { %802 = vmax.xlane.f32.xlu1 %v801_v46  ;;  %v240_v46 = vld [vmem:[%s4954_s26 + $0x110] sm:$0xff] }
  0x59   : > { %v5367_v59 = vsel %vm8818_vm7, %v240_v46, 0.0  ;;  %v5375_v8 = vadd.s32 %v4923_v2, %v371_v30  ;;  %v373_v46 = vadd.s32 320, %v4921_v1  ;;  %v819_v30 = vsel %vm713_vm1, %v5371_v18, -inf }
  0x5a   : > { %v816_v24 = vsel %vm713_vm1, %v5367_v59, -inf  ;;  %vm8829_vm7 = vcmp.lt.s32.totalorder %v5381_v57, 1000  ;;  %v378_v57 = vadd.s32 360, %v4921_v1 }
  0x5b   : > { %805 = vmax.xlane.f32.xlu0 %v804_v51  ;;  %9237 = vst [vmem:[#allocation54_spill] sm:$0xff] %v5375_v8  ;;  %v243_v51 = vld [vmem:[%s4954_s26 + $0x128] sm:$0xff]  ;;  %vm8830_vm9 = vcmp.lt.s32.totalorder %v5375_v8, 1000  ;;  %v5403_v47 = vadd.s32 %v4923_v2, %v373_v46  ;;  %v5419_v46 = vsel %vm8829_vm7, %v245_v19, 0.0 }
  0x5c   : > { %808 = vmax.xlane.f32.xlu1 %v807_v7  ;;  %v242_v7 = vld [vmem:[%s4954_s26 + $0x120] sm:$0xff]  ;;  %v5395_v52 = vsel %vm8823_vm8, %v243_v51, 0.0  ;;  %9242 = vst [vmem:[#allocation59_spill] sm:$0xff] %v5419_v46 }
  0x5d   : > { %v5391_v43 = vsel %vm8825_vm10, %v242_v7, 0.0  ;;  %9239 = vst [vmem:[#allocation56_spill] sm:$0xff] %v5403_v47  ;;  %v5406_v7 = vadd.s32 %v4923_v2, %v374_v34  ;;  %v825_v63 = vsel %vm713_vm1, %v5395_v52, -inf  ;;  %vm8837_vm8 = vcmp.lt.s32.totalorder %v5403_v47, 1000 }
  0x5e   : > { %v822_v51 = vsel %vm713_vm1, %v5391_v43, -inf }
  0x5f   : > { %811 = vmax.xlane.f32.xlu0 %v810_v39  ;;  %v375_v39 = vadd.s32 336, %v4921_v1  ;;  %9240 = vst [vmem:[#allocation57_spill] sm:$0xff] %v5406_v7  ;;  %vm8835_vm10 = vcmp.lt.s32.totalorder %v5406_v7, 1000  ;;  %v380_v7 = vadd.s32 376, %v4921_v1 }
  0x60   : > { %814 = vmax.xlane.f32.xlu1 %v813_v9  ;;  %v244_v9 = vld [vmem:[%s4954_s26 + $0x130] sm:$0xff]  ;;  %v5443_v60 = vsel %vm8835_vm10, %v247_v6, 0.0 }
  0x61   : > { %v5415_v29 = vsel %vm8830_vm9, %v244_v9, 0.0  ;;  %v5422_v34 = vadd.s32 %v4923_v2, %v375_v39  ;;  %v5430_v9 = vadd.s32 %v4923_v2, %v376_v61  ;;  %v831_v39 = vsel %vm713_vm1, %v5419_v46, -inf  ;;  %9246 = vst [vmem:[#allocation63_spill] sm:$0xff] %v5443_v60 }
  0x62   : > { %9241 = vst [vmem:[#allocation58_spill] sm:$0xff] %v5415_v29  ;;  %v828_v19 = vsel %vm713_vm1, %v5415_v29, -inf  ;;  %v379_v61 = vadd.s32 368, %v4921_v1  ;;  %v837_v47 = vsel %vm713_vm1, %v5443_v60, -inf }
  0x63   : > { %817 = vmax.xlane.f32.xlu0 %v816_v24  ;;  %9243 = vst [vmem:[#allocation60_spill] sm:$0xff] %v5422_v34  ;;  %v377_v24 = vadd.s32 352, %v4921_v1  ;;  %9244 = vst [vmem:[#allocation61_spill] sm:$0xff] %v5430_v9  ;;  %vm8842_vm7 = vcmp.lt.s32.totalorder %v5422_v34, 1000  ;;  %vm8841_vm9 = vcmp.lt.s32.totalorder %v5430_v9, 1000  ;;  %v382_v9 = vadd.s32 392, %v4921_v1 }
  0x64   : > { %820 = vmax.xlane.f32.xlu1 %v819_v30  ;;  %v246_v30 = vld [vmem:[%s4954_s26 + $0x140] sm:$0xff] }
  0x65   : > { %v5439_v8 = vsel %vm8837_vm8, %v246_v30, 0.0  ;;  %v5451_v50 = vadd.s32 %v4923_v2, %v377_v24  ;;  %v5454_v30 = vadd.s32 %v4923_v2, %v378_v57  ;;  %v5470_v57 = vadd.s32 %v4923_v2, %v379_v61 }
  0x66   : > { %9245 = vst [vmem:[#allocation62_spill] sm:$0xff] %v5439_v8  ;;  %v834_v6 = vsel %vm713_vm1, %v5439_v8, -inf  ;;  %v5501_v11 = vadd.s32 %v4923_v2, %v382_v9 }
  0x67   : > { %823 = vmax.xlane.f32.xlu0 %v822_v51  ;;  %v249_v51 = vld [vmem:[%s4954_s26 + $0x158] sm:$0xff]  ;;  %9247 = vst [vmem:[#allocation64_spill] sm:$0xff] %v5451_v50  ;;  %9248 = vst [vmem:[#allocation65_spill] sm:$0xff] %v5454_v30  ;;  %vm8848_vm10 = vcmp.lt.s32.totalorder %v5451_v50, 1000  ;;  %vm8846_vm8 = vcmp.lt.s32.totalorder %v5454_v30, 1000  ;;  %v384_v30 = vadd.s32 408, %v4921_v1 }
  0x68   : > { %826 = vmax.xlane.f32.xlu1 %v825_v63  ;;  %v248_v63 = vld [vmem:[%s4954_s26 + $0x150] sm:$0xff]  ;;  %v5467_v24 = vsel %vm8841_vm9, %v249_v51, 0.0  ;;  %9251 = vst [vmem:[#allocation68_spill] sm:$0xff] %v5470_v57  ;;  %v5491_v13 = vsel %vm8846_vm8, %v251_v14, 0.0  ;;  %vm8857_vm9 = vcmp.lt.s32.totalorder %v5470_v57, 1000  ;;  %9256 = vst [vmem:[#allocation73_spill] sm:$0xff] %v5501_v11 }
  0x69   : > { %v5463_v15 = vsel %vm8842_vm7, %v248_v63, 0.0  ;;  %9250 = vst [vmem:[#allocation67_spill] sm:$0xff] %v5467_v24  ;;  %v5478_v63 = vadd.s32 %v4923_v2, %v380_v7  ;;  %v843_v51 = vsel %vm713_vm1, %v5467_v24, -inf  ;;  %9254 = vst [vmem:[#allocation71_spill] sm:$0xff] %v5491_v13 }
  0x6a   : > { %9249 = vst [vmem:[#allocation66_spill] sm:$0xff] %v5463_v15  ;;  %v840_v61 = vsel %vm713_vm1, %v5463_v15, -inf }
  0x6b   : > { %829 = vmax.xlane.f32.xlu0 %v828_v19  ;;  %v381_v19 = vadd.s32 384, %v4921_v1  ;;  %9252 = vst [vmem:[#allocation69_spill] sm:$0xff] %v5478_v63  ;;  %vm8854_vm7 = vcmp.lt.s32.totalorder %v5478_v63, 1000  ;;  %v386_v63 = vadd.s32 424, %v4921_v1 }
  0x6c   : > { %832 = vmax.xlane.f32.xlu1 %v831_v39  ;;  %v250_v39 = vld [vmem:[%s4954_s26 + $0x160] sm:$0xff] }
  0x6d   : > { %v5487_v34 = vsel %vm8848_vm10, %v250_v39, 0.0  ;;  %v5495_v7 = vadd.s32 %v4923_v2, %v381_v19  ;;  %v383_v39 = vadd.s32 400, %v4921_v1  ;;  %v849_v19 = vsel %vm713_vm1, %v5491_v13, -inf }
  0x6e   : > { %9253 = vst [vmem:[#allocation70_spill] sm:$0xff] %v5487_v34  ;;  %v846_v14 = vsel %vm713_vm1, %v5487_v34, -inf  ;;  %vm8862_vm10 = vcmp.lt.s32.totalorder %v5501_v11, 1000  ;;  %v388_v11 = vadd.s32 440, %v4921_v1 }
  0x6f   : > { %835 = vmax.xlane.f32.xlu0 %v834_v6  ;;  %9255 = vst [vmem:[#allocation72_spill] sm:$0xff] %v5495_v7  ;;  %v253_v6 = vld [vmem:[%s4954_s26 + $0x178] sm:$0xff]  ;;  %vm8863_vm8 = vcmp.lt.s32.totalorder %v5495_v7, 1000  ;;  %v5523_v3 = vadd.s32 %v4923_v2, %v383_v39  ;;  %v5539_v39 = vsel %vm8862_vm10, %v255_v12, 0.0 }
  0x70   : > { %838 = vmax.xlane.f32.xlu1 %v837_v47  ;;  %v252_v47 = vld [vmem:[%s4954_s26 + $0x170] sm:$0xff]  ;;  %v5515_v9 = vsel %vm8854_vm7, %v253_v6, 0.0  ;;  %9262 = vst [vmem:[#allocation79_spill] sm:$0xff] %v5539_v39 }
  0x71   : > { %v5511_v50 = vsel %vm8857_vm9, %v252_v47, 0.0  ;;  %9258 = vst [vmem:[#allocation75_spill] sm:$0xff] %v5515_v9  ;;  %9259 = vst [vmem:[#allocation76_spill] sm:$0xff] %v5523_v3  ;;  %v5526_v47 = vadd.s32 %v4923_v2, %v384_v30  ;;  %v855_v57 = vsel %vm713_vm1, %v5515_v9, -inf  ;;  %vm8871_vm7 = vcmp.lt.s32.totalorder %v5523_v3, 1000 }
  0x72   : > { %9257 = vst [vmem:[#allocation74_spill] sm:$0xff] %v5511_v50  ;;  %v852_v6 = vsel %vm713_vm1, %v5511_v50, -inf  ;;  %v257_v50 = vld [vmem:[%s4954_s26 + $0x198] sm:$0xff] }
  0x73   : > { %841 = vmax.xlane.f32.xlu0 %v840_v61  ;;  %v385_v61 = vadd.s32 416, %v4921_v1  ;;  %9260 = vst [vmem:[#allocation77_spill] sm:$0xff] %v5526_v47  ;;  %vm8868_vm9 = vcmp.lt.s32.totalorder %v5526_v47, 1000  ;;  %v390_v47 = vadd.s32 456, %v4921_v1 }
  0x74   : > { %844 = vmax.xlane.f32.xlu1 %v843_v51  ;;  %v254_v51 = vld [vmem:[%s4954_s26 + $0x180] sm:$0xff]  ;;  %v5563_v9 = vsel %vm8868_vm9, %v257_v50, 0.0 }
  0x75   : > { %v5535_v13 = vsel %vm8863_vm8, %v254_v51, 0.0  ;;  %v5542_v30 = vadd.s32 %v4923_v2, %v385_v61  ;;  %v5550_v51 = vadd.s32 %v4923_v2, %v386_v63  ;;  %v861_v61 = vsel %vm713_vm1, %v5539_v39, -inf  ;;  %9266 = vst [vmem:[#allocation83_spill] sm:$0xff] %v5563_v9 }
  0x76   : > { %9261 = vst [vmem:[#allocation78_spill] sm:$0xff] %v5535_v13  ;;  %v858_v12 = vsel %vm713_vm1, %v5535_v13, -inf  ;;  %v5573_v39 = vadd.s32 %v4923_v2, %v388_v11  ;;  %v261_v13 = vld [vmem:[%s4954_s26 + $0x1b8] sm:$0xff] }
  0x77   : > { %847 = vmax.xlane.f32.xlu0 %v846_v14  ;;  %9263 = vst [vmem:[#allocation80_spill] sm:$0xff] %v5542_v30  ;;  %v387_v14 = vadd.s32 432, %v4921_v1  ;;  %9264 = vst [vmem:[#allocation81_spill] sm:$0xff] %v5550_v51  ;;  %vm8881_vm10 = vcmp.lt.s32.totalorder %v5542_v30, 1000  ;;  %vm8878_vm8 = vcmp.lt.s32.totalorder %v5550_v51, 1000  ;;  %v392_v51 = vadd.s32 472, %v4921_v1 }
  0x78   : > { %850 = vmax.xlane.f32.xlu1 %v849_v19  ;;  %v256_v19 = vld [vmem:[%s4954_s26 + $0x190] sm:$0xff]  ;;  %9268 = vst [vmem:[#allocation85_spill] sm:$0xff] %v5573_v39 }
  0x79   : > { %v5559_v7 = vsel %vm8871_vm7, %v256_v19, 0.0  ;;  %v5567_v63 = vadd.s32 %v4923_v2, %v387_v14  ;;  %v389_v19 = vadd.s32 448, %v4921_v1  ;;  %v867_v14 = vsel %vm713_vm1, %v5563_v9, -inf }
  0x7a   : > { %9265 = vst [vmem:[#allocation82_spill] sm:$0xff] %v5559_v7  ;;  %v864_v50 = vsel %vm713_vm1, %v5559_v7, -inf  ;;  %vm8886_vm7 = vcmp.lt.s32.totalorder %v5573_v39, 1000  ;;  %v394_v39 = vadd.s32 488, %v4921_v1 }
  0x7b   : > { %853 = vmax.xlane.f32.xlu0 %v852_v6  ;;  %9267 = vst [vmem:[#allocation84_spill] sm:$0xff] %v5567_v63  ;;  %v259_v6 = vld [vmem:[%s4954_s26 + $0x1a8] sm:$0xff]  ;;  %vm8887_vm9 = vcmp.lt.s32.totalorder %v5567_v63, 1000  ;;  %v5595_v9 = vadd.s32 %v4923_v2, %v389_v19  ;;  %v5611_v19 = vsel %vm8886_vm7, %v261_v13, 0.0 }
  0x7c   : > { %856 = vmax.xlane.f32.xlu1 %v855_v57  ;;  %v258_v57 = vld [vmem:[%s4954_s26 + $0x1a0] sm:$0xff]  ;;  %v5587_v11 = vsel %vm8878_vm8, %v259_v6, 0.0  ;;  %9274 = vst [vmem:[#allocation91_spill] sm:$0xff] %v5611_v19 }
  0x7d   : > { %v5583_v3 = vsel %vm8881_vm10, %v258_v57, 0.0  ;;  %9270 = vst [vmem:[#allocation87_spill] sm:$0xff] %v5587_v11  ;;  %9271 = vst [vmem:[#allocation88_spill] sm:$0xff] %v5595_v9  ;;  %v5598_v57 = vadd.s32 %v4923_v2, %v390_v47  ;;  %v873_v30 = vsel %vm713_vm1, %v5587_v11, -inf  ;;  %vm8893_vm8 = vcmp.lt.s32.totalorder %v5595_v9, 1000 }
  0x7e   : > { %9269 = vst [vmem:[#allocation86_spill] sm:$0xff] %v5583_v3  ;;  %v870_v6 = vsel %vm713_vm1, %v5583_v3, -inf  ;;  %v263_v3 = vld [vmem:[%s4954_s26 + $0x1c8] sm:$0xff] }
  0x7f   : > { %859 = vmax.xlane.f32.xlu0 %v858_v12  ;;  %v391_v12 = vadd.s32 464, %v4921_v1  ;;  %9272 = vst [vmem:[#allocation89_spill] sm:$0xff] %v5598_v57  ;;  %vm8892_vm10 = vcmp.lt.s32.totalorder %v5598_v57, 1000 }
  0x80   : > { %862 = vmax.xlane.f32.xlu1 %v861_v61  ;;  %v260_v61 = vld [vmem:[%s4954_s26 + $0x1b0] sm:$0xff]  ;;  %v5635_v11 = vsel %vm8892_vm10, %v263_v3, 0.0 }
  0x81   : > { %v5607_v7 = vsel %vm8887_vm9, %v260_v61, 0.0  ;;  %v5614_v47 = vadd.s32 %v4923_v2, %v391_v12  ;;  %v5622_v61 = vadd.s32 %v4923_v2, %v392_v51  ;;  %v879_v12 = vsel %vm713_vm1, %v5611_v19, -inf  ;;  %9278 = vst [vmem:[#allocation95_spill] sm:$0xff] %v5635_v11 }
  0x82   : > { %9273 = vst [vmem:[#allocation90_spill] sm:$0xff] %v5607_v7  ;;  %v876_v13 = vsel %vm713_vm1, %v5607_v7, -inf  ;;  %v5645_v19 = vadd.s32 %v4923_v2, %v394_v39  ;;  %v266_v39 = vld [vmem:[%s4954_s26 + $0x1e0] sm:$0xff] }
  0x83   : > { %865 = vmax.xlane.f32.xlu0 %v864_v50  ;;  %9275 = vst [vmem:[#allocation92_spill] sm:$0xff] %v5614_v47  ;;  %v393_v50 = vadd.s32 480, %v4921_v1  ;;  %9276 = vst [vmem:[#allocation93_spill] sm:$0xff] %v5622_v61  ;;  %vm8976_vm7 = vcmp.lt.s32.totalorder %v5614_v47, 1000  ;;  %vm8896_vm9 = vcmp.lt.s32.totalorder %v5622_v61, 1000  ;;  %v268_v47 = vld [vmem:[%s4954_s26 + $0x1f0] sm:$0xff] }
  0x84   : > { %868 = vmax.xlane.f32.xlu1 %v867_v14  ;;  %v262_v14 = vld [vmem:[%s4954_s26 + $0x1c0] sm:$0xff]  ;;  %9280 = vst [vmem:[#allocation97_spill] sm:$0xff] %v5645_v19 }
  0x85   : > { %v5631_v63 = vsel %vm8893_vm8, %v262_v14, 0.0  ;;  %v5638_v51 = vadd.s32 %v4923_v2, %v393_v50  ;;  %v395_v14 = vadd.s32 496, %v4921_v1  ;;  %v885_v50 = vsel %vm713_vm1, %v5635_v11, -inf  ;;  %v267_v1 = vld [vmem:[%s4954_s26 + $0x1e8] sm:$0xff] }
  0x86   : > { %9277 = vst [vmem:[#allocation94_spill] sm:$0xff] %v5631_v63  ;;  %v882_v3 = vsel %vm713_vm1, %v5631_v63, -inf  ;;  %vm8960_vm8 = vcmp.lt.s32.totalorder %v5645_v19, 1000 }
  0x87   : > { %871 = vmax.xlane.f32.xlu0 %v870_v6  ;;  %9279 = vst [vmem:[#allocation96_spill] sm:$0xff] %v5638_v51  ;;  %v265_v6 = vld [vmem:[%s4954_s26 + $0x1d8] sm:$0xff]  ;;  %vm8966_vm10 = vcmp.lt.s32.totalorder %v5638_v51, 1000  ;;  %v5677_v61 = vsel %vm8960_vm8, %v267_v1, 0.0 }
  0x88   : > { %874 = vmax.xlane.f32.xlu1 %v873_v30  ;;  %v264_v30 = vld [vmem:[%s4954_s26 + $0x1d0] sm:$0xff]  ;;  %v5658_v9 = vsel %vm8896_vm9, %v265_v6, 0.0  ;;  %v5673_v6 = vsel %vm8966_vm10, %v266_v39, 0.0  ;;  %9285 = vst [vmem:[#allocation102_spill] sm:$0xff] %v5677_v61 }
  0x89   : > { %v5654_v57 = vsel %vm8976_vm7, %v264_v30, 0.0  ;;  %9282 = vst [vmem:[#allocation99_spill] sm:$0xff] %v5658_v9  ;;  %v891_v30 = vsel %vm713_vm1, %v5658_v9, -inf  ;;  %9284 = vst [vmem:[#allocation101_spill] sm:$0xff] %v5673_v6 }
  0x8a   : > { %9281 = vst [vmem:[#allocation98_spill] sm:$0xff] %v5654_v57 }
  0x8b   : > { %877 = vmax.xlane.f32.xlu0 %v876_v13  ;;  %v5665_v13 = vadd.s32 %v4923_v2, %v395_v14  ;;  %v894_v2 = vsel %vm713_vm1, %v5673_v6, -inf  ;;  %v897_v14 = vsel %vm713_vm1, %v5677_v61, -inf }
  0x8c   : > { %880 = vmax.xlane.f32.xlu1 %v879_v12  ;;  %v888_v12 = vsel %vm713_vm1, %v5654_v57, -inf }
  0x8d   : > { %9283 = vst [vmem:[#allocation100_spill] sm:$0xff] %v5665_v13  ;;  %vm8965_vm9 = vcmp.lt.s32.totalorder %v5665_v13, 1000 }
  0x8f   : > { %883 = vmax.xlane.f32.xlu0 %v882_v3  ;;  %v5687_v3 = vsel %vm8965_vm9, %v268_v47, 0.0 }
  0x90   : > { %886 = vmax.xlane.f32.xlu1 %v885_v50  ;;  %9286 = vst [vmem:[#allocation103_spill] sm:$0xff] %v5687_v3  ;;  %v900_v50 = vsel %vm713_vm1, %v5687_v3, -inf }
  0x93   : > { %889 = vmax.xlane.f32.xlu0 %v888_v12 }
  0x94   : > { %892 = vmax.xlane.f32.xlu1 %v891_v30 }
  0x97   : > { %895 = vmax.xlane.f32.xlu0 %v894_v2 }
  0x98   : > { %898 = vmax.xlane.f32.xlu1 %v897_v14 }
  0x9b   : > { %901 = vmax.xlane.f32.xlu0 %v900_v50 }
  0xac   : > { %v5691_v39 = vpop.xlane.xlu0 %715 }
  0xad   : > { %v5693_v1 = vpop.xlane.xlu1 %721  ;;  %v903_v12 = vsub.f32 %v4973_v20, %v5691_v39  ;;  %vm1409_vm8 = vcmp.eq.f32.partialorder %v4973_v20, %v5691_v39 }
  0xae   : > { %v905_v30 = vsub.f32 %v4977_v21, %v5693_v1  ;;  %vm1411_vm9 = vcmp.eq.f32.partialorder %v4977_v21, %v5693_v1 }
  0xaf   : > { %v966_v19 = vmul.f32 1.442695, %v903_v12 }
  0xb0   : > { %v970_v13 = vmul.f32 1.442695, %v905_v30  ;;  %v5699_v47 = vpop.xlane.xlu0 %718 }
  0xb1   : > { %v5701_v2 = vpop.xlane.xlu1 %724  ;;  %4536 = vpow2.f32 %v966_v19  ;;  %v904_v14 = vsub.f32 %v4981_v22, %v5699_v47 }
  0xb2   : > { %v906_v50 = vsub.f32 %v4993_v27, %v5701_v2  ;;  %4538 = vpow2.f32 %v970_v13  ;;  %vm1412_vm10 = vcmp.eq.f32.partialorder %v4993_v27, %v5701_v2 }
  0xb3   : > { %v968_v51 = vmul.f32 1.442695, %v904_v14 }
  0xb4   : > { %v972_v3 = vmul.f32 1.442695, %v906_v50  ;;  %v5707_v61 = vpop.xlane.xlu0 %727 }
  0xb5   : > { %v5709_v6 = vpop.xlane.xlu1 %730  ;;  %4540 = vpow2.f32 %v968_v51  ;;  %v907_v12 = vsub.f32 %v5005_v32, %v5707_v61 }
  0xb6   : > { %v908_v19 = vsub.f32 %v5009_v33, %v5709_v6  ;;  %4542 = vpow2.f32 %v972_v3 }
  0xb7   : > { %v974_v30 = vmul.f32 1.442695, %v907_v12 }
  0xb8   : > { %v976_v9 = vmul.f32 1.442695, %v908_v19  ;;  %v5715_v57 = vpop.xlane.xlu0 %733 }
  0xb9   : > { %v5717_v11 = vpop.xlane.xlu1 %736  ;;  %4544 = vpow2.f32 %v974_v30  ;;  %v909_v13 = vsub.f32 %v5031_v44, %v5715_v57 }
  0xba   : > { %v910_v51 = vsub.f32 %v5035_v45, %v5717_v11  ;;  %4546 = vpow2.f32 %v976_v9 }
  0xbb   : > { %v4537_v14 = vpop.eup %4536  ;;  %v978_v50 = vmul.f32 1.442695, %v909_v13 }
  0xbc   : > { %v980_v63 = vmul.f32 1.442695, %v910_v51  ;;  %v4539_v7 = vpop.eup %4538  ;;  %v1092_v3 = vsel %vm713_vm1, %v4537_v14, 0.0  ;;  %v5724_v12 = vpop.xlane.xlu0 %739 }
  0xbd   : > { %v5726_v19 = vpop.xlane.xlu1 %742  ;;  %4548 = vpow2.f32 %v978_v50  ;;  %1093 = vadd.xlane.f32.xlu1 %v1092_v3  ;;  %v911_v30 = vsub.f32 %v5055_v54, %v5724_v12  ;;  %v1098_v9 = vsel %vm713_vm1, %v4539_v7, 0.0 }
  0xbe   : > { %v912_v34 = vsub.f32 %v5059_v55, %v5726_v19  ;;  %4550 = vpow2.f32 %v980_v63 }
  0xbf   : > { %v4541_v13 = vpop.eup %4540  ;;  %v982_v51 = vmul.f32 1.442695, %v911_v30 }
  0xc0   : > { %v984_v24 = vmul.f32 1.442695, %v912_v34  ;;  %v4543_v15 = vpop.eup %4542  ;;  %v1095_v14 = vsel %vm713_vm1, %v4541_v13, 0.0  ;;  %v5734_v60 = vpop.xlane.xlu0 %745 }
  0xc1   : > { %v5736_v8 = vpop.xlane.xlu1 %748  ;;  %4552 = vpow2.f32 %v982_v51  ;;  %1099 = vadd.xlane.f32.xlu1 %v1098_v9  ;;  %1096 = vadd.xlane.f32.xlu0 %v1095_v14  ;;  %v913_v50 = vsub.f32 %v5079_v4, %v5734_v60  ;;  %v1101_v7 = vsel %vm713_vm1, %v4543_v15, 0.0 }
  0xc2   : > { %9287 = vst [vmem:[#allocation104_spill] sm:$0xff] %v5736_v8  ;;  %v914_v63 = vsub.f32 %v5083_v5, %v5736_v8  ;;  %4554 = vpow2.f32 %v984_v24 }
  0xc3   : > { %v4545_v34 = vpop.eup %4544  ;;  %v986_v3 = vmul.f32 1.442695, %v913_v50 }
  0xc4   : > { %v988_v30 = vmul.f32 1.442695, %v914_v63  ;;  %v4547_v13 = vpop.eup %4546  ;;  %v5743_v46 = vpop.xlane.xlu0 %751  ;;  %v1104_v29 = vsel %vm713_vm1, %v4545_v34, 0.0 }
  0xc5   : > { %v5746_v51 = vpop.xlane.xlu1 %754  ;;  %4556 = vpow2.f32 %v986_v3  ;;  %1102 = vadd.xlane.f32.xlu0 %v1101_v7  ;;  %v915_v9 = vsub.f32 %v5103_v23, %v5743_v46  ;;  %1105 = vadd.xlane.f32.xlu1 %v1104_v29  ;;  %v1107_v15 = vsel %vm713_vm1, %v4547_v13, 0.0 }
  0xc6   : > { %9288 = vst [vmem:[#allocation105_spill] sm:$0xff] %v5746_v51  ;;  %v916_v24 = vsub.f32 %v5107_v25, %v5746_v51  ;;  %4558 = vpow2.f32 %v988_v30 }
  0xc7   : > { %v4549_v14 = vpop.eup %4548  ;;  %v990_v50 = vmul.f32 1.442695, %v915_v9 }
  0xc8   : > { %v992_v63 = vmul.f32 1.442695, %v916_v24  ;;  %v4551_v5 = vpop.eup %4550  ;;  %v5753_v8 = vpop.xlane.xlu0 %757  ;;  %v1110_v34 = vsel %vm713_vm1, %v4549_v14, 0.0 }
  0xc9   : > { %v5756_v3 = vpop.xlane.xlu1 %760  ;;  %4560 = vpow2.f32 %v990_v50  ;;  %1108 = vadd.xlane.f32.xlu0 %v1107_v15  ;;  %v917_v29 = vsub.f32 %v5127_v37, %v5753_v8  ;;  %1111 = vadd.xlane.f32.xlu1 %v1110_v34  ;;  %v1113_v30 = vsel %vm713_vm1, %v4551_v5, 0.0 }
  0xca   : > { %9289 = vst [vmem:[#allocation106_spill] sm:$0xff] %v5756_v3  ;;  %v918_v7 = vsub.f32 %v5131_v38, %v5756_v3  ;;  %4562 = vpow2.f32 %v992_v63 }
  0xcb   : > { %v4553_v13 = vpop.eup %4552  ;;  %v994_v9 = vmul.f32 1.442695, %v917_v29 }
  0xcc   : > { %v996_v24 = vmul.f32 1.442695, %v918_v7  ;;  %v4555_v25 = vpop.eup %4554  ;;  %v5763_v51 = vpop.xlane.xlu0 %763  ;;  %v1116_v14 = vsel %vm713_vm1, %v4553_v13, 0.0 }
  0xcd   : > { %v5766_v50 = vpop.xlane.xlu1 %766  ;;  %4564 = vpow2.f32 %v994_v9  ;;  %1114 = vadd.xlane.f32.xlu0 %v1113_v30  ;;  %v919_v15 = vsub.f32 %v5151_v53, %v5763_v51  ;;  %1117 = vadd.xlane.f32.xlu1 %v1116_v14  ;;  %v1119_v5 = vsel %vm713_vm1, %v4555_v25, 0.0 }
  0xce   : > { %9290 = vst [vmem:[#allocation107_spill] sm:$0xff] %v5766_v50  ;;  %v920_v63 = vsub.f32 %v5155_v56, %v5766_v50  ;;  %4566 = vpow2.f32 %v996_v24 }
  0xcf   : > { %v4557_v34 = vpop.eup %4556  ;;  %v998_v29 = vmul.f32 1.442695, %v919_v15 }
  0xd0   : > { %v1000_v7 = vmul.f32 1.442695, %v920_v63  ;;  %v4559_v38 = vpop.eup %4558  ;;  %v5773_v3 = vpop.xlane.xlu0 %769  ;;  %v1122_v13 = vsel %vm713_vm1, %v4557_v34, 0.0 }
  0xd1   : > { %v5776_v9 = vpop.xlane.xlu1 %772  ;;  %4568 = vpow2.f32 %v998_v29  ;;  %1120 = vadd.xlane.f32.xlu0 %v1119_v5  ;;  %v921_v30 = vsub.f32 %v5175_v16, %v5773_v3  ;;  %1123 = vadd.xlane.f32.xlu1 %v1122_v13  ;;  %v1125_v25 = vsel %vm713_vm1, %v4559_v38, 0.0 }
  0xd2   : > { %9291 = vst [vmem:[#allocation108_spill] sm:$0xff] %v5776_v9  ;;  %v922_v24 = vsub.f32 %v5179_v17, %v5776_v9  ;;  %4570 = vpow2.f32 %v1000_v7 }
  0xd3   : > { %v4561_v14 = vpop.eup %4560  ;;  %v1002_v15 = vmul.f32 1.442695, %v921_v30 }
  0xd4   : > { %v1004_v63 = vmul.f32 1.442695, %v922_v24  ;;  %v4563_v56 = vpop.eup %4562  ;;  %v5783_v50 = vpop.xlane.xlu0 %775  ;;  %v1128_v34 = vsel %vm713_vm1, %v4561_v14, 0.0 }
  0xd5   : > { %v5786_v29 = vpop.xlane.xlu1 %778  ;;  %4572 = vpow2.f32 %v1002_v15  ;;  %1126 = vadd.xlane.f32.xlu0 %v1125_v25  ;;  %v923_v5 = vsub.f32 %v5199_v41, %v5783_v50  ;;  %1129 = vadd.xlane.f32.xlu1 %v1128_v34  ;;  %v1131_v38 = vsel %vm713_vm1, %v4563_v56, 0.0 }
  0xd6   : > { %9292 = vst [vmem:[#allocation109_spill] sm:$0xff] %v5786_v29  ;;  %v924_v7 = vsub.f32 %v5203_v42, %v5786_v29  ;;  %4574 = vpow2.f32 %v1004_v63 }
  0xd7   : > { %v4565_v13 = vpop.eup %4564  ;;  %v1006_v30 = vmul.f32 1.442695, %v923_v5 }
  0xd8   : > { %v1008_v24 = vmul.f32 1.442695, %v924_v7  ;;  %v4567_v17 = vpop.eup %4566  ;;  %v5793_v9 = vpop.xlane.xlu0 %781  ;;  %v1134_v14 = vsel %vm713_vm1, %v4565_v13, 0.0 }
  0xd9   : > { %v5796_v15 = vpop.xlane.xlu1 %784  ;;  %4576 = vpow2.f32 %v1006_v30  ;;  %1132 = vadd.xlane.f32.xlu0 %v1131_v38  ;;  %v925_v25 = vsub.f32 %v5223_v10, %v5793_v9  ;;  %1135 = vadd.xlane.f32.xlu1 %v1134_v14  ;;  %v1137_v56 = vsel %vm713_vm1, %v4567_v17, 0.0 }
  0xda   : > { %9293 = vst [vmem:[#allocation110_spill] sm:$0xff] %v5796_v15  ;;  %v926_v63 = vsub.f32 %v5227_v26, %v5796_v15  ;;  %4578 = vpow2.f32 %v1008_v24  ;;  %v9295_v15 = vlaneseq }
  0xdb   : > { %v4569_v34 = vpop.eup %4568  ;;  %v1010_v5 = vmul.f32 1.442695, %v925_v25 }
  0xdc   : > { %v1012_v7 = vmul.f32 1.442695, %v926_v63  ;;  %v4571_v42 = vpop.eup %4570  ;;  %v5803_v29 = vpop.xlane.xlu0 %787  ;;  %v1140_v13 = vsel %vm713_vm1, %v4569_v34, 0.0  ;;  %v5814_v34 = vand.u32 127, %v9295_v15 }
  0xdd   : > { %v5806_v30 = vpop.xlane.xlu1 %790  ;;  %4580 = vpow2.f32 %v1010_v5  ;;  %1138 = vadd.xlane.f32.xlu0 %v1137_v56  ;;  %v927_v38 = vsub.f32 %v5247_v0, %v5803_v29  ;;  %1141 = vadd.xlane.f32.xlu1 %v1140_v13  ;;  %v1143_v17 = vsel %vm713_vm1, %v4571_v42, 0.0 }
  0xde   : > { %9294 = vst [vmem:[#allocation111_spill] sm:$0xff] %v5806_v30  ;;  %v928_v24 = vsub.f32 %v5251_v31, %v5806_v30  ;;  %4582 = vpow2.f32 %v1012_v7  ;;  %v1472_v31 = vsel %vm1409_vm8, %v5814_v34, 10  ;;  %vm1410_vm8 = vcmp.eq.f32.partialorder %v4981_v22, %v5699_v47 }
  0xdf   : > { %v4573_v14 = vpop.eup %4572  ;;  %v1014_v25 = vmul.f32 1.442695, %v927_v38  ;;  %v1535_v21 = vsel %vm713_vm1, %v1472_v31, 2147483647  ;;  %v1473_v47 = vsel %vm1410_vm8, %v5814_v34, 10  ;;  %vm1415_vm8 = vcmp.eq.f32.partialorder %v5031_v44, %v5715_v57 }
  0xe0   : > { %v1016_v63 = vmul.f32 1.442695, %v928_v24  ;;  %v4575_v26 = vpop.eup %4574  ;;  %v5816_v10 = vpop.xlane.xlu0 %793  ;;  %v1146_v56 = vsel %vm713_vm1, %v4573_v14, 0.0 }
  0xe1   : > { %v5819_v5 = vpop.xlane.xlu1 %796  ;;  %4584 = vpow2.f32 %v1014_v25  ;;  %1144 = vadd.xlane.f32.xlu0 %v1143_v17  ;;  %v929_v42 = vsub.f32 %v5271_v48, %v5816_v10  ;;  %1147 = vadd.xlane.f32.xlu1 %v1146_v56  ;;  %v1149_v15 = vsel %vm713_vm1, %v4575_v26, 0.0 }
  0xe2   : > { %v930_v7 = vsub.f32 %v5275_v49, %v5819_v5  ;;  %4586 = vpow2.f32 %v1016_v63 }
  0xe3   : > { %v4577_v13 = vpop.eup %4576  ;;  %v1018_v38 = vmul.f32 1.442695, %v929_v42 }
  0xe4   : > { %v1020_v24 = vmul.f32 1.442695, %v930_v7  ;;  %v4579_v14 = vpop.eup %4578  ;;  %v5829_v30 = vpop.xlane.xlu0 %799  ;;  %v1152_v20 = vsel %vm713_vm1, %v4577_v13, 0.0  ;;  %v1474_v7 = vsel %vm1411_vm9, %v5814_v34, 10  ;;  %vm1413_vm9 = vcmp.eq.f32.partialorder %v5005_v32, %v5707_v61 }
  0xe5   : > { %v5832_v39 = vpop.xlane.xlu1 %802  ;;  %4588 = vpow2.f32 %v1018_v38  ;;  %1150 = vadd.xlane.f32.xlu0 %v1149_v15  ;;  %v931_v26 = vsub.f32 %v5295_v28, %v5829_v30  ;;  %1153 = vadd.xlane.f32.xlu1 %v1152_v20  ;;  %v1155_v25 = vsel %vm713_vm1, %v4579_v14, 0.0  ;;  %v1537_v14 = vshra.s32 %v1535_v21, 16 }
  0xe6   : > { %v932_v17 = vsub.f32 %v5299_v35, %v5832_v39  ;;  %4590 = vpow2.f32 %v1020_v24  ;;  %v5859_v27 = vsel %vm713_vm1, %v1474_v7, 2147483647  ;;  %v5872_v7 = vsel %vm713_vm1, %v1473_v47, 2147483647 }
  0xe7   : > { %v4581_v63 = vpop.eup %4580  ;;  %v1022_v56 = vmul.f32 1.442695, %v931_v26  ;;  %9296 = vst [vmem:[#allocation112_spill] sm:$0xff] %v5859_v27  ;;  %9297 = vst [vmem:[#allocation113_spill] sm:$0xff] %v5872_v7 }
  0xe8   : > { %v1024_v42 = vmul.f32 1.442695, %v932_v17  ;;  %v4583_v1 = vpop.eup %4582  ;;  %v5845_v15 = vpop.xlane.xlu0 %805  ;;  %v1158_v13 = vsel %vm713_vm1, %v4581_v63, 0.0 }
  0xe9   : > { %v5848_v38 = vpop.xlane.xlu1 %808  ;;  %4592 = vpow2.f32 %v1022_v56  ;;  %1156 = vadd.xlane.f32.xlu0 %v1155_v25  ;;  %v933_v22 = vsub.f32 %v5319_v62, %v5845_v15  ;;  %1159 = vadd.xlane.f32.xlu1 %v1158_v13  ;;  %v1161_v24 = vsel %vm713_vm1, %v4583_v1, 0.0  ;;  %v1475_v25 = vsel %vm1412_vm10, %v5814_v34, 10 }
  0xea   : > { %v934_v31 = vsub.f32 %v5323_v58, %v5848_v38  ;;  %4594 = vpow2.f32 %v1024_v42  ;;  %v1536_v58 = vand.u32 65535, %v1535_v21  ;;  %vm1414_vm10 = vcmp.eq.f32.partialorder %v5009_v33, %v5709_v6 }
  0xeb   : > { %v4585_v20 = vpop.eup %4584  ;;  %v1026_v26 = vmul.f32 1.442695, %v933_v22 }
  0xec   : > { %v1028_v17 = vmul.f32 1.442695, %v934_v31  ;;  %v4587_v2 = vpop.eup %4586  ;;  %v5862_v63 = vpop.xlane.xlu0 %811  ;;  %v1164_v56 = vsel %vm713_vm1, %v4585_v20, 0.0  ;;  %v5875_v31 = vcvt.s32.f32 %v1537_v14  ;;  %v1567_v20 = vshra.s32 %v5859_v27, 16 }
  0xed   : > { %v5865_v13 = vpop.xlane.xlu1 %814  ;;  %4596 = vpow2.f32 %v1026_v26  ;;  %1162 = vadd.xlane.f32.xlu0 %v1161_v24  ;;  %v935_v42 = vsub.f32 %v5343_v40, %v5862_v63  ;;  %1165 = vadd.xlane.f32.xlu1 %v1164_v56  ;;  %v1167_v22 = vsel %vm713_vm1, %v4587_v2, 0.0  ;;  %v1552_v14 = vshra.s32 %v5872_v7, 16 }
  0xee   : > { %v936_v1 = vsub.f32 %v5347_v36, %v5865_v13  ;;  %4598 = vpow2.f32 %v1028_v17  ;;  %9298 = vst [vmem:[#allocation114_spill] sm:$0xff] %v5875_v31  ;;  %v5889_v2 = vsel %vm713_vm1, %v1475_v25, 2147483647  ;;  %v5891_v31 = vcvt.s32.f32 %v1536_v58 }
  0xef   : > { %v4589_v21 = vpop.eup %4588  ;;  %v1030_v24 = vmul.f32 1.442695, %v935_v42  ;;  %9299 = vst [vmem:[#allocation115_spill] sm:$0xff] %v5889_v2  ;;  %v1476_v7 = vsel %vm1413_vm9, %v5814_v34, 10  ;;  %v1477_v58 = vsel %vm1414_vm10, %v5814_v34, 10  ;;  %vm1416_vm9 = vcmp.eq.f32.partialorder %v5035_v45, %v5717_v11  ;;  %v9307_v11 = vld [vmem:[#allocation58_spill] sm:$0xff] }
  0xf0   : > { %v1032_v26 = vmul.f32 1.442695, %v936_v1  ;;  %v4591_v56 = vpop.eup %4590  ;;  %v5882_v36 = vpop.xlane.xlu0 %817  ;;  %v1170_v47 = vsel %vm713_vm1, %v4589_v21, 0.0  ;;  %9300 = vst [vmem:[#allocation116_spill] sm:$0xff] %v5891_v31  ;;  %v1582_v21 = vshra.s32 %v5889_v2, 16  ;;  %v5917_v6 = vcvt.s32.f32 %v1552_v14 }
  0xf1   : > { %v5885_v17 = vpop.xlane.xlu1 %820  ;;  %4600 = vpow2.f32 %v1030_v24  ;;  %1168 = vadd.xlane.f32.xlu0 %v1167_v22  ;;  %v937_v42 = vsub.f32 %v5367_v59, %v5882_v36  ;;  %1171 = vadd.xlane.f32.xlu1 %v1170_v47  ;;  %v1173_v25 = vsel %vm713_vm1, %v4591_v56, 0.0  ;;  %v1478_v14 = vsel %vm1415_vm8, %v5814_v34, 10 }
  0xf2   : > { %v938_v1 = vsub.f32 %v5371_v18, %v5885_v17  ;;  %4602 = vpow2.f32 %v1032_v26  ;;  %9301 = vst [vmem:[#allocation117_spill] sm:$0xff] %v5917_v6  ;;  %v5919_v26 = vcvt.s32.f32 %v1567_v20  ;;  %v5940_v27 = vcvt.s32.f32 %v1582_v21 }
  0xf3   : > { %v4593_v22 = vpop.eup %4592  ;;  %v1034_v24 = vmul.f32 1.442695, %v937_v42  ;;  %vm1417_vm10 = vcmp.eq.f32.partialorder %v5055_v54, %v5724_v12  ;;  %vm1418_vm8 = vcmp.eq.f32.partialorder %v5059_v55, %v5726_v19  ;;  %v9313_v55 = vld [vmem:[#allocation62_spill] sm:$0xff] }
  0xf4   : > { %v1036_v47 = vmul.f32 1.442695, %v938_v1  ;;  %v4595_v31 = vpop.eup %4594  ;;  %v5912_v32 = vpop.xlane.xlu0 %823  ;;  %v1176_v33 = vsel %vm713_vm1, %v4593_v22, 0.0  ;;  %9302 = vst [vmem:[#allocation118_spill] sm:$0xff] %v5919_v26  ;;  %v5926_v1 = vsel %vm713_vm1, %v1476_v7, 2147483647 }
  0xf5   : > { %v5915_v61 = vpop.xlane.xlu1 %826  ;;  %4604 = vpow2.f32 %v1034_v24  ;;  %1174 = vadd.xlane.f32.xlu0 %v1173_v25  ;;  %v939_v56 = vsub.f32 %v5391_v43, %v5912_v32  ;;  %1177 = vadd.xlane.f32.xlu1 %v1176_v33  ;;  %9303 = vst [vmem:[#allocation119_spill] sm:$0xff] %v5926_v1  ;;  %v1179_v20 = vsel %vm713_vm1, %v4595_v31, 0.0  ;;  %v5934_v25 = vsel %vm713_vm1, %v1477_v58, 2147483647  ;;  %9305 = vst [vmem:[#allocation121_spill] sm:$0xff] %v5940_v27  ;;  %v9308_v58 = vld [vmem:[#allocation59_spill] sm:$0xff] }
  0xf6   : > { %v940_v42 = vsub.f32 %v5395_v52, %v5915_v61  ;;  %4606 = vpow2.f32 %v1036_v47  ;;  %9304 = vst [vmem:[#allocation120_spill] sm:$0xff] %v5934_v25  ;;  %v1479_v24 = vsel %vm1416_vm9, %v5814_v34, 10  ;;  %v1597_v45 = vshra.s32 %v5926_v1, 16 }
  0xf7   : > { %v4597_v22 = vpop.eup %4596  ;;  %v1038_v33 = vmul.f32 1.442695, %v939_v56  ;;  %v5957_v56 = vsel %vm713_vm1, %v1478_v14, 2147483647  ;;  %v5962_v27 = vsel %vm713_vm1, %v1479_v24, 2147483647  ;;  %vm1419_vm9 = vcmp.eq.f32.partialorder %v5079_v4, %v5734_v60 }
  0xf8   : > { %v1040_v7 = vmul.f32 1.442695, %v940_v42  ;;  %v4599_v2 = vpop.eup %4598  ;;  %v5946_v44 = vpop.xlane.xlu0 %829  ;;  %v1182_v57 = vsel %vm713_vm1, %v4597_v22, 0.0  ;;  %9309 = vst [vmem:[#allocation123_spill] sm:$0xff] %v5957_v56  ;;  %v1612_v22 = vshra.s32 %v5934_v25, 16  ;;  %9310 = vst [vmem:[#allocation124_spill] sm:$0xff] %v5962_v27  ;;  %v5986_v6 = vcvt.s32.f32 %v1597_v45 }
  0xf9   : > { %v5949_v31 = vpop.xlane.xlu1 %832  ;;  %4608 = vpow2.f32 %v1038_v33  ;;  %1180 = vadd.xlane.f32.xlu0 %v1179_v20  ;;  %v941_v21 = vsub.f32 %v9307_v11, %v5946_v44  ;;  %1183 = vadd.xlane.f32.xlu1 %v1182_v57  ;;  %v1185_v42 = vsel %vm713_vm1, %v4599_v2, 0.0  ;;  %v1480_v20 = vsel %vm1417_vm10, %v5814_v34, 10  ;;  %v9311_v2 = vld [vmem:[#allocation104_spill] sm:$0xff]  ;;  %v9312_v24 = vld [vmem:[#allocation19_spill] sm:$0xff] }
  0xfa   : > { %9306 = vst [vmem:[#allocation122_spill] sm:$0xff] %v5949_v31  ;;  %v942_v47 = vsub.f32 %v9308_v58, %v5949_v31  ;;  %4610 = vpow2.f32 %v1040_v7  ;;  %v1481_v14 = vsel %vm1418_vm8, %v5814_v34, 10  ;;  %vm1420_vm7 = vcmp.eq.f32.partialorder %v9312_v24, %v9311_v2  ;;  %9315 = vst [vmem:[#allocation104_spill] sm:$0xff] %v5986_v6  ;;  %v9322_v2 = vld [vmem:[#allocation66_spill] sm:$0xff] }
  0xfb   : > { %v4601_v33 = vpop.eup %4600  ;;  %v1042_v57 = vmul.f32 1.442695, %v941_v21  ;;  %v1627_v12 = vshra.s32 %v5957_v56, 16  ;;  %v9314_v21 = vld [vmem:[#allocation63_spill] sm:$0xff]  ;;  %v5989_v31 = vcvt.s32.f32 %v1612_v22  ;;  %vm1421_vm10 = vcmp.eq.f32.partialorder %v5103_v23, %v5743_v46  ;;  %v9318_v22 = vld [vmem:[#allocation22_spill] sm:$0xff] }
  0xfc   : > { %v1044_v7 = vmul.f32 1.442695, %v942_v47  ;;  %v4603_v1 = vpop.eup %4602  ;;  %v5976_v25 = vpop.xlane.xlu0 %835  ;;  %v1188_v26 = vsel %vm713_vm1, %v4601_v33, 0.0  ;;  %v1642_v33 = vshra.s32 %v5962_v27, 16  ;;  %v6016_v56 = vsel %vm713_vm1, %v1480_v20, 2147483647 }
  0xfd   : > { %v5979_v54 = vpop.xlane.xlu1 %838  ;;  %4612 = vpow2.f32 %v1042_v57  ;;  %1186 = vadd.xlane.f32.xlu0 %v1185_v42  ;;  %v943_v19 = vsub.f32 %v9313_v55, %v5976_v25  ;;  %1189 = vadd.xlane.f32.xlu1 %v1188_v26  ;;  %v1191_v58 = vsel %vm713_vm1, %v4603_v1, 0.0  ;;  %9316 = vst [vmem:[#allocation19_spill] sm:$0xff] %v5989_v31  ;;  %v1482_v42 = vsel %vm1419_vm9, %v5814_v34, 10  ;;  %v9317_v1 = vld [vmem:[#allocation105_spill] sm:$0xff]  ;;  %9324 = vst [vmem:[#allocation22_spill] sm:$0xff] %v6016_v56 }
  0xfe   : > { %v944_v47 = vsub.f32 %v9314_v21, %v5979_v54  ;;  %4614 = vpow2.f32 %v1044_v7  ;;  %v1483_v26 = vsel %vm1420_vm7, %v5814_v34, 10  ;;  %vm1422_vm8 = vcmp.eq.f32.partialorder %v9318_v22, %v9317_v1  ;;  %v9331_v1 = vld [vmem:[#allocation70_spill] sm:$0xff] }
  0xff   : > { %v4605_v11 = vpop.eup %4604  ;;  %v1046_v45 = vmul.f32 1.442695, %v943_v19  ;;  %v6009_v4 = vcvt.s32.f32 %v1627_v12  ;;  %v9323_v19 = vld [vmem:[#allocation67_spill] sm:$0xff]  ;;  %v6022_v12 = vsel %vm713_vm1, %v1481_v14, 2147483647  ;;  %vm1423_vm7 = vcmp.eq.f32.partialorder %v5127_v37, %v5753_v8  ;;  %v9327_v14 = vld [vmem:[#allocation106_spill] sm:$0xff] }
 0x100   : > { %v1048_v57 = vmul.f32 1.442695, %v944_v47  ;;  %v4607_v7 = vpop.eup %4606  ;;  %v6004_v31 = vpop.xlane.xlu0 %841  ;;  %v1194_v27 = vsel %vm713_vm1, %v4605_v11, 0.0  ;;  %v6019_v11 = vcvt.s32.f32 %v1642_v33  ;;  %9326 = vst [vmem:[#allocation126_spill] sm:$0xff] %v6022_v12  ;;  %v9328_v33 = vld [vmem:[#allocation25_spill] sm:$0xff] }
 0x101   : > { %9319 = vst [vmem:[#allocation62_spill] sm:$0xff] %v6004_v31  ;;  %v6007_v60 = vpop.xlane.xlu1 %844  ;;  %9321 = vst [vmem:[#allocation105_spill] sm:$0xff] %v6009_v4  ;;  %4616 = vpow2.f32 %v1046_v45  ;;  %1192 = vadd.xlane.f32.xlu0 %v1191_v58  ;;  %v945_v24 = vsub.f32 %v9322_v2, %v6004_v31  ;;  %1195 = vadd.xlane.f32.xlu1 %v1194_v27  ;;  %v1197_v6 = vsel %vm713_vm1, %v4607_v7, 0.0  ;;  %v1484_v27 = vsel %vm1421_vm10, %v5814_v34, 10 }
 0x102   : > { %9320 = vst [vmem:[#allocation63_spill] sm:$0xff] %v6007_v60  ;;  %v946_v47 = vsub.f32 %v9323_v19, %v6007_v60  ;;  %4618 = vpow2.f32 %v1048_v57  ;;  %9325 = vst [vmem:[#allocation125_spill] sm:$0xff] %v6019_v11  ;;  %v6032_v58 = vsel %vm1422_vm8, %v5814_v34, 10  ;;  %vm1424_vm9 = vcmp.eq.f32.partialorder %v9328_v33, %v9327_v14  ;;  %v9337_v14 = vld [vmem:[#allocation74_spill] sm:$0xff] }
 0x103   : > { %v4609_v45 = vpop.eup %4608  ;;  %v1050_v20 = vmul.f32 1.442695, %v945_v24  ;;  %v1657_v4 = vshra.s32 %v6016_v56, 16  ;;  %v9332_v24 = vld [vmem:[#allocation71_spill] sm:$0xff]  ;;  %v6049_v19 = vsel %vm713_vm1, %v1482_v42, 2147483647  ;;  %vm1425_vm10 = vcmp.eq.f32.partialorder %v5151_v53, %v5763_v51 }
 0x104   : > { %v1052_v57 = vmul.f32 1.442695, %v946_v47  ;;  %v4611_v7 = vpop.eup %4610  ;;  %v6038_v11 = vpop.xlane.xlu0 %847  ;;  %v1200_v23 = vsel %vm713_vm1, %v4609_v45, 0.0  ;;  %9333 = vst [vmem:[#allocation127_spill] sm:$0xff] %v6049_v19  ;;  %v1672_v45 = vshra.s32 %v6022_v12, 16  ;;  %v6064_v42 = vsel %vm1424_vm9, %v5814_v34, 10 }
 0x105   : > { %9329 = vst [vmem:[#allocation106_spill] sm:$0xff] %v6038_v11  ;;  %v6041_v46 = vpop.xlane.xlu1 %850  ;;  %4620 = vpow2.f32 %v1050_v20  ;;  %1198 = vadd.xlane.f32.xlu0 %v1197_v6  ;;  %v947_v22 = vsub.f32 %v9331_v1, %v6038_v11  ;;  %1201 = vadd.xlane.f32.xlu1 %v1200_v23  ;;  %v1203_v60 = vsel %vm713_vm1, %v4611_v7, 0.0  ;;  %v6054_v2 = vsel %vm713_vm1, %v1483_v26, 2147483647  ;;  %v9335_v26 = vld [vmem:[#allocation107_spill] sm:$0xff]  ;;  %v9336_v12 = vld [vmem:[#allocation28_spill] sm:$0xff] }
 0x106   : > { %9330 = vst [vmem:[#allocation25_spill] sm:$0xff] %v6041_v46  ;;  %v948_v47 = vsub.f32 %v9332_v24, %v6041_v46  ;;  %4622 = vpow2.f32 %v1052_v57  ;;  %9334 = vst [vmem:[#allocation128_spill] sm:$0xff] %v6054_v2  ;;  %v1486_v6 = vsel %vm1423_vm7, %v5814_v34, 10  ;;  %vm1426_vm8 = vcmp.eq.f32.partialorder %v9336_v12, %v9335_v26  ;;  %v9346_v12 = vld [vmem:[#allocation78_spill] sm:$0xff] }
 0x107   : > { %v4613_v20 = vpop.eup %4612  ;;  %v1054_v57 = vmul.f32 1.442695, %v947_v22  ;;  %v1687_v24 = vshra.s32 %v6049_v19, 16  ;;  %v9338_v22 = vld [vmem:[#allocation75_spill] sm:$0xff]  ;;  %v6080_v46 = vcvt.s32.f32 %v1657_v4  ;;  %v6083_v11 = vcvt.s32.f32 %v1672_v45  ;;  %v9341_v45 = vld [vmem:[#allocation108_spill] sm:$0xff] }
 0x108   : > { %v1056_v23 = vmul.f32 1.442695, %v948_v47  ;;  %v4615_v7 = vpop.eup %4614  ;;  %v6070_v56 = vpop.xlane.xlu0 %853  ;;  %v1206_v37 = vsel %vm713_vm1, %v4613_v20, 0.0  ;;  %v1702_v20 = vshra.s32 %v6054_v2, 16  ;;  %v6096_v4 = vsel %vm1426_vm8, %v5814_v34, 10 }
 0x109   : > { %v6073_v8 = vpop.xlane.xlu1 %856  ;;  %4624 = vpow2.f32 %v1054_v57  ;;  %1204 = vadd.xlane.f32.xlu0 %v1203_v60  ;;  %v949_v33 = vsub.f32 %v9337_v14, %v6070_v56  ;;  %1207 = vadd.xlane.f32.xlu1 %v1206_v37  ;;  %9339 = vst [vmem:[#allocation107_spill] sm:$0xff] %v6080_v46  ;;  %v1209_v1 = vsel %vm713_vm1, %v4615_v7, 0.0  ;;  %9340 = vst [vmem:[#allocation28_spill] sm:$0xff] %v6083_v11  ;;  %v6090_v60 = vsel %vm1425_vm10, %v5814_v34, 10  ;;  %v9342_v37 = vld [vmem:[#allocation31_spill] sm:$0xff] }
 0x10a   : > { %v950_v47 = vsub.f32 %v9338_v22, %v6073_v8  ;;  %4626 = vpow2.f32 %v1056_v23  ;;  %vm1427_vm7 = vcmp.eq.f32.partialorder %v5175_v16, %v5773_v3  ;;  %vm1428_vm9 = vcmp.eq.f32.partialorder %v9342_v37, %v9341_v45  ;;  %v9355_v45 = vld [vmem:[#allocation82_spill] sm:$0xff] }
 0x10b   : > { %v4617_v31 = vpop.eup %4616  ;;  %v1058_v57 = vmul.f32 1.442695, %v949_v33  ;;  %v6107_v46 = vcvt.s32.f32 %v1687_v24  ;;  %v9347_v33 = vld [vmem:[#allocation79_spill] sm:$0xff]  ;;  %v6114_v2 = vsel %vm713_vm1, %v1484_v27, 2147483647  ;;  %v6133_v27 = vsel %vm1428_vm9, %v5814_v34, 10 }
 0x10c   : > { %v1060_v23 = vmul.f32 1.442695, %v950_v47  ;;  %v4619_v7 = vpop.eup %4618  ;;  %v6102_v11 = vpop.xlane.xlu0 %859  ;;  %v1212_v53 = vsel %vm713_vm1, %v4617_v31, 0.0  ;;  %9348 = vst [vmem:[#allocation129_spill] sm:$0xff] %v6114_v2  ;;  %v6117_v31 = vcvt.s32.f32 %v1702_v20  ;;  %v6121_v24 = vsel %vm713_vm1, %v6032_v58, 2147483647 }
 0x10d   : > { %9343 = vst [vmem:[#allocation74_spill] sm:$0xff] %v6102_v11  ;;  %v6105_v51 = vpop.xlane.xlu1 %862  ;;  %9345 = vst [vmem:[#allocation31_spill] sm:$0xff] %v6107_v46  ;;  %4628 = vpow2.f32 %v1058_v57  ;;  %1210 = vadd.xlane.f32.xlu0 %v1209_v1  ;;  %v951_v26 = vsub.f32 %v9346_v12, %v6102_v11  ;;  %1213 = vadd.xlane.f32.xlu1 %v1212_v53  ;;  %v1215_v19 = vsel %vm713_vm1, %v4619_v7, 0.0  ;;  %v6127_v57 = vsel %vm1427_vm7, %v5814_v34, 10  ;;  %v9351_v58 = vld [vmem:[#allocation109_spill] sm:$0xff]  ;;  %v9352_v53 = vld [vmem:[#allocation34_spill] sm:$0xff] }
 0x10e   : > { %9344 = vst [vmem:[#allocation108_spill] sm:$0xff] %v6105_v51  ;;  %v952_v47 = vsub.f32 %v9347_v33, %v6105_v51  ;;  %4630 = vpow2.f32 %v1060_v23  ;;  %9349 = vst [vmem:[#allocation130_spill] sm:$0xff] %v6117_v31  ;;  %vm1429_vm10 = vcmp.eq.f32.partialorder %v5199_v41, %v5783_v50  ;;  %vm1430_vm8 = vcmp.eq.f32.partialorder %v9352_v53, %v9351_v58  ;;  %v9362_v58 = vld [vmem:[#allocation86_spill] sm:$0xff] }
 0x10f   : > { %9350 = vst [vmem:[#allocation131_spill] sm:$0xff] %v6121_v24  ;;  %v4621_v1 = vpop.eup %4620  ;;  %v1062_v23 = vmul.f32 1.442695, %v951_v26  ;;  %v1717_v46 = vshra.s32 %v6114_v2, 16  ;;  %v9356_v26 = vld [vmem:[#allocation83_spill] sm:$0xff] }
 0x110   : > { %v1064_v20 = vmul.f32 1.442695, %v952_v47  ;;  %v4623_v7 = vpop.eup %4622  ;;  %v6139_v31 = vpop.xlane.xlu0 %865  ;;  %v1218_v16 = vsel %vm713_vm1, %v4621_v1, 0.0  ;;  %v6150_v33 = vsel %vm713_vm1, %v1486_v6, 2147483647  ;;  %v1732_v1 = vshra.s32 %v6121_v24, 16 }
 0x111   : > { %9353 = vst [vmem:[#allocation109_spill] sm:$0xff] %v6139_v31  ;;  %v6142_v3 = vpop.xlane.xlu1 %868  ;;  %4632 = vpow2.f32 %v1062_v23  ;;  %1216 = vadd.xlane.f32.xlu0 %v1215_v19  ;;  %v953_v37 = vsub.f32 %v9355_v45, %v6139_v31  ;;  %1219 = vadd.xlane.f32.xlu1 %v1218_v16  ;;  %9357 = vst [vmem:[#allocation132_spill] sm:$0xff] %v6150_v33  ;;  %v1221_v51 = vsel %vm713_vm1, %v4623_v7, 0.0  ;;  %v6156_v2 = vsel %vm713_vm1, %v6064_v42, 2147483647  ;;  %v9359_v24 = vld [vmem:[#allocation37_spill] sm:$0xff] }
 0x112   : > { %9354 = vst [vmem:[#allocation34_spill] sm:$0xff] %v6142_v3  ;;  %v954_v47 = vsub.f32 %v9356_v26, %v6142_v3  ;;  %4634 = vpow2.f32 %v1064_v20  ;;  %9358 = vst [vmem:[#allocation133_spill] sm:$0xff] %v6156_v2  ;;  %v6162_v23 = vsel %vm1429_vm10, %v5814_v34, 10  ;;  %v6168_v6 = vsel %vm1430_vm8, %v5814_v34, 10  ;;  %v9360_v42 = vld [vmem:[#allocation110_spill] sm:$0xff] }
 0x113   : > { %v4625_v19 = vpop.eup %4624  ;;  %v1066_v20 = vmul.f32 1.442695, %v953_v37  ;;  %vm1431_vm7 = vcmp.eq.f32.partialorder %v9359_v24, %v5793_v9  ;;  %v9361_v26 = vld [vmem:[#allocation38_spill] sm:$0xff]  ;;  %v1747_v45 = vshra.s32 %v6150_v33, 16  ;;  %v9363_v37 = vld [vmem:[#allocation87_spill] sm:$0xff]  ;;  %v6184_v31 = vcvt.s32.f32 %v1717_v46 }
 0x114   : > { %v1068_v7 = vmul.f32 1.442695, %v954_v47  ;;  %v4627_v16 = vpop.eup %4626  ;;  %vm1432_vm9 = vcmp.eq.f32.partialorder %v9361_v26, %v9360_v42  ;;  %v6174_v3 = vpop.xlane.xlu0 %871  ;;  %v1224_v41 = vsel %vm713_vm1, %v4625_v19, 0.0  ;;  %v6187_v11 = vcvt.s32.f32 %v1732_v1  ;;  %v9366_v1 = vld [vmem:[#allocation111_spill] sm:$0xff]  ;;  %v9369_v26 = vld [vmem:[#allocation90_spill] sm:$0xff] }
 0x115   : > { %v6177_v50 = vpop.xlane.xlu1 %874  ;;  %4636 = vpow2.f32 %v1066_v20  ;;  %1222 = vadd.xlane.f32.xlu0 %v1221_v51  ;;  %v955_v53 = vsub.f32 %v9362_v58, %v6174_v3  ;;  %1225 = vadd.xlane.f32.xlu1 %v1224_v41  ;;  %9364 = vst [vmem:[#allocation37_spill] sm:$0xff] %v6184_v31  ;;  %v1227_v12 = vsel %vm713_vm1, %v4627_v16, 0.0  ;;  %v1762_v19 = vshra.s32 %v6156_v2, 16  ;;  %v9367_v41 = vld [vmem:[#allocation41_spill] sm:$0xff] }
 0x116   : > { %v956_v47 = vsub.f32 %v9363_v37, %v6177_v50  ;;  %4638 = vpow2.f32 %v1068_v7  ;;  %9365 = vst [vmem:[#allocation110_spill] sm:$0xff] %v6187_v11  ;;  %v6194_v51 = vsel %vm1431_vm7, %v5814_v34, 10  ;;  %v6200_v46 = vsel %vm1432_vm9, %v5814_v34, 10 }
 0x117   : > { %v4629_v22 = vpop.eup %4628  ;;  %v1070_v20 = vmul.f32 1.442695, %v955_v53  ;;  %vm1433_vm10 = vcmp.eq.f32.partialorder %v5247_v0, %v5803_v29  ;;  %vm1434_vm8 = vcmp.eq.f32.partialorder %v9367_v41, %v9366_v1  ;;  %v6211_v31 = vcvt.s32.f32 %v1747_v45  ;;  %v9370_v53 = vld [vmem:[#allocation91_spill] sm:$0xff]  ;;  %v9377_v1 = vld [vmem:[#allocation94_spill] sm:$0xff] }
 0x118   : > { %v1072_v7 = vmul.f32 1.442695, %v956_v47  ;;  %v4631_v16 = vpop.eup %4630  ;;  %v6206_v11 = vpop.xlane.xlu0 %877  ;;  %v1230_v9 = vsel %vm713_vm1, %v4629_v22, 0.0  ;;  %v6219_v2 = vsel %vm713_vm1, %v6090_v60, 2147483647  ;;  %v6222_v33 = vcvt.s32.f32 %v1762_v19 }
 0x119   : > { %v6209_v24 = vpop.xlane.xlu1 %880  ;;  %9368 = vst [vmem:[#allocation38_spill] sm:$0xff] %v6211_v31  ;;  %4640 = vpow2.f32 %v1070_v20  ;;  %1228 = vadd.xlane.f32.xlu0 %v1227_v12  ;;  %v957_v42 = vsub.f32 %v9369_v26, %v6206_v11  ;;  %1231 = vadd.xlane.f32.xlu1 %v1230_v9  ;;  %9371 = vst [vmem:[#allocation86_spill] sm:$0xff] %v6219_v2  ;;  %v1233_v22 = vsel %vm713_vm1, %v4631_v16, 0.0  ;;  %v6226_v45 = vsel %vm713_vm1, %v6096_v4, 2147483647 }
 0x11a   : > { %v958_v47 = vsub.f32 %v9370_v53, %v6209_v24  ;;  %4642 = vpow2.f32 %v1072_v7  ;;  %9372 = vst [vmem:[#allocation87_spill] sm:$0xff] %v6222_v33  ;;  %9373 = vst [vmem:[#allocation111_spill] sm:$0xff] %v6226_v45  ;;  %v6232_v20 = vsel %vm1433_vm10, %v5814_v34, 10  ;;  %v6238_v60 = vsel %vm1434_vm8, %v5814_v34, 10 }
 0x11b   : > { %v4633_v12 = vpop.eup %4632  ;;  %v1074_v7 = vmul.f32 1.442695, %v957_v42  ;;  %vm1435_vm7 = vcmp.eq.f32.partialorder %v5271_v48, %v5816_v10  ;;  %v1777_v0 = vshra.s32 %v6219_v2, 16  ;;  %v6250_v29 = vsel %vm713_vm1, %v6127_v57, 2147483647  ;;  %v9378_v42 = vld [vmem:[#allocation95_spill] sm:$0xff] }
 0x11c   : > { %v1076_v19 = vmul.f32 1.442695, %v958_v47  ;;  %v4635_v16 = vpop.eup %4634  ;;  %v6242_v4 = vpop.xlane.xlu0 %883  ;;  %v1236_v9 = vsel %vm713_vm1, %v4633_v12, 0.0  ;;  %9376 = vst [vmem:[#allocation91_spill] sm:$0xff] %v6250_v29  ;;  %v6258_v12 = vsel %vm713_vm1, %v6133_v27, 2147483647  ;;  %vm1436_vm9 = vcmp.eq.f32.partialorder %v5275_v49, %v5819_v5 }
 0x11d   : > { %9374 = vst [vmem:[#allocation41_spill] sm:$0xff] %v6242_v4  ;;  %v6245_v33 = vpop.xlane.xlu1 %886  ;;  %4644 = vpow2.f32 %v1074_v7  ;;  %1234 = vadd.xlane.f32.xlu0 %v1233_v22  ;;  %v959_v41 = vsub.f32 %v9377_v1, %v6242_v4  ;;  %1237 = vadd.xlane.f32.xlu1 %v1236_v9  ;;  %9379 = vst [vmem:[#allocation134_spill] sm:$0xff] %v6258_v12  ;;  %v1239_v57 = vsel %vm713_vm1, %v4635_v16, 0.0  ;;  %v1792_v7 = vshra.s32 %v6226_v45, 16 }
 0x11e   : > { %9375 = vst [vmem:[#allocation90_spill] sm:$0xff] %v6245_v33  ;;  %v960_v47 = vsub.f32 %v9378_v42, %v6245_v33  ;;  %4646 = vpow2.f32 %v1076_v19  ;;  %v6268_v9 = vsel %vm1435_vm7, %v5814_v34, 10  ;;  %v1807_v27 = vshra.s32 %v6250_v29, 16  ;;  %v9381_v29 = vld [vmem:[#allocation99_spill] sm:$0xff] }
 0x11f   : > { %v4637_v22 = vpop.eup %4636  ;;  %v1078_v31 = vmul.f32 1.442695, %v959_v41  ;;  %vm1437_vm10 = vcmp.eq.f32.partialorder %v5295_v28, %v5829_v30  ;;  %vm1438_vm8 = vcmp.eq.f32.partialorder %v5299_v35, %v5832_v39  ;;  %v1822_v48 = vshra.s32 %v6258_v12, 16  ;;  %v9380_v41 = vld [vmem:[#allocation98_spill] sm:$0xff]  ;;  %v9386_v35 = vld [vmem:[#allocation101_spill] sm:$0xff] }
 0x120   : > { %v1080_v2 = vmul.f32 1.442695, %v960_v47  ;;  %v4639_v42 = vpop.eup %4638  ;;  %v6275_v19 = vpop.xlane.xlu0 %889  ;;  %v1242_v16 = vsel %vm713_vm1, %v4637_v22, 0.0  ;;  %v6285_v10 = vsel %vm1436_vm9, %v5814_v34, 10  ;;  %v6292_v1 = vcvt.s32.f32 %v1777_v0 }
 0x121   : > { %v6278_v45 = vpop.xlane.xlu1 %892  ;;  %4648 = vpow2.f32 %v1078_v31  ;;  %1240 = vadd.xlane.f32.xlu0 %v1239_v57  ;;  %v961_v47 = vsub.f32 %v9380_v41, %v6275_v19  ;;  %1243 = vadd.xlane.f32.xlu1 %v1242_v16  ;;  %v1245_v22 = vsel %vm713_vm1, %v4639_v42, 0.0  ;;  %v6294_v12 = vcvt.s32.f32 %v1792_v7 }
 0x122   : > { %v962_v33 = vsub.f32 %v9381_v29, %v6278_v45  ;;  %4650 = vpow2.f32 %v1080_v2  ;;  %9382 = vst [vmem:[#allocation98_spill] sm:$0xff] %v6292_v1  ;;  %v6300_v49 = vsel %vm1437_vm10, %v5814_v34, 10  ;;  %v6306_v5 = vsel %vm1438_vm8, %v5814_v34, 10 }
 0x123   : > { %9383 = vst [vmem:[#allocation99_spill] sm:$0xff] %v6294_v12  ;;  %v4641_v4 = vpop.eup %4640  ;;  %v1082_v2 = vmul.f32 1.442695, %v961_v47  ;;  %vm1439_vm7 = vcmp.eq.f32.partialorder %v5319_v62, %v5845_v15  ;;  %v6315_v28 = vcvt.s32.f32 %v1807_v27  ;;  %v6317_v30 = vcvt.s32.f32 %v1822_v48 }
 0x124   : > { %v1084_v31 = vmul.f32 1.442695, %v962_v33  ;;  %v4643_v42 = vpop.eup %4642  ;;  %v6310_v0 = vpop.xlane.xlu0 %895  ;;  %v1248_v57 = vsel %vm713_vm1, %v4641_v4, 0.0  ;;  %v9387_v33 = vld [vmem:[#allocation102_spill] sm:$0xff]  ;;  %v6325_v47 = vsel %vm713_vm1, %v6162_v23, 2147483647  ;;  %vm1441_vm10 = vcmp.eq.f32.partialorder %v5343_v40, %v5862_v63 }
 0x125   : > { %v6313_v7 = vpop.xlane.xlu1 %898  ;;  %9384 = vst [vmem:[#allocation135_spill] sm:$0xff] %v6315_v28  ;;  %9385 = vst [vmem:[#allocation136_spill] sm:$0xff] %v6317_v30  ;;  %4652 = vpow2.f32 %v1082_v2  ;;  %1246 = vadd.xlane.f32.xlu0 %v1245_v22  ;;  %v963_v39 = vsub.f32 %v9386_v35, %v6310_v0  ;;  %1249 = vadd.xlane.f32.xlu1 %v1248_v57  ;;  %v9388_v4 = vld [vmem:[#allocation48_spill] sm:$0xff]  ;;  %v1251_v27 = vsel %vm713_vm1, %v4643_v42, 0.0  ;;  %v6332_v48 = vsel %vm713_vm1, %v6168_v6, 2147483647 }
 0x126   : > { %v964_v16 = vsub.f32 %v9387_v33, %v6313_v7  ;;  %vm1440_vm9 = vcmp.eq.f32.partialorder %v9388_v4, %v5848_v38  ;;  %4654 = vpow2.f32 %v1084_v31  ;;  %v6338_v2 = vsel %vm1439_vm7, %v5814_v34, 10  ;;  %v9389_v31 = vld [vmem:[#allocation51_spill] sm:$0xff] }
 0x127   : > { %v4645_v22 = vpop.eup %4644  ;;  %v1086_v23 = vmul.f32 1.442695, %v963_v39  ;;  %vm1442_vm8 = vcmp.eq.f32.partialorder %v9389_v31, %v5865_v13  ;;  %v1837_v4 = vshra.s32 %v6325_v47, 16  ;;  %v6350_v62 = vsel %vm713_vm1, %v6194_v51, 2147483647  ;;  %v9390_v40 = vld [vmem:[#allocation103_spill] sm:$0xff] }
 0x128   : > { %v1088_v57 = vmul.f32 1.442695, %v964_v16  ;;  %v4647_v38 = vpop.eup %4646  ;;  %v6344_v42 = vpop.xlane.xlu0 %901  ;;  %v1254_v6 = vsel %vm713_vm1, %v4645_v22, 0.0  ;;  %v6353_v15 = vsel %vm1440_vm9, %v5814_v34, 10  ;;  %v1852_v39 = vshra.s32 %v6332_v48, 16  ;;  %v9393_v31 = vld [vmem:[#allocation58_spill] sm:$0xff] }
 0x129   : > { %4656 = vpow2.f32 %v1086_v23  ;;  %1252 = vadd.xlane.f32.xlu0 %v1251_v27  ;;  %v965_v63 = vsub.f32 %v9390_v40, %v6344_v42  ;;  %1255 = vadd.xlane.f32.xlu1 %v1254_v6  ;;  %v6359_v16 = vsel %vm1441_vm10, %v5814_v34, 10  ;;  %v1257_v22 = vsel %vm713_vm1, %v4647_v38, 0.0 }
 0x12a   : > { %4658 = vpow2.f32 %v1088_v57  ;;  %v6364_v51 = vsel %vm713_vm1, %v6200_v46, 2147483647  ;;  %v6370_v27 = vsel %vm1442_vm8, %v5814_v34, 10  ;;  %vm1443_vm7 = vcmp.eq.f32.partialorder %v5367_v59, %v5882_v36 }
 0x12b   : > { %v4649_v30 = vpop.eup %4648  ;;  %v1090_v23 = vmul.f32 1.442695, %v965_v63  ;;  %v1867_v6 = vshra.s32 %v6350_v62, 16  ;;  %vm1444_vm9 = vcmp.eq.f32.partialorder %v5371_v18, %v5885_v17  ;;  %v6378_v38 = vcvt.s32.f32 %v1837_v4 }
 0x12c   : > { %v4651_v57 = vpop.eup %4650  ;;  %v1260_v46 = vsel %vm713_vm1, %v4649_v30, 0.0  ;;  %v6382_v28 = vsel %vm713_vm1, %v6232_v20, 2147483647  ;;  %v6384_v13 = vcvt.s32.f32 %v1852_v39  ;;  %v1882_v59 = vshra.s32 %v6364_v51, 16  ;;  %v9395_v39 = vld [vmem:[#allocation122_spill] sm:$0xff] }
 0x12d   : > { %9391 = vst [vmem:[#allocation101_spill] sm:$0xff] %v6378_v38  ;;  %4660 = vpow2.f32 %v1090_v23  ;;  %1258 = vadd.xlane.f32.xlu0 %v1257_v22  ;;  %1261 = vadd.xlane.f32.xlu1 %v1260_v46  ;;  %v6389_v36 = vsel %vm713_vm1, %v6238_v60, 2147483647  ;;  %v6392_v18 = vsel %vm1443_vm7, %v5814_v34, 10  ;;  %vm1445_vm10 = vcmp.eq.f32.partialorder %v5391_v43, %v5912_v32  ;;  %v9396_v22 = vld [vmem:[#allocation59_spill] sm:$0xff] }
 0x12e   : > { %9392 = vst [vmem:[#allocation102_spill] sm:$0xff] %v6384_v13  ;;  %vm1446_vm8 = vcmp.eq.f32.partialorder %v5395_v52, %v5915_v61  ;;  %v1263_v17 = vsel %vm713_vm1, %v4651_v57, 0.0  ;;  %v6400_v30 = vsel %vm1444_vm9, %v5814_v34, 10  ;;  %vm1447_vm12 = vcmp.eq.f32.partialorder %v9393_v31, %v5946_v44  ;;  %v9407_v13 = vld [vmem:[#allocation71_spill] sm:$0xff] }
 0x12f   : > { %v4653_v20 = vpop.eup %4652  ;;  %v6404_v60 = vcvt.s32.f32 %v1867_v6  ;;  %v1897_v4 = vshra.s32 %v6382_v28, 16  ;;  %vm1448_vm7 = vcmp.eq.f32.partialorder %v9396_v22, %v9395_v39  ;;  %v1912_v52 = vshra.s32 %v6389_v36, 16  ;;  %v9400_v39 = vld [vmem:[#allocation62_spill] sm:$0xff]  ;;  %v9402_v22 = vld [vmem:[#allocation63_spill] sm:$0xff] }
 0x130   : > { %v4655_v63 = vpop.eup %4654  ;;  %v1266_v43 = vsel %vm713_vm1, %v4653_v20, 0.0  ;;  %v6413_v32 = vsel %vm713_vm1, %v6268_v9, 2147483647  ;;  %v6416_v61 = vsel %vm1445_vm10, %v5814_v34, 10  ;;  %v6419_v44 = vsel %vm1446_vm8, %v5814_v34, 10 }
 0x131   : > { %9394 = vst [vmem:[#allocation48_spill] sm:$0xff] %v6404_v60  ;;  %1264 = vadd.xlane.f32.xlu0 %v1263_v17  ;;  %1267 = vadd.xlane.f32.xlu1 %v1266_v43  ;;  %v6421_v23 = vcvt.s32.f32 %v1882_v59  ;;  %v6425_v6 = vsel %vm713_vm1, %v6285_v10, 2147483647  ;;  %v6428_v57 = vsel %vm1447_vm12, %v5814_v34, 10  ;;  %vm1449_vm9 = vcmp.eq.f32.partialorder %v9313_v55, %v5976_v25  ;;  %v9403_v43 = vld [vmem:[#allocation67_spill] sm:$0xff]  ;;  %v9406_v60 = vld [vmem:[#allocation25_spill] sm:$0xff] }
 0x132   : > { %vm1450_vm10 = vcmp.eq.f32.partialorder %v9314_v21, %v5979_v54  ;;  %v1269_v9 = vsel %vm713_vm1, %v4655_v63, 0.0  ;;  %v6436_v17 = vsel %vm1448_vm7, %v5814_v34, 10  ;;  %v6438_v59 = vcvt.s32.f32 %v1897_v4 }
 0x133   : > { %9397 = vst [vmem:[#allocation51_spill] sm:$0xff] %v6421_v23  ;;  %v4657_v46 = vpop.eup %4656  ;;  %v1927_v10 = vshra.s32 %v6413_v32, 16  ;;  %v6443_v20 = vsel %vm713_vm1, %v6300_v49, 2147483647  ;;  %v6446_v55 = vcvt.s32.f32 %v1912_v52  ;;  %v1942_v54 = vshra.s32 %v6425_v6, 16  ;;  %v9401_v49 = vld [vmem:[#allocation66_spill] sm:$0xff] }
 0x134   : > { %9398 = vst [vmem:[#allocation103_spill] sm:$0xff] %v6438_v59  ;;  %v4659_v31 = vpop.eup %4658  ;;  %v1272_v25 = vsel %vm713_vm1, %v4657_v46, 0.0  ;;  %v6451_v21 = vsel %vm713_vm1, %v6306_v5, 2147483647  ;;  %v6454_v4 = vsel %vm1449_vm9, %v5814_v34, 10  ;;  %v6457_v63 = vsel %vm1450_vm10, %v5814_v34, 10 }
 0x135   : > { %9399 = vst [vmem:[#allocation58_spill] sm:$0xff] %v6446_v55  ;;  %vm1451_vm12 = vcmp.eq.f32.partialorder %v9401_v49, %v9400_v39  ;;  %vm1452_vm8 = vcmp.eq.f32.partialorder %v9403_v43, %v9402_v22  ;;  %1270 = vadd.xlane.f32.xlu0 %v1269_v9  ;;  %1273 = vadd.xlane.f32.xlu1 %v1272_v25  ;;  %v9404_v52 = vld [vmem:[#allocation106_spill] sm:$0xff]  ;;  %v1275_v5 = vsel %vm713_vm1, %v4659_v31, 0.0  ;;  %v1957_v55 = vshra.s32 %v6443_v20, 16 }
 0x136   : > { %v9405_v46 = vld [vmem:[#allocation70_spill] sm:$0xff]  ;;  %v6469_v59 = vsel %vm713_vm1, %v6338_v2, 2147483647  ;;  %vm1454_vm9 = vcmp.eq.f32.partialorder %v9407_v13, %v9406_v60  ;;  %v6473_v39 = vcvt.s32.f32 %v1927_v10  ;;  %v1972_v9 = vshra.s32 %v6451_v21, 16 }
 0x137   : > { %vm1453_vm7 = vcmp.eq.f32.partialorder %v9405_v46, %v9404_v52  ;;  %v4661_v23 = vpop.eup %4660  ;;  %v6478_v25 = vsel %vm713_vm1, %v6353_v15, 2147483647  ;;  %v6481_v31 = vsel %vm1451_vm12, %v5814_v34, 10  ;;  %vm1455_vm10 = vcmp.eq.f32.partialorder %v9337_v14, %v6070_v56  ;;  %v9410_v15 = vld [vmem:[#allocation75_spill] sm:$0xff]  ;;  %v9412_v43 = vld [vmem:[#allocation74_spill] sm:$0xff]  ;;  %v9414_v52 = vld [vmem:[#allocation108_spill] sm:$0xff] }
 0x138   : > { %9408 = vst [vmem:[#allocation122_spill] sm:$0xff] %v6473_v39  ;;  %v1278_v2 = vsel %vm713_vm1, %v4661_v23, 0.0  ;;  %v6486_v49 = vcvt.s32.f32 %v1942_v54  ;;  %v6492_v13 = vsel %vm1452_vm8, %v5814_v34, 10  ;;  %v6495_v60 = vsel %vm1453_vm7, %v5814_v34, 10  ;;  %v9415_v46 = vld [vmem:[#allocation79_spill] sm:$0xff]  ;;  %v9421_v39 = vld [vmem:[#allocation114_spill] sm:$0xff] }
 0x139   : > { %vm1456_vm12 = vcmp.eq.f32.partialorder %v9410_v15, %v6073_v8  ;;  %1276 = vadd.xlane.f32.xlu0 %v1275_v5  ;;  %1279 = vadd.xlane.f32.xlu1 %v1278_v2  ;;  %v1987_v56 = vshra.s32 %v6469_v59, 16  ;;  %v6501_v14 = vsel %vm1454_vm9, %v5814_v34, 10  ;;  %v6503_v23 = vcvt.s32.f32 %v1957_v55  ;;  %v9413_v8 = vld [vmem:[#allocation78_spill] sm:$0xff]  ;;  %v9417_v2 = vld [vmem:[#allocation109_spill] sm:$0xff] }
 0x13a   : > { %9409 = vst [vmem:[#allocation59_spill] sm:$0xff] %v6486_v49  ;;  %v2002_v10 = vshra.s32 %v6478_v25, 16  ;;  %v6508_v54 = vsel %vm713_vm1, %v6359_v16, 2147483647  ;;  %v6511_v22 = vsel %vm1455_vm10, %v5814_v34, 10  ;;  %vm1457_vm8 = vcmp.eq.f32.partialorder %v9413_v8, %v9412_v43  ;;  %v9418_v15 = vld [vmem:[#allocation82_spill] sm:$0xff] }
 0x13b   : > { %9411 = vst [vmem:[#allocation62_spill] sm:$0xff] %v6503_v23  ;;  %vm1458_vm7 = vcmp.eq.f32.partialorder %v9415_v46, %v9414_v52  ;;  %v6517_v5 = vcvt.s32.f32 %v1972_v9  ;;  %v6520_v55 = vsel %vm1456_vm12, %v5814_v34, 10  ;;  %vm1459_vm9 = vcmp.eq.f32.partialorder %v9418_v15, %v9417_v2  ;;  %v9419_v23 = vld [vmem:[#allocation34_spill] sm:$0xff]  ;;  %v9420_v16 = vld [vmem:[#allocation83_spill] sm:$0xff] }
 0x13c   : > { %vm1460_vm14 = vcmp.eq.f32.partialorder %v9420_v16, %v9419_v23  ;;  %v6528_v49 = vsel %vm713_vm1, %v6370_v27, 2147483647  ;;  %v6531_v43 = vcvt.s32.f32 %v1987_v56  ;;  %v2017_v9 = vshra.s32 %v6508_v54, 16  ;;  %v9424_v16 = vld [vmem:[#allocation117_spill] sm:$0xff] }
 0x13d   : > { %9416 = vst [vmem:[#allocation66_spill] sm:$0xff] %v6517_v5  ;;  %1540 = vmin.xlane.f32.xlu0 %v9421_v39  ;;  %v6536_v8 = vsel %vm713_vm1, %v6392_v18, 2147483647  ;;  %v6540_v52 = vsel %vm713_vm1, %v6400_v30, 2147483647  ;;  %v6543_v23 = vsel %vm1457_vm8, %v5814_v34, 10  ;;  %v6548_v46 = vcvt.s32.f32 %v2002_v10 }
 0x13e   : > { %9422 = vst [vmem:[#allocation63_spill] sm:$0xff] %v6531_v43  ;;  %v6546_v27 = vsel %vm1458_vm7, %v5814_v34, 10  ;;  %v6552_v56 = vsel %vm713_vm1, %v6416_v61, 2147483647  ;;  %v6555_v2 = vsel %vm1459_vm9, %v5814_v34, 10  ;;  %v6558_v18 = vsel %vm1460_vm14, %v5814_v34, 10 }
 0x13f   : > { %9423 = vst [vmem:[#allocation67_spill] sm:$0xff] %v6548_v46  ;;  %v2032_v30 = vshra.s32 %v6528_v49, 16  ;;  %v6563_v15 = vsel %vm713_vm1, %v6419_v44, 2147483647  ;;  %vm1461_vm10 = vcmp.eq.f32.partialorder %v9362_v58, %v6174_v3  ;;  %vm1462_vm12 = vcmp.eq.f32.partialorder %v9363_v37, %v6177_v50  ;;  %v9426_v3 = vld [vmem:[#allocation41_spill] sm:$0xff]  ;;  %v9427_v58 = vld [vmem:[#allocation94_spill] sm:$0xff] }
 0x140   : > { %v2047_v61 = vshra.s32 %v6536_v8, 16  ;;  %v2062_v10 = vshra.s32 %v6540_v52, 16  ;;  %vm1463_vm14 = vcmp.eq.f32.partialorder %v9369_v26, %v6206_v11  ;;  %vm1464_vm8 = vcmp.eq.f32.partialorder %v9370_v53, %v6209_v24  ;;  %v9428_v37 = vld [vmem:[#allocation113_spill] sm:$0xff] }
 0x141   : > { %1555 = vmin.xlane.f32.xlu0 %v9424_v16  ;;  %v6576_v44 = vcvt.s32.f32 %v2017_v9  ;;  %v2077_v39 = vshra.s32 %v6552_v56, 16  ;;  %vm1465_vm7 = vcmp.eq.f32.partialorder %v9427_v58, %v9426_v3  ;;  %v2092_v50 = vshra.s32 %v6563_v15, 16  ;;  %v9429_v9 = vld [vmem:[#allocation90_spill] sm:$0xff] }
 0x142   : > { %v1551_v46 = vand.u32 65535, %v9428_v37  ;;  %v6585_v43 = vsel %vm713_vm1, %v6428_v57, 2147483647  ;;  %v6588_v5 = vsel %vm1461_vm10, %v5814_v34, 10  ;;  %v6591_v16 = vsel %vm1462_vm12, %v5814_v34, 10 }
 0x143   : > { %9425 = vst [vmem:[#allocation106_spill] sm:$0xff] %v6576_v44  ;;  %v9430_v44 = vld [vmem:[#allocation95_spill] sm:$0xff]  ;;  %v6595_v38 = vcvt.s32.f32 %v2032_v30  ;;  %vm1467_vm15 = vcmp.eq.f32.partialorder %v9380_v41, %v6275_v19  ;;  %vm1468_vm13 = vcmp.eq.f32.partialorder %v9381_v29, %v6278_v45  ;;  %v6601_v3 = vcvt.s32.f32 %v2047_v61  ;;  %v9434_v45 = vld [vmem:[#allocation118_spill] sm:$0xff] }
 0x144   : > { %vm1466_vm9 = vcmp.eq.f32.partialorder %v9430_v44, %v9429_v9  ;;  %v6603_v57 = vcvt.s32.f32 %v2062_v10  ;;  %v6609_v58 = vsel %vm1463_vm14, %v5814_v34, 10  ;;  %v6615_v30 = vsel %vm1464_vm8, %v5814_v34, 10 }
 0x145   : > { %9431 = vst [vmem:[#allocation70_spill] sm:$0xff] %v6595_v38  ;;  %9432 = vst [vmem:[#allocation25_spill] sm:$0xff] %v6601_v3  ;;  %v6618_v19 = vsel %vm1465_vm7, %v5814_v34, 10  ;;  %1570 = vmin.xlane.f32.xlu0 %v9434_v45  ;;  %v2107_v29 = vshra.s32 %v6585_v43, 16  ;;  %v6623_v41 = vsel %vm1466_vm9, %v5814_v34, 10  ;;  %v6625_v61 = vcvt.s32.f32 %v2077_v39  ;;  %v9438_v39 = vld [vmem:[#allocation115_spill] sm:$0xff] }
 0x146   : > { %9433 = vst [vmem:[#allocation71_spill] sm:$0xff] %v6603_v57  ;;  %v6627_v11 = vcvt.s32.f32 %v2092_v50  ;;  %v6629_v26 = vcvt.s32.f32 %v1551_v46  ;;  %v6632_v24 = vsel %vm1467_vm15, %v5814_v34, 10  ;;  %v6635_v53 = vsel %vm1468_vm13, %v5814_v34, 10 }
 0x147   : > { %9435 = vst [vmem:[#allocation75_spill] sm:$0xff] %v6625_v61  ;;  %v6639_v10 = vsel %vm713_vm1, %v6436_v17, 2147483647  ;;  %v6643_v44 = vsel %vm713_vm1, %v6454_v4, 2147483647  ;;  %vm1469_vm10 = vcmp.eq.f32.partialorder %v9386_v35, %v6310_v0  ;;  %vm1470_vm12 = vcmp.eq.f32.partialorder %v9387_v33, %v6313_v7  ;;  %v9439_v17 = vld [vmem:[#allocation121_spill] sm:$0xff] }
 0x148   : > { %9436 = vst [vmem:[#allocation74_spill] sm:$0xff] %v6627_v11  ;;  %9437 = vst [vmem:[#allocation78_spill] sm:$0xff] %v6629_v26  ;;  %v1581_v46 = vand.u32 65535, %v9438_v39  ;;  %v6652_v50 = vsel %vm713_vm1, %v6457_v63, 2147483647  ;;  %vm1471_vm13 = vcmp.eq.f32.partialorder %v9390_v40, %v6344_v42  ;;  %v6657_v37 = vcvt.s32.f32 %v2107_v29  ;;  %v9441_v4 = vld [vmem:[#allocation112_spill] sm:$0xff] }
 0x149   : > { %1585 = vmin.xlane.f32.xlu0 %v9439_v17  ;;  %v9442_v9 = vand.u32 65535, %v9441_v4  ;;  %v6665_v0 = vsel %vm713_vm1, %v6481_v31, 2147483647  ;;  %v2122_v35 = vshra.s32 %v6639_v10, 16  ;;  %v2137_v33 = vshra.s32 %v6643_v44, 16  ;;  %v9445_v63 = vld [vmem:[#allocation119_spill] sm:$0xff] }
 0x14a   : > { %9440 = vst [vmem:[#allocation108_spill] sm:$0xff] %v6657_v37  ;;  %9444 = vst [vmem:[#allocation109_spill] sm:$0xff] %v6665_v0  ;;  %v1094_v7 = vpop.xlane.xlu1 %1093  ;;  %v1596_v39 = vand.u32 65535, %v9445_v63  ;;  %v9446_v42 = vld [vmem:[#allocation120_spill] sm:$0xff]  ;;  %v6672_v29 = vsel %vm1469_vm10, %v5814_v34, 10  ;;  %v6675_v4 = vsel %vm1470_vm12, %v5814_v34, 10  ;;  %v6681_v17 = vcvt.s32.f32 %v1581_v46 }
 0x14b   : > { %v6661_v45 = vcvt.s32.f32 %v9442_v9  ;;  %v1611_v40 = vand.u32 65535, %v9446_v42  ;;  %4662 = vrcp.f32 %v1094_v7  ;;  %v2152_v9 = vshra.s32 %v6652_v50, 16  ;;  %v9448_v42 = vld [vmem:[#allocation104_spill] sm:$0xff] }
 0x14c   : > { %v6679_v31 = vsel %vm1471_vm13, %v5814_v34, 10  ;;  %9447 = vst [vmem:[#allocation82_spill] sm:$0xff] %v6681_v17  ;;  %v2167_v37 = vshra.s32 %v6665_v0, 16  ;;  %v6686_v63 = vsel %vm713_vm1, %v6492_v13, 2147483647  ;;  %v9450_v26 = vld [vmem:[#allocation124_spill] sm:$0xff]  ;;  %v6699_v3 = vcvt.s32.f32 %v2122_v35 }
 0x14d   : > { %9443 = vst [vmem:[#allocation79_spill] sm:$0xff] %v6661_v45  ;;  %1600 = vmin.xlane.f32.xlu0 %v9448_v42  ;;  %v9449_v45 = vld [vmem:[#allocation123_spill] sm:$0xff]  ;;  %v1641_v61 = vand.u32 65535, %v9450_v26  ;;  %v6693_v7 = vsel %vm713_vm1, %v6495_v60, 2147483647  ;;  %v6701_v13 = vcvt.s32.f32 %v2137_v33  ;;  %v6703_v38 = vcvt.s32.f32 %v1596_v39  ;;  %v9457_v60 = vld [vmem:[#allocation22_spill] sm:$0xff] }
 0x14e   : > { %v1626_v11 = vand.u32 65535, %v9449_v45  ;;  %v6697_v46 = vsel %vm713_vm1, %v6501_v14, 2147483647  ;;  %v1100_v17 = vpop.xlane.xlu1 %1099  ;;  %v1097_v57 = vpop.xlane.xlu0 %1096  ;;  %9452 = vst [vmem:[#allocation83_spill] sm:$0xff] %v6699_v3  ;;  %v6705_v42 = vcvt.s32.f32 %v1611_v40  ;;  %v6707_v45 = vcvt.s32.f32 %v2152_v9  ;;  %v9460_v40 = vld [vmem:[#allocation19_spill] sm:$0xff] }
 0x14f   : > { %9451 = vst [vmem:[#allocation34_spill] sm:$0xff] %v6697_v46  ;;  %9453 = vst [vmem:[#allocation41_spill] sm:$0xff] %v6701_v13  ;;  %v2182_v26 = vshra.s32 %v6686_v63, 16  ;;  %v1656_v0 = vand.u32 65535, %v9457_v60  ;;  %v6713_v14 = vsel %vm713_vm1, %v6511_v22, 2147483647  ;;  %4664 = vrcp.f32 %v1097_v57 }
 0x150   : > { %9454 = vst [vmem:[#allocation94_spill] sm:$0xff] %v6703_v38  ;;  %9455 = vst [vmem:[#allocation113_spill] sm:$0xff] %v6705_v42  ;;  %v2197_v35 = vshra.s32 %v6693_v7, 16  ;;  %v2212_v33 = vshra.s32 %v6697_v46, 16  ;;  %v6719_v39 = vsel %vm713_vm1, %v6520_v55, 2147483647  ;;  %4666 = vrcp.f32 %v1100_v17 }
 0x151   : > { %9456 = vst [vmem:[#allocation90_spill] sm:$0xff] %v6707_v45  ;;  %9458 = vst [vmem:[#allocation95_spill] sm:$0xff] %v6713_v14  ;;  %1615 = vmin.xlane.f32.xlu0 %v9460_v40  ;;  %v6722_v9 = vcvt.s32.f32 %v2167_v37  ;;  %v6724_v45 = vcvt.s32.f32 %v1626_v11  ;;  %v6726_v60 = vcvt.s32.f32 %v1641_v61  ;;  %v9464_v57 = vld [vmem:[#allocation126_spill] sm:$0xff]  ;;  %v2227_v38 = vshra.s32 %v6713_v14, 16  ;;  %v9467_v17 = vld [vmem:[#allocation127_spill] sm:$0xff] }
 0x152   : > { %9459 = vst [vmem:[#allocation115_spill] sm:$0xff] %v6719_v39  ;;  %v1103_v22 = vpop.xlane.xlu0 %1102  ;;  %v1106_v42 = vpop.xlane.xlu1 %1105  ;;  %v1671_v13 = vand.u32 65535, %v9464_v57  ;;  %v6732_v3 = vsel %vm713_vm1, %v6543_v23, 2147483647  ;;  %v6736_v55 = vsel %vm713_vm1, %v6546_v27, 2147483647  ;;  %v6743_v57 = vcvt.s32.f32 %v2197_v35 }
 0x153   : > { %9461 = vst [vmem:[#allocation112_spill] sm:$0xff] %v6722_v9  ;;  %9462 = vst [vmem:[#allocation119_spill] sm:$0xff] %v6724_v45  ;;  %4668 = vrcp.f32 %v1103_v22  ;;  %v1686_v11 = vand.u32 65535, %v9467_v17  ;;  %v2242_v61 = vshra.s32 %v6719_v39, 16  ;;  %v9468_v37 = vld [vmem:[#allocation128_spill] sm:$0xff]  ;;  %v6741_v9 = vcvt.s32.f32 %v2182_v26  ;;  %v9473_v14 = vld [vmem:[#allocation105_spill] sm:$0xff] }
 0x154   : > { %9463 = vst [vmem:[#allocation120_spill] sm:$0xff] %v6726_v60  ;;  %9465 = vst [vmem:[#allocation123_spill] sm:$0xff] %v6732_v3  ;;  %v1701_v60 = vand.u32 65535, %v9468_v37  ;;  %v6745_v45 = vcvt.s32.f32 %v1656_v0  ;;  %v6747_v40 = vcvt.s32.f32 %v2212_v33  ;;  %v2257_v27 = vshra.s32 %v6732_v3, 16  ;;  %v9474_v22 = vld [vmem:[#allocation129_spill] sm:$0xff] }
 0x155   : > { %9466 = vst [vmem:[#allocation124_spill] sm:$0xff] %v6736_v55  ;;  %9469 = vst [vmem:[#allocation22_spill] sm:$0xff] %v6741_v9  ;;  %v6749_v23 = vpop.eup %4662  ;;  %1630 = vmin.xlane.f32.xlu0 %v9473_v14  ;;  %v1716_v17 = vand.u32 65535, %v9474_v22  ;;  %v2272_v39 = vshra.s32 %v6736_v55, 16  ;;  %v6757_v26 = vsel %vm713_vm1, %v6555_v2, 2147483647  ;;  %v6762_v33 = vcvt.s32.f32 %v1671_v13 }
 0x156   : > { %9470 = vst [vmem:[#allocation126_spill] sm:$0xff] %v6743_v57  ;;  %9471 = vst [vmem:[#allocation127_spill] sm:$0xff] %v6745_v45  ;;  %v2669_v35 = vmul.f32 15.0, %v6749_v23  ;;  %v1109_v0 = vpop.xlane.xlu0 %1108  ;;  %v6760_v37 = vpop.xlane.xlu1 %1111  ;;  %v6767_v45 = vsel %vm713_vm1, %v6558_v18, 2147483647  ;;  %v6769_v22 = vcvt.s32.f32 %v2227_v38  ;;  %v6771_v55 = vcvt.s32.f32 %v1686_v11  ;;  %v9483_v13 = vld [vmem:[#allocation132_spill] sm:$0xff] }
 0x157   : > { %9472 = vst [vmem:[#allocation128_spill] sm:$0xff] %v6747_v40  ;;  %9475 = vst [vmem:[#allocation129_spill] sm:$0xff] %v6757_v26  ;;  %v9477_v40 = vld [vmem:[#allocation131_spill] sm:$0xff]  ;;  %v6773_v9 = vcvt.s32.f32 %v2242_v61  ;;  %v6775_v2 = vcvt.s32.f32 %v1701_v60  ;;  %4670 = vrcp.f32 %v1106_v42  ;;  %v2287_v3 = vshra.s32 %v6757_v26, 16  ;;  %v9484_v46 = vld [vmem:[#allocation125_spill] sm:$0xff] }
 0x158   : > { %9476 = vst [vmem:[#allocation137_spill] sm:$0xff] %v6762_v33  ;;  %v1731_v57 = vand.u32 65535, %v9477_v40  ;;  %9478 = vst [vmem:[#allocation131_spill] sm:$0xff] %v6767_v45  ;;  %v2732_v14 = vceil.f32 %v2669_v35  ;;  %v1746_v33 = vand.u32 65535, %v9483_v13  ;;  %v6780_v40 = vcvt.s32.f32 %v2257_v27  ;;  %v9490_v13 = vld [vmem:[#allocation133_spill] sm:$0xff] }
 0x159   : > { %9479 = vst [vmem:[#allocation138_spill] sm:$0xff] %v6769_v22  ;;  %9480 = vst [vmem:[#allocation139_spill] sm:$0xff] %v6771_v55  ;;  %1645 = vmin.xlane.f32.xlu0 %v9484_v46  ;;  %v6782_v18 = vcvt.s32.f32 %v1716_v17  ;;  %v6784_v38 = vcvt.s32.f32 %v2272_v39  ;;  %v2302_v11 = vshra.s32 %v6767_v45, 16  ;;  %v6787_v61 = vpop.eup %4664  ;;  %v1761_v26 = vand.u32 65535, %v9490_v13  ;;  %v9492_v45 = vld [vmem:[#allocation86_spill] sm:$0xff]  ;;  %v9496_v13 = vld [vmem:[#allocation111_spill] sm:$0xff] }
 0x15a   : > { %9481 = vst [vmem:[#allocation140_spill] sm:$0xff] %v6773_v9  ;;  %9482 = vst [vmem:[#allocation141_spill] sm:$0xff] %v6775_v2  ;;  %v4362_v60 = vtrunc.f32 %v2732_v14  ;;  %v6789_v9 = vpop.xlane.xlu0 %1114  ;;  %v6791_v42 = vpop.xlane.xlu1 %1117  ;;  %v6793_v35 = vcvt.s32.f32 %v1731_v57  ;;  %v6798_v27 = vsel %vm713_vm1, %v6588_v5, 2147483647  ;;  %v2670_v39 = vmul.f32 15.0, %v6787_v61  ;;  %v9497_v22 = vld [vmem:[#allocation107_spill] sm:$0xff] }
 0x15b   : > { %9485 = vst [vmem:[#allocation132_spill] sm:$0xff] %v6780_v40  ;;  %9486 = vst [vmem:[#allocation142_spill] sm:$0xff] %v6782_v18  ;;  %v6800_v17 = vpop.eup %4666  ;;  %4672 = vrcp.f32 %v1109_v0  ;;  %v6806_v14 = vsel %vm713_vm1, %v6591_v16, 2147483647  ;;  %v6808_v57 = vcvt.s32.f32 %v2287_v3  ;;  %v1791_v18 = vand.u32 65535, %v9496_v13  ;;  %v9501_v13 = vld [vmem:[#allocation91_spill] sm:$0xff] }
 0x15c   : > { %9487 = vst [vmem:[#allocation143_spill] sm:$0xff] %v6784_v38  ;;  %9488 = vst [vmem:[#allocation144_spill] sm:$0xff] %v6791_v42  ;;  %v1776_v38 = vand.u32 65535, %v9492_v45  ;;  %v4363_v40 = vcvt.f32.s32 %v4362_v60  ;;  %v2733_v2 = vceil.f32 %v2670_v39  ;;  %v6816_v55 = vcvt.s32.f32 %v2302_v11  ;;  %v9506_v46 = vld [vmem:[#allocation28_spill] sm:$0xff] }
 0x15d   : > { %9489 = vst [vmem:[#allocation145_spill] sm:$0xff] %v6793_v35  ;;  %9491 = vst [vmem:[#allocation133_spill] sm:$0xff] %v6798_v27  ;;  %v6810_v35 = vcvt.s32.f32 %v1746_v33  ;;  %v6813_v5 = vpop.eup %4668  ;;  %1660 = vmin.xlane.f32.xlu0 %v9497_v22  ;;  %v2317_v45 = vshra.s32 %v6798_v27, 16  ;;  %v6821_v16 = vsel %vm713_vm1, %v6609_v58, 2147483647  ;;  %v2332_v60 = vshra.s32 %v6806_v14, 16 }
 0x15e   : > { %9493 = vst [vmem:[#allocation86_spill] sm:$0xff] %v6806_v14  ;;  %9494 = vst [vmem:[#allocation146_spill] sm:$0xff] %v6808_v57  ;;  %v4232_v0 = vadd.s32 4294967295, %v4363_v40  ;;  %v6823_v3 = vpop.xlane.xlu0 %1120  ;;  %v6825_v33 = vpop.xlane.xlu1 %1123  ;;  %v1806_v57 = vand.u32 65535, %v9501_v13  ;;  %v2671_v39 = vmul.f32 15.0, %v6800_v17  ;;  %v6830_v11 = vcvt.s32.f32 %v1761_v26 }
 0x15f   : > { %9495 = vst [vmem:[#allocation147_spill] sm:$0xff] %v6810_v35  ;;  %9498 = vst [vmem:[#allocation111_spill] sm:$0xff] %v6816_v55  ;;  %v4364_v35 = vtrunc.f32 %v2733_v2  ;;  %v6832_v55 = vcvt.s32.f32 %v1776_v38  ;;  %v2672_v27 = vmul.f32 15.0, %v6813_v5  ;;  %v6835_v58 = vcvt.s32.f32 %v1791_v18 }
 0x160   : > { %9499 = vst [vmem:[#allocation148_spill] sm:$0xff] %v6821_v16  ;;  %9500 = vst [vmem:[#allocation149_spill] sm:$0xff] %v6823_v3  ;;  %vm2921_vm15 = vcmp.gt.s32.totalorder %v4232_v0, 0  ;;  %v2347_v40 = vshra.s32 %v6821_v16, 16  ;;  %v6840_v22 = vsel %vm713_vm1, %v6615_v30, 2147483647  ;;  %v2734_v2 = vceil.f32 %v2671_v39 }
 0x161   : > { %9502 = vst [vmem:[#allocation91_spill] sm:$0xff] %v6830_v11  ;;  %9503 = vst [vmem:[#allocation150_spill] sm:$0xff] %v6832_v55  ;;  %v2922_v14 = vsel %vm2921_vm15, %v4232_v0, 0  ;;  %v4365_v13 = vcvt.f32.s32 %v4364_v35  ;;  %1675 = vmin.xlane.f32.xlu0 %v9506_v46  ;;  %v2735_v26 = vceil.f32 %v2672_v27  ;;  %v6843_v11 = vpop.eup %4670  ;;  %v6847_v18 = vcvt.s32.f32 %v2317_v45  ;;  %v9513_v46 = vld [vmem:[#allocation134_spill] sm:$0xff] }
 0x162   : > { %9504 = vst [vmem:[#allocation151_spill] sm:$0xff] %v6835_v58  ;;  %9505 = vst [vmem:[#allocation152_spill] sm:$0xff] %v6840_v22  ;;  %vm3047_vm14 = vcmp.lt.s32.totalorder %v2922_v14, 14  ;;  %v6845_v38 = vpop.xlane.xlu0 %1126  ;;  %v1130_v55 = vpop.xlane.xlu1 %1129  ;;  %v6849_v58 = vcvt.s32.f32 %v2332_v60  ;;  %v6851_v16 = vcvt.s32.f32 %v1806_v57  ;;  %v6855_v35 = vsel %vm713_vm1, %v6618_v19, 2147483647 }
 0x163   : > { %9507 = vst [vmem:[#allocation153_spill] sm:$0xff] %v6845_v38  ;;  %9508 = vst [vmem:[#allocation154_spill] sm:$0xff] %v6847_v18  ;;  %v3048_v30 = vsel %vm3047_vm14, %v2922_v14, 14  ;;  %v4233_v3 = vadd.s32 4294967295, %v4365_v13  ;;  %v4366_v0 = vtrunc.f32 %v2734_v2  ;;  %v6857_v27 = vcvt.s32.f32 %v2347_v40  ;;  %v9515_v14 = vld [vmem:[#allocation31_spill] sm:$0xff] }
 0x164   : > { %9509 = vst [vmem:[#allocation155_spill] sm:$0xff] %v6849_v58  ;;  %9510 = vst [vmem:[#allocation156_spill] sm:$0xff] %v6851_v16  ;;  %v2362_v39 = vshra.s32 %v6840_v22, 16  ;;  %v1821_v38 = vand.u32 65535, %v9513_v46  ;;  %v4368_v42 = vtrunc.f32 %v2735_v26  ;;  %v3173_v57 = vsel %vm461_vm0, %v3048_v30, 15 }
 0x165   : > { %9511 = vst [vmem:[#allocation157_spill] sm:$0xff] %v6855_v35  ;;  %9512 = vst [vmem:[#allocation158_spill] sm:$0xff] %v6857_v27  ;;  %v6861_v45 = vpop.eup %4672  ;;  %vm2923_vm8 = vcmp.gt.s32.totalorder %v4233_v3, 0  ;;  %1690 = vmin.xlane.f32.xlu0 %v9515_v14  ;;  %v4367_v13 = vcvt.f32.s32 %v4366_v0  ;;  %v2673_v19 = vmul.f32 15.0, %v6843_v11  ;;  %v2377_v40 = vshra.s32 %v6855_v35, 16  ;;  %v9518_v35 = vld [vmem:[#allocation130_spill] sm:$0xff] }
 0x166   : > { %v2924_v16 = vsel %vm2923_vm8, %v4233_v3, 0  ;;  %v6867_v2 = vpop.xlane.xlu0 %1132  ;;  %v1836_v22 = vand.u32 65535, %v6325_v47  ;;  %v4369_v46 = vcvt.f32.s32 %v4368_v42  ;;  %v1136_v26 = vpop.xlane.xlu1 %1135  ;;  %v6873_v60 = vsel %vm713_vm1, %v6623_v41, 2147483647 }
 0x167   : > { %vm3049_vm7 = vcmp.lt.s32.totalorder %v2924_v16, 14  ;;  %9516 = vst [vmem:[#allocation134_spill] sm:$0xff] %v6873_v60  ;;  %v4234_v30 = vadd.s32 4294967295, %v4367_v13  ;;  %vm3236_vm0 = vcmp.eq.s32.totalorder %v5814_v34, %v3173_v57  ;;  %v2674_v3 = vmul.f32 15.0, %v6861_v45 }
 0x168   : > { %v3050_v0 = vsel %vm3049_vm7, %v2924_v16, 14  ;;  %v4235_v27 = vadd.s32 4294967295, %v4369_v46  ;;  %v6880_v47 = vcvt.s32.f32 %v2362_v39  ;;  %v2736_v42 = vceil.f32 %v2673_v19 }
 0x169   : > { %v3174_v18 = vsel %vm462_vm3, %v3050_v0, 15  ;;  %1705 = vmin.xlane.f32.xlu0 %v9518_v35  ;;  %vm2925_vm9 = vcmp.gt.s32.totalorder %v4234_v30, 0  ;;  %v6885_v13 = vcvt.s32.f32 %v1821_v38  ;;  %v2392_v16 = vshra.s32 %v6873_v60, 16  ;;  %v9523_v0 = vld [vmem:[#allocation37_spill] sm:$0xff] }
 0x16a   : > { %9519 = vst [vmem:[#allocation5_spill] sm:$0xff] %v6880_v47  ;;  %vm3237_vm10 = vcmp.eq.s32.totalorder %v5814_v34, %v3174_v18  ;;  %v6883_v41 = vpop.xlane.xlu0 %1138  ;;  %v2926_v14 = vsel %vm2925_vm9, %v4234_v30, 0  ;;  %vm2927_vm12 = vcmp.gt.s32.totalorder %v4235_v27, 0  ;;  %v9074_v46 = vmov 0.0   ;;  %v1142_v30 = vpop.xlane.xlu1 %1141 }
 0x16b   : > { %9520 = vst [vmem:[#allocation7_spill] sm:$0xff] %v6885_v13  ;;  %v6891_v58 = vsel %vm3236_vm0, 1.0, %v9074_v46  ;;  %v6894_v39 = vsel %vm3237_vm10, 1.0, %v9074_v46  ;;  %vm3051_vm3 = vcmp.lt.s32.totalorder %v2926_v14, 14  ;;  %4674 = vrcp.f32 %v6825_v33 }
 0x16c   : > { %9521 = vst [vmem:[#allocation159_spill] sm:$0xff] %v6891_v58  ;;  %9522 = vst [vmem:[#allocation160_spill] sm:$0xff] %v6894_v39  ;;  %v3052_v18 = vsel %vm3051_vm3, %v2926_v14, 14  ;;  %v3494_v38 = vmul.f32 %v6787_v61, %v6894_v39  ;;  %v2737_v19 = vceil.f32 %v2674_v3  ;;  %v3425_v57 = vadd.f32 %v6894_v39, %v6891_v58 }
 0x16d   : > { %1720 = vmin.xlane.f32.xlu0 %v9523_v0  ;;  %v3175_v47 = vsel %vm463_vm2, %v3052_v18, 15  ;;  %v2928_v13 = vsel %vm2927_vm12, %v4235_v27, 0  ;;  %v4370_v46 = vtrunc.f32 %v2736_v42  ;;  %v1851_v33 = vand.u32 65535, %v6332_v48  ;;  %v9530_v18 = vld [vmem:[#allocation110_spill] sm:$0xff] }
 0x16e   : > { %v6904_v35 = vpop.xlane.xlu0 %1144  ;;  %vm3238_vm13 = vcmp.eq.s32.totalorder %v5814_v34, %v3175_v47  ;;  %v3493_v61 = vmul.f32 %v6749_v23, %v6891_v58  ;;  %vm3053_vm15 = vcmp.lt.s32.totalorder %v2928_v13, 14  ;;  %4676 = vrcp.f32 %v1130_v55 }
 0x16f   : > { %v6910_v14 = vcvt.s32.f32 %v2377_v40  ;;  %v6914_v60 = vsel %vm713_vm1, %v6632_v24, 2147483647  ;;  %v9527_v3 = vmov 0.0   ;;  %4678 = vrcp.f32 %v1136_v26 }
 0x170   : > { %9526 = vst [vmem:[#allocation161_spill] sm:$0xff] %v6914_v60  ;;  %v6917_v27 = vsel %vm3238_vm13, 1.0, %v9527_v3  ;;  %v6921_v48 = vsel %vm713_vm1, %v6635_v53, 2147483647  ;;  %v3556_v47 = vadd.f32 %v3494_v38, %v3493_v61  ;;  %v3054_v42 = vsel %vm3053_vm15, %v2928_v13, 14  ;;  %v1148_v13 = vpop.xlane.xlu1 %1147 }
 0x171   : > { %9525 = vst [vmem:[#allocation6_spill] sm:$0xff] %v6910_v14  ;;  %9528 = vst [vmem:[#allocation162_spill] sm:$0xff] %v6917_v27  ;;  %1735 = vmin.xlane.f32.xlu0 %v9530_v18  ;;  %v3426_v55 = vadd.f32 %v6917_v27, %v3425_v57  ;;  %v3176_v40 = vsel %vm464_vm4, %v3054_v42, 15  ;;  %v4371_v58 = vcvt.f32.s32 %v4370_v46  ;;  %v4372_v24 = vtrunc.f32 %v2737_v19 }
 0x172   : > { %9529 = vst [vmem:[#allocation163_spill] sm:$0xff] %v6921_v48  ;;  %4680 = vrcp.f32 %v1142_v30  ;;  %v6927_v39 = vpop.xlane.xlu0 %1150  ;;  %v1866_v26 = vand.u32 65535, %v6350_v62  ;;  %v3495_v53 = vmul.f32 %v6800_v17, %v6917_v27  ;;  %vm3239_vm2 = vcmp.eq.s32.totalorder %v5814_v34, %v3176_v40 }
 0x173   : > { %v6933_v38 = vcvt.s32.f32 %v1836_v22  ;;  %v6935_v61 = vcvt.s32.f32 %v2392_v16  ;;  %v2407_v57 = vshra.s32 %v6914_v60, 16  ;;  %v6940_v46 = vsel %vm713_vm1, %v6672_v29, 2147483647  ;;  %v9537_v22 = vld [vmem:[#allocation38_spill] sm:$0xff] }
 0x174   : > { %9534 = vst [vmem:[#allocation165_spill] sm:$0xff] %v6940_v46  ;;  %v2422_v19 = vshra.s32 %v6921_v48, 16  ;;  %v6945_v62 = vsel %vm713_vm1, %v6675_v4, 2147483647  ;;  %v3557_v17 = vadd.f32 %v3556_v47, %v3495_v53  ;;  %v6948_v30 = vsel %vm3239_vm2, 1.0, %v9527_v3 }
 0x175   : > { %9532 = vst [vmem:[#allocation8_spill] sm:$0xff] %v6933_v38  ;;  %9533 = vst [vmem:[#allocation164_spill] sm:$0xff] %v6935_v61  ;;  %1750 = vmin.xlane.f32.xlu0 %v9537_v22  ;;  %v1881_v16 = vand.u32 65535, %v6364_v51  ;;  %v6953_v42 = vadd.f32 %v6948_v30, %v3426_v55  ;;  %v4236_v23 = vadd.s32 4294967295, %v4371_v58  ;;  %v4373_v29 = vcvt.f32.s32 %v4372_v24  ;;  %v6955_v40 = vpop.eup %4674 }
 0x176   : > { %9535 = vst [vmem:[#allocation166_spill] sm:$0xff] %v6945_v62  ;;  %9536 = vst [vmem:[#allocation167_spill] sm:$0xff] %v6948_v30  ;;  %v6957_v27 = vpop.xlane.xlu0 %1156  ;;  %v6959_v48 = vcvt.s32.f32 %v1851_v33  ;;  %v6961_v4 = vcvt.s32.f32 %v1866_v26  ;;  %v2437_v47 = vshra.s32 %v6940_v46, 16  ;;  %v3496_v53 = vmul.f32 %v6813_v5, %v6948_v30  ;;  %v1154_v5 = vpop.xlane.xlu1 %1153  ;;  %v9543_v30 = vld [vmem:[#allocation87_spill] sm:$0xff] }
 0x177   : > { %v1896_v51 = vand.u32 65535, %v6382_v28  ;;  %v2452_v55 = vshra.s32 %v6945_v62, 16  ;;  %v1911_v58 = vand.u32 65535, %v6389_v36  ;;  %v6971_v24 = vsel %vm713_vm1, %v6679_v31, 2147483647 }
 0x178   : > { %9538 = vst [vmem:[#allocation168_spill] sm:$0xff] %v6959_v48  ;;  %9539 = vst [vmem:[#allocation169_spill] sm:$0xff] %v6961_v4  ;;  %4682 = vrcp.f32 %v1148_v13  ;;  %v6973_v33 = vcvt.s32.f32 %v2407_v57  ;;  %v6975_v26 = vcvt.s32.f32 %v2422_v19  ;;  %v6977_v60 = vadd.f32 %v3557_v17, %v3496_v53  ;;  %v6979_v46 = vpop.eup %4676 }
 0x179   : > { %9540 = vst [vmem:[#allocation170_spill] sm:$0xff] %v6971_v24  ;;  %1765 = vmin.xlane.f32.xlu0 %v9543_v30  ;;  %v6982_v28 = vcvt.s32.f32 %v1881_v16  ;;  %v1926_v36 = vand.u32 65535, %v6413_v32  ;;  %vm2929_vm4 = vcmp.gt.s32.totalorder %v4236_v23, 0  ;;  %v4237_v62 = vadd.s32 4294967295, %v4373_v29  ;;  %v6985_v31 = vpop.eup %4678 }
 0x17a   : > { %9541 = vst [vmem:[#allocation171_spill] sm:$0xff] %v6973_v33  ;;  %9542 = vst [vmem:[#allocation172_spill] sm:$0xff] %v6975_v26  ;;  %v6987_v13 = vpop.xlane.xlu0 %1162  ;;  %v6989_v57 = vcvt.s32.f32 %v2437_v47  ;;  %v2467_v19 = vshra.s32 %v6971_v24, 16  ;;  %v1941_v17 = vand.u32 65535, %v6425_v6  ;;  %v2679_v53 = vmul.f32 15.0, %v6955_v40 }
 0x17b   : > { %9544 = vst [vmem:[#allocation173_spill] sm:$0xff] %v6982_v28  ;;  %v6994_v26 = vcvt.s32.f32 %v1896_v51  ;;  %v6996_v16 = vcvt.s32.f32 %v2452_v55  ;;  %v6998_v28 = vcvt.s32.f32 %v1911_v58  ;;  %v1956_v32 = vand.u32 65535, %v6443_v20 }
 0x17c   : > { %9545 = vst [vmem:[#allocation174_spill] sm:$0xff] %v6989_v57  ;;  %v7001_v29 = vpop.eup %4680  ;;  %4684 = vrcp.f32 %v1154_v5  ;;  %v1971_v47 = vand.u32 65535, %v6451_v21  ;;  %v1986_v57 = vand.u32 65535, %v6469_v59  ;;  %v2930_v24 = vsel %vm2929_vm4, %v4236_v23, 0  ;;  %v1160_v23 = vpop.xlane.xlu1 %1159 }
 0x17d   : > { %9546 = vst [vmem:[#allocation175_spill] sm:$0xff] %v6994_v26  ;;  %9547 = vst [vmem:[#allocation176_spill] sm:$0xff] %v6996_v16  ;;  %1780 = vmin.xlane.f32.xlu0 %v6292_v1  ;;  %v7007_v6 = vcvt.s32.f32 %v1926_v36  ;;  %v2001_v51 = vand.u32 65535, %v6478_v25  ;;  %v2681_v55 = vmul.f32 15.0, %v6979_v46  ;;  %vm2931_vm1 = vcmp.gt.s32.totalorder %v4237_v62, 0 }
 0x17e   : > { %9548 = vst [vmem:[#allocation177_spill] sm:$0xff] %v6998_v28  ;;  %v7011_v58 = vpop.xlane.xlu0 %1168  ;;  %v7013_v20 = vcvt.s32.f32 %v2467_v19  ;;  %v7015_v5 = vcvt.s32.f32 %v1941_v17  ;;  %v2742_v21 = vceil.f32 %v2679_v53  ;;  %v2683_v59 = vmul.f32 15.0, %v6985_v31 }
 0x17f   : > { %9549 = vst [vmem:[#allocation178_spill] sm:$0xff] %v7007_v6  ;;  %4686 = vrcp.f32 %v6760_v37  ;;  %v2016_v36 = vand.u32 65535, %v6508_v54  ;;  %v2685_v6 = vmul.f32 15.0, %v7001_v29  ;;  %vm3055_vm14 = vcmp.lt.s32.totalorder %v2930_v24, 14 }
 0x180   : > { %9550 = vst [vmem:[#allocation179_spill] sm:$0xff] %v7013_v20  ;;  %9551 = vst [vmem:[#allocation180_spill] sm:$0xff] %v7015_v5  ;;  %v7021_v25 = vcvt.s32.f32 %v1956_v32  ;;  %v7023_v16 = vcvt.s32.f32 %v1971_v47  ;;  %v7025_v28 = vcvt.s32.f32 %v1986_v57  ;;  %v2932_v19 = vsel %vm2931_vm1, %v4237_v62, 0 }
 0x181   : > { %1795 = vmin.xlane.f32.xlu0 %v6294_v12  ;;  %v7028_v17 = vcvt.s32.f32 %v2001_v51  ;;  %v2031_v53 = vand.u32 65535, %v6528_v49  ;;  %v2046_v37 = vand.u32 65535, %v6536_v8  ;;  %v2744_v5 = vceil.f32 %v2681_v55  ;;  %v9619_v12 = vld [vmem:[#allocation66_spill] sm:$0xff] }
 0x182   : > { %9552 = vst [vmem:[#allocation181_spill] sm:$0xff] %v7021_v25  ;;  %9553 = vst [vmem:[#allocation182_spill] sm:$0xff] %v7023_v16  ;;  %v7032_v54 = vpop.eup %4682  ;;  %4688 = vrcp.f32 %v1160_v23  ;;  %v7034_v20 = vpop.xlane.xlu0 %1174  ;;  %v4382_v32 = vtrunc.f32 %v2742_v21  ;;  %v2746_v47 = vceil.f32 %v2683_v59  ;;  %v3056_v16 = vsel %vm3055_vm14, %v2930_v24, 14  ;;  %v9557_v23 = vld [vmem:[#allocation135_spill] sm:$0xff] }
 0x183   : > { %9554 = vst [vmem:[#allocation183_spill] sm:$0xff] %v7025_v28  ;;  %9555 = vst [vmem:[#allocation184_spill] sm:$0xff] %v7028_v17  ;;  %v2061_v57 = vand.u32 65535, %v6540_v52  ;;  %v2076_v62 = vand.u32 65535, %v6552_v56  ;;  %v2748_v28 = vceil.f32 %v2685_v6  ;;  %vm3057_vm8 = vcmp.lt.s32.totalorder %v2932_v19, 14 }
 0x184   : > { %v7038_v51 = vcvt.s32.f32 %v2016_v36  ;;  %v2091_v49 = vand.u32 65535, %v6563_v15  ;;  %v2106_v8 = vand.u32 65535, %v6585_v43  ;;  %v2121_v55 = vand.u32 65535, %v6639_v10 }
 0x185   : > { %1810 = vmin.xlane.f32.xlu0 %v9557_v23  ;;  %v7044_v17 = vcvt.s32.f32 %v2031_v53  ;;  %v4386_v21 = vtrunc.f32 %v2744_v5  ;;  %v2687_v24 = vmul.f32 15.0, %v7032_v54  ;;  %v3177_v56 = vsel %vm465_vm5, %v3056_v16, 15 }
 0x186   : > { %9556 = vst [vmem:[#allocation185_spill] sm:$0xff] %v7038_v51  ;;  %v7049_v6 = vpop.eup %4684  ;;  %v7051_v59 = vpop.xlane.xlu0 %1180  ;;  %v2136_v15 = vand.u32 65535, %v6643_v44  ;;  %v4383_v36 = vcvt.f32.s32 %v4382_v32  ;;  %v4390_v43 = vtrunc.f32 %v2746_v47  ;;  %v3058_v51 = vsel %vm3057_vm8, %v2932_v19, 14  ;;  %v9566_v44 = vld [vmem:[#allocation136_spill] sm:$0xff] }
 0x187   : > { %9558 = vst [vmem:[#allocation186_spill] sm:$0xff] %v7044_v17  ;;  %v7054_v10 = vcvt.s32.f32 %v2046_v37  ;;  %v7056_v25 = vcvt.s32.f32 %v2061_v57  ;;  %v7058_v53 = vcvt.s32.f32 %v2076_v62  ;;  %v4394_v5 = vtrunc.f32 %v2748_v28  ;;  %v1166_v47 = vpop.xlane.xlu1 %1165 }
 0x188   : > { %v7060_v17 = vcvt.s32.f32 %v2091_v49  ;;  %v7062_v52 = vcvt.s32.f32 %v2106_v8  ;;  %v7064_v16 = vcvt.s32.f32 %v2121_v55  ;;  %vm3240_vm5 = vcmp.eq.s32.totalorder %v5814_v34, %v3177_v56  ;;  %v9569_v56 = vld [vmem:[#allocation109_spill] sm:$0xff] }
 0x189   : > { %9560 = vst [vmem:[#allocation9_spill] sm:$0xff] %v7054_v10  ;;  %9561 = vst [vmem:[#allocation187_spill] sm:$0xff] %v7056_v25  ;;  %v7067_v26 = vpop.eup %4686  ;;  %1825 = vmin.xlane.f32.xlu0 %v9566_v44  ;;  %v4387_v19 = vcvt.f32.s32 %v4386_v21  ;;  %v2750_v37 = vceil.f32 %v2687_v24  ;;  %v2689_v32 = vmul.f32 15.0, %v7049_v6  ;;  %v3178_v57 = vsel %vm466_vm6, %v3058_v51, 15  ;;  %v9574_v10 = vld [vmem:[#allocation115_spill] sm:$0xff] }
 0x18a   : > { %9562 = vst [vmem:[#allocation188_spill] sm:$0xff] %v7058_v53  ;;  %9563 = vst [vmem:[#allocation189_spill] sm:$0xff] %v7060_v17  ;;  %v7073_v28 = vpop.xlane.xlu0 %1186  ;;  %v7075_v62 = vcvt.s32.f32 %v2136_v15  ;;  %v2151_v49 = vand.u32 65535, %v6652_v50  ;;  %v4242_v8 = vadd.s32 4294967295, %v4383_v36  ;;  %v4391_v55 = vcvt.f32.s32 %v4390_v43  ;;  %v9571_v53 = vld [vmem:[#allocation34_spill] sm:$0xff]  ;;  %v9572_v36 = vld [vmem:[#allocation101_spill] sm:$0xff] }
 0x18b   : > { %9564 = vst [vmem:[#allocation190_spill] sm:$0xff] %v7062_v52  ;;  %9565 = vst [vmem:[#allocation191_spill] sm:$0xff] %v7064_v16  ;;  %v2166_v16 = vand.u32 65535, %v9569_v56  ;;  %v2181_v52 = vand.u32 65535, %v6686_v63  ;;  %v4395_v17 = vcvt.f32.s32 %v4394_v5  ;;  %v7081_v21 = vsel %vm3240_vm5, 1.0, %v9527_v3  ;;  %v9573_v43 = vld [vmem:[#allocation95_spill] sm:$0xff] }
 0x18c   : > { %9568 = vst [vmem:[#allocation10_spill] sm:$0xff] %v7075_v62  ;;  %9570 = vst [vmem:[#allocation109_spill] sm:$0xff] %v7081_v21  ;;  %v7083_v24 = vpop.eup %4688  ;;  %v2196_v51 = vand.u32 65535, %v6693_v7  ;;  %v2211_v15 = vand.u32 65535, %v9571_v53  ;;  %vm3241_vm6 = vcmp.eq.s32.totalorder %v5814_v34, %v3178_v57  ;;  %v2675_v50 = vmul.f32 15.0, %v7067_v26 }
 0x18d   : > { %1840 = vmin.xlane.f32.xlu0 %v9572_v36  ;;  %v2226_v56 = vand.u32 65535, %v9573_v43  ;;  %v4244_v63 = vadd.s32 4294967295, %v4387_v19  ;;  %v4398_v5 = vtrunc.f32 %v2750_v37  ;;  %v2752_v62 = vceil.f32 %v2689_v32  ;;  %v9578_v37 = vld [vmem:[#allocation123_spill] sm:$0xff] }
 0x18e   : > { %v7091_v25 = vpop.xlane.xlu0 %1192  ;;  %v2241_v33 = vand.u32 65535, %v9574_v10  ;;  %vm2941_vm7 = vcmp.gt.s32.totalorder %v4242_v8, 0  ;;  %v4246_v4 = vadd.s32 4294967295, %v4391_v55  ;;  %v3428_v7 = vadd.f32 %v7081_v21, %v6953_v42  ;;  %v9579_v10 = vld [vmem:[#allocation102_spill] sm:$0xff] }
 0x18f   : > { %4690 = vrcp.f32 %v1166_v47  ;;  %v4248_v53 = vadd.s32 4294967295, %v4395_v17  ;;  %v2691_v57 = vmul.f32 15.0, %v7083_v24  ;;  %v7098_v61 = vsel %vm3241_vm6, 1.0, %v9527_v3  ;;  %v1172_v47 = vpop.xlane.xlu1 %1171 }
 0x190   : > { %9575 = vst [vmem:[#allocation34_spill] sm:$0xff] %v7098_v61  ;;  %v7100_v43 = vcvt.s32.f32 %v2151_v49  ;;  %v7102_v19 = vcvt.s32.f32 %v2166_v16  ;;  %v2256_v32 = vand.u32 65535, %v9578_v37  ;;  %v2738_v48 = vceil.f32 %v2675_v50 }
 0x191   : > { %1855 = vmin.xlane.f32.xlu0 %v9579_v10  ;;  %v2942_v55 = vsel %vm2941_vm7, %v4242_v8, 0  ;;  %vm2945_vm0 = vcmp.gt.s32.totalorder %v4244_v63, 0  ;;  %v4399_v14 = vcvt.f32.s32 %v4398_v5  ;;  %v4402_v42 = vtrunc.f32 %v2752_v62 }
 0x192   : > { %9576 = vst [vmem:[#allocation95_spill] sm:$0xff] %v7100_v43  ;;  %9577 = vst [vmem:[#allocation115_spill] sm:$0xff] %v7102_v19  ;;  %v7106_v17 = vpop.xlane.xlu0 %1198  ;;  %v7108_v38 = vcvt.s32.f32 %v2181_v52  ;;  %vm2949_vm9 = vcmp.gt.s32.totalorder %v4246_v4, 0  ;;  %v3497_v49 = vmul.f32 %v6843_v11, %v7081_v21  ;;  %v7113_v16 = vadd.f32 %v7098_v61, %v3428_v7  ;;  %v9583_v52 = vld [vmem:[#allocation48_spill] sm:$0xff] }
 0x193   : > { %v7115_v37 = vcvt.s32.f32 %v2196_v51  ;;  %v7117_v50 = vcvt.s32.f32 %v2211_v15  ;;  %vm2953_vm10 = vcmp.gt.s32.totalorder %v4248_v53, 0  ;;  %v2754_v8 = vceil.f32 %v2691_v57  ;;  %v9584_v21 = vld [vmem:[#allocation144_spill] sm:$0xff] }
 0x194   : > { %9580 = vst [vmem:[#allocation123_spill] sm:$0xff] %v7108_v38  ;;  %4692 = vrcp.f32 %v6789_v9  ;;  %vm3067_vm12 = vcmp.lt.s32.totalorder %v2942_v55, 14  ;;  %v2946_v62 = vsel %vm2945_vm0, %v4244_v63, 0  ;;  %v4374_v5 = vtrunc.f32 %v2738_v48  ;;  %v9585_v9 = vld [vmem:[#allocation149_spill] sm:$0xff] }
 0x195   : > { %9581 = vst [vmem:[#allocation192_spill] sm:$0xff] %v7115_v37  ;;  %9582 = vst [vmem:[#allocation193_spill] sm:$0xff] %v7117_v50  ;;  %4694 = vrcp.f32 %v1172_v47  ;;  %1870 = vmin.xlane.f32.xlu0 %v9583_v52  ;;  %v2950_v38 = vsel %vm2949_vm9, %v4246_v4, 0  ;;  %v4250_v19 = vadd.s32 4294967295, %v4399_v14  ;;  %v4403_v11 = vcvt.f32.s32 %v4402_v42  ;;  %v9587_v47 = vld [vmem:[#allocation153_spill] sm:$0xff]  ;;  %v9605_v50 = vld [vmem:[#allocation26_spill] sm:$0xff] }
 0x196   : > { %4696 = vrcp.f32 %v9584_v21  ;;  %v7122_v7 = vpop.xlane.xlu0 %1204  ;;  %v2954_v51 = vsel %vm2953_vm10, %v4248_v53, 0  ;;  %v3559_v15 = vadd.f32 %v6977_v60, %v3497_v49  ;;  %v3498_v57 = vmul.f32 %v6861_v45, %v7098_v61  ;;  %v1178_v60 = vpop.xlane.xlu1 %1177  ;;  %v9588_v53 = vld [vmem:[#allocation51_spill] sm:$0xff]  ;;  %v9613_v52 = vld [vmem:[#allocation62_spill] sm:$0xff] }
 0x197   : > { %4698 = vrcp.f32 %v9585_v9  ;;  %v7128_v63 = vcvt.s32.f32 %v2226_v56  ;;  %vm3071_vm3 = vcmp.lt.s32.totalorder %v2946_v62, 14  ;;  %v4406_v48 = vtrunc.f32 %v2754_v8 }
 0x198   : > { %4700 = vrcp.f32 %v9587_v47  ;;  %v3068_v14 = vsel %vm3067_vm12, %v2942_v55, 14  ;;  %vm3075_vm13 = vcmp.lt.s32.totalorder %v2950_v38, 14  ;;  %v4375_v4 = vcvt.f32.s32 %v4374_v5 }
 0x199   : > { %9586 = vst [vmem:[#allocation144_spill] sm:$0xff] %v7128_v63  ;;  %v7132_v21 = vpop.eup %4690  ;;  %4702 = vrcp.f32 %v6867_v2  ;;  %1885 = vmin.xlane.f32.xlu0 %v9588_v53  ;;  %vm3079_vm15 = vcmp.lt.s32.totalorder %v2954_v51, 14  ;;  %vm2957_vm2 = vcmp.gt.s32.totalorder %v4250_v19, 0  ;;  %v4252_v45 = vadd.s32 4294967295, %v4403_v11 }
 0x19a   : > { %4704 = vrcp.f32 %v6883_v41  ;;  %v7137_v56 = vpop.xlane.xlu0 %1210  ;;  %v7139_v42 = vcvt.s32.f32 %v2241_v33  ;;  %v3072_v55 = vsel %vm3071_vm3, %v2946_v62, 14  ;;  %v7142_v49 = vadd.f32 %v3559_v15, %v3498_v57  ;;  %v9591_v33 = vld [vmem:[#allocation103_spill] sm:$0xff]  ;;  %v9593_v15 = vld [vmem:[#allocation17_spill] sm:$0xff] }
 0x19b   : > { %4706 = vrcp.f32 %v6904_v35  ;;  %v3183_v2 = vsel %vm471_vm11, %v3068_v14, 15  ;;  %v3076_v5 = vsel %vm3075_vm13, %v2950_v38, 14  ;;  %v4407_v9 = vcvt.f32.s32 %v4406_v48  ;;  %v9597_v48 = vld [vmem:[#allocation23_spill] sm:$0xff] }
 0x19c   : > { %9589 = vst [vmem:[#allocation149_spill] sm:$0xff] %v7139_v42  ;;  %v3080_v47 = vsel %vm3079_vm15, %v2954_v51, 14  ;;  %v2958_v11 = vsel %vm2957_vm2, %v4250_v19, 0  ;;  %v2693_v41 = vmul.f32 15.0, %v7132_v21  ;;  %v4238_v61 = vadd.s32 4294967295, %v4375_v4  ;;  %v9595_v19 = vld [vmem:[#allocation20_spill] sm:$0xff] }
 0x19d   : > { %4708 = vrcp.f32 %v6927_v39  ;;  %1900 = vmin.xlane.f32.xlu0 %v9591_v33  ;;  %v7151_v62 = vcvt.s32.f32 %v2256_v32  ;;  %vm9594_vm4 = vcmp.lt.s32.totalorder %v9593_v15, 1000  ;;  %vm2961_vm1 = vcmp.gt.s32.totalorder %v4252_v45, 0  ;;  %v1184_v32 = vpop.xlane.xlu1 %1183 }
 0x19e   : > { %v3185_v35 = vsel %vm9594_vm4, %v3072_v55, 15  ;;  %v7155_v57 = vpop.eup %4692  ;;  %4710 = vrcp.f32 %v6957_v27  ;;  %v7158_v38 = vpop.xlane.xlu0 %1216  ;;  %vm3246_vm11 = vcmp.eq.s32.totalorder %v5814_v34, %v3183_v2  ;;  %vm9596_vm14 = vcmp.lt.s32.totalorder %v9595_v19, 1000  ;;  %v9599_v19 = vld [vmem:[#allocation58_spill] sm:$0xff] }
 0x19f   : > { %9592 = vst [vmem:[#allocation153_spill] sm:$0xff] %v7151_v62  ;;  %v3187_v51 = vsel %vm9596_vm14, %v3076_v5, 15  ;;  %vm2933_vm8 = vcmp.gt.s32.totalorder %v4238_v61, 0  ;;  %v7163_v39 = vpop.eup %4694  ;;  %vm9598_vm5 = vcmp.lt.s32.totalorder %v9597_v48, 1000  ;;  %vm3083_vm6 = vcmp.lt.s32.totalorder %v2958_v11, 14 }
 0x1a0   : > { %v3189_v14 = vsel %vm9598_vm5, %v3080_v47, 15  ;;  %v4254_v4 = vadd.s32 4294967295, %v4407_v9  ;;  %v2934_v55 = vsel %vm2933_vm8, %v4238_v61, 0  ;;  %v7167_v8 = vpop.eup %4696  ;;  %4712 = vrcp.f32 %v6987_v13 }
 0x1a1   : > { %vm3248_vm7 = vcmp.eq.s32.totalorder %v5814_v34, %v3185_v35  ;;  %v2962_v27 = vsel %vm2961_vm1, %v4252_v45, 0  ;;  %v2756_v15 = vceil.f32 %v2693_v41  ;;  %v7172_v5 = vpop.eup %4698  ;;  %4714 = vrcp.f32 %v1178_v60  ;;  %1915 = vmin.xlane.f32.xlu0 %v9599_v19  ;;  %v9603_v35 = vld [vmem:[#allocation122_spill] sm:$0xff] }
 0x1a2   : > { %v7178_v47 = vsel %vm3246_vm11, 1.0, %v9527_v3  ;;  %vm3250_vm0 = vcmp.eq.s32.totalorder %v5814_v34, %v3187_v51  ;;  %vm3059_vm9 = vcmp.lt.s32.totalorder %v2934_v55, 14  ;;  %v7181_v61 = vpop.eup %4700  ;;  %v7183_v13 = vpop.xlane.xlu0 %1222  ;;  %vm3252_vm10 = vcmp.eq.s32.totalorder %v5814_v34, %v3189_v14 }
 0x1a3   : > { %9600 = vst [vmem:[#allocation15_spill] sm:$0xff] %v7178_v47  ;;  %v3084_v45 = vsel %vm3083_vm6, %v2958_v11, 14  ;;  %v2695_v60 = vmul.f32 15.0, %v7163_v39  ;;  %v2676_v9 = vmul.f32 15.0, %v7155_v57  ;;  %v7189_v41 = vpop.eup %4702  ;;  %4716 = vrcp.f32 %v7011_v58  ;;  %v1190_v58 = vpop.xlane.xlu1 %1189 }
 0x1a4   : > { %v7195_v2 = vsel %vm3248_vm7, 1.0, %v9527_v3  ;;  %vm3087_vm12 = vcmp.lt.s32.totalorder %v2962_v27, 14  ;;  %vm2965_vm3 = vcmp.gt.s32.totalorder %v4254_v4, 0  ;;  %v7197_v51 = vpop.eup %4704  ;;  %4718 = vrcp.f32 %v7034_v20 }
 0x1a5   : > { %9601 = vst [vmem:[#allocation17_spill] sm:$0xff] %v7195_v2  ;;  %v7201_v11 = vsel %vm3250_vm0, 1.0, %v9527_v3  ;;  %v4410_v48 = vtrunc.f32 %v2756_v15  ;;  %v3060_v62 = vsel %vm3059_vm9, %v2934_v55, 14  ;;  %v7204_v42 = vpop.eup %4706  ;;  %4720 = vrcp.f32 %v7051_v59  ;;  %1930 = vmin.xlane.f32.xlu0 %v9603_v35  ;;  %v9607_v35 = vld [vmem:[#allocation11_spill] sm:$0xff] }
 0x1a6   : > { %9602 = vst [vmem:[#allocation20_spill] sm:$0xff] %v7201_v11  ;;  %v7210_v63 = vmul.f32 %v6955_v40, %v7178_v47  ;;  %v7215_v20 = vsel %vm3252_vm10, 1.0, %v9527_v3  ;;  %vm9606_vm13 = vcmp.lt.s32.totalorder %v9605_v50, 1000  ;;  %v7219_v55 = vpop.xlane.xlu0 %1228  ;;  %v3088_v37 = vsel %vm3087_vm12, %v2962_v27, 14  ;;  %v9610_v27 = vld [vmem:[#allocation29_spill] sm:$0xff] }
 0x1a7   : > { %9604 = vst [vmem:[#allocation23_spill] sm:$0xff] %v7215_v20  ;;  %v3191_v15 = vsel %vm9606_vm13, %v3084_v45, 15  ;;  %v2966_v43 = vsel %vm2965_vm3, %v4254_v4, 0  ;;  %v2758_v59 = vceil.f32 %v2695_v60  ;;  %v2739_v19 = vceil.f32 %v2676_v9  ;;  %v7221_v33 = vpop.eup %4708 }
 0x1a8   : > { %4722 = vrcp.f32 %v1184_v32  ;;  %v7225_v40 = vmul.f32 %v6979_v46, %v7195_v2  ;;  %v7229_v14 = vmul.f32 %v6985_v31, %v7201_v11  ;;  %vm9608_vm15 = vcmp.lt.s32.totalorder %v9607_v35, 1000  ;;  %v7233_v45 = vpop.eup %4710  ;;  %v9609_v46 = vld [vmem:[#allocation59_spill] sm:$0xff] }
 0x1a9   : > { %v3179_v50 = vsel %vm9608_vm15, %v3060_v62, 15  ;;  %4724 = vrcp.f32 %v7073_v28  ;;  %v7238_v4 = vmul.f32 %v7001_v29, %v7215_v20  ;;  %vm3254_vm2 = vcmp.eq.s32.totalorder %v5814_v34, %v3191_v15  ;;  %1945 = vmin.xlane.f32.xlu0 %v9609_v46 }
 0x1aa   : > { %v4411_v32 = vcvt.f32.s32 %v4410_v48  ;;  %vm9611_vm4 = vcmp.lt.s32.totalorder %v9610_v27, 1000  ;;  %vm3091_vm1 = vcmp.lt.s32.totalorder %v2966_v43, 14  ;;  %v4376_v60 = vtrunc.f32 %v2739_v19  ;;  %v7245_v9 = vpop.eup %4712  ;;  %v7247_v28 = vpop.xlane.xlu0 %1234 }
 0x1ab   : > { %v3193_v31 = vsel %vm9611_vm4, %v3088_v37, 15  ;;  %v2677_v62 = vmul.f32 15.0, %v7167_v8  ;;  %4726 = vrcp.f32 %v1190_v58  ;;  %v4414_v35 = vtrunc.f32 %v2758_v59  ;;  %v7251_v48 = vpop.eup %4714  ;;  %v1196_v27 = vpop.xlane.xlu1 %1195 }
 0x1ac   : > { %vm3242_vm11 = vcmp.eq.s32.totalorder %v5814_v34, %v3179_v50  ;;  %v2678_v29 = vmul.f32 15.0, %v7172_v5  ;;  %4728 = vrcp.f32 %v7091_v25  ;;  %v7257_v37 = vsel %vm3254_vm2, 1.0, %v9527_v3 }
 0x1ad   : > { %9612 = vst [vmem:[#allocation26_spill] sm:$0xff] %v7257_v37  ;;  %v4377_v19 = vcvt.f32.s32 %v4376_v60  ;;  %v2740_v46 = vceil.f32 %v2677_v62  ;;  %vm3256_vm14 = vcmp.eq.s32.totalorder %v5814_v34, %v3193_v31  ;;  %v3092_v58 = vsel %vm3091_vm1, %v2966_v43, 14  ;;  %v7261_v53 = vpop.eup %4716  ;;  %1960 = vmin.xlane.f32.xlu0 %v9613_v52 }
 0x1ae   : > { %v4256_v59 = vadd.s32 4294967295, %v4411_v32  ;;  %v2741_v50 = vceil.f32 %v2678_v29  ;;  %v7265_v25 = vsel %vm3242_vm11, 1.0, %v9527_v3  ;;  %v2680_v15 = vmul.f32 15.0, %v7181_v61  ;;  %v7268_v44 = vpop.eup %4718  ;;  %v7270_v60 = vpop.xlane.xlu0 %1240 }
 0x1af   : > { %9614 = vst [vmem:[#allocation11_spill] sm:$0xff] %v7265_v25  ;;  %v4239_v10 = vadd.s32 4294967295, %v4377_v19  ;;  %v4378_v36 = vtrunc.f32 %v2740_v46  ;;  %4730 = vrcp.f32 %v1196_v27  ;;  %v7274_v43 = vmul.f32 %v7032_v54, %v7257_v37  ;;  %v7276_v29 = vpop.eup %4720  ;;  %v9616_v27 = vld [vmem:[#allocation32_spill] sm:$0xff] }
 0x1b0   : > { %v4415_v32 = vcvt.f32.s32 %v4414_v35  ;;  %v4380_v62 = vtrunc.f32 %v2741_v50  ;;  %v7281_v19 = vsel %vm3256_vm14, 1.0, %v9527_v3  ;;  %v2697_v46 = vmul.f32 15.0, %v7251_v48 }
 0x1b1   : > { %9615 = vst [vmem:[#allocation29_spill] sm:$0xff] %v7281_v19  ;;  %vm2935_vm8 = vcmp.gt.s32.totalorder %v4239_v10, 0  ;;  %v4379_v52 = vcvt.f32.s32 %v4378_v36  ;;  %vm9617_vm5 = vcmp.lt.s32.totalorder %v9616_v27, 1000  ;;  %vm2969_vm6 = vcmp.gt.s32.totalorder %v4256_v59, 0  ;;  %1975 = vmin.xlane.f32.xlu0 %v9619_v12  ;;  %v9621_v12 = vld [vmem:[#allocation12_spill] sm:$0xff] }
 0x1b2   : > { %v3195_v23 = vsel %vm9617_vm5, %v3092_v58, 15  ;;  %v3499_v54 = vmul.f32 %v7067_v26, %v7265_v25  ;;  %v2936_v35 = vsel %vm2935_vm8, %v4239_v10, 0  ;;  %v7288_v50 = vpop.eup %4722  ;;  %v4381_v1 = vcvt.f32.s32 %v4380_v62  ;;  %v7294_v36 = vpop.xlane.xlu0 %1246 }
 0x1b3   : > { %9618 = vst [vmem:[#allocation32_spill] sm:$0xff] %v7288_v50  ;;  %vm3061_vm7 = vcmp.lt.s32.totalorder %v2936_v35, 14  ;;  %v4240_v31 = vadd.s32 4294967295, %v4379_v52  ;;  %v2743_v30 = vceil.f32 %v2680_v15  ;;  %v7291_v22 = vpop.eup %4724  ;;  %4732 = vrcp.f32 %v7106_v17  ;;  %v1202_v62 = vpop.xlane.xlu1 %1201 }
 0x1b4   : > { %9620 = vst [vmem:[#allocation194_spill] sm:$0xff] %v7291_v22  ;;  %v4258_v58 = vadd.s32 4294967295, %v4415_v32  ;;  %v3430_v27 = vadd.f32 %v7265_v25, %v7113_v16  ;;  %v3062_v26 = vsel %vm3061_vm7, %v2936_v35, 14  ;;  %vm3258_vm0 = vcmp.eq.s32.totalorder %v5814_v34, %v3195_v23  ;;  %v9624_v16 = vld [vmem:[#allocation63_spill] sm:$0xff] }
 0x1b5   : > { %v2970_v10 = vsel %vm2969_vm6, %v4256_v59, 0  ;;  %vm9622_vm9 = vcmp.lt.s32.totalorder %v9621_v12, 1000  ;;  %vm2937_vm10 = vcmp.gt.s32.totalorder %v4240_v31, 0  ;;  %v7302_v15 = vpop.eup %4726  ;;  %v2760_v18 = vceil.f32 %v2697_v46  ;;  %1990 = vmin.xlane.f32.xlu0 %v9624_v16 }
 0x1b6   : > { %v3180_v52 = vsel %vm9622_vm9, %v3062_v26, 15  ;;  %v3561_v17 = vadd.f32 %v7142_v49, %v3499_v54  ;;  %v2938_v32 = vsel %vm2937_vm10, %v4240_v31, 0  ;;  %v7306_v0 = vpop.eup %4728  ;;  %v4241_v12 = vadd.s32 4294967295, %v4381_v1  ;;  %v7312_v26 = vpop.xlane.xlu0 %1252  ;;  %v9626_v31 = vld [vmem:[#allocation13_spill] sm:$0xff] }
 0x1b7   : > { %vm3243_vm12 = vcmp.eq.s32.totalorder %v5814_v34, %v3180_v52  ;;  %9623 = vst [vmem:[#allocation12_spill] sm:$0xff] %v7306_v0  ;;  %vm3063_vm3 = vcmp.lt.s32.totalorder %v2938_v32, 14  ;;  %v4384_v59 = vtrunc.f32 %v2743_v30  ;;  %vm2973_vm13 = vcmp.gt.s32.totalorder %v4258_v58, 0 }
 0x1b8   : > { %v7310_v35 = vsel %vm3243_vm12, 1.0, %v9527_v3  ;;  %v3064_v54 = vsel %vm3063_vm3, %v2938_v32, 14  ;;  %4734 = vrcp.f32 %v1202_v62  ;;  %vm3095_vm15 = vcmp.lt.s32.totalorder %v2970_v10, 14 }
 0x1b9   : > { %9625 = vst [vmem:[#allocation195_spill] sm:$0xff] %v7310_v35  ;;  %v3431_v46 = vadd.f32 %v7310_v35, %v3430_v27  ;;  %v3500_v49 = vmul.f32 %v7155_v57, %v7310_v35  ;;  %vm9627_vm2 = vcmp.lt.s32.totalorder %v9626_v31, 1000  ;;  %vm2939_vm4 = vcmp.gt.s32.totalorder %v4241_v12, 0  ;;  %v7319_v25 = vpop.eup %4730  ;;  %v9629_v27 = vld [vmem:[#allocation67_spill] sm:$0xff] }
 0x1ba   : > { %v3181_v52 = vsel %vm9627_vm2, %v3064_v54, 15  ;;  %v7324_v1 = vsel %vm3258_vm0, 1.0, %v9527_v3  ;;  %v4418_v30 = vtrunc.f32 %v2760_v18  ;;  %2005 = vmin.xlane.f32.xlu0 %v9629_v27  ;;  %v2974_v57 = vsel %vm2973_vm13, %v4258_v58, 0  ;;  %v7331_v31 = vpop.xlane.xlu0 %1258  ;;  %v9635_v27 = vld [vmem:[#allocation106_spill] sm:$0xff] }
 0x1bb   : > { %9628 = vst [vmem:[#allocation13_spill] sm:$0xff] %v7324_v1  ;;  %v3562_v16 = vadd.f32 %v3561_v17, %v3500_v49  ;;  %vm3244_vm1 = vcmp.eq.s32.totalorder %v5814_v34, %v3181_v52  ;;  %v2940_v32 = vsel %vm2939_vm4, %v4241_v12, 0  ;;  %v4385_v54 = vcvt.f32.s32 %v4384_v59  ;;  %9631 = vst [vmem:[#allocation197_spill] sm:$0xff] %v7331_v31  ;;  %v9633_v52 = vld [vmem:[#allocation14_spill] sm:$0xff]  ;;  %v9641_v31 = vld [vmem:[#allocation16_spill] sm:$0xff] }
 0x1bc   : > { %v7329_v62 = vsel %vm3244_vm1, 1.0, %v9527_v3  ;;  %v3096_v35 = vsel %vm3095_vm15, %v2970_v10, 14  ;;  %v2699_v0 = vmul.f32 15.0, %v7288_v50  ;;  %vm3065_vm11 = vcmp.lt.s32.totalorder %v2940_v32, 14 }
 0x1bd   : > { %9630 = vst [vmem:[#allocation196_spill] sm:$0xff] %v7329_v62  ;;  %v3501_v23 = vmul.f32 %v7167_v8, %v7329_v62  ;;  %4736 = vrcp.f32 %v7122_v7  ;;  %v3432_v18 = vadd.f32 %v7329_v62, %v3431_v46  ;;  %v3066_v17 = vsel %vm3065_vm11, %v2940_v32, 14  ;;  %v7338_v49 = vpop.eup %4732  ;;  %v9637_v32 = vld [vmem:[#allocation35_spill] sm:$0xff] }
 0x1be   : > { %v4243_v58 = vadd.s32 4294967295, %v4385_v54  ;;  %9632 = vst [vmem:[#allocation198_spill] sm:$0xff] %v7338_v49  ;;  %vm3099_vm14 = vcmp.lt.s32.totalorder %v2974_v57, 14  ;;  %v4419_v12 = vcvt.f32.s32 %v4418_v30  ;;  %vm9634_vm8 = vcmp.lt.s32.totalorder %v9633_v52, 1000  ;;  %2020 = vmin.xlane.f32.xlu0 %v9635_v27  ;;  %v7346_v46 = vpop.xlane.xlu0 %1264 }
 0x1bf   : > { %v3563_v59 = vadd.f32 %v3562_v16, %v3501_v23  ;;  %v3182_v10 = vsel %vm9634_vm8, %v3066_v17, 15  ;;  %v2682_v8 = vmul.f32 15.0, %v7189_v41  ;;  %v2684_v7 = vmul.f32 15.0, %v7197_v51  ;;  %9636 = vst [vmem:[#allocation14_spill] sm:$0xff] %v7346_v46  ;;  %v1208_v23 = vpop.xlane.xlu1 %1207 }
 0x1c0   : > { %vm3245_vm5 = vcmp.eq.s32.totalorder %v5814_v34, %v3182_v10  ;;  %vm2943_vm6 = vcmp.gt.s32.totalorder %v4243_v58, 0  ;;  %vm9638_vm7 = vcmp.lt.s32.totalorder %v9637_v32, 1000  ;;  %v2762_v62 = vceil.f32 %v2699_v0  ;;  %v9640_v0 = vld [vmem:[#allocation70_spill] sm:$0xff] }
 0x1c1   : > { %v3197_v54 = vsel %vm9638_vm7, %v3096_v35, 15  ;;  %v7351_v16 = vsel %vm3245_vm5, 1.0, %v9527_v3  ;;  %v2944_v30 = vsel %vm2943_vm6, %v4243_v58, 0  ;;  %v3100_v17 = vsel %vm3099_vm14, %v2974_v57, 14 }
 0x1c2   : > { %9639 = vst [vmem:[#allocation35_spill] sm:$0xff] %v7351_v16  ;;  %v3433_v52 = vadd.f32 %v7351_v16, %v3432_v18  ;;  %v3502_v10 = vmul.f32 %v7172_v5, %v7351_v16  ;;  %vm3069_vm0 = vcmp.lt.s32.totalorder %v2944_v30, 14  ;;  %v4260_v27 = vadd.s32 4294967295, %v4419_v12  ;;  %v7357_v32 = vpop.eup %4734  ;;  %2035 = vmin.xlane.f32.xlu0 %v9640_v0  ;;  %v7363_v22 = vpop.xlane.xlu0 %1270  ;;  %v9643_v5 = vld [vmem:[#allocation39_spill] sm:$0xff] }
 0x1c3   : > { %v2701_v49 = vmul.f32 15.0, %v7302_v15  ;;  %v3070_v50 = vsel %vm3069_vm0, %v2944_v30, 14  ;;  %v2745_v46 = vceil.f32 %v2682_v8  ;;  %vm9642_vm9 = vcmp.lt.s32.totalorder %v9641_v31, 1000 }
 0x1c4   : > { %v3434_v35 = vadd.f32 %v7178_v47, %v3433_v52  ;;  %v3564_v58 = vadd.f32 %v3563_v59, %v3502_v10  ;;  %v3184_v57 = vsel %vm9642_vm9, %v3070_v50, 15  ;;  %v2747_v18 = vceil.f32 %v2684_v7  ;;  %v9652_v47 = vld [vmem:[#allocation75_spill] sm:$0xff] }
 0x1c5   : > { %vm3260_vm10 = vcmp.eq.s32.totalorder %v5814_v34, %v3197_v54  ;;  %vm9644_vm12 = vcmp.lt.s32.totalorder %v9643_v5, 1000  ;;  %vm3247_vm3 = vcmp.eq.s32.totalorder %v5814_v34, %v3184_v57  ;;  %v4388_v8 = vtrunc.f32 %v2745_v46  ;;  %v1214_v54 = vpop.xlane.xlu1 %1213 }
 0x1c6   : > { %v3199_v12 = vsel %vm9644_vm12, %v3100_v17, 15  ;;  %v4422_v30 = vtrunc.f32 %v2762_v62  ;;  %v3565_v16 = vadd.f32 %v3564_v58, %v7210_v63  ;;  %v7371_v52 = vsel %vm3247_vm3, 1.0, %v9527_v3  ;;  %v9646_v17 = vld [vmem:[#allocation25_spill] sm:$0xff] }
 0x1c7   : > { %9645 = vst [vmem:[#allocation16_spill] sm:$0xff] %v7371_v52  ;;  %v4392_v59 = vtrunc.f32 %v2747_v18  ;;  %4738 = vrcp.f32 %v1208_v23  ;;  %vm2977_vm13 = vcmp.gt.s32.totalorder %v4260_v27, 0  ;;  %v3435_v50 = vadd.f32 %v7371_v52, %v3434_v35  ;;  %v7376_v7 = vpop.eup %4736  ;;  %2050 = vmin.xlane.f32.xlu0 %v9646_v17  ;;  %v7383_v23 = vpop.xlane.xlu0 %1276 }
 0x1c8   : > { %v3504_v31 = vmul.f32 %v7181_v61, %v7371_v52  ;;  %v7380_v62 = vsel %vm3260_vm10, 1.0, %v9527_v3  ;;  %v2764_v63 = vceil.f32 %v2701_v49  ;;  %v4389_v46 = vcvt.f32.s32 %v4388_v8 }
 0x1c9   : > { %9647 = vst [vmem:[#allocation39_spill] sm:$0xff] %v7380_v62  ;;  %v4393_v10 = vcvt.f32.s32 %v4392_v59  ;;  %4740 = vrcp.f32 %v7137_v56  ;;  %vm3262_vm15 = vcmp.eq.s32.totalorder %v5814_v34, %v3199_v12  ;;  %v2686_v61 = vmul.f32 15.0, %v7204_v42 }
 0x1ca   : > { %v3566_v35 = vadd.f32 %v3565_v16, %v3504_v31  ;;  %v2978_v58 = vsel %vm2977_vm13, %v4260_v27, 0  ;;  %v4423_v57 = vcvt.f32.s32 %v4422_v30  ;;  %v4245_v18 = vadd.s32 4294967295, %v4389_v46  ;;  %v9648_v16 = vld [vmem:[#allocation71_spill] sm:$0xff] }
 0x1cb   : > { %v4247_v5 = vadd.s32 4294967295, %v4393_v10  ;;  %4742 = vrcp.f32 %v1214_v54  ;;  %v7389_v52 = vmul.f32 %v7049_v6, %v7281_v19  ;;  %v7393_v49 = vmul.f32 %v7083_v24, %v7324_v1  ;;  %2065 = vmin.xlane.f32.xlu0 %v9648_v16  ;;  %v7403_v8 = vpop.xlane.xlu0 %1540  ;;  %v9650_v24 = vld [vmem:[#allocation114_spill] sm:$0xff]  ;;  %v9651_v54 = vld [vmem:[#allocation116_spill] sm:$0xff] }
 0x1cc   : > { %v7397_v56 = vmul.f32 %v7132_v21, %v7380_v62  ;;  %v7401_v27 = vsel %vm3262_vm15, 1.0, %v9527_v3  ;;  %v4426_v12 = vtrunc.f32 %v2764_v63  ;;  %vm2947_vm2 = vcmp.gt.s32.totalorder %v4245_v18, 0 }
 0x1cd   : > { %9649 = vst [vmem:[#allocation199_spill] sm:$0xff] %v7401_v27  ;;  %vm2951_vm4 = vcmp.gt.s32.totalorder %v4247_v5, 0  ;;  %vm3103_vm1 = vcmp.lt.s32.totalorder %v2978_v58, 14  ;;  %v2948_v6 = vsel %vm2947_vm2, %v4245_v18, 0  ;;  %v2749_v59 = vceil.f32 %v2686_v61 }
 0x1ce   : > { %v2952_v30 = vsel %vm2951_vm4, %v4247_v5, 0  ;;  %vm1542_vm11 = vcmp.eq.f32.partialorder %v9650_v24, %v7403_v8  ;;  %v4262_v31 = vadd.s32 4294967295, %v4423_v57  ;;  %v2703_v21 = vmul.f32 15.0, %v7319_v25  ;;  %v9653_v5 = vld [vmem:[#allocation18_spill] sm:$0xff] }
 0x1cf   : > { %vm3073_vm14 = vcmp.lt.s32.totalorder %v2948_v6, 14  ;;  %v1543_v46 = vsel %vm1542_vm11, %v9651_v54, inf  ;;  %v3436_v63 = vadd.f32 %v7195_v2, %v3435_v50  ;;  %vm3077_vm8 = vcmp.lt.s32.totalorder %v2952_v30, 14  ;;  %2080 = vmin.xlane.f32.xlu0 %v9652_v47  ;;  %v7415_v57 = vpop.xlane.xlu0 %1555  ;;  %v9656_v54 = vld [vmem:[#allocation21_spill] sm:$0xff]  ;;  %v9666_v47 = vld [vmem:[#allocation79_spill] sm:$0xff] }
 0x1d0   : > { %v3074_v10 = vsel %vm3073_vm14, %v2948_v6, 14  ;;  %1544 = vmin.xlane.f32.xlu1 %v1543_v46  ;;  %v3104_v16 = vsel %vm3103_vm1, %v2978_v58, 14  ;;  %v4427_v18 = vcvt.f32.s32 %v4426_v12  ;;  %vm9654_vm5 = vcmp.lt.s32.totalorder %v9653_v5, 1000  ;;  %9655 = vst [vmem:[#allocation114_spill] sm:$0xff] %v7415_v57  ;;  %v9658_v46 = vld [vmem:[#allocation117_spill] sm:$0xff] }
 0x1d1   : > { %v3186_v61 = vsel %vm9654_vm5, %v3074_v10, 15  ;;  %v3078_v17 = vsel %vm3077_vm8, %v2952_v30, 14  ;;  %v7413_v24 = vpop.eup %4738  ;;  %v3567_v6 = vadd.f32 %v3566_v35, %v7225_v40  ;;  %vm9657_vm7 = vcmp.lt.s32.totalorder %v9656_v54, 1000  ;;  %v9660_v30 = vld [vmem:[#allocation78_spill] sm:$0xff] }
 0x1d2   : > { %vm3249_vm6 = vcmp.eq.s32.totalorder %v5814_v34, %v3186_v61  ;;  %v3188_v50 = vsel %vm9657_vm7, %v3078_v17, 15  ;;  %v4396_v2 = vtrunc.f32 %v2749_v59  ;;  %vm1557_vm0 = vcmp.eq.f32.partialorder %v9658_v46, %v7415_v57  ;;  %v9662_v35 = vld [vmem:[#allocation74_spill] sm:$0xff] }
 0x1d3   : > { %vm2981_vm9 = vcmp.gt.s32.totalorder %v4262_v31, 0  ;;  %v7424_v58 = vsel %vm3249_vm6, 1.0, %v9527_v3  ;;  %vm3251_vm10 = vcmp.eq.s32.totalorder %v5814_v34, %v3188_v50  ;;  %v7427_v12 = vpop.eup %4740  ;;  %v1558_v10 = vsel %vm1557_vm0, %v9660_v30, inf  ;;  %2095 = vmin.xlane.f32.xlu0 %v9662_v35  ;;  %v7444_v46 = vpop.xlane.xlu0 %1570 }
 0x1d4   : > { %9659 = vst [vmem:[#allocation116_spill] sm:$0xff] %v7424_v58  ;;  %v3437_v5 = vadd.f32 %v7424_v58, %v3436_v63  ;;  %v3506_v40 = vmul.f32 %v7189_v41, %v7424_v58  ;;  %v7434_v17 = vsel %vm3251_vm10, 1.0, %v9527_v3  ;;  %4744 = vrcp.f32 %v7158_v38  ;;  %1559 = vmin.xlane.f32.xlu1 %v1558_v10  ;;  %v1220_v63 = vpop.xlane.xlu1 %1219  ;;  %v9663_v10 = vld [vmem:[#allocation118_spill] sm:$0xff] }
 0x1d5   : > { %9661 = vst [vmem:[#allocation18_spill] sm:$0xff] %v7434_v17  ;;  %v7440_v59 = vmul.f32 %v7163_v39, %v7401_v27  ;;  %v2766_v61 = vceil.f32 %v2703_v21  ;;  %v4397_v54 = vcvt.f32.s32 %v4396_v2  ;;  %v7442_v50 = vpop.eup %4742  ;;  %v3508_v38 = vmul.f32 %v7197_v51, %v7434_v17  ;;  %v9664_v39 = vld [vmem:[#allocation42_spill] sm:$0xff]  ;;  %v9667_v51 = vld [vmem:[#allocation108_spill] sm:$0xff] }
 0x1d6   : > { %v3568_v41 = vadd.f32 %v3567_v6, %v3506_v40  ;;  %v3438_v30 = vadd.f32 %v7201_v11, %v3437_v5  ;;  %v2688_v58 = vmul.f32 15.0, %v7221_v33  ;;  %vm1572_vm12 = vcmp.eq.f32.partialorder %v9663_v10, %v7444_v46 }
 0x1d7   : > { %vm9665_vm3 = vcmp.lt.s32.totalorder %v9664_v39, 1000  ;;  %v2982_v2 = vsel %vm2981_vm9, %v4262_v31, 0  ;;  %v4249_v35 = vadd.s32 4294967295, %v4397_v54  ;;  %v1573_v0 = vsel %vm1572_vm12, %v9666_v47, inf  ;;  %2110 = vmin.xlane.f32.xlu0 %v9667_v51  ;;  %v7459_v11 = vpop.xlane.xlu0 %1585  ;;  %v9669_v54 = vld [vmem:[#allocation82_spill] sm:$0xff] }
 0x1d8   : > { %v3201_v21 = vsel %vm9665_vm3, %v3104_v16, 15  ;;  %v4264_v57 = vadd.s32 4294967295, %v4427_v18  ;;  %v3439_v6 = vadd.f32 %v7434_v17, %v3438_v30  ;;  %v3569_v5 = vadd.f32 %v3568_v41, %v7229_v14  ;;  %1574 = vmin.xlane.f32.xlu1 %v1573_v0  ;;  %v9668_v18 = vld [vmem:[#allocation121_spill] sm:$0xff]  ;;  %v9671_v30 = vld [vmem:[#allocation24_spill] sm:$0xff] }
 0x1d9   : > { %4746 = vrcp.f32 %v1220_v63  ;;  %v4430_v40 = vtrunc.f32 %v2766_v61  ;;  %vm2955_vm13 = vcmp.gt.s32.totalorder %v4249_v35, 0  ;;  %v2751_v10 = vceil.f32 %v2688_v58  ;;  %v9670_v61 = vld [vmem:[#allocation83_spill] sm:$0xff] }
 0x1da   : > { %vm3264_vm15 = vcmp.eq.s32.totalorder %v5814_v34, %v3201_v21  ;;  %v2705_v16 = vmul.f32 15.0, %v7357_v32  ;;  %v3570_v31 = vadd.f32 %v3569_v5, %v3508_v38  ;;  %v2956_v47 = vsel %vm2955_vm13, %v4249_v35, 0  ;;  %v1226_v5 = vpop.xlane.xlu1 %1225 }
 0x1db   : > { %vm1587_vm2 = vcmp.eq.f32.partialorder %v9668_v18, %v7459_v11  ;;  %vm3107_vm4 = vcmp.lt.s32.totalorder %v2982_v2, 14  ;;  %vm3081_vm1 = vcmp.lt.s32.totalorder %v2956_v47, 14  ;;  %v4400_v14 = vtrunc.f32 %v2751_v10  ;;  %2125 = vmin.xlane.f32.xlu0 %v9670_v61  ;;  %v7471_v18 = vpop.xlane.xlu0 %1600 }
 0x1dc   : > { %v1588_v63 = vsel %vm1587_vm2, %v9669_v54, inf  ;;  %vm2985_vm11 = vcmp.gt.s32.totalorder %v4264_v57, 0  ;;  %v3082_v0 = vsel %vm3081_vm1, %v2956_v47, 14  ;;  %v3440_v58 = vadd.f32 %v7215_v20, %v3439_v6 }
 0x1dd   : > { %1589 = vmin.xlane.f32.xlu1 %v1588_v63  ;;  %v4431_v41 = vcvt.f32.s32 %v4430_v40  ;;  %vm9672_vm14 = vcmp.lt.s32.totalorder %v9671_v30, 1000  ;;  %v4401_v35 = vcvt.f32.s32 %v4400_v14  ;;  %v2690_v39 = vmul.f32 15.0, %v7233_v45  ;;  %v9673_v40 = vld [vmem:[#allocation104_spill] sm:$0xff] }
 0x1de   : > { %v3190_v38 = vsel %vm9672_vm14, %v3082_v0, 15  ;;  %v2768_v10 = vceil.f32 %v2705_v16  ;;  %v3571_v47 = vadd.f32 %v3570_v31, %v7238_v4  ;;  %v2692_v6 = vmul.f32 15.0, %v7245_v9  ;;  %v7476_v54 = vpop.eup %4744  ;;  %v9675_v0 = vld [vmem:[#allocation94_spill] sm:$0xff] }
 0x1df   : > { %vm3253_vm8 = vcmp.eq.s32.totalorder %v5814_v34, %v3190_v38  ;;  %4748 = vrcp.f32 %v7183_v13  ;;  %vm1602_vm5 = vcmp.eq.f32.partialorder %v9673_v40, %v7471_v18  ;;  %v4251_v63 = vadd.s32 4294967295, %v4401_v35  ;;  %v9677_v13 = vld [vmem:[#allocation41_spill] sm:$0xff]  ;;  %v7495_v20 = vpop.xlane.xlu0 %1615 }
 0x1e0   : > { %v7482_v14 = vsel %vm3253_vm8, 1.0, %v9527_v3  ;;  %v1603_v30 = vsel %vm1602_vm5, %v9675_v0, inf  ;;  %v7488_v16 = vsel %vm3264_vm15, 1.0, %v9527_v3  ;;  %2140 = vmin.xlane.f32.xlu0 %v9677_v13  ;;  %v2986_v38 = vsel %vm2985_vm11, %v4264_v57, 0  ;;  %v1232_v57 = vpop.xlane.xlu1 %1231 }
 0x1e1   : > { %9674 = vst [vmem:[#allocation21_spill] sm:$0xff] %v7482_v14  ;;  %9676 = vst [vmem:[#allocation117_spill] sm:$0xff] %v7488_v16  ;;  %v3441_v4 = vadd.f32 %v7482_v14, %v3440_v58  ;;  %v3510_v31 = vmul.f32 %v7204_v42, %v7482_v14  ;;  %1604 = vmin.xlane.f32.xlu1 %v1603_v30  ;;  %v4266_v40 = vadd.s32 4294967295, %v4431_v41  ;;  %vm2959_vm6 = vcmp.gt.s32.totalorder %v4251_v63, 0  ;;  %v9678_v58 = vld [vmem:[#allocation19_spill] sm:$0xff]  ;;  %v9679_v41 = vld [vmem:[#allocation113_spill] sm:$0xff] }
 0x1e2   : > { %v2753_v35 = vceil.f32 %v2690_v39  ;;  %v4434_v0 = vtrunc.f32 %v2768_v10  ;;  %v2960_v21 = vsel %vm2959_vm6, %v4251_v63, 0  ;;  %v2755_v61 = vceil.f32 %v2692_v6  ;;  %v9680_v10 = vld [vmem:[#allocation90_spill] sm:$0xff] }
 0x1e3   : > { %v3572_v17 = vadd.f32 %v3571_v47, %v3510_v31  ;;  %v7497_v51 = vpop.eup %4746  ;;  %vm1617_vm7 = vcmp.eq.f32.partialorder %v9678_v58, %v7495_v20  ;;  %v3108_v42 = vsel %vm3107_vm4, %v2982_v2, 14  ;;  %vm3085_vm0 = vcmp.lt.s32.totalorder %v2960_v21, 14  ;;  %v9681_v47 = vld [vmem:[#allocation27_spill] sm:$0xff]  ;;  %v7507_v31 = vpop.xlane.xlu0 %1630 }
 0x1e4   : > { %v4404_v30 = vtrunc.f32 %v2753_v35  ;;  %4750 = vrcp.f32 %v1226_v5  ;;  %v1618_v14 = vsel %vm1617_vm7, %v9679_v41, inf  ;;  %v3086_v39 = vsel %vm3085_vm0, %v2960_v21, 14  ;;  %2155 = vmin.xlane.f32.xlu0 %v9680_v10  ;;  %9683 = vst [vmem:[#allocation78_spill] sm:$0xff] %v7507_v31  ;;  %v9684_v21 = vld [vmem:[#allocation105_spill] sm:$0xff] }
 0x1e5   : > { %v3442_v13 = vadd.f32 %v7257_v37, %v3441_v4  ;;  %1619 = vmin.xlane.f32.xlu1 %v1618_v14  ;;  %vm3111_vm9 = vcmp.lt.s32.totalorder %v2986_v38, 14  ;;  %vm2989_vm10 = vcmp.gt.s32.totalorder %v4266_v40, 0  ;;  %vm9682_vm12 = vcmp.lt.s32.totalorder %v9681_v47, 1000  ;;  %v9685_v4 = vld [vmem:[#allocation44_spill] sm:$0xff] }
 0x1e6   : > { %v3192_v6 = vsel %vm9682_vm12, %v3086_v39, 15  ;;  %v4405_v63 = vcvt.f32.s32 %v4404_v30  ;;  %v4435_v2 = vcvt.f32.s32 %v4434_v0  ;;  %v3573_v5 = vadd.f32 %v3572_v17, %v7274_v43  ;;  %v9688_v0 = vld [vmem:[#allocation119_spill] sm:$0xff] }
 0x1e7   : > { %vm3255_vm3 = vcmp.eq.s32.totalorder %v5814_v34, %v3192_v6  ;;  %v4408_v35 = vtrunc.f32 %v2755_v61  ;;  %vm1632_vm13 = vcmp.eq.f32.partialorder %v9684_v21, %v7507_v31  ;;  %v7515_v14 = vmul.f32 %v7251_v48, %v7488_v16  ;;  %v9689_v48 = vld [vmem:[#allocation112_spill] sm:$0xff]  ;;  %v1238_v6 = vpop.xlane.xlu1 %1237  ;;  %v7533_v21 = vpop.xlane.xlu0 %1645 }
 0x1e8   : > { %vm9686_vm15 = vcmp.lt.s32.totalorder %v9685_v4, 1000  ;;  %v7522_v30 = vsel %vm3255_vm3, 1.0, %v9527_v3  ;;  %v1633_v41 = vsel %vm1632_vm13, %v9688_v0, inf  ;;  %v3112_v39 = vsel %vm3111_vm9, %v2986_v38, 14  ;;  %2170 = vmin.xlane.f32.xlu0 %v9689_v48  ;;  %9690 = vst [vmem:[#allocation42_spill] sm:$0xff] %v7533_v21  ;;  %v9692_v0 = vld [vmem:[#allocation46_spill] sm:$0xff] }
 0x1e9   : > { %v7519_v58 = vsel %vm9686_vm15, %v3108_v42, 15  ;;  %9687 = vst [vmem:[#allocation118_spill] sm:$0xff] %v7522_v30  ;;  %v3443_v43 = vadd.f32 %v7522_v30, %v3442_v13  ;;  %v3512_v17 = vmul.f32 %v7221_v33, %v7522_v30  ;;  %v7528_v61 = vpop.eup %4748  ;;  %4752 = vrcp.f32 %v7219_v55  ;;  %1634 = vmin.xlane.f32.xlu1 %v1633_v41  ;;  %v9691_v55 = vld [vmem:[#allocation125_spill] sm:$0xff] }
 0x1ea   : > { %v2990_v42 = vsel %vm2989_vm10, %v4266_v40, 0  ;;  %v4253_v47 = vadd.s32 4294967295, %v4405_v63  ;;  %4754 = vrcp.f32 %v1232_v57  ;;  %v4853_v38 = vmov 0   ;;  %v9694_v40 = vld [vmem:[#allocation120_spill] sm:$0xff] }
 0x1eb   : > { %4529 = vset.pattern.permute.xlu0 %v4853_v38  ;;  %4535 = vset.pattern.permute.xlu1 %v4853_v38  ;;  %v4268_v13 = vadd.s32 4294967295, %v4435_v2  ;;  %v3574_v4 = vadd.f32 %v3573_v5, %v3512_v17  ;;  %v4409_v33 = vcvt.f32.s32 %v4408_v35  ;;  %4756 = vrcp.f32 %v7247_v28  ;;  %v9695_v38 = vld [vmem:[#allocation22_spill] sm:$0xff]  ;;  %v7550_v35 = vpop.xlane.xlu0 %1660 }
 0x1ec   : > { %vm1647_vm2 = vcmp.eq.f32.partialorder %v9691_v55, %v7533_v21  ;;  %vm9693_vm4 = vcmp.lt.s32.totalorder %v9692_v0, 1000  ;;  %vm2963_vm1 = vcmp.gt.s32.totalorder %v4253_v47, 0  ;;  %vm3115_vm11 = vcmp.lt.s32.totalorder %v2990_v42, 14  ;;  %2185 = vmin.xlane.f32.xlu0 %v9695_v38  ;;  %9696 = vst [vmem:[#allocation79_spill] sm:$0xff] %v7550_v35  ;;  %v9768_v21 = vld [vmem:[#allocation155_spill] sm:$0xff] }
 0x1ed   : > { %v7540_v41 = vsel %vm9693_vm4, %v3112_v39, 15  ;;  %v1648_v57 = vsel %vm1647_vm2, %v9694_v40, inf  ;;  %v2964_v63 = vsel %vm2963_vm1, %v4253_v47, 0  ;;  %v4255_v30 = vadd.s32 4294967295, %v4409_v33  ;;  %v9697_v47 = vld [vmem:[#allocation107_spill] sm:$0xff]  ;;  %v9698_v33 = vld [vmem:[#allocation30_spill] sm:$0xff]  ;;  %v1244_v40 = vpop.xlane.xlu1 %1243 }
 0x1ee   : > { %4758 = vrcp.f32 %v1238_v6  ;;  %1649 = vmin.xlane.f32.xlu1 %v1648_v57  ;;  %vm3266_vm14 = vcmp.eq.s32.totalorder %v5814_v34, %v7519_v58  ;;  %v2707_v28 = vmul.f32 15.0, %v7413_v24  ;;  %vm3089_vm8 = vcmp.lt.s32.totalorder %v2964_v63, 14  ;;  %v7548_v5 = vpop.eup %4750  ;;  %v9700_v57 = vld [vmem:[#allocation127_spill] sm:$0xff] }
 0x1ef   : > { %v2694_v2 = vmul.f32 15.0, %v7261_v53  ;;  %vm2993_vm5 = vcmp.gt.s32.totalorder %v4268_v13, 0  ;;  %v3090_v39 = vsel %vm3089_vm8, %v2964_v63, 14  ;;  %v3444_v17 = vadd.f32 %v7281_v19, %v3443_v43  ;;  %v9701_v63 = vld [vmem:[#allocation126_spill] sm:$0xff] }
 0x1f0   : > { %vm2967_vm6 = vcmp.gt.s32.totalorder %v4255_v30, 0  ;;  %vm1662_vm7 = vcmp.eq.f32.partialorder %v9697_v47, %v7550_v35  ;;  %v3116_v6 = vsel %vm3115_vm11, %v2990_v42, 14  ;;  %vm9699_vm0 = vcmp.lt.s32.totalorder %v9698_v33, 1000  ;;  %2200 = vmin.xlane.f32.xlu0 %v9701_v63  ;;  %v7565_v33 = vpop.xlane.xlu0 %1675  ;;  %v9760_v35 = vld [vmem:[#allocation154_spill] sm:$0xff] }
 0x1f1   : > { %v3194_v55 = vsel %vm9699_vm0, %v3090_v39, 15  ;;  %v2968_v0 = vsel %vm2967_vm6, %v4255_v30, 0  ;;  %v1663_v37 = vsel %vm1662_vm7, %v9700_v57, inf  ;;  %v3575_v38 = vadd.f32 %v3574_v4, %v7389_v52  ;;  %9703 = vst [vmem:[#allocation82_spill] sm:$0xff] %v7565_v33 }
 0x1f2   : > { %vm3257_vm9 = vcmp.eq.s32.totalorder %v5814_v34, %v3194_v55  ;;  %vm3093_vm10 = vcmp.lt.s32.totalorder %v2968_v0, 14  ;;  %1664 = vmin.xlane.f32.xlu1 %v1663_v37  ;;  %v2994_v43 = vsel %vm2993_vm5, %v4268_v13, 0  ;;  %v2757_v19 = vceil.f32 %v2694_v2  ;;  %v9704_v55 = vld [vmem:[#allocation33_spill] sm:$0xff]  ;;  %v9706_v37 = vld [vmem:[#allocation28_spill] sm:$0xff] }
 0x1f3   : > { %v7563_v47 = vsel %vm3257_vm9, 1.0, %v9527_v3  ;;  %v3094_v42 = vsel %vm3093_vm10, %v2968_v0, 14  ;;  %vm9705_vm12 = vcmp.lt.s32.totalorder %v9704_v55, 1000  ;;  %v2696_v4 = vmul.f32 15.0, %v7268_v44  ;;  %v7573_v57 = vpop.eup %4752 }
 0x1f4   : > { %9702 = vst [vmem:[#allocation121_spill] sm:$0xff] %v7563_v47  ;;  %v3445_v30 = vadd.f32 %v7563_v47, %v3444_v17  ;;  %v3514_v39 = vmul.f32 %v7233_v45, %v7563_v47  ;;  %v3196_v52 = vsel %vm9705_vm12, %v3094_v42, 15  ;;  %vm1677_vm3 = vcmp.eq.f32.partialorder %v9706_v37, %v7565_v33  ;;  %v7578_v0 = vpop.eup %4754  ;;  %v9707_v17 = vld [vmem:[#allocation137_spill] sm:$0xff]  ;;  %v9709_v47 = vld [vmem:[#allocation128_spill] sm:$0xff] }
 0x1f5   : > { %v2770_v13 = vceil.f32 %v2707_v28  ;;  %vm3259_vm13 = vcmp.eq.s32.totalorder %v5814_v34, %v3196_v52  ;;  %v4412_v2 = vtrunc.f32 %v2757_v19  ;;  %v1678_v63 = vsel %vm1677_vm3, %v9707_v17, inf  ;;  %v7585_v55 = vpop.eup %4756  ;;  %2215 = vmin.xlane.f32.xlu0 %v9709_v47  ;;  %v9711_v52 = vld [vmem:[#allocation49_spill] sm:$0xff] }
 0x1f6   : > { %v3576_v48 = vadd.f32 %v3575_v38, %v3514_v39  ;;  %v7582_v45 = vsel %vm3259_vm13, 1.0, %v9527_v3  ;;  %v3446_v42 = vadd.f32 %v7324_v1, %v3445_v30  ;;  %4760 = vrcp.f32 %v7270_v60  ;;  %1679 = vmin.xlane.f32.xlu1 %v1678_v63  ;;  %v1250_v38 = vpop.xlane.xlu1 %1249  ;;  %v7593_v39 = vpop.xlane.xlu0 %1690  ;;  %v9713_v63 = vld [vmem:[#allocation31_spill] sm:$0xff] }
 0x1f7   : > { %9708 = vst [vmem:[#allocation24_spill] sm:$0xff] %v7582_v45  ;;  %vm3268_vm15 = vcmp.eq.s32.totalorder %v5814_v34, %v7540_v41  ;;  %v3516_v19 = vmul.f32 %v7245_v9, %v7582_v45  ;;  %v4413_v28 = vcvt.f32.s32 %v4412_v2  ;;  %9710 = vst [vmem:[#allocation104_spill] sm:$0xff] %v7593_v39  ;;  %vm9712_vm2 = vcmp.lt.s32.totalorder %v9711_v52, 1000  ;;  %v9714_v2 = vld [vmem:[#allocation139_spill] sm:$0xff] }
 0x1f8   : > { %v3207_v30 = vsel %vm9712_vm2, %v3116_v6, 15  ;;  %v3447_v37 = vadd.f32 %v7582_v45, %v3446_v42  ;;  %v3577_v60 = vadd.f32 %v3576_v48, %v7393_v49  ;;  %v2759_v17 = vceil.f32 %v2696_v4  ;;  %v7599_v1 = vpop.eup %4758  ;;  %v9716_v49 = vld [vmem:[#allocation138_spill] sm:$0xff] }
 0x1f9   : > { %vm1692_vm4 = vcmp.eq.f32.partialorder %v9713_v63, %v7593_v39  ;;  %vm3119_vm1 = vcmp.lt.s32.totalorder %v2994_v43, 14  ;;  %v4438_v47 = vtrunc.f32 %v2770_v13  ;;  %v4257_v9 = vadd.s32 4294967295, %v4413_v28  ;;  %2230 = vmin.xlane.f32.xlu0 %v9716_v49  ;;  %v9720_v28 = vld [vmem:[#allocation141_spill] sm:$0xff]  ;;  %v9721_v63 = vld [vmem:[#allocation140_spill] sm:$0xff] }
 0x1fa   : > { %4762 = vrcp.f32 %v1244_v40  ;;  %v1693_v33 = vsel %vm1692_vm4, %v9714_v2, inf  ;;  %v7608_v6 = vsel %vm3266_vm14, 1.0, %v9527_v3  ;;  %v3578_v42 = vadd.f32 %v3577_v60, %v3516_v19  ;;  %v7618_v4 = vpop.xlane.xlu0 %1705  ;;  %v1256_v41 = vpop.xlane.xlu1 %1255  ;;  %v9758_v39 = vld [vmem:[#allocation45_spill] sm:$0xff] }
 0x1fb   : > { %9715 = vst [vmem:[#allocation94_spill] sm:$0xff] %v7608_v6  ;;  %4764 = vrcp.f32 %v7294_v36  ;;  %1694 = vmin.xlane.f32.xlu1 %v1693_v33  ;;  %v7616_v48 = vsel %vm3268_vm15, 1.0, %v9527_v3  ;;  %vm2971_vm11 = vcmp.gt.s32.totalorder %v4257_v9, 0  ;;  %v4416_v40 = vtrunc.f32 %v2759_v17  ;;  %9718 = vst [vmem:[#allocation113_spill] sm:$0xff] %v7618_v4  ;;  %v9719_v36 = vld [vmem:[#allocation130_spill] sm:$0xff] }
 0x1fc   : > { %9717 = vst [vmem:[#allocation19_spill] sm:$0xff] %v7616_v48  ;;  %4766 = vrcp.f32 %v1250_v38  ;;  %vm3270_vm14 = vcmp.eq.s32.totalorder %v5814_v34, %v3207_v30  ;;  %v3120_v58 = vsel %vm3119_vm1, %v2994_v43, 14  ;;  %v2972_v13 = vsel %vm2971_vm11, %v4257_v9, 0  ;;  %v9722_v43 = vld [vmem:[#allocation52_spill] sm:$0xff] }
 0x1fd   : > { %vm1707_vm8 = vcmp.eq.f32.partialorder %v9719_v36, %v7618_v4  ;;  %v4439_v33 = vcvt.f32.s32 %v4438_v47  ;;  %v2709_v19 = vmul.f32 15.0, %v7442_v50  ;;  %vm3097_vm5 = vcmp.lt.s32.totalorder %v2972_v13, 14  ;;  %2245 = vmin.xlane.f32.xlu0 %v9721_v63  ;;  %v9724_v47 = vld [vmem:[#allocation36_spill] sm:$0xff]  ;;  %v9739_v4 = vld [vmem:[#allocation143_spill] sm:$0xff] }
 0x1fe   : > { %v1708_v52 = vsel %vm1707_vm8, %v9720_v28, inf  ;;  %v3098_v60 = vsel %vm3097_vm5, %v2972_v13, 14  ;;  %v3448_v38 = vadd.f32 %v7380_v62, %v3447_v37  ;;  %v4417_v17 = vcvt.f32.s32 %v4416_v40  ;;  %v7636_v45 = vpop.xlane.xlu0 %1720 }
 0x1ff   : > { %4768 = vrcp.f32 %v7312_v26  ;;  %1709 = vmin.xlane.f32.xlu1 %v1708_v52  ;;  %vm9723_vm6 = vcmp.lt.s32.totalorder %v9722_v43, 1000  ;;  %vm9725_vm7 = vcmp.lt.s32.totalorder %v9724_v47, 1000  ;;  %v2698_v36 = vmul.f32 15.0, %v7276_v29  ;;  %9726 = vst [vmem:[#allocation27_spill] sm:$0xff] %v7636_v45  ;;  %v9727_v26 = vld [vmem:[#allocation194_spill] sm:$0xff]  ;;  %v9728_v52 = vld [vmem:[#allocation37_spill] sm:$0xff] }
 0x200   : > { %v7631_v9 = vsel %vm9723_vm6, %v3120_v58, 15  ;;  %v3198_v2 = vsel %vm9725_vm7, %v3098_v60, 15  ;;  %v3579_v37 = vadd.f32 %v3578_v42, %v7397_v56  ;;  %v4259_v40 = vadd.s32 4294967295, %v4417_v17  ;;  %v7641_v28 = vpop.eup %4760  ;;  %v9730_v47 = vld [vmem:[#allocation142_spill] sm:$0xff]  ;;  %v9731_v42 = vld [vmem:[#allocation132_spill] sm:$0xff] }
 0x201   : > { %vm3261_vm0 = vcmp.eq.s32.totalorder %v5814_v34, %v3198_v2  ;;  %v2700_v13 = vmul.f32 15.0, %v9727_v26  ;;  %vm1722_vm9 = vcmp.eq.f32.partialorder %v9728_v52, %v7636_v45  ;;  %v4270_v58 = vadd.s32 4294967295, %v4439_v33  ;;  %2260 = vmin.xlane.f32.xlu0 %v9731_v42  ;;  %v1262_v52 = vpop.xlane.xlu1 %1261  ;;  %v9735_v42 = vld [vmem:[#allocation145_spill] sm:$0xff] }
 0x202   : > { %v2772_v43 = vceil.f32 %v2709_v19  ;;  %v7646_v60 = vsel %vm3261_vm0, 1.0, %v9527_v3  ;;  %v1723_v62 = vsel %vm1722_vm9, %v9730_v47, inf  ;;  %vm2975_vm10 = vcmp.gt.s32.totalorder %v4259_v40, 0  ;;  %v7660_v47 = vpop.xlane.xlu0 %1735 }
 0x203   : > { %9729 = vst [vmem:[#allocation105_spill] sm:$0xff] %v7646_v60  ;;  %v3449_v63 = vadd.f32 %v7646_v60, %v3448_v38  ;;  %v3518_v56 = vmul.f32 %v7261_v53, %v7646_v60  ;;  %4770 = vrcp.f32 %v1256_v41  ;;  %1724 = vmin.xlane.f32.xlu1 %v1723_v62  ;;  %v7656_v33 = vsel %vm3270_vm14, 1.0, %v9527_v3  ;;  %9733 = vst [vmem:[#allocation119_spill] sm:$0xff] %v7660_v47  ;;  %v9734_v62 = vld [vmem:[#allocation110_spill] sm:$0xff] }
 0x204   : > { %9732 = vst [vmem:[#allocation44_spill] sm:$0xff] %v7656_v33  ;;  %v2976_v19 = vsel %vm2975_vm10, %v4259_v40, 0  ;;  %v2761_v17 = vceil.f32 %v2698_v36  ;;  %v7658_v2 = vpop.eup %4762  ;;  %v2711_v38 = vmul.f32 15.0, %v7497_v51  ;;  %v2763_v41 = vceil.f32 %v2700_v13 }
 0x205   : > { %v3580_v53 = vadd.f32 %v3579_v37, %v3518_v56  ;;  %vm3101_vm12 = vcmp.lt.s32.totalorder %v2976_v19, 14  ;;  %v7663_v60 = vpop.eup %4764  ;;  %vm1737_vm3 = vcmp.eq.f32.partialorder %v9734_v62, %v7660_v47  ;;  %vm3272_vm13 = vcmp.eq.s32.totalorder %v5814_v34, %v7631_v9  ;;  %v9736_v37 = vld [vmem:[#allocation40_spill] sm:$0xff]  ;;  %v9738_v56 = vld [vmem:[#allocation197_spill] sm:$0xff]  ;;  %2275 = vmin.xlane.f32.xlu0 %v9739_v4  ;;  %v9744_v47 = vld [vmem:[#allocation14_spill] sm:$0xff] }
 0x206   : > { %v3102_v30 = vsel %vm3101_vm12, %v2976_v19, 14  ;;  %v3450_v36 = vadd.f32 %v7401_v27, %v3449_v63  ;;  %v7670_v40 = vpop.eup %4766  ;;  %v1738_v49 = vsel %vm1737_vm3, %v9735_v42, inf  ;;  %vm2997_vm15 = vcmp.gt.s32.totalorder %v4270_v58, 0  ;;  %v7679_v63 = vpop.xlane.xlu0 %1750  ;;  %v9753_v9 = vld [vmem:[#allocation12_spill] sm:$0xff] }
 0x207   : > { %v4442_v45 = vtrunc.f32 %v2772_v43  ;;  %vm9737_vm2 = vcmp.lt.s32.totalorder %v9736_v37, 1000  ;;  %4772 = vrcp.f32 %v9738_v56  ;;  %1739 = vmin.xlane.f32.xlu1 %v1738_v49  ;;  %v3581_v19 = vadd.f32 %v3580_v53, %v7440_v59  ;;  %9740 = vst [vmem:[#allocation125_spill] sm:$0xff] %v7679_v63 }
 0x208   : > { %v3200_v13 = vsel %vm9737_vm2, %v3102_v30, 15  ;;  %v4420_v62 = vtrunc.f32 %v2761_v17  ;;  %4774 = vrcp.f32 %v1262_v52  ;;  %v2774_v27 = vceil.f32 %v2711_v38  ;;  %v9742_v30 = vld [vmem:[#allocation38_spill] sm:$0xff]  ;;  %v1268_v17 = vpop.xlane.xlu1 %1267  ;;  %v9743_v52 = vld [vmem:[#allocation147_spill] sm:$0xff] }
 0x209   : > { %vm3263_vm4 = vcmp.eq.s32.totalorder %v5814_v34, %v3200_v13  ;;  %v4424_v43 = vtrunc.f32 %v2763_v41  ;;  %v7684_v37 = vpop.eup %4768  ;;  %vm1752_vm1 = vcmp.eq.f32.partialorder %v9742_v30, %v7679_v63  ;;  %v2998_v49 = vsel %vm2997_vm15, %v4270_v58, 0  ;;  %v9745_v41 = vld [vmem:[#allocation146_spill] sm:$0xff]  ;;  %v9746_v30 = vld [vmem:[#allocation32_spill] sm:$0xff] }
 0x20a   : > { %v7682_v42 = vsel %vm3263_vm4, 1.0, %v9527_v3  ;;  %v1753_v53 = vsel %vm1752_vm1, %v9743_v52, inf  ;;  %v4443_v38 = vcvt.f32.s32 %v4442_v45  ;;  %v4421_v56 = vcvt.f32.s32 %v4420_v62  ;;  %2290 = vmin.xlane.f32.xlu0 %v9745_v41 }
 0x20b   : > { %9741 = vst [vmem:[#allocation46_spill] sm:$0xff] %v7682_v42  ;;  %v3451_v13 = vadd.f32 %v7682_v42, %v3450_v36  ;;  %v3520_v59 = vmul.f32 %v7268_v44, %v7682_v42  ;;  %v4425_v4 = vcvt.f32.s32 %v4424_v43  ;;  %4776 = vrcp.f32 %v9744_v47  ;;  %1754 = vmin.xlane.f32.xlu1 %v1753_v53  ;;  %v7703_v36 = vpop.xlane.xlu0 %1765  ;;  %v9748_v47 = vld [vmem:[#allocation87_spill] sm:$0xff] }
 0x20c   : > { %v7697_v63 = vmul.f32 %v9746_v30, %v7608_v6  ;;  %v7701_v58 = vmul.f32 %v7302_v15, %v7616_v48  ;;  %9747 = vst [vmem:[#allocation120_spill] sm:$0xff] %v7703_v36  ;;  %vm3123_vm11 = vcmp.lt.s32.totalorder %v2998_v49, 14  ;;  %v4446_v45 = vtrunc.f32 %v2774_v27 }
 0x20d   : > { %v3582_v44 = vadd.f32 %v3581_v19, %v3520_v59  ;;  %v4261_v62 = vadd.s32 4294967295, %v4421_v56  ;;  %v4263_v43 = vadd.s32 4294967295, %v4425_v4  ;;  %v7705_v52 = vpop.eup %4770  ;;  %4778 = vrcp.f32 %v1268_v17  ;;  %v9750_v19 = vld [vmem:[#allocation91_spill] sm:$0xff] }
 0x20e   : > { %vm1767_vm14 = vcmp.eq.f32.partialorder %v9748_v47, %v7703_v36  ;;  %v7711_v53 = vmul.f32 %v7319_v25, %v7656_v33  ;;  %v7717_v15 = vsel %vm3272_vm13, 1.0, %v9527_v3  ;;  %v4272_v59 = vadd.s32 4294967295, %v4443_v38  ;;  %v9751_v4 = vld [vmem:[#allocation111_spill] sm:$0xff]  ;;  %v9754_v38 = vld [vmem:[#allocation98_spill] sm:$0xff] }
 0x20f   : > { %9749 = vst [vmem:[#allocation107_spill] sm:$0xff] %v7717_v15  ;;  %v1768_v27 = vsel %vm1767_vm14, %v9750_v19, inf  ;;  %vm2979_vm8 = vcmp.gt.s32.totalorder %v4261_v62, 0  ;;  %vm2983_vm5 = vcmp.gt.s32.totalorder %v4263_v43, 0  ;;  %4780 = vrcp.f32 %v7363_v22  ;;  %2305 = vmin.xlane.f32.xlu0 %v9751_v4  ;;  %v7723_v30 = vpop.xlane.xlu0 %1780 }
 0x210   : > { %1769 = vmin.xlane.f32.xlu1 %v1768_v27  ;;  %v3124_v17 = vsel %vm3123_vm11, %v2998_v49, 14  ;;  %v2980_v25 = vsel %vm2979_vm8, %v4261_v62, 0  ;;  %v2984_v56 = vsel %vm2983_vm5, %v4263_v43, 0  ;;  %9752 = vst [vmem:[#allocation30_spill] sm:$0xff] %v7723_v30  ;;  %v4447_v47 = vcvt.f32.s32 %v4446_v45  ;;  %v1274_v49 = vpop.xlane.xlu1 %1273  ;;  %v9755_v62 = vld [vmem:[#allocation150_spill] sm:$0xff]  ;;  %v9756_v45 = vld [vmem:[#allocation43_spill] sm:$0xff] }
 0x211   : > { %vm3105_vm6 = vcmp.lt.s32.totalorder %v2980_v25, 14  ;;  %vm3109_vm7 = vcmp.lt.s32.totalorder %v2984_v56, 14  ;;  %v2702_v42 = vmul.f32 15.0, %v9753_v9  ;;  %v7726_v19 = vpop.eup %4772  ;;  %vm1782_vm0 = vcmp.eq.f32.partialorder %v9754_v38, %v7723_v30 }
 0x212   : > { %v3106_v22 = vsel %vm3105_vm6, %v2980_v25, 14  ;;  %v3452_v36 = vadd.f32 %v7488_v16, %v3451_v13  ;;  %v3110_v27 = vsel %vm3109_vm7, %v2984_v56, 14  ;;  %v7731_v4 = vpop.eup %4774  ;;  %v1783_v43 = vsel %vm1782_vm0, %v9755_v62, inf }
 0x213   : > { %vm3001_vm9 = vcmp.gt.s32.totalorder %v4272_v59, 0  ;;  %vm9757_vm10 = vcmp.lt.s32.totalorder %v9756_v45, 1000  ;;  %vm9759_vm12 = vcmp.lt.s32.totalorder %v9758_v39, 1000  ;;  %2320 = vmin.xlane.f32.xlu0 %v9760_v35  ;;  %v2713_v25 = vmul.f32 15.0, %v7548_v5  ;;  %v7743_v56 = vpop.xlane.xlu0 %1795  ;;  %v9766_v45 = vld [vmem:[#allocation99_spill] sm:$0xff] }
 0x214   : > { %v3202_v41 = vsel %vm9757_vm10, %v3106_v22, 15  ;;  %v3204_v10 = vsel %vm9759_vm12, %v3110_v27, 15  ;;  %1784 = vmin.xlane.f32.xlu1 %v1783_v43  ;;  %v3583_v13 = vadd.f32 %v3582_v44, %v7515_v14  ;;  %9761 = vst [vmem:[#allocation127_spill] sm:$0xff] %v7743_v56  ;;  %v2765_v39 = vceil.f32 %v2702_v42  ;;  %v9764_v27 = vld [vmem:[#allocation198_spill] sm:$0xff]  ;;  %v9767_v44 = vld [vmem:[#allocation151_spill] sm:$0xff] }
 0x215   : > { %vm3265_vm3 = vcmp.eq.s32.totalorder %v5814_v34, %v3202_v41  ;;  %vm3267_vm13 = vcmp.eq.s32.totalorder %v5814_v34, %v3204_v10  ;;  %v2704_v62 = vmul.f32 15.0, %v9764_v27  ;;  %v7752_v43 = vpop.eup %4776  ;;  %vm1797_vm15 = vcmp.eq.f32.partialorder %v9766_v45, %v7743_v56  ;;  %v9769_v45 = vld [vmem:[#allocation54_spill] sm:$0xff] }
 0x216   : > { %v7746_v38 = vsel %vm3265_vm3, 1.0, %v9527_v3  ;;  %v7749_v22 = vsel %vm3267_vm13, 1.0, %v9527_v3  ;;  %9765 = vst [vmem:[#allocation137_spill] sm:$0xff] %v7752_v43  ;;  %v4274_v41 = vadd.s32 4294967295, %v4447_v47  ;;  %4782 = vrcp.f32 %v1274_v49 }
 0x217   : > { %9762 = vst [vmem:[#allocation33_spill] sm:$0xff] %v7746_v38  ;;  %9763 = vst [vmem:[#allocation28_spill] sm:$0xff] %v7749_v22  ;;  %v3453_v14 = vadd.f32 %v7746_v38, %v3452_v36  ;;  %v3522_v10 = vmul.f32 %v7276_v29, %v7746_v38  ;;  %v1798_v16 = vsel %vm1797_vm15, %v9767_v44, inf  ;;  %v3002_v35 = vsel %vm3001_vm9, %v4272_v59, 0  ;;  %v7761_v42 = vpop.eup %4778  ;;  %2335 = vmin.xlane.f32.xlu0 %v9768_v21  ;;  %v1280_v29 = vpop.xlane.xlu1 %1279 }
 0x218   : > { %v4428_v30 = vtrunc.f32 %v2765_v39  ;;  %1799 = vmin.xlane.f32.xlu1 %v1798_v16  ;;  %v2776_v43 = vceil.f32 %v2713_v25  ;;  %v3524_v36 = vmul.f32 %v9727_v26, %v7749_v22  ;;  %4784 = vrcp.f32 %v7383_v23  ;;  %v7768_v49 = vpop.xlane.xlu0 %1810  ;;  %v9771_v16 = vld [vmem:[#allocation135_spill] sm:$0xff]  ;;  %v9772_v23 = vld [vmem:[#allocation156_spill] sm:$0xff] }
 0x219   : > { %v3584_v31 = vadd.f32 %v3583_v13, %v3522_v10  ;;  %v3454_v47 = vadd.f32 %v7608_v6, %v3453_v14  ;;  %vm9770_vm2 = vcmp.lt.s32.totalorder %v9769_v45, 1000  ;;  %v2767_v44 = vceil.f32 %v2704_v62  ;;  %v7774_v38 = vpop.eup %4780 }
 0x21a   : > { %v7772_v59 = vsel %vm9770_vm2, %v3124_v17, 15  ;;  %v4429_v39 = vcvt.f32.s32 %v4428_v30  ;;  %vm1812_vm4 = vcmp.eq.f32.partialorder %v9771_v16, %v7768_v49  ;;  %vm3005_vm1 = vcmp.gt.s32.totalorder %v4274_v41, 0  ;;  %v9773_v17 = vld [vmem:[#allocation158_spill] sm:$0xff] }
 0x21b   : > { %v3455_v25 = vadd.f32 %v7749_v22, %v3454_v47  ;;  %v3585_v26 = vadd.f32 %v3584_v31, %v7697_v63  ;;  %v1813_v13 = vsel %vm1812_vm4, %v9772_v23, inf  ;;  %vm3127_vm11 = vcmp.lt.s32.totalorder %v3002_v35, 14  ;;  %2350 = vmin.xlane.f32.xlu0 %v9773_v17 }
 0x21c   : > { %v4265_v14 = vadd.s32 4294967295, %v4429_v39  ;;  %v4432_v10 = vtrunc.f32 %v2767_v44  ;;  %4786 = vrcp.f32 %v1280_v29  ;;  %1814 = vmin.xlane.f32.xlu1 %v1813_v13  ;;  %v7784_v30 = vmul.f32 %v7357_v32, %v7717_v15  ;;  %v7786_v16 = vpop.xlane.xlu0 %1825  ;;  %v9775_v39 = vld [vmem:[#allocation136_spill] sm:$0xff]  ;;  %v9776_v32 = vld [vmem:[#allocation7_spill] sm:$0xff] }
 0x21d   : > { %v4450_v62 = vtrunc.f32 %v2776_v43  ;;  %v3586_v45 = vadd.f32 %v3585_v26, %v3524_v36  ;;  %9774 = vst [vmem:[#allocation49_spill] sm:$0xff] %v7786_v16  ;;  %v3006_v47 = vsel %vm3005_vm1, %v4274_v41, 0  ;;  %v2706_v63 = vmul.f32 15.0, %v7376_v7  ;;  %v9777_v41 = vld [vmem:[#allocation5_spill] sm:$0xff] }
 0x21e   : > { %vm2987_vm14 = vcmp.gt.s32.totalorder %v4265_v14, 0  ;;  %v4433_v31 = vcvt.f32.s32 %v4432_v10  ;;  %vm1827_vm8 = vcmp.eq.f32.partialorder %v9775_v39, %v7786_v16  ;;  %vm3274_vm5 = vcmp.eq.s32.totalorder %v5814_v34, %v7772_v59 }
 0x21f   : > { %v3128_v29 = vsel %vm3127_vm11, %v3002_v35, 14  ;;  %v2988_v44 = vsel %vm2987_vm14, %v4265_v14, 0  ;;  %v1828_v23 = vsel %vm1827_vm8, %v9776_v32, inf  ;;  %v2715_v43 = vmul.f32 15.0, %v7578_v0  ;;  %2365 = vmin.xlane.f32.xlu0 %v9777_v41  ;;  %v9779_v35 = vld [vmem:[#allocation47_spill] sm:$0xff] }
 0x220   : > { %vm3113_vm6 = vcmp.lt.s32.totalorder %v2988_v44, 14  ;;  %v4267_v36 = vadd.s32 4294967295, %v4433_v31  ;;  %1829 = vmin.xlane.f32.xlu1 %v1828_v23  ;;  %vm3131_vm7 = vcmp.lt.s32.totalorder %v3006_v47, 14  ;;  %v4451_v26 = vcvt.f32.s32 %v4450_v62  ;;  %v7798_v39 = vpop.eup %4782  ;;  %v7800_v22 = vpop.xlane.xlu0 %1840  ;;  %v9781_v31 = vld [vmem:[#allocation101_spill] sm:$0xff]  ;;  %v9782_v23 = vld [vmem:[#allocation8_spill] sm:$0xff] }
 0x221   : > { %v3114_v13 = vsel %vm3113_vm6, %v2988_v44, 14  ;;  %v3456_v10 = vadd.f32 %v7616_v48, %v3455_v25  ;;  %9778 = vst [vmem:[#allocation31_spill] sm:$0xff] %v7800_v22  ;;  %vm9780_vm0 = vcmp.lt.s32.totalorder %v9779_v35, 1000  ;;  %v2769_v32 = vceil.f32 %v2706_v63  ;;  %v9784_v63 = vld [vmem:[#allocation6_spill] sm:$0xff] }
 0x222   : > { %v3206_v14 = vsel %vm9780_vm0, %v3114_v13, 15  ;;  %vm2991_vm9 = vcmp.gt.s32.totalorder %v4267_v36, 0  ;;  %v2708_v6 = vmul.f32 15.0, %v7427_v12  ;;  %vm1842_vm10 = vcmp.eq.f32.partialorder %v9781_v31, %v7800_v22  ;;  %v7809_v25 = vpop.eup %4784  ;;  %v9785_v13 = vld [vmem:[#allocation56_spill] sm:$0xff] }
 0x223   : > { %vm3269_vm12 = vcmp.eq.s32.totalorder %v5814_v34, %v3206_v14  ;;  %v3587_v62 = vadd.f32 %v3586_v45, %v7701_v58  ;;  %v2992_v44 = vsel %vm2991_vm9, %v4267_v36, 0  ;;  %v1843_v48 = vsel %vm1842_vm10, %v9782_v23, inf  ;;  %2380 = vmin.xlane.f32.xlu0 %v9784_v63  ;;  %v9788_v23 = vld [vmem:[#allocation50_spill] sm:$0xff] }
 0x224   : > { %v2778_v16 = vceil.f32 %v2715_v43  ;;  %v7813_v35 = vsel %vm3269_vm12, 1.0, %v9527_v3  ;;  %vm3117_vm3 = vcmp.lt.s32.totalorder %v2992_v44, 14  ;;  %1844 = vmin.xlane.f32.xlu1 %v1843_v48  ;;  %vm9786_vm13 = vcmp.lt.s32.totalorder %v9785_v13, 1000  ;;  %v7821_v36 = vpop.xlane.xlu0 %1855  ;;  %v9790_v48 = vld [vmem:[#allocation102_spill] sm:$0xff] }
 0x225   : > { %9783 = vst [vmem:[#allocation139_spill] sm:$0xff] %v7813_v35  ;;  %v3213_v31 = vsel %vm9786_vm13, %v3128_v29, 15  ;;  %v3457_v14 = vadd.f32 %v7813_v35, %v3456_v10  ;;  %v3526_v58 = vmul.f32 %v9753_v9, %v7813_v35  ;;  %v3118_v45 = vsel %vm3117_vm3, %v2992_v44, 14  ;;  %9787 = vst [vmem:[#allocation130_spill] sm:$0xff] %v7821_v36  ;;  %v9791_v9 = vld [vmem:[#allocation168_spill] sm:$0xff] }
 0x226   : > { %v3132_v43 = vsel %vm3131_vm7, %v3006_v47, 14  ;;  %vm9789_vm15 = vcmp.lt.s32.totalorder %v9788_v23, 1000  ;;  %v4436_v41 = vtrunc.f32 %v2769_v32  ;;  %v2771_v22 = vceil.f32 %v2708_v6  ;;  %v7826_v63 = vpop.eup %4786  ;;  %v9793_v6 = vld [vmem:[#allocation164_spill] sm:$0xff] }
 0x227   : > { %v3208_v56 = vsel %vm9789_vm15, %v3118_v45, 15  ;;  %vm1857_vm2 = vcmp.eq.f32.partialorder %v9790_v48, %v7821_v36  ;;  %v4276_v29 = vadd.s32 4294967295, %v4451_v26  ;;  %v3588_v10 = vadd.f32 %v3587_v62, %v3526_v58  ;;  %2395 = vmin.xlane.f32.xlu0 %v9793_v6  ;;  %v9795_v45 = vld [vmem:[#allocation48_spill] sm:$0xff] }
 0x228   : > { %vm3271_vm4 = vcmp.eq.s32.totalorder %v5814_v34, %v3208_v56  ;;  %v1858_v44 = vsel %vm1857_vm2, %v9791_v9, inf  ;;  %v4454_v13 = vtrunc.f32 %v2778_v16  ;;  %v3458_v47 = vadd.f32 %v7656_v33, %v3457_v14  ;;  %v7847_v62 = vpop.xlane.xlu0 %1870  ;;  %v9796_v23 = vld [vmem:[#allocation60_spill] sm:$0xff] }
 0x229   : > { %v7833_v35 = vsel %vm3271_vm4, 1.0, %v9527_v3  ;;  %v1547_v32 = vcvt.f32.s32 %v7403_v8  ;;  %1859 = vmin.xlane.f32.xlu1 %v1858_v44  ;;  %v7842_v26 = vsel %vm3274_vm5, 1.0, %v9527_v3  ;;  %v3589_v16 = vadd.f32 %v3588_v10, %v7711_v53 }
 0x22a   : > { %9792 = vst [vmem:[#allocation141_spill] sm:$0xff] %v7833_v35  ;;  %9794 = vst [vmem:[#allocation52_spill] sm:$0xff] %v7842_v26  ;;  %v3528_v56 = vmul.f32 %v9764_v27, %v7833_v35  ;;  %vm3276_vm1 = vcmp.eq.s32.totalorder %v5814_v34, %v3213_v31  ;;  %v3459_v8 = vadd.f32 %v7833_v35, %v3458_v47  ;;  %v4437_v14 = vcvt.f32.s32 %v4436_v41  ;;  %v9798_v27 = vld [vmem:[#allocation169_spill] sm:$0xff]  ;;  %v9800_v35 = vld [vmem:[#allocation171_spill] sm:$0xff] }
 0x22b   : > { %v4440_v58 = vtrunc.f32 %v2771_v22  ;;  %vm1872_vm11 = vcmp.eq.f32.partialorder %v9795_v45, %v7847_v62  ;;  %vm9797_vm14 = vcmp.lt.s32.totalorder %v9796_v23, 1000  ;;  %vm3009_vm8 = vcmp.gt.s32.totalorder %v4276_v29, 0  ;;  %v9799_v22 = vld [vmem:[#allocation114_spill] sm:$0xff]  ;;  %2410 = vmin.xlane.f32.xlu0 %v9800_v35  ;;  %v9804_v31 = vld [vmem:[#allocation173_spill] sm:$0xff]  ;;  %v9805_v41 = vld [vmem:[#allocation172_spill] sm:$0xff] }
 0x22c   : > { %v7855_v59 = vsel %vm9797_vm14, %v3132_v43, 15  ;;  %v3590_v48 = vadd.f32 %v3589_v16, %v3528_v56  ;;  %v1873_v9 = vsel %vm1872_vm11, %v9798_v27, inf  ;;  %v7860_v53 = vmul.f32 %v7413_v24, %v7842_v26  ;;  %v7871_v16 = vpop.xlane.xlu0 %1885 }
 0x22d   : > { %v4455_v10 = vcvt.f32.s32 %v4454_v13  ;;  %v4269_v44 = vadd.s32 4294967295, %v4437_v14  ;;  %v7862_v47 = vshll.u32 %v1547_v32, 16  ;;  %1874 = vmin.xlane.f32.xlu1 %v1873_v9  ;;  %v7869_v43 = vsel %vm3276_vm1, 1.0, %v9527_v3  ;;  %9802 = vst [vmem:[#allocation194_spill] sm:$0xff] %v7871_v16  ;;  %v9803_v32 = vld [vmem:[#allocation51_spill] sm:$0xff] }
 0x22e   : > { %9801 = vst [vmem:[#allocation36_spill] sm:$0xff] %v7869_v43  ;;  %v4441_v56 = vcvt.f32.s32 %v4440_v58  ;;  %vm3278_vm5 = vcmp.eq.s32.totalorder %v5814_v34, %v7855_v59  ;;  %v3010_v24 = vsel %vm3009_vm8, %v4276_v29, 0  ;;  %v2710_v13 = vmul.f32 15.0, %v7476_v54 }
 0x22f   : > { %vm2995_vm6 = vcmp.gt.s32.totalorder %v4269_v44, 0  ;;  %vm1887_vm7 = vcmp.eq.f32.partialorder %v9803_v32, %v7871_v16  ;;  %v2717_v14 = vmul.f32 15.0, %v7599_v1  ;;  %v4278_v9 = vadd.s32 4294967295, %v4455_v10  ;;  %2425 = vmin.xlane.f32.xlu0 %v9805_v41  ;;  %v9806_v32 = vld [vmem:[#allocation53_spill] sm:$0xff] }
 0x230   : > { %v2996_v45 = vsel %vm2995_vm6, %v4269_v44, 0  ;;  %v4271_v23 = vadd.s32 4294967295, %v4441_v56  ;;  %v1888_v27 = vsel %vm1887_vm7, %v9804_v31, inf  ;;  %v2773_v58 = vceil.f32 %v2710_v13  ;;  %v7883_v35 = vpop.xlane.xlu0 %1900  ;;  %v9808_v13 = vld [vmem:[#allocation103_spill] sm:$0xff] }
 0x231   : > { %vm3121_vm0 = vcmp.lt.s32.totalorder %v2996_v45, 14  ;;  %1889 = vmin.xlane.f32.xlu1 %v1888_v27  ;;  %v2719_v29 = vmul.f32 15.0, %v7658_v2  ;;  %v3460_v36 = vadd.f32 %v7717_v15, %v3459_v8  ;;  %vm9807_vm10 = vcmp.lt.s32.totalorder %v9806_v32, 1000 }
 0x232   : > { %v3122_v33 = vsel %vm3121_vm0, %v2996_v45, 14  ;;  %vm2999_vm9 = vcmp.gt.s32.totalorder %v4271_v23, 0  ;;  %v4444_v16 = vtrunc.f32 %v2773_v58  ;;  %v2712_v10 = vmul.f32 15.0, %v7528_v61  ;;  %v9809_v45 = vld [vmem:[#allocation175_spill] sm:$0xff] }
 0x233   : > { %v3210_v44 = vsel %vm9807_vm10, %v3122_v33, 15  ;;  %v3000_v56 = vsel %vm2999_vm9, %v4271_v23, 0  ;;  %vm1902_vm12 = vcmp.eq.f32.partialorder %v9808_v13, %v7883_v35  ;;  %v3591_v31 = vadd.f32 %v3590_v48, %v7784_v30  ;;  %v9811_v33 = vld [vmem:[#allocation174_spill] sm:$0xff] }
 0x234   : > { %vm3273_vm3 = vcmp.eq.s32.totalorder %v5814_v34, %v3210_v44  ;;  %vm3125_vm13 = vcmp.lt.s32.totalorder %v3000_v56, 14  ;;  %v1903_v8 = vsel %vm1902_vm12, %v9809_v45, inf  ;;  %vm3013_vm15 = vcmp.gt.s32.totalorder %v4278_v9, 0  ;;  %2440 = vmin.xlane.f32.xlu0 %v9811_v33  ;;  %v9812_v44 = vld [vmem:[#allocation55_spill] sm:$0xff]  ;;  %v7902_v48 = vpop.xlane.xlu0 %1915  ;;  %v9816_v33 = vld [vmem:[#allocation177_spill] sm:$0xff] }
 0x235   : > { %v7894_v27 = vsel %vm3273_vm3, 1.0, %v9527_v3  ;;  %v3126_v32 = vsel %vm3125_vm13, %v3000_v56, 14  ;;  %1904 = vmin.xlane.f32.xlu1 %v1903_v8  ;;  %v2780_v23 = vceil.f32 %v2717_v14  ;;  %vm9813_vm2 = vcmp.lt.s32.totalorder %v9812_v44, 1000  ;;  %v9814_v56 = vld [vmem:[#allocation58_spill] sm:$0xff]  ;;  %v9817_v44 = vld [vmem:[#allocation176_spill] sm:$0xff] }
 0x236   : > { %9810 = vst [vmem:[#allocation37_spill] sm:$0xff] %v7894_v27  ;;  %v3461_v58 = vadd.f32 %v7894_v27, %v3460_v36  ;;  %v3530_v13 = vmul.f32 %v7376_v7, %v7894_v27  ;;  %v3212_v30 = vsel %vm9813_vm2, %v3126_v32, 15  ;;  %v2782_v45 = vceil.f32 %v2719_v29  ;;  %v9830_v27 = vld [vmem:[#allocation57_spill] sm:$0xff] }
 0x237   : > { %vm3275_vm4 = vcmp.eq.s32.totalorder %v5814_v34, %v3212_v30  ;;  %v4445_v15 = vcvt.f32.s32 %v4444_v16  ;;  %v2775_v41 = vceil.f32 %v2712_v10  ;;  %vm1917_vm1 = vcmp.eq.f32.partialorder %v9814_v56, %v7902_v48 }
 0x238   : > { %v3014_v8 = vsel %vm3013_vm15, %v4278_v9, 0  ;;  %v3592_v14 = vadd.f32 %v3591_v31, %v3530_v13  ;;  %v7908_v36 = vsel %vm3275_vm4, 1.0, %v9527_v3  ;;  %v1918_v7 = vsel %vm1917_vm1, %v9816_v33, inf  ;;  %2455 = vmin.xlane.f32.xlu0 %v9817_v44  ;;  %v7922_v33 = vpop.xlane.xlu0 %1930 }
 0x239   : > { %9815 = vst [vmem:[#allocation142_spill] sm:$0xff] %v7908_v36  ;;  %vm3135_vm11 = vcmp.lt.s32.totalorder %v3010_v24, 14  ;;  %v3462_v32 = vadd.f32 %v7842_v26, %v3461_v58  ;;  %v3532_v29 = vmul.f32 %v7427_v12, %v7908_v36  ;;  %1919 = vmin.xlane.f32.xlu1 %v1918_v7  ;;  %v7919_v16 = vsel %vm3278_vm5, 1.0, %v9527_v3  ;;  %v9820_v7 = vld [vmem:[#allocation122_spill] sm:$0xff] }
 0x23a   : > { %9818 = vst [vmem:[#allocation110_spill] sm:$0xff] %v7919_v16  ;;  %v4458_v9 = vtrunc.f32 %v2780_v23  ;;  %v3593_v10 = vadd.f32 %v3592_v14, %v7860_v53  ;;  %v4273_v31 = vadd.s32 4294967295, %v4445_v15  ;;  %vm3139_vm14 = vcmp.lt.s32.totalorder %v3014_v8, 14  ;;  %v9821_v15 = vld [vmem:[#allocation178_spill] sm:$0xff] }
 0x23b   : > { %v4462_v58 = vtrunc.f32 %v2782_v45  ;;  %v3463_v13 = vadd.f32 %v7908_v36, %v3462_v32  ;;  %v4448_v12 = vtrunc.f32 %v2775_v41  ;;  %v9819_v30 = vcvt.f32.s32 %v9799_v22  ;;  %v9822_v32 = vld [vmem:[#allocation179_spill] sm:$0xff] }
 0x23c   : > { %vm1932_vm8 = vcmp.eq.f32.partialorder %v9820_v7, %v7922_v33  ;;  %v3136_v59 = vsel %vm3135_vm11, %v3010_v24, 14  ;;  %v3594_v23 = vadd.f32 %v3593_v10, %v3532_v29  ;;  %v3533_v45 = vmul.f32 %v7442_v50, %v7869_v43  ;;  %2470 = vmin.xlane.f32.xlu0 %v9822_v32  ;;  %v7939_v36 = vpop.xlane.xlu0 %1945  ;;  %v9824_v24 = vld [vmem:[#allocation64_spill] sm:$0xff]  ;;  %v9826_v50 = vld [vmem:[#allocation59_spill] sm:$0xff] }
 0x23d   : > { %v7927_v56 = vshll.u32 %v9819_v30, 16  ;;  %v1933_v14 = vsel %vm1932_vm8, %v9821_v15, inf  ;;  %vm3003_vm5 = vcmp.gt.s32.totalorder %v4273_v31, 0  ;;  %v3535_v22 = vmul.f32 %v7497_v51, %v7919_v16  ;;  %9823 = vst [vmem:[#allocation145_spill] sm:$0xff] %v7939_v36  ;;  %v9827_v51 = vld [vmem:[#allocation180_spill] sm:$0xff] }
 0x23e   : > { %1934 = vmin.xlane.f32.xlu1 %v1933_v14  ;;  %v3140_v41 = vsel %vm3139_vm14, %v3014_v8, 14  ;;  %v4459_v30 = vcvt.f32.s32 %v4458_v9  ;;  %v3004_v7 = vsel %vm3003_vm5, %v4273_v31, 0  ;;  %vm9825_vm6 = vcmp.lt.s32.totalorder %v9824_v24, 1000  ;;  %v9828_v9 = vld [vmem:[#allocation68_spill] sm:$0xff] }
 0x23f   : > { %v3217_v29 = vsel %vm9825_vm6, %v3136_v59, 15  ;;  %v4463_v10 = vcvt.f32.s32 %v4462_v58  ;;  %vm3129_vm7 = vcmp.lt.s32.totalorder %v3004_v7, 14  ;;  %v4449_v15 = vcvt.f32.s32 %v4448_v12 }
 0x240   : > { %vm1947_vm0 = vcmp.eq.f32.partialorder %v9826_v50, %v7939_v36  ;;  %v3130_v53 = vsel %vm3129_vm7, %v3004_v7, 14  ;;  %v3464_v14 = vadd.f32 %v7869_v43, %v3463_v13  ;;  %v2714_v26 = vmul.f32 15.0, %v7573_v57  ;;  %v7953_v7 = vpop.xlane.xlu0 %1960 }
 0x241   : > { %v1948_v8 = vsel %vm1947_vm0, %v9827_v51, inf  ;;  %vm9829_vm9 = vcmp.lt.s32.totalorder %v9828_v9, 1000  ;;  %vm9831_vm10 = vcmp.lt.s32.totalorder %v9830_v27, 1000  ;;  %v4275_v59 = vadd.s32 4294967295, %v4449_v15  ;;  %v9833_v27 = vld [vmem:[#allocation62_spill] sm:$0xff] }
 0x242   : > { %v3219_v31 = vsel %vm9829_vm9, %v3140_v41, 15  ;;  %v3214_v24 = vsel %vm9831_vm10, %v3130_v53, 15  ;;  %1949 = vmin.xlane.f32.xlu1 %v1948_v8  ;;  %v4280_v58 = vadd.s32 4294967295, %v4459_v30  ;;  %v3595_v12 = vadd.f32 %v3594_v23, %v3533_v45 }
 0x243   : > { %vm3277_vm12 = vcmp.eq.s32.totalorder %v5814_v34, %v3214_v24  ;;  %v2777_v50 = vceil.f32 %v2714_v26  ;;  %vm3280_vm3 = vcmp.eq.s32.totalorder %v5814_v34, %v3217_v29  ;;  %vm3007_vm13 = vcmp.gt.s32.totalorder %v4275_v59, 0  ;;  %v9834_v26 = vld [vmem:[#allocation181_spill] sm:$0xff] }
 0x244   : > { %v7957_v13 = vsel %vm3277_vm12, 1.0, %v9527_v3  ;;  %v2716_v41 = vmul.f32 15.0, %v7585_v55  ;;  %vm1962_vm15 = vcmp.eq.f32.partialorder %v9833_v27, %v7953_v7  ;;  %v4282_v53 = vadd.s32 4294967295, %v4463_v10  ;;  %v7968_v24 = vpop.xlane.xlu0 %1975 }
 0x245   : > { %9832 = vst [vmem:[#allocation40_spill] sm:$0xff] %v7957_v13  ;;  %v3465_v30 = vadd.f32 %v7957_v13, %v3464_v14  ;;  %v3534_v23 = vmul.f32 %v7476_v54, %v7957_v13  ;;  %v1963_v45 = vsel %vm1962_vm15, %v9834_v26, inf  ;;  %vm3282_vm2 = vcmp.eq.s32.totalorder %v5814_v34, %v3219_v31  ;;  %9835 = vst [vmem:[#allocation197_spill] sm:$0xff] %v7968_v24  ;;  %v9836_v54 = vld [vmem:[#allocation66_spill] sm:$0xff] }
 0x246   : > { %v3008_v15 = vsel %vm3007_vm13, %v4275_v59, 0  ;;  %v4452_v51 = vtrunc.f32 %v2777_v50  ;;  %1964 = vmin.xlane.f32.xlu1 %v1963_v45  ;;  %vm3017_vm4 = vcmp.gt.s32.totalorder %v4280_v58, 0  ;;  %v2721_v8 = vmul.f32 15.0, %v7670_v40  ;;  %v9838_v50 = vld [vmem:[#allocation61_spill] sm:$0xff] }
 0x247   : > { %v3596_v9 = vadd.f32 %v3595_v12, %v3534_v23  ;;  %vm3133_vm1 = vcmp.lt.s32.totalorder %v3008_v15, 14  ;;  %v3466_v14 = vadd.f32 %v7919_v16, %v3465_v30  ;;  %v2779_v43 = vceil.f32 %v2716_v41  ;;  %v9840_v23 = vld [vmem:[#allocation182_spill] sm:$0xff] }
 0x248   : > { %v3134_v10 = vsel %vm3133_vm1, %v3008_v15, 14  ;;  %v4453_v27 = vcvt.f32.s32 %v4452_v51  ;;  %vm1977_vm11 = vcmp.eq.f32.partialorder %v9836_v54, %v7968_v24  ;;  %v7976_v59 = vsel %vm3280_vm3, 1.0, %v9527_v3  ;;  %v7991_v54 = vpop.xlane.xlu0 %1990 }
 0x249   : > { %9837 = vst [vmem:[#allocation38_spill] sm:$0xff] %v7976_v59  ;;  %vm3021_vm14 = vcmp.gt.s32.totalorder %v4282_v53, 0  ;;  %vm9839_vm8 = vcmp.lt.s32.totalorder %v9838_v50, 1000  ;;  %v1978_v26 = vsel %vm1977_vm11, %v9840_v23, inf  ;;  %v3597_v45 = vadd.f32 %v3596_v9, %v3535_v22  ;;  %v9844_v50 = vld [vmem:[#allocation183_spill] sm:$0xff] }
 0x24a   : > { %v3216_v12 = vsel %vm9839_vm8, %v3134_v10, 15  ;;  %v4277_v30 = vadd.s32 4294967295, %v4453_v27  ;;  %1979 = vmin.xlane.f32.xlu1 %v1978_v26  ;;  %v7985_v41 = vsel %vm3282_vm2, 1.0, %v9527_v3  ;;  %v3018_v29 = vsel %vm3017_vm4, %v4280_v58, 0  ;;  %v9843_v27 = vld [vmem:[#allocation63_spill] sm:$0xff] }
 0x24b   : > { %vm3279_vm5 = vcmp.eq.s32.totalorder %v5814_v34, %v3216_v12  ;;  %9841 = vst [vmem:[#allocation147_spill] sm:$0xff] %v7985_v41  ;;  %v2784_v15 = vceil.f32 %v2721_v8  ;;  %v4456_v9 = vtrunc.f32 %v2779_v43  ;;  %vm1992_vm7 = vcmp.eq.f32.partialorder %v9843_v27, %v7991_v54 }
 0x24c   : > { %v7989_v51 = vsel %vm3279_vm5, 1.0, %v9527_v3  ;;  %vm3011_vm6 = vcmp.gt.s32.totalorder %v4277_v30, 0  ;;  %v3537_v31 = vmul.f32 %v7548_v5, %v7976_v59  ;;  %v3022_v58 = vsel %vm3021_vm14, %v4282_v53, 0  ;;  %v8006_v27 = vpop.xlane.xlu0 %2005  ;;  %v9846_v53 = vld [vmem:[#allocation65_spill] sm:$0xff] }
 0x24d   : > { %9842 = vst [vmem:[#allocation14_spill] sm:$0xff] %v7989_v51  ;;  %v3467_v10 = vadd.f32 %v7989_v51, %v3466_v14  ;;  %v3536_v22 = vmul.f32 %v7528_v61, %v7989_v51  ;;  %v3012_v8 = vsel %vm3011_vm6, %v4277_v30, 0  ;;  %v1993_v12 = vsel %vm1992_vm7, %v9844_v50, inf  ;;  %9845 = vst [vmem:[#allocation32_spill] sm:$0xff] %v8006_v27 }
 0x24e   : > { %vm3143_vm0 = vcmp.lt.s32.totalorder %v3018_v29, 14  ;;  %vm3137_vm9 = vcmp.lt.s32.totalorder %v3012_v8, 14  ;;  %1994 = vmin.xlane.f32.xlu1 %v1993_v12  ;;  %v3539_v61 = vmul.f32 %v7578_v0, %v7985_v41  ;;  %v2723_v43 = vmul.f32 15.0, %v7705_v52  ;;  %v9849_v12 = vld [vmem:[#allocation184_spill] sm:$0xff] }
 0x24f   : > { %v3598_v23 = vadd.f32 %v3597_v45, %v3536_v22  ;;  %v3138_v14 = vsel %vm3137_vm9, %v3012_v8, 14  ;;  %v3468_v26 = vadd.f32 %v7976_v59, %v3467_v10  ;;  %vm3147_vm10 = vcmp.lt.s32.totalorder %v3022_v58, 14  ;;  %v9848_v45 = vld [vmem:[#allocation67_spill] sm:$0xff] }
 0x250   : > { %v4466_v5 = vtrunc.f32 %v2784_v15  ;;  %vm9847_vm12 = vcmp.lt.s32.totalorder %v9846_v53, 1000  ;;  %v4457_v50 = vcvt.f32.s32 %v4456_v9  ;;  %vm2007_vm3 = vcmp.eq.f32.partialorder %v9848_v45, %v8006_v27  ;;  %v9851_v45 = vld [vmem:[#allocation106_spill] sm:$0xff] }
 0x251   : > { %v3218_v30 = vsel %vm9847_vm12, %v3138_v14, 15  ;;  %v3144_v22 = vsel %vm3143_vm0, %v3018_v29, 14  ;;  %v3599_v0 = vadd.f32 %v3598_v23, %v3537_v31  ;;  %v2008_v51 = vsel %vm2007_vm3, %v9849_v12, inf  ;;  %v8021_v29 = vpop.xlane.xlu0 %2020  ;;  %v9854_v12 = vld [vmem:[#allocation185_spill] sm:$0xff] }
 0x252   : > { %vm3281_vm13 = vcmp.eq.s32.totalorder %v5814_v34, %v3218_v30  ;;  %v4279_v10 = vadd.s32 4294967295, %v4457_v50  ;;  %v2718_v59 = vmul.f32 15.0, %v7641_v28  ;;  %2009 = vmin.xlane.f32.xlu1 %v2008_v51  ;;  %v3148_v15 = vsel %vm3147_vm10, %v3022_v58, 14  ;;  %v9852_v50 = vld [vmem:[#allocation72_spill] sm:$0xff] }
 0x253   : > { %v8015_v8 = vsel %vm3281_vm13, 1.0, %v9527_v3  ;;  %v2786_v53 = vceil.f32 %v2723_v43  ;;  %v4467_v30 = vcvt.f32.s32 %v4466_v5  ;;  %v2720_v23 = vmul.f32 15.0, %v7663_v60 }
 0x254   : > { %9850 = vst [vmem:[#allocation87_spill] sm:$0xff] %v8015_v8  ;;  %v3469_v9 = vadd.f32 %v8015_v8, %v3468_v26  ;;  %v3538_v14 = vmul.f32 %v7573_v57, %v8015_v8  ;;  %vm3015_vm15 = vcmp.gt.s32.totalorder %v4279_v10, 0  ;;  %v2781_v31 = vceil.f32 %v2718_v59  ;;  %v9855_v57 = vld [vmem:[#allocation76_spill] sm:$0xff] }
 0x255   : > { %vm2022_vm2 = vcmp.eq.f32.partialorder %v9851_v45, %v8021_v29  ;;  %vm9853_vm4 = vcmp.lt.s32.totalorder %v9852_v50, 1000  ;;  %v3016_v43 = vsel %vm3015_vm15, %v4279_v10, 0  ;;  %v1592_v26 = vcvt.f32.s32 %v7459_v11  ;;  %v8033_v45 = vpop.xlane.xlu0 %2035 }
 0x256   : > { %v3221_v51 = vsel %vm9853_vm4, %v3144_v22, 15  ;;  %v3600_v58 = vadd.f32 %v3599_v0, %v3538_v14  ;;  %v2023_v16 = vsel %vm2022_vm2, %v9854_v12, inf  ;;  %vm9856_vm1 = vcmp.lt.s32.totalorder %v9855_v57, 1000  ;;  %9857 = vst [vmem:[#allocation91_spill] sm:$0xff] %v8033_v45  ;;  %v9858_v0 = vld [vmem:[#allocation69_spill] sm:$0xff]  ;;  %v9860_v14 = vld [vmem:[#allocation70_spill] sm:$0xff] }
 0x257   : > { %v3223_v8 = vsel %vm9856_vm1, %v3148_v15, 15  ;;  %vm3141_vm11 = vcmp.lt.s32.totalorder %v3016_v43, 14  ;;  %2024 = vmin.xlane.f32.xlu1 %v2023_v16  ;;  %v4470_v59 = vtrunc.f32 %v2786_v53  ;;  %v3470_v13 = vadd.f32 %v7985_v41, %v3469_v9  ;;  %v9861_v53 = vld [vmem:[#allocation186_spill] sm:$0xff] }
 0x258   : > { %v3142_v5 = vsel %vm3141_vm11, %v3016_v43, 14  ;;  %v4460_v27 = vtrunc.f32 %v2781_v31  ;;  %vm3284_vm14 = vcmp.eq.s32.totalorder %v5814_v34, %v3221_v51  ;;  %v4284_v22 = vadd.s32 4294967295, %v4467_v30 }
 0x259   : > { %vm9859_vm8 = vcmp.lt.s32.totalorder %v9858_v0, 1000  ;;  %v2783_v10 = vceil.f32 %v2720_v23  ;;  %vm2037_vm5 = vcmp.eq.f32.partialorder %v9860_v14, %v8033_v45  ;;  %v3601_v16 = vadd.f32 %v3600_v58, %v3539_v61  ;;  %v8054_v58 = vpop.xlane.xlu0 %2050 }
 0x25a   : > { %v3220_v11 = vsel %vm9859_vm8, %v3142_v5, 15  ;;  %v4461_v15 = vcvt.f32.s32 %v4460_v27  ;;  %v2038_v50 = vsel %vm2037_vm5, %v9861_v53, inf  ;;  %vm3286_vm7 = vcmp.eq.s32.totalorder %v5814_v34, %v3223_v8 }
 0x25b   : > { %vm3283_vm6 = vcmp.eq.s32.totalorder %v5814_v34, %v3220_v11  ;;  %v4464_v31 = vtrunc.f32 %v2783_v10  ;;  %2039 = vmin.xlane.f32.xlu1 %v2038_v50  ;;  %v4471_v30 = vcvt.f32.s32 %v4470_v59  ;;  %v2725_v12 = vmul.f32 15.0, %v7731_v4  ;;  %v9864_v59 = vld [vmem:[#allocation25_spill] sm:$0xff] }
 0x25c   : > { %v8044_v9 = vsel %vm3283_vm6, 1.0, %v9527_v3  ;;  %v9863_v61 = vcvt.f32.s32 %v7444_v46  ;;  %vm3025_vm0 = vcmp.gt.s32.totalorder %v4284_v22, 0  ;;  %v4281_v57 = vadd.s32 4294967295, %v4461_v15  ;;  %v9866_v11 = vld [vmem:[#allocation9_spill] sm:$0xff] }
 0x25d   : > { %9862 = vst [vmem:[#allocation12_spill] sm:$0xff] %v8044_v9  ;;  %v3471_v43 = vadd.f32 %v8044_v9, %v3470_v13  ;;  %v3540_v23 = vmul.f32 %v7585_v55, %v8044_v9  ;;  %v4465_v5 = vcvt.f32.s32 %v4464_v31  ;;  %v8056_v0 = vshll.u32 %v1592_v26, 16  ;;  %v8073_v31 = vpop.xlane.xlu0 %2065  ;;  %v9876_v46 = vld [vmem:[#allocation77_spill] sm:$0xff] }
 0x25e   : > { %v8052_v27 = vshll.u32 %v9863_v61, 16  ;;  %vm2052_vm9 = vcmp.eq.f32.partialorder %v9864_v59, %v8054_v58  ;;  %v8063_v55 = vsel %vm3284_vm14, 1.0, %v9527_v3  ;;  %v8070_v14 = vsel %vm3286_vm7, 1.0, %v9527_v3  ;;  %9868 = vst [vmem:[#allocation43_spill] sm:$0xff] %v8073_v31  ;;  %v9869_v61 = vld [vmem:[#allocation71_spill] sm:$0xff] }
 0x25f   : > { %9865 = vst [vmem:[#allocation98_spill] sm:$0xff] %v8063_v55  ;;  %v3602_v13 = vadd.f32 %v3601_v16, %v3540_v23  ;;  %v2053_v10 = vsel %vm2052_vm9, %v9866_v11, inf  ;;  %9867 = vst [vmem:[#allocation150_spill] sm:$0xff] %v8070_v14  ;;  %vm3019_vm10 = vcmp.gt.s32.totalorder %v4281_v57, 0  ;;  %v3026_v26 = vsel %vm3025_vm0, %v4284_v22, 0 }
 0x260   : > { %2054 = vmin.xlane.f32.xlu1 %v2053_v10  ;;  %v4286_v15 = vadd.s32 4294967295, %v4471_v30  ;;  %v2788_v53 = vceil.f32 %v2725_v12  ;;  %v3020_v50 = vsel %vm3019_vm10, %v4281_v57, 0  ;;  %v3541_v16 = vmul.f32 %v7599_v1, %v8063_v55  ;;  %v9870_v30 = vld [vmem:[#allocation187_spill] sm:$0xff]  ;;  %v9871_v57 = vld [vmem:[#allocation73_spill] sm:$0xff]  ;;  %v1545_v10 = vpop.xlane.xlu1 %1544 }
 0x261   : > { %vm3145_vm12 = vcmp.lt.s32.totalorder %v3020_v50, 14  ;;  %v4283_v23 = vadd.s32 4294967295, %v4465_v5  ;;  %vm2067_vm3 = vcmp.eq.f32.partialorder %v9869_v61, %v8073_v31  ;;  %v3543_v8 = vmul.f32 %v7658_v2, %v8070_v14  ;;  %v8086_v61 = vpop.xlane.xlu0 %2080 }
 0x262   : > { %v3146_v59 = vsel %vm3145_vm12, %v3020_v50, 14  ;;  %v3472_v22 = vadd.f32 %v8063_v55, %v3471_v43  ;;  %v2068_v12 = vsel %vm2067_vm3, %v9870_v30, inf  ;;  %vm3151_vm13 = vcmp.lt.s32.totalorder %v3026_v26, 14  ;;  %v269_v55 = vld [vmem:[%s8097_s29] sm:$0xff] }
 0x263   : > { %vm9872_vm15 = vcmp.lt.s32.totalorder %v9871_v57, 1000  ;;  %vm3023_vm2 = vcmp.gt.s32.totalorder %v4283_v23, 0  ;;  %vm3029_vm4 = vcmp.gt.s32.totalorder %v4286_v15, 0  ;;  %v4474_v1 = vtrunc.f32 %v2788_v53 }
 0x264   : > { %v3222_v11 = vsel %vm9872_vm15, %v3146_v59, 15  ;;  %2069 = vmin.xlane.f32.xlu1 %v2068_v12  ;;  %v3024_v5 = vsel %vm3023_vm2, %v4283_v23, 0  ;;  %v3603_v43 = vadd.f32 %v3602_v13, %v3541_v16  ;;  %v2722_v50 = vmul.f32 15.0, %v7684_v37  ;;  %v9874_v23 = vld [vmem:[#allocation75_spill] sm:$0xff]  ;;  %v9875_v12 = vld [vmem:[#allocation188_spill] sm:$0xff]  ;;  %v1560_v9 = vpop.xlane.xlu1 %1559 }
 0x265   : > { %vm3285_vm1 = vcmp.eq.s32.totalorder %v5814_v34, %v3222_v11  ;;  %vm3149_vm11 = vcmp.lt.s32.totalorder %v3024_v5, 14  ;;  %v1546_v53 = vcvt.f32.s32 %v1545_v10  ;;  %vm2082_vm14 = vcmp.eq.f32.partialorder %v9874_v23, %v8086_v61 }
 0x266   : > { %v8089_v2 = vsel %vm3285_vm1, 1.0, %v9527_v3  ;;  %v2727_v30 = vmul.f32 15.0, %v7761_v42  ;;  %v2083_v13 = vsel %vm2082_vm14, %v9875_v12, inf  ;;  %v3030_v16 = vsel %vm3029_vm4, %v4286_v15, 0  ;;  %v8113_v12 = vpop.xlane.xlu0 %2095 }
 0x267   : > { %9873 = vst [vmem:[#allocation45_spill] sm:$0xff] %v8089_v2  ;;  %v3473_v59 = vadd.f32 %v8089_v2, %v3472_v22  ;;  %v3542_v57 = vmul.f32 %v7641_v28, %v8089_v2  ;;  %v3150_v11 = vsel %vm3149_vm11, %v3024_v5, 14  ;;  %v1549_v51 = vadd.s32 %v7862_v47, %v1546_v53  ;;  %9878 = vst [vmem:[#allocation198_spill] sm:$0xff] %v8113_v12  ;;  %v9879_v47 = vld [vmem:[#allocation74_spill] sm:$0xff]  ;;  %v270_v53 = vld [vmem:[%s8097_s29 + $0x8] sm:$0xff] }
 0x268   : > { %2084 = vmin.xlane.f32.xlu1 %v2083_v13  ;;  %v3152_v10 = vsel %vm3151_vm13, %v3026_v26, 14  ;;  %vm9877_vm8 = vcmp.lt.s32.totalorder %v9876_v46, 1000  ;;  %v4475_v15 = vcvt.f32.s32 %v4474_v1  ;;  %v2785_v28 = vceil.f32 %v2722_v50  ;;  %v9880_v46 = vld [vmem:[#allocation189_spill] sm:$0xff]  ;;  %v9882_v50 = vld [vmem:[#allocation78_spill] sm:$0xff] }
 0x269   : > { %v3224_v23 = vsel %vm9877_vm8, %v3150_v11, 15  ;;  %v3474_v22 = vadd.f32 %v8070_v14, %v3473_v59  ;;  %v3604_v41 = vadd.f32 %v3603_v43, %v3542_v57  ;;  %v1561_v5 = vcvt.f32.s32 %v1560_v9  ;;  %v1575_v57 = vpop.xlane.xlu1 %1574 }
 0x26a   : > { %vm3287_vm5 = vcmp.eq.s32.totalorder %v5814_v34, %v3224_v23  ;;  %vm2097_vm6 = vcmp.eq.f32.partialorder %v9879_v47, %v8113_v12  ;;  %vm3155_vm7 = vcmp.lt.s32.totalorder %v3030_v16, 14  ;;  %v2790_v26 = vceil.f32 %v2727_v30  ;;  %v8131_v23 = vpop.xlane.xlu0 %2110  ;;  %v9883_v47 = vld [vmem:[#allocation80_spill] sm:$0xff] }
 0x26b   : > { %v2098_v13 = vsel %vm2097_vm6, %v9880_v46, inf  ;;  %v8121_v59 = vsel %vm3287_vm5, 1.0, %v9527_v3  ;;  %v3605_v11 = vadd.f32 %v3604_v41, %v3543_v8  ;;  %v2724_v14 = vmul.f32 15.0, %v7726_v19 }
 0x26c   : > { %9881 = vst [vmem:[#allocation99_spill] sm:$0xff] %v8121_v59  ;;  %vm2480_vm0 = vcmp.eq.s32.totalorder %v1549_v51, %v269_v55  ;;  %v1564_v1 = vadd.s32 %v7927_v56, %v1561_v5  ;;  %2099 = vmin.xlane.f32.xlu1 %v2098_v13  ;;  %v8126_v9 = vadd.f32 %v8121_v59, %v3474_v22  ;;  %v1637_v30 = vcvt.f32.s32 %v9882_v50  ;;  %v9885_v56 = vld [vmem:[#allocation108_spill] sm:$0xff]  ;;  %v9886_v5 = vld [vmem:[#allocation190_spill] sm:$0xff] }
 0x26d   : > { %v3544_v43 = vmul.f32 %v7663_v60, %v8121_v59  ;;  %vm9884_vm9 = vcmp.lt.s32.totalorder %v9883_v47, 1000  ;;  %v4288_v8 = vadd.s32 4294967295, %v4475_v15  ;;  %v4468_v46 = vtrunc.f32 %v2785_v28 }
 0x26e   : > { %v3225_v41 = vsel %vm9884_vm9, %v3152_v10, 15  ;;  %vm2481_vm10 = vcmp.eq.s32.totalorder %v1564_v1, %v270_v53  ;;  %v1576_v55 = vcvt.f32.s32 %v1575_v57  ;;  %vm2112_vm12 = vcmp.eq.f32.partialorder %v9885_v56, %v8131_v23  ;;  %v9888_v57 = vld [vmem:[#allocation42_spill] sm:$0xff]  ;;  %v1590_v56 = vpop.xlane.xlu1 %1589  ;;  %v8149_v59 = vpop.xlane.xlu0 %2125 }
 0x26f   : > { %v3156_v51 = vsel %vm3155_vm7, %v3030_v16, 14  ;;  %v4169_v22 = vsel %vm2480_vm0, 1.0, %v9527_v3  ;;  %v4170_v60 = vsel %vm2481_vm10, 1.0, %v9527_v3  ;;  %v2113_v13 = vsel %vm2112_vm12, %v9886_v5, inf  ;;  %9889 = vst [vmem:[#allocation151_spill] sm:$0xff] %v8149_v59 }
 0x270   : > { %v8141_v50 = vadd.f32 %v3605_v11, %v3544_v43  ;;  %v8144_v47 = vadd.s32 %v8052_v27, %v1576_v55  ;;  %2114 = vmin.xlane.f32.xlu1 %v2113_v13  ;;  %v4530_v10 = vpack.i.bf16 %v4170_v60, %v4169_v22  ;;  %v4478_v15 = vtrunc.f32 %v2790_v26  ;;  %v9891_v27 = vld [vmem:[#allocation83_spill] sm:$0xff]  ;;  %v9893_v55 = vld [vmem:[#allocation84_spill] sm:$0xff] }
 0x271   : > { %v2787_v28 = vceil.f32 %v2724_v14  ;;  %v9887_v53 = vcvt.f32.s32 %v7471_v18  ;;  %v1652_v16 = vcvt.f32.s32 %v9888_v57  ;;  %vm3033_vm3 = vcmp.gt.s32.totalorder %v4288_v8, 0  ;;  %v9892_v18 = vld [vmem:[#allocation191_spill] sm:$0xff] }
 0x272   : > { %v4469_v2 = vcvt.f32.s32 %v4468_v46  ;;  %v9890_v11 = vcvt.f32.s32 %v7495_v20  ;;  %v1591_v5 = vcvt.f32.s32 %v1590_v56  ;;  %4531 = vperm.xlu0 %4529, %v4530_v10   ;;  %vm2127_vm13 = vcmp.eq.f32.partialorder %v9891_v27, %v8149_v59  ;;  %v1605_v57 = vpop.xlane.xlu1 %1604  ;;  %v8164_v56 = vpop.xlane.xlu0 %2140 }
 0x273   : > { %v1608_v1 = vshll.u32 %v9887_v53, 16  ;;  %vm3288_vm15 = vcmp.eq.s32.totalorder %v5814_v34, %v3225_v41  ;;  %v1638_v14 = vshll.u32 %v1637_v30, 16  ;;  %v2128_v26 = vsel %vm2127_vm13, %v9892_v18, inf  ;;  %v9896_v41 = vld [vmem:[#allocation137_spill] sm:$0xff] }
 0x274   : > { %v1623_v43 = vshll.u32 %v9890_v11, 16  ;;  %vm9894_vm2 = vcmp.lt.s32.totalorder %v9893_v55, 1000  ;;  %v4285_v60 = vadd.s32 4294967295, %v4469_v2  ;;  %v8160_v13 = vadd.s32 %v8056_v0, %v1591_v5  ;;  %2129 = vmin.xlane.f32.xlu1 %v2128_v26  ;;  %v9898_v0 = vld [vmem:[#allocation41_spill] sm:$0xff] }
 0x275   : > { %v3227_v22 = vsel %vm9894_vm2, %v3156_v51, 15  ;;  %v3034_v20 = vsel %vm3033_vm3, %v4288_v8, 0  ;;  %v4479_v46 = vcvt.f32.s32 %v4478_v15  ;;  %v4472_v53 = vtrunc.f32 %v2787_v28  ;;  %v9897_v51 = vld [vmem:[#allocation79_spill] sm:$0xff]  ;;  %v9899_v8 = vld [vmem:[#allocation10_spill] sm:$0xff] }
 0x276   : > { %v8162_v10 = vshll.u32 %v1652_v16, 16  ;;  %v8167_v30 = vsel %vm3288_vm15, 1.0, %v9527_v3  ;;  %vm3027_vm4 = vcmp.gt.s32.totalorder %v4285_v60, 0  ;;  %v2726_v11 = vmul.f32 15.0, %v9896_v41  ;;  %v1620_v55 = vpop.xlane.xlu1 %1619 }
 0x277   : > { %9895 = vst [vmem:[#allocation155_spill] sm:$0xff] %v8167_v30  ;;  %v1667_v2 = vcvt.f32.s32 %v9897_v51  ;;  %v1606_v27 = vcvt.f32.s32 %v1605_v57  ;;  %vm2142_vm1 = vcmp.eq.f32.partialorder %v9898_v0, %v8164_v56  ;;  %vm3290_vm11 = vcmp.eq.s32.totalorder %v5814_v34, %v3227_v22  ;;  %v8179_v57 = vpop.xlane.xlu0 %2155 }
 0x278   : > { %v2143_v15 = vsel %vm2142_vm1, %v9899_v8, inf  ;;  %vm3159_vm14 = vcmp.lt.s32.totalorder %v3034_v20, 14  ;;  %v3028_v28 = vsel %vm3027_vm4, %v4285_v60, 0  ;;  %v4473_v16 = vcvt.f32.s32 %v4472_v53  ;;  %9900 = vst [vmem:[#allocation54_spill] sm:$0xff] %v8179_v57  ;;  %v9902_v60 = vld [vmem:[#allocation90_spill] sm:$0xff] }
 0x279   : > { %v8175_v5 = vadd.s32 %v1608_v1, %v1606_v27  ;;  %2144 = vmin.xlane.f32.xlu1 %v2143_v15  ;;  %v3545_v18 = vmul.f32 %v7670_v40, %v8167_v30  ;;  %v4290_v26 = vadd.s32 4294967295, %v4479_v46  ;;  %vm3153_vm8 = vcmp.lt.s32.totalorder %v3028_v28, 14  ;;  %v9903_v40 = vld [vmem:[#allocation95_spill] sm:$0xff]  ;;  %v9904_v27 = vld [vmem:[#allocation81_spill] sm:$0xff] }
 0x27a   : > { %v8182_v51 = vsel %vm3290_vm11, 1.0, %v9527_v3  ;;  %v3154_v22 = vsel %vm3153_vm8, %v3028_v28, 14  ;;  %v4287_v0 = vadd.s32 4294967295, %v4473_v16  ;;  %v2789_v8 = vceil.f32 %v2726_v11  ;;  %v1635_v16 = vpop.xlane.xlu1 %1634 }
 0x27b   : > { %9901 = vst [vmem:[#allocation135_spill] sm:$0xff] %v8182_v51  ;;  %v1621_v59 = vcvt.f32.s32 %v1620_v55  ;;  %vm2157_vm5 = vcmp.eq.f32.partialorder %v9902_v60, %v8179_v57  ;;  %v3160_v1 = vsel %vm3159_vm14, %v3034_v20, 14  ;;  %v2729_v53 = vmul.f32 15.0, %v7798_v39  ;;  %v8196_v20 = vpop.xlane.xlu0 %2170 }
 0x27c   : > { %v2158_v46 = vsel %vm2157_vm5, %v9903_v40, inf  ;;  %vm9905_vm6 = vcmp.lt.s32.totalorder %v9904_v27, 1000  ;;  %v3476_v12 = vadd.f32 %v8167_v30, %v8126_v9  ;;  %vm3031_vm7 = vcmp.gt.s32.totalorder %v4287_v0, 0 }
 0x27d   : > { %v3226_v15 = vsel %vm9905_vm6, %v3154_v22, 15  ;;  %v8193_v28 = vadd.s32 %v1623_v43, %v1621_v59  ;;  %2159 = vmin.xlane.f32.xlu1 %v2158_v46  ;;  %vm3037_vm0 = vcmp.gt.s32.totalorder %v4290_v26, 0  ;;  %v3032_v11 = vsel %vm3031_vm7, %v4287_v0, 0  ;;  %v9907_v59 = vld [vmem:[#allocation112_spill] sm:$0xff]  ;;  %v9908_v46 = vld [vmem:[#allocation115_spill] sm:$0xff] }
 0x27e   : > { %vm3289_vm9 = vcmp.eq.s32.totalorder %v5814_v34, %v3226_v15  ;;  %v3607_v60 = vadd.f32 %v8141_v50, %v3545_v18  ;;  %vm3157_vm10 = vcmp.lt.s32.totalorder %v3032_v11, 14  ;;  %v4476_v22 = vtrunc.f32 %v2789_v8  ;;  %v9909_v50 = vld [vmem:[#allocation88_spill] sm:$0xff] }
 0x27f   : > { %v8199_v55 = vsel %vm3289_vm9, 1.0, %v9527_v3  ;;  %v1668_v40 = vshll.u32 %v1667_v2, 16  ;;  %v1636_v9 = vcvt.f32.s32 %v1635_v16  ;;  %vm2172_vm12 = vcmp.eq.f32.partialorder %v9907_v59, %v8196_v20  ;;  %v8215_v16 = vpop.xlane.xlu0 %2185 }
 0x280   : > { %9906 = vst [vmem:[#allocation156_spill] sm:$0xff] %v8199_v55  ;;  %v2792_v43 = vceil.f32 %v2729_v53  ;;  %v2173_v27 = vsel %vm2172_vm12, %v9908_v46, inf  ;;  %v3547_v0 = vmul.f32 %v7705_v52, %v8182_v51  ;;  %v3477_v15 = vadd.f32 %v8199_v55, %v3476_v12  ;;  %v1650_v53 = vpop.xlane.xlu1 %1649  ;;  %9911 = vst [vmem:[#allocation158_spill] sm:$0xff] %v8215_v16  ;;  %v9912_v46 = vld [vmem:[#allocation85_spill] sm:$0xff] }
 0x281   : > { %v3546_v30 = vmul.f32 %v7684_v37, %v8199_v55  ;;  %v8210_v57 = vadd.s32 %v1638_v14, %v1636_v9  ;;  %2174 = vmin.xlane.f32.xlu1 %v2173_v27  ;;  %vm9910_vm3 = vcmp.lt.s32.totalorder %v9909_v50, 1000  ;;  %v3038_v18 = vsel %vm3037_vm0, %v4290_v26, 0  ;;  %v9914_v37 = vld [vmem:[#allocation82_spill] sm:$0xff]  ;;  %v9916_v50 = vld [vmem:[#allocation123_spill] sm:$0xff] }
 0x282   : > { %v3229_v2 = vsel %vm9910_vm3, %v3160_v1, 15  ;;  %v3158_v8 = vsel %vm3157_vm10, %v3032_v11, 14  ;;  %vm9913_vm13 = vcmp.lt.s32.totalorder %v9912_v46, 1000  ;;  %v3478_v12 = vadd.f32 %v8182_v51, %v3477_v15  ;;  %v9915_v27 = vld [vmem:[#allocation22_spill] sm:$0xff]  ;;  %v9922_v51 = vld [vmem:[#allocation124_spill] sm:$0xff] }
 0x283   : > { %v3608_v59 = vadd.f32 %v3607_v60, %v3546_v30  ;;  %v3228_v52 = vsel %vm9913_vm13, %v3158_v8, 15  ;;  %v4477_v31 = vcvt.f32.s32 %v4476_v22  ;;  %v1682_v14 = vcvt.f32.s32 %v9914_v37  ;;  %v9917_v30 = vld [vmem:[#allocation104_spill] sm:$0xff] }
 0x284   : > { %v1651_v9 = vcvt.f32.s32 %v1650_v53  ;;  %vm2187_vm15 = vcmp.eq.f32.partialorder %v9915_v27, %v8215_v16  ;;  %v4482_v1 = vtrunc.f32 %v2792_v43  ;;  %vm3163_vm2 = vcmp.lt.s32.totalorder %v3038_v18, 14  ;;  %v1665_v15 = vpop.xlane.xlu1 %1664  ;;  %v8233_v53 = vpop.xlane.xlu0 %2200  ;;  %v9920_v27 = vld [vmem:[#allocation113_spill] sm:$0xff] }
 0x285   : > { %v2188_v26 = vsel %vm2187_vm15, %v9916_v50, inf  ;;  %vm3291_vm4 = vcmp.eq.s32.totalorder %v5814_v34, %v3228_v52  ;;  %v3609_v11 = vadd.f32 %v3608_v59, %v3547_v0  ;;  %v1697_v60 = vcvt.f32.s32 %v9917_v30 }
 0x286   : > { %v8227_v8 = vadd.s32 %v8162_v10, %v1651_v9  ;;  %2189 = vmin.xlane.f32.xlu1 %v2188_v26  ;;  %vm3292_vm1 = vcmp.eq.s32.totalorder %v5814_v34, %v3229_v2  ;;  %v8231_v22 = vsel %vm3291_vm4, 1.0, %v9527_v3  ;;  %v4289_v0 = vadd.s32 4294967295, %v4477_v31  ;;  %v9919_v10 = vld [vmem:[#allocation126_spill] sm:$0xff]  ;;  %v9921_v26 = vld [vmem:[#allocation192_spill] sm:$0xff] }
 0x287   : > { %9918 = vst [vmem:[#allocation136_spill] sm:$0xff] %v8231_v22  ;;  %v3479_v43 = vadd.f32 %v8231_v22, %v3478_v12  ;;  %v3548_v46 = vmul.f32 %v7726_v19, %v8231_v22  ;;  %v2728_v59 = vmul.f32 15.0, %v7774_v38  ;;  %v1666_v52 = vcvt.f32.s32 %v1665_v15  ;;  %v9929_v22 = vld [vmem:[#allocation27_spill] sm:$0xff] }
 0x288   : > { %vm2202_vm11 = vcmp.eq.f32.partialorder %v9919_v10, %v8233_v53  ;;  %v3164_v37 = vsel %vm3163_vm2, %v3038_v18, 14  ;;  %v4483_v9 = vcvt.f32.s32 %v4482_v1  ;;  %v1712_v50 = vcvt.f32.s32 %v9920_v27  ;;  %v1680_v31 = vpop.xlane.xlu1 %1679  ;;  %v8252_v18 = vpop.xlane.xlu0 %2215  ;;  %v9925_v1 = vld [vmem:[#allocation92_spill] sm:$0xff] }
 0x289   : > { %v2203_v30 = vsel %vm2202_vm11, %v9921_v26, inf  ;;  %v2271_v55 = vand.u32 65535, %v9922_v51  ;;  %v3610_v12 = vadd.f32 %v3609_v11, %v3548_v46  ;;  %v1683_v16 = vshll.u32 %v1682_v14, 16  ;;  %9924 = vst [vmem:[#allocation47_spill] sm:$0xff] %v8252_v18  ;;  %v9927_v11 = vld [vmem:[#allocation128_spill] sm:$0xff] }
 0x28a   : > { %v8245_v45 = vadd.s32 %v1668_v40, %v1666_v52  ;;  %2204 = vmin.xlane.f32.xlu1 %v2203_v30  ;;  %v8250_v19 = vsel %vm3292_vm1, 1.0, %v9527_v3  ;;  %vm3035_vm14 = vcmp.gt.s32.totalorder %v4289_v0, 0  ;;  %vm9926_vm8 = vcmp.lt.s32.totalorder %v9925_v1, 1000  ;;  %v9928_v52 = vld [vmem:[#allocation193_spill] sm:$0xff] }
 0x28b   : > { %9923 = vst [vmem:[#allocation7_spill] sm:$0xff] %v8250_v19  ;;  %v3231_v15 = vsel %vm9926_vm8, %v3164_v37, 15  ;;  %v3036_v10 = vsel %vm3035_vm14, %v4289_v0, 0  ;;  %v2791_v27 = vceil.f32 %v2728_v59  ;;  %v2731_v51 = vmul.f32 15.0, %v7826_v63 }
 0x28c   : > { %v1698_v14 = vshll.u32 %v1697_v60, 16  ;;  %v1681_v40 = vcvt.f32.s32 %v1680_v31  ;;  %vm2217_vm5 = vcmp.eq.f32.partialorder %v9927_v11, %v8252_v18  ;;  %v4292_v46 = vadd.s32 4294967295, %v4483_v9  ;;  %v1695_v59 = vpop.xlane.xlu1 %1694  ;;  %v8266_v37 = vpop.xlane.xlu0 %2230  ;;  %v9930_v9 = vld [vmem:[#allocation89_spill] sm:$0xff] }
 0x28d   : > { %v1713_v2 = vshll.u32 %v1712_v50, 16  ;;  %v2218_v26 = vsel %vm2217_vm5, %v9928_v52, inf  ;;  %v3549_v30 = vmul.f32 %v7731_v4, %v8250_v19  ;;  %vm3161_vm6 = vcmp.lt.s32.totalorder %v3036_v10, 14  ;;  %v9932_v52 = vld [vmem:[#allocation119_spill] sm:$0xff] }
 0x28e   : > { %v1727_v1 = vcvt.f32.s32 %v9929_v22  ;;  %v8263_v0 = vadd.s32 %v1683_v16, %v1681_v40  ;;  %2219 = vmin.xlane.f32.xlu1 %v2218_v26  ;;  %vm3294_vm7 = vcmp.eq.s32.totalorder %v5814_v34, %v3231_v15  ;;  %v3162_v60 = vsel %vm3161_vm6, %v3036_v10, 14  ;;  %v9933_v16 = vld [vmem:[#allocation138_spill] sm:$0xff]  ;;  %v9934_v40 = vld [vmem:[#allocation144_spill] sm:$0xff]  ;;  %v279_v10 = vld [vmem:[%s8097_s29 + $0x50] sm:$0xff] }
 0x28f   : > { %vm9931_vm0 = vcmp.lt.s32.totalorder %v9930_v9, 1000  ;;  %v3480_v31 = vadd.f32 %v8250_v19, %v3479_v43  ;;  %v4480_v11 = vtrunc.f32 %v2791_v27  ;;  %v2794_v4 = vceil.f32 %v2731_v51  ;;  %v9937_v15 = vld [vmem:[#allocation140_spill] sm:$0xff] }
 0x290   : > { %v3230_v50 = vsel %vm9931_vm0, %v3162_v60, 15  ;;  %v1742_v18 = vcvt.f32.s32 %v9932_v52  ;;  %v1696_v22 = vcvt.f32.s32 %v1695_v59  ;;  %vm2232_vm9 = vcmp.eq.f32.partialorder %v9933_v16, %v8266_v37  ;;  %v1710_v60 = vpop.xlane.xlu1 %1709  ;;  %v8285_v59 = vpop.xlane.xlu0 %2245 }
 0x291   : > { %vm3041_vm10 = vcmp.gt.s32.totalorder %v4292_v46, 0  ;;  %v2233_v26 = vsel %vm2232_vm9, %v9934_v40, inf  ;;  %vm3293_vm12 = vcmp.eq.s32.totalorder %v5814_v34, %v3230_v50  ;;  %v3611_v24 = vadd.f32 %v3610_v12, %v3549_v30  ;;  %9936 = vst [vmem:[#allocation8_spill] sm:$0xff] %v8285_v59 }
 0x292   : > { %v4481_v36 = vcvt.f32.s32 %v4480_v11  ;;  %v1699_v9 = vadd.s32 %v1698_v14, %v1696_v22  ;;  %2234 = vmin.xlane.f32.xlu1 %v2233_v26  ;;  %v8280_v43 = vsel %vm3294_vm7, 1.0, %v9527_v3  ;;  %v8283_v27 = vsel %vm3293_vm12, 1.0, %v9527_v3  ;;  %v9938_v22 = vld [vmem:[#allocation149_spill] sm:$0xff] }
 0x293   : > { %9935 = vst [vmem:[#allocation101_spill] sm:$0xff] %v8283_v27  ;;  %v4486_v51 = vtrunc.f32 %v2794_v4  ;;  %v3481_v52 = vadd.f32 %v8283_v27, %v3480_v31  ;;  %v3550_v12 = vmul.f32 %v9896_v41, %v8283_v27  ;;  %v2730_v14 = vmul.f32 15.0, %v7809_v25  ;;  %v9939_v41 = vld [vmem:[#allocation129_spill] sm:$0xff] }
 0x294   : > { %v4291_v30 = vadd.s32 4294967295, %v4481_v36  ;;  %v1711_v50 = vcvt.f32.s32 %v1710_v60  ;;  %vm2247_vm3 = vcmp.eq.f32.partialorder %v9937_v15, %v8285_v59  ;;  %vm2490_vm13 = vcmp.eq.s32.totalorder %v1699_v9, %v279_v10  ;;  %v1725_v15 = vpop.xlane.xlu1 %1724  ;;  %v8299_v10 = vpop.xlane.xlu0 %2260 }
 0x295   : > { %v3042_v11 = vsel %vm3041_vm10, %v4292_v46, 0  ;;  %v4179_v4 = vsel %vm2490_vm13, 1.0, %v9527_v3  ;;  %v2248_v16 = vsel %vm2247_vm3, %v9938_v22, inf  ;;  %v3612_v40 = vadd.f32 %v3611_v24, %v3550_v12  ;;  %v9940_v24 = vld [vmem:[#allocation132_spill] sm:$0xff]  ;;  %v9942_v22 = vld [vmem:[#allocation125_spill] sm:$0xff] }
 0x296   : > { %vm3039_vm15 = vcmp.gt.s32.totalorder %v4291_v30, 0  ;;  %v8296_v31 = vadd.s32 %v1713_v2, %v1711_v50  ;;  %3676 = vperm.xlu0 %4529, %v4179_v4   ;;  %2249 = vmin.xlane.f32.xlu1 %v2248_v16  ;;  %v2273_v36 = vcvt.s32.f32 %v2271_v55  ;;  %v2286_v26 = vand.u32 65535, %v9939_v41  ;;  %v9941_v55 = vld [vmem:[#allocation153_spill] sm:$0xff]  ;;  %v281_v4 = vld [vmem:[%s8097_s29 + $0x60] sm:$0xff] }
 0x297   : > { %v3040_v60 = vsel %vm3039_vm15, %v4291_v30, 0  ;;  %v1728_v27 = vshll.u32 %v1727_v1, 16  ;;  %v4487_v46 = vcvt.f32.s32 %v4486_v51  ;;  %v2793_v9 = vceil.f32 %v2730_v14  ;;  %v9943_v51 = vld [vmem:[#allocation93_spill] sm:$0xff] }
 0x298   : > { %vm3165_vm2 = vcmp.lt.s32.totalorder %v3040_v60, 14  ;;  %v1726_v19 = vcvt.f32.s32 %v1725_v15  ;;  %vm2262_vm4 = vcmp.eq.f32.partialorder %v9940_v24, %v8299_v10  ;;  %v3551_v2 = vmul.f32 %v7761_v42, %v8280_v43  ;;  %v1740_v24 = vpop.xlane.xlu1 %1739  ;;  %v8311_v59 = vpop.xlane.xlu0 %2275 }
 0x299   : > { %vm3167_vm1 = vcmp.lt.s32.totalorder %v3042_v11, 14  ;;  %v1743_v12 = vshll.u32 %v1742_v18, 16  ;;  %v2263_v50 = vsel %vm2262_vm4, %v9941_v55, inf  ;;  %v3166_v30 = vsel %vm3165_vm2, %v3040_v60, 14  ;;  %v9945_v60 = vld [vmem:[#allocation143_spill] sm:$0xff] }
 0x29a   : > { %v4294_v1 = vadd.s32 4294967295, %v4487_v46  ;;  %v1757_v16 = vcvt.f32.s32 %v9942_v22  ;;  %v1729_v41 = vadd.s32 %v1728_v27, %v1726_v19  ;;  %2264 = vmin.xlane.f32.xlu1 %v2263_v50  ;;  %vm9944_vm11 = vcmp.lt.s32.totalorder %v9943_v51, 1000 }
 0x29b   : > { %v3232_v14 = vsel %vm9944_vm11, %v3166_v30, 15  ;;  %v3482_v15 = vadd.f32 %v8280_v43, %v3481_v52  ;;  %v3168_v42 = vsel %vm3167_vm1, %v3042_v11, 14  ;;  %v4484_v18 = vtrunc.f32 %v2793_v9 }
 0x29c   : > { %vm3295_vm14 = vcmp.eq.s32.totalorder %v5814_v34, %v3232_v14  ;;  %vm3045_vm8 = vcmp.gt.s32.totalorder %v4294_v1, 0  ;;  %v1741_v55 = vcvt.f32.s32 %v1740_v24  ;;  %vm2277_vm5 = vcmp.eq.f32.partialorder %v9945_v60, %v8311_v59 }
 0x29d   : > { %vm2492_vm6 = vcmp.eq.s32.totalorder %v1729_v41, %v281_v4  ;;  %v3613_v19 = vadd.f32 %v3612_v40, %v3551_v2  ;;  %v2278_v46 = vsel %vm2277_vm5, %v2273_v36, inf  ;;  %v8318_v50 = vsel %vm3295_vm14, 1.0, %v9527_v3  ;;  %v1755_v4 = vpop.xlane.xlu1 %1754  ;;  %v8325_v40 = vpop.xlane.xlu0 %2290  ;;  %v9947_v36 = vld [vmem:[#allocation131_spill] sm:$0xff] }
 0x29e   : > { %v4181_v27 = vsel %vm2492_vm6, 1.0, %v9527_v3  ;;  %9946 = vst [vmem:[#allocation56_spill] sm:$0xff] %v8318_v50  ;;  %v3046_v52 = vsel %vm3045_vm8, %v4294_v1, 0  ;;  %v8320_v30 = vadd.s32 %v1743_v12, %v1741_v55  ;;  %2279 = vmin.xlane.f32.xlu1 %v2278_v46  ;;  %v3483_v11 = vadd.f32 %v8318_v50, %v3482_v15  ;;  %v9948_v12 = vld [vmem:[#allocation146_spill] sm:$0xff]  ;;  %v9949_v1 = vld [vmem:[#allocation96_spill] sm:$0xff]  ;;  %v283_v55 = vld [vmem:[%s8097_s29 + $0x70] sm:$0xff] }
 0x29f   : > { %3686 = vperm.xlu0 %4529, %v4181_v27   ;;  %v3552_v9 = vmul.f32 %v7774_v38, %v8318_v50  ;;  %v1758_v22 = vshll.u32 %v1757_v16, 16  ;;  %v2288_v2 = vcvt.s32.f32 %v2286_v26  ;;  %v2301_v41 = vand.u32 65535, %v9947_v36 }
 0x2a0   : > { %v4485_v51 = vcvt.f32.s32 %v4484_v18  ;;  %v1756_v14 = vcvt.f32.s32 %v1755_v4  ;;  %vm2292_vm7 = vcmp.eq.f32.partialorder %v9948_v12, %v8325_v40  ;;  %vm9950_vm0 = vcmp.lt.s32.totalorder %v9949_v1, 1000  ;;  %v9951_v18 = vld [vmem:[#allocation133_spill] sm:$0xff]  ;;  %v9952_v12 = vld [vmem:[#allocation30_spill] sm:$0xff] }
 0x2a1   : > { %v3233_v24 = vsel %vm9950_vm0, %v3168_v42, 15  ;;  %vm3171_vm9 = vcmp.lt.s32.totalorder %v3046_v52, 14  ;;  %v2293_v15 = vsel %vm2292_vm7, %v2288_v2, inf  ;;  %v3614_v60 = vadd.f32 %v3613_v19, %v3552_v9  ;;  %v8333_v27 = vpop.xlane.xlu1 %1769  ;;  %v8335_v26 = vpop.xlane.xlu0 %2305  ;;  %v9953_v42 = vld [vmem:[#allocation111_spill] sm:$0xff]  ;;  %v9955_v2 = vld [vmem:[#allocation100_spill] sm:$0xff] }
 0x2a2   : > { %v1759_v38 = vadd.s32 %v1758_v22, %v1756_v14  ;;  %2294 = vmin.xlane.f32.xlu1 %v2293_v15  ;;  %v4293_v16 = vadd.s32 4294967295, %v4485_v51  ;;  %v2303_v46 = vcvt.s32.f32 %v2301_v41  ;;  %v2316_v4 = vand.u32 65535, %v9951_v18  ;;  %v9957_v15 = vld [vmem:[#allocation86_spill] sm:$0xff] }
 0x2a3   : > { %vm3296_vm10 = vcmp.eq.s32.totalorder %v5814_v34, %v3233_v24  ;;  %v3172_v36 = vsel %vm3171_vm9, %v3046_v52, 14  ;;  %v1787_v1 = vcvt.f32.s32 %v9952_v12  ;;  %vm2307_vm12 = vcmp.eq.f32.partialorder %v9953_v42, %v8335_v26  ;;  %v9958_v18 = vld [vmem:[#allocation154_spill] sm:$0xff]  ;;  %v285_v42 = vld [vmem:[%s8097_s29 + $0x80] sm:$0xff] }
 0x2a4   : > { %vm2494_vm3 = vcmp.eq.s32.totalorder %v1759_v38, %v283_v55  ;;  %v2308_v9 = vsel %vm2307_vm12, %v2303_v46, inf  ;;  %vm3043_vm13 = vcmp.gt.s32.totalorder %v4293_v16, 0  ;;  %v8344_v22 = vsel %vm3296_vm10, 1.0, %v9527_v3 }
 0x2a5   : > { %v4183_v19 = vsel %vm2494_vm3, 1.0, %v9527_v3  ;;  %9954 = vst [vmem:[#allocation50_spill] sm:$0xff] %v8344_v22  ;;  %vm9956_vm15 = vcmp.lt.s32.totalorder %v9955_v2, 1000  ;;  %v3044_v52 = vsel %vm3043_vm13, %v4293_v16, 0  ;;  %v1785_v51 = vpop.xlane.xlu1 %1784  ;;  %v8348_v14 = vpop.xlane.xlu0 %2320  ;;  %v2318_v24 = vcvt.s32.f32 %v2316_v4 }
 0x2a6   : > { %3696 = vperm.xlu0 %4529, %v4183_v19   ;;  %2309 = vmin.xlane.f32.xlu1 %v2308_v9  ;;  %v3235_v41 = vsel %vm9956_vm15, %v3172_v36, 15  ;;  %v2331_v55 = vand.u32 65535, %v9957_v15  ;;  %vm3169_vm2 = vcmp.lt.s32.totalorder %v3044_v52, 14  ;;  %v1788_v38 = vshll.u32 %v1787_v1, 16  ;;  %v9959_v9 = vld [vmem:[#allocation97_spill] sm:$0xff] }
 0x2a7   : > { %v1786_v46 = vcvt.f32.s32 %v1785_v51  ;;  %vm2322_vm4 = vcmp.eq.f32.partialorder %v9958_v18, %v8348_v14  ;;  %v3553_v19 = vmul.f32 %v7798_v39, %v8344_v22  ;;  %vm3298_vm1 = vcmp.eq.s32.totalorder %v5814_v34, %v3235_v41 }
 0x2a8   : > { %v2323_v12 = vsel %vm2322_vm4, %v2318_v24, inf  ;;  %v3170_v16 = vsel %vm3169_vm2, %v3044_v52, 14  ;;  %vm9960_vm11 = vcmp.lt.s32.totalorder %v9959_v9, 1000  ;;  %v3484_v2 = vadd.f32 %v8344_v22, %v3483_v11  ;;  %v9961_v24 = vld [vmem:[#allocation148_spill] sm:$0xff]  ;;  %v9970_v22 = vld [vmem:[#allocation161_spill] sm:$0xff] }
 0x2a9   : > { %v1789_v36 = vadd.s32 %v1788_v38, %v1786_v46  ;;  %v3234_v4 = vsel %vm9960_vm11, %v3170_v16, 15  ;;  %v8360_v1 = vpop.xlane.xlu1 %1799  ;;  %v8362_v51 = vpop.xlane.xlu0 %2335  ;;  %v2333_v15 = vcvt.s32.f32 %v2331_v55  ;;  %v2346_v18 = vand.u32 65535, %v9961_v24 }
 0x2aa   : > { %2324 = vmin.xlane.f32.xlu1 %v2323_v12  ;;  %vm3297_vm14 = vcmp.eq.s32.totalorder %v5814_v34, %v3234_v4  ;;  %v1817_v39 = vcvt.f32.s32 %v7768_v49  ;;  %vm2337_vm8 = vcmp.eq.f32.partialorder %v9768_v21, %v8362_v51  ;;  %v8370_v41 = vsel %vm3298_vm1, 1.0, %v9527_v3 }
 0x2ab   : > { %vm2496_vm5 = vcmp.eq.s32.totalorder %v1789_v36, %v285_v42  ;;  %9962 = vst [vmem:[#allocation102_spill] sm:$0xff] %v8370_v41  ;;  %v2338_v52 = vsel %vm2337_vm8, %v2333_v15, inf  ;;  %v8374_v38 = vsel %vm3297_vm14, 1.0, %v9527_v3  ;;  %v3615_v55 = vadd.f32 %v3614_v60, %v3553_v19  ;;  %v9964_v42 = vld [vmem:[#allocation152_spill] sm:$0xff]  ;;  %v287_v19 = vld [vmem:[%s8097_s29 + $0x90] sm:$0xff] }
 0x2ac   : > { %v4185_v11 = vsel %vm2496_vm5, 1.0, %v9527_v3  ;;  %9963 = vst [vmem:[#allocation168_spill] sm:$0xff] %v8374_v38  ;;  %v3485_v34 = vadd.f32 %v8374_v38, %v3484_v2  ;;  %v3554_v49 = vmul.f32 %v7809_v25, %v8374_v38  ;;  %v2348_v12 = vcvt.s32.f32 %v2346_v18 }
 0x2ad   : > { %3706 = vperm.xlu0 %4529, %v4185_v11   ;;  %v1815_v21 = vpop.xlane.xlu1 %1814  ;;  %v8379_v46 = vpop.xlane.xlu0 %2350  ;;  %v2361_v16 = vand.u32 65535, %v9964_v42  ;;  %v3555_v36 = vmul.f32 %v7826_v63, %v8370_v41  ;;  %v1818_v9 = vshll.u32 %v1817_v39, 16  ;;  %vm4070_vm3 = vcmask 1040384  }
 0x2ae   : > { %2339 = vmin.xlane.f32.xlu1 %v2338_v52  ;;  %v1816_v4 = vcvt.f32.s32 %v1815_v21  ;;  %vm2352_vm6 = vcmp.eq.f32.partialorder %v9773_v17, %v8379_v46  ;;  %v3486_v2 = vadd.f32 %v8370_v41, %v3485_v34  ;;  %v3616_v15 = vadd.f32 %v3615_v55, %v3554_v49  ;;  %v9965_v52 = vld [vmem:[#allocation157_spill] sm:$0xff]  ;;  %v9966_v21 = vld [vmem:[#allocation31_spill] sm:$0xff] }
 0x2af   : > { %v2353_v60 = vsel %vm2352_vm6, %v2348_v12, inf  ;;  %v2363_v11 = vcvt.s32.f32 %v2361_v16  ;;  %v2376_v42 = vand.u32 65535, %v9965_v52  ;;  %v1847_v38 = vcvt.f32.s32 %v9966_v21  ;;  %v9967_v17 = vld [vmem:[#allocation5_spill] sm:$0xff] }
 0x2b0   : > { %v1819_v25 = vadd.s32 %v1818_v9, %v1816_v4  ;;  %v3487_v63 = vrot.slane %v3486_v2, 4  ;;  %v3617_v39 = vadd.f32 %v3616_v15, %v3555_v36 }
 0x2b1   : > { %v8388_v24 = vpop.xlane.xlu1 %1829  ;;  %v8390_v18 = vpop.xlane.xlu0 %2365  ;;  %v2378_v4 = vcvt.s32.f32 %v2376_v42  ;;  %v1848_v21 = vshll.u32 %v1847_v38, 16  ;;  %v1877_v38 = vcvt.f32.s32 %v7847_v62 }
 0x2b2   : > { %2354 = vmin.xlane.f32.xlu1 %v2353_v60  ;;  %vm2367_vm7 = vcmp.eq.f32.partialorder %v9967_v17, %v8390_v18  ;;  %vm2498_vm0 = vcmp.eq.s32.totalorder %v1819_v25, %v287_v19  ;;  %v3488_v49 = vadd.f32 %v3487_v63, %v3486_v2  ;;  %v3618_v12 = vrot.slane %v3617_v39, 4  ;;  %v9968_v60 = vld [vmem:[#allocation134_spill] sm:$0xff]  ;;  %v289_v17 = vld [vmem:[%s8097_s29 + $0xa0] sm:$0xff] }
 0x2b3   : > { %v4187_v34 = vsel %vm2498_vm0, 1.0, %v9527_v3  ;;  %v2368_v55 = vsel %vm2367_vm7, %v2363_v11, inf  ;;  %v2391_v36 = vand.u32 65535, %v9968_v60  ;;  %v9969_v19 = vld [vmem:[#allocation6_spill] sm:$0xff]  ;;  %v2406_v60 = vand.u32 65535, %v9970_v22 }
 0x2b4   : > { %3716 = vperm.xlu0 %4529, %v4187_v34   ;;  %v3489_v15 = vrot.slane %v3488_v49, 2  ;;  %v3619_v52 = vadd.f32 %v3618_v12, %v3617_v39 }
 0x2b5   : > { %v1845_v9 = vpop.xlane.xlu1 %1844  ;;  %v8397_v16 = vpop.xlane.xlu0 %2380  ;;  %v2393_v42 = vcvt.s32.f32 %v2391_v36  ;;  %v2408_v22 = vcvt.s32.f32 %v2406_v60  ;;  %v9971_v36 = vld [vmem:[#allocation163_spill] sm:$0xff] }
 0x2b6   : > { %2369 = vmin.xlane.f32.xlu1 %v2368_v55  ;;  %v1846_v41 = vcvt.f32.s32 %v1845_v9  ;;  %vm2382_vm9 = vcmp.eq.f32.partialorder %v9969_v19, %v8397_v16  ;;  %v3490_v11 = vadd.f32 %v3489_v15, %v3488_v49  ;;  %v3620_v2 = vrot.slane %v3619_v52, 2 }
 0x2b7   : > { %v2383_v25 = vsel %vm2382_vm9, %v2378_v4, inf  ;;  %v2421_v15 = vand.u32 65535, %v9971_v36 }
 0x2b8   : > { %v1849_v63 = vadd.s32 %v1848_v21, %v1846_v41  ;;  %v3491_v50 = vrot.slane %v3490_v11, 1  ;;  %v3621_v39 = vadd.f32 %v3620_v2, %v3619_v52  ;;  %v1878_v21 = vshll.u32 %v1877_v38, 16 }
 0x2b9   : > { %v8403_v34 = vpop.xlane.xlu1 %1859  ;;  %v8405_v55 = vpop.xlane.xlu0 %2395  ;;  %v2423_v60 = vcvt.s32.f32 %v2421_v15 }
 0x2ba   : > { %2384 = vmin.xlane.f32.xlu1 %v2383_v25  ;;  %vm2397_vm10 = vcmp.eq.f32.partialorder %v9793_v6, %v8405_v55  ;;  %vm2500_vm12 = vcmp.eq.s32.totalorder %v1849_v63, %v289_v17  ;;  %v3622_v12 = vrot.slane %v3621_v39, 1  ;;  %v3492_v52 = vadd.f32 %v3491_v50, %v3490_v11  ;;  %v9972_v6 = vld [vmem:[#allocation171_spill] sm:$0xff]  ;;  %v291_v17 = vld [vmem:[%s8097_s29 + $0xb0] sm:$0xff]  ;;  %v9974_v11 = vld [vmem:[#allocation172_spill] sm:$0xff] }
 0x2bb   : > { %v4189_v49 = vsel %vm2500_vm12, 1.0, %v9527_v3  ;;  %v2398_v41 = vsel %vm2397_vm10, %v2393_v42, inf  ;;  %v1907_v50 = vcvt.f32.s32 %v7883_v35 }
 0x2bc   : > { %3726 = vperm.xlu0 %4529, %v4189_v49   ;;  %v3623_v62 = vadd.f32 %v3622_v12, %v3621_v39 }
 0x2bd   : > { %v1875_v9 = vpop.xlane.xlu1 %1874  ;;  %v8412_v4 = vpop.xlane.xlu0 %2410 }
 0x2be   : > { %2399 = vmin.xlane.f32.xlu1 %v2398_v41  ;;  %v1876_v19 = vcvt.f32.s32 %v1875_v9  ;;  %vm2412_vm13 = vcmp.eq.f32.partialorder %v9972_v6, %v8412_v4  ;;  %v8418_v2 = vsel %vm4070_vm3, %v3492_v52, %v3623_v62  ;;  %v9973_v41 = vld [vmem:[#allocation165_spill] sm:$0xff]  ;;  %v9975_v52 = vld [vmem:[#allocation166_spill] sm:$0xff]  ;;  %v1908_v62 = vshll.u32 %v1907_v50, 16  ;;  %v293_v6 = vld [vmem:[%s8097_s29 + $0xc0] sm:$0xff] }
 0x2bf   : > { %v2413_v25 = vsel %vm2412_vm13, %v2408_v22, inf  ;;  %v2436_v36 = vand.u32 65535, %v9973_v41  ;;  %v2451_v15 = vand.u32 65535, %v9975_v52  ;;  %v9977_v41 = vld [vmem:[#allocation170_spill] sm:$0xff] }
 0x2c0   : > { %v1879_v63 = vadd.s32 %v1878_v21, %v1876_v19  ;;  %v9976_v19 = vld [vmem:[#allocation174_spill] sm:$0xff] }
 0x2c1   : > { %v8420_v42 = vpop.xlane.xlu1 %1889  ;;  %v8422_v49 = vpop.xlane.xlu0 %2425  ;;  %v2438_v22 = vcvt.s32.f32 %v2436_v36  ;;  %v1937_v36 = vcvt.f32.s32 %v7922_v33 }
 0x2c2   : > { %2414 = vmin.xlane.f32.xlu1 %v2413_v25  ;;  %vm2427_vm15 = vcmp.eq.f32.partialorder %v9974_v11, %v8422_v49  ;;  %vm2502_vm2 = vcmp.eq.s32.totalorder %v1879_v63, %v291_v17  ;;  %v2466_v11 = vand.u32 65535, %v9977_v41  ;;  %v297_v41 = vld [vmem:[%s8097_s29 + $0xe0] sm:$0xff] }
 0x2c3   : > { %v4191_v39 = vsel %vm2502_vm2, 1.0, %v9527_v3  ;;  %v2428_v38 = vsel %vm2427_vm15, %v2423_v60, inf  ;;  %v2453_v60 = vcvt.s32.f32 %v2451_v15  ;;  %v1938_v52 = vshll.u32 %v1937_v36, 16 }
 0x2c4   : > { %3736 = vperm.xlu0 %4529, %v4191_v39   ;;  %v1997_v36 = vcvt.f32.s32 %v7991_v54  ;;  %v2027_v54 = vcvt.f32.s32 %v8021_v29 }
 0x2c5   : > { %v1905_v12 = vpop.xlane.xlu1 %1904  ;;  %v8429_v9 = vpop.xlane.xlu0 %2440 }
 0x2c6   : > { %2429 = vmin.xlane.f32.xlu1 %v2428_v38  ;;  %v1906_v21 = vcvt.f32.s32 %v1905_v12  ;;  %vm2442_vm4 = vcmp.eq.f32.partialorder %v9976_v19, %v8429_v9  ;;  %v1967_v19 = vcvt.f32.s32 %v7953_v7 }
 0x2c7   : > { %v2443_v35 = vsel %vm2442_vm4, %v2438_v22, inf  ;;  %v2468_v22 = vcvt.s32.f32 %v2466_v11 }
 0x2c8   : > { %v1909_v25 = vadd.s32 %v1908_v62, %v1906_v21  ;;  %v295_v62 = vld [vmem:[%s8097_s29 + $0xd0] sm:$0xff] }
 0x2c9   : > { %v8435_v17 = vpop.xlane.xlu1 %1919  ;;  %v8437_v63 = vpop.xlane.xlu0 %2455 }
 0x2ca   : > { %2444 = vmin.xlane.f32.xlu1 %v2443_v35  ;;  %vm2457_vm1 = vcmp.eq.f32.partialorder %v9817_v44, %v8437_v63  ;;  %vm2504_vm11 = vcmp.eq.s32.totalorder %v1909_v25, %v293_v6  ;;  %v1968_v25 = vshll.u32 %v1967_v19, 16  ;;  %v273_v19 = vld [vmem:[%s8097_s29 + $0x20] sm:$0xff] }
 0x2cb   : > { %v4193_v50 = vsel %vm2504_vm11, 1.0, %v9527_v3  ;;  %v2458_v39 = vsel %vm2457_vm1, %v2453_v60, inf  ;;  %vm2484_vm9 = vcmp.eq.s32.totalorder %v8175_v5, %v273_v19  ;;  %v277_v19 = vld [vmem:[%s8097_s29 + $0x40] sm:$0xff] }
 0x2cc   : > { %3746 = vperm.xlu0 %4529, %v4193_v50   ;;  %v271_v50 = vld [vmem:[%s8097_s29 + $0x10] sm:$0xff]  ;;  %v4173_v29 = vsel %vm2484_vm9, 1.0, %v9527_v3  ;;  %vm2488_vm2 = vcmp.eq.s32.totalorder %v8245_v45, %v277_v19 }
 0x2cd   : > { %v1935_v38 = vpop.xlane.xlu1 %1934  ;;  %v8444_v12 = vpop.xlane.xlu0 %2470  ;;  %vm2482_vm6 = vcmp.eq.s32.totalorder %v8144_v47, %v271_v50  ;;  %v2057_v50 = vcvt.f32.s32 %v8054_v58 }
 0x2ce   : > { %2459 = vmin.xlane.f32.xlu1 %v2458_v39  ;;  %v1936_v15 = vcvt.f32.s32 %v1935_v38  ;;  %vm2472_vm14 = vcmp.eq.f32.partialorder %v9822_v32, %v8444_v12  ;;  %v1998_v38 = vshll.u32 %v1997_v36, 16 }
 0x2cf   : > { %v2473_v33 = vsel %vm2472_vm14, %v2468_v22, inf }
 0x2d0   : > { %v1939_v44 = vadd.s32 %v1938_v52, %v1936_v15  ;;  %v272_v52 = vld [vmem:[%s8097_s29 + $0x18] sm:$0xff]  ;;  %v299_v15 = vld [vmem:[%s8097_s29 + $0xf0] sm:$0xff] }
 0x2d1   : > { %v8449_v21 = vpop.xlane.xlu1 %1949  ;;  %vm2483_vm7 = vcmp.eq.s32.totalorder %v8160_v13, %v272_v52 }
 0x2d2   : > { %2474 = vmin.xlane.f32.xlu1 %v2473_v33  ;;  %vm2506_vm8 = vcmp.eq.s32.totalorder %v1939_v44, %v295_v62  ;;  %v4171_v62 = vsel %vm2482_vm6, 1.0, %v9527_v3 }
 0x2d3   : > { %v4195_v35 = vsel %vm2506_vm8, 1.0, %v9527_v3 }
 0x2d4   : > { %3756 = vperm.xlu0 %4529, %v4195_v35   ;;  %v4172_v35 = vsel %vm2483_vm7, 1.0, %v9527_v3 }
 0x2d5   : > { %v1965_v6 = vpop.xlane.xlu1 %1964 }
 0x2d6   : > { %v1966_v60 = vcvt.f32.s32 %v1965_v6 }
 0x2d8   : > { %v1969_v32 = vadd.s32 %v1968_v25, %v1966_v60  ;;  %v2028_v25 = vshll.u32 %v2027_v54, 16  ;;  %v2087_v54 = vcvt.f32.s32 %v8086_v61 }
 0x2d9   : > { %v8454_v11 = vpop.xlane.xlu1 %1979 }
 0x2da   : > { %vm2508_vm5 = vcmp.eq.s32.totalorder %v1969_v32, %v297_v41  ;;  %v274_v41 = vld [vmem:[%s8097_s29 + $0x28] sm:$0xff]  ;;  %v301_v32 = vld [vmem:[%s8097_s29 + $0x100] sm:$0xff] }
 0x2db   : > { %v4197_v7 = vsel %vm2508_vm5, 1.0, %v9527_v3  ;;  %vm2485_vm10 = vcmp.eq.s32.totalorder %v8193_v28, %v274_v41  ;;  %v305_v41 = vld [vmem:[%s8097_s29 + $0x120] sm:$0xff] }
 0x2dc   : > { %3766 = vperm.xlu0 %4529, %v4197_v7   ;;  %v275_v7 = vld [vmem:[%s8097_s29 + $0x30] sm:$0xff] }
 0x2dd   : > { %v1995_v39 = vpop.xlane.xlu1 %1994  ;;  %vm2486_vm3 = vcmp.eq.s32.totalorder %v8210_v57, %v275_v7 }
 0x2de   : > { %v1996_v22 = vcvt.f32.s32 %v1995_v39  ;;  %v4174_v39 = vsel %vm2485_vm10, 1.0, %v9527_v3  ;;  %v4175_v58 = vsel %vm2486_vm3, 1.0, %v9527_v3 }
 0x2e0   : > { %v1999_v33 = vadd.s32 %v1998_v38, %v1996_v22  ;;  %v2058_v22 = vshll.u32 %v2057_v50, 16  ;;  %v9978_v50 = vld [vmem:[#allocation120_spill] sm:$0xff] }
 0x2e1   : > { %v8463_v44 = vpop.xlane.xlu1 %2009  ;;  %v1772_v45 = vcvt.f32.s32 %v9978_v50  ;;  %v9981_v50 = vld [vmem:[#allocation130_spill] sm:$0xff] }
 0x2e2   : > { %vm2510_vm0 = vcmp.eq.s32.totalorder %v1999_v33, %v299_v15  ;;  %v276_v15 = vld [vmem:[%s8097_s29 + $0x38] sm:$0xff]  ;;  %v303_v33 = vld [vmem:[%s8097_s29 + $0x110] sm:$0xff] }
 0x2e3   : > { %3636 = vperm.xlu1 %4535, %v4171_v62   ;;  %v4199_v47 = vsel %vm2510_vm0, 1.0, %v9527_v3  ;;  %vm2487_vm13 = vcmp.eq.s32.totalorder %v8227_v8, %v276_v15  ;;  %v4177_v8 = vsel %vm2488_vm2, 1.0, %v9527_v3  ;;  %v9979_v15 = vld [vmem:[#allocation127_spill] sm:$0xff] }
 0x2e4   : > { %3776 = vperm.xlu0 %4529, %v4199_v47   ;;  %v4176_v47 = vsel %vm2487_vm13, 1.0, %v9527_v3 }
 0x2e5   : > { %v2025_v6 = vpop.xlane.xlu1 %2024 }
 0x2e6   : > { %v2026_v60 = vcvt.f32.s32 %v2025_v6  ;;  %v2088_v6 = vshll.u32 %v2087_v54, 16 }
 0x2e7   : > { %3641 = vperm.xlu1 %4535, %v4172_v35  }
 0x2e8   : > { %v2029_v36 = vadd.s32 %v2028_v25, %v2026_v60  ;;  %v278_v60 = vld [vmem:[%s8097_s29 + $0x48] sm:$0xff] }
 0x2e9   : > { %v8474_v13 = vpop.xlane.xlu1 %2039  ;;  %vm2489_vm4 = vcmp.eq.s32.totalorder %v8263_v0, %v278_v60 }
 0x2ea   : > { %vm2512_vm12 = vcmp.eq.s32.totalorder %v2029_v36, %v301_v32  ;;  %v2117_v36 = vcvt.f32.s32 %v8131_v23  ;;  %v282_v23 = vld [vmem:[%s8097_s29 + $0x68] sm:$0xff] }
 0x2eb   : > { %3646 = vperm.xlu1 %4535, %v4173_v29   ;;  %v4201_v5 = vsel %vm2512_vm12, 1.0, %v9527_v3  ;;  %v280_v29 = vld [vmem:[%s8097_s29 + $0x58] sm:$0xff]  ;;  %vm2493_vm14 = vcmp.eq.s32.totalorder %v8320_v30, %v282_v23 }
 0x2ec   : > { %3786 = vperm.xlu0 %4529, %v4201_v5   ;;  %v4178_v5 = vsel %vm2489_vm4, 1.0, %v9527_v3  ;;  %vm2491_vm11 = vcmp.eq.s32.totalorder %v8296_v31, %v280_v29  ;;  %v2118_v0 = vshll.u32 %v2117_v36, 16  ;;  %v2147_v31 = vcvt.f32.s32 %v8164_v56  ;;  %v286_v36 = vld [vmem:[%s8097_s29 + $0x88] sm:$0xff]  ;;  %v288_v23 = vld [vmem:[%s8097_s29 + $0x98] sm:$0xff] }
 0x2ed   : > { %v2055_v38 = vpop.xlane.xlu1 %2054  ;;  %v4180_v54 = vsel %vm2491_vm11, 1.0, %v9527_v3 }
 0x2ee   : > { %v2056_v52 = vcvt.f32.s32 %v2055_v38  ;;  %v2148_v30 = vshll.u32 %v2147_v31, 16  ;;  %v290_v31 = vld [vmem:[%s8097_s29 + $0xa8] sm:$0xff] }
 0x2ef   : > { %3651 = vperm.xlu1 %4535, %v4174_v39   ;;  %v1771_v39 = vcvt.f32.s32 %v8333_v27  ;;  %v284_v27 = vld [vmem:[%s8097_s29 + $0x78] sm:$0xff] }
 0x2f0   : > { %v2059_v62 = vadd.s32 %v2058_v22, %v2056_v52  ;;  %v1773_v52 = vshll.u32 %v1772_v45, 16  ;;  %v1862_v45 = vcvt.f32.s32 %v9981_v50 }
 0x2f1   : > { %v8485_v28 = vpop.xlane.xlu1 %2069 }
 0x2f2   : > { %vm2514_vm15 = vcmp.eq.s32.totalorder %v2059_v62, %v303_v33  ;;  %v1802_v33 = vcvt.f32.s32 %v9979_v15  ;;  %v307_v62 = vld [vmem:[%s8097_s29 + $0x130] sm:$0xff]  ;;  %v1774_v19 = vadd.s32 %v1773_v52, %v1771_v39  ;;  %v1863_v52 = vshll.u32 %v1862_v45, 16  ;;  %v9982_v15 = vld [vmem:[#allocation194_spill] sm:$0xff] }
 0x2f3   : > { %3656 = vperm.xlu1 %4535, %v4175_v58   ;;  %v4203_v57 = vsel %vm2514_vm15, 1.0, %v9527_v3 }
 0x2f4   : > { %3796 = vperm.xlu0 %4529, %v4203_v57   ;;  %v1801_v57 = vcvt.f32.s32 %v8360_v1  ;;  %vm2495_vm5 = vcmp.eq.s32.totalorder %v1774_v19, %v284_v27 }
 0x2f5   : > { %v2085_v35 = vpop.xlane.xlu1 %2084  ;;  %v4184_v39 = vsel %vm2495_vm5, 1.0, %v9527_v3 }
 0x2f6   : > { %v2086_v25 = vcvt.f32.s32 %v2085_v35  ;;  %v1803_v35 = vshll.u32 %v1802_v33, 16  ;;  %v1892_v33 = vcvt.f32.s32 %v9982_v15 }
 0x2f7   : > { %3661 = vperm.xlu1 %4535, %v4176_v47  }
 0x2f8   : > { %v2089_v32 = vadd.s32 %v2088_v6, %v2086_v25  ;;  %v9980_v6 = vld [vmem:[#allocation49_spill] sm:$0xff]  ;;  %v1804_v1 = vadd.s32 %v1803_v35, %v1801_v57  ;;  %v1893_v27 = vshll.u32 %v1892_v33, 16  ;;  %v1922_v35 = vcvt.f32.s32 %v7902_v48 }
 0x2f9   : > { %v8496_v61 = vpop.xlane.xlu1 %2099  ;;  %v1832_v25 = vcvt.f32.s32 %v9980_v6  ;;  %v311_v6 = vld [vmem:[%s8097_s29 + $0x150] sm:$0xff]  ;;  %v1981_v33 = vcvt.f32.s32 %v8454_v11  ;;  %v2011_v11 = vcvt.f32.s32 %v8463_v44  ;;  %v2267_v44 = vcvt.f32.s32 %v8299_v10 }
 0x2fa   : > { %vm2516_vm1 = vcmp.eq.s32.totalorder %v2089_v32, %v305_v41  ;;  %v4182_v41 = vsel %vm2493_vm14, 1.0, %v9527_v3  ;;  %v1831_v32 = vcvt.f32.s32 %v8388_v24  ;;  %vm2497_vm6 = vcmp.eq.s32.totalorder %v1804_v1, %v286_v36 }
 0x2fb   : > { %3666 = vperm.xlu1 %4535, %v4177_v8   ;;  %v4205_v7 = vsel %vm2516_vm1, 1.0, %v9527_v3  ;;  %v1833_v29 = vshll.u32 %v1832_v25, 16  ;;  %v2177_v24 = vcvt.f32.s32 %v8196_v20  ;;  %v1921_v1 = vcvt.f32.s32 %v8435_v17 }
 0x2fc   : > { %3806 = vperm.xlu0 %4529, %v4205_v7   ;;  %v309_v7 = vld [vmem:[%s8097_s29 + $0x140] sm:$0xff]  ;;  %v1951_v17 = vcvt.f32.s32 %v8449_v21  ;;  %v2237_v21 = vcvt.f32.s32 %v8266_v37 }
 0x2fd   : > { %v2115_v38 = vpop.xlane.xlu1 %2114  ;;  %v2178_v57 = vshll.u32 %v2177_v24, 16  ;;  %v313_v24 = vld [vmem:[%s8097_s29 + $0x160] sm:$0xff] }
 0x2fe   : > { %v2116_v22 = vcvt.f32.s32 %v2115_v38  ;;  %v1834_v38 = vadd.s32 %v1833_v29, %v1831_v32 }
 0x2ff   : > { %3671 = vperm.xlu1 %4535, %v4178_v5  }
 0x300   : > { %v2119_v58 = vadd.s32 %v2118_v0, %v2116_v22  ;;  %v1861_v0 = vcvt.f32.s32 %v8403_v34  ;;  %v1891_v34 = vcvt.f32.s32 %v8420_v42  ;;  %vm2499_vm0 = vcmp.eq.s32.totalorder %v1834_v38, %v288_v23  ;;  %v9984_v38 = vld [vmem:[#allocation197_spill] sm:$0xff] }
 0x301   : > { %v8511_v47 = vpop.xlane.xlu1 %2129  ;;  %v2207_v42 = vcvt.f32.s32 %v8233_v53 }
 0x302   : > { %vm2518_vm8 = vcmp.eq.s32.totalorder %v2119_v58, %v307_v62  ;;  %v4186_v58 = vsel %vm2497_vm6, 1.0, %v9527_v3 }
 0x303   : > { %3681 = vperm.xlu1 %4535, %v4180_v54   ;;  %v4207_v60 = vsel %vm2518_vm8, 1.0, %v9527_v3  ;;  %v1864_v54 = vadd.s32 %v1863_v52, %v1861_v0  ;;  %v1982_v0 = vcvt.f32.s32 %v9984_v38  ;;  %v302_v38 = vld [vmem:[%s8097_s29 + $0x108] sm:$0xff] }
 0x304   : > { %3816 = vperm.xlu0 %4529, %v4207_v60   ;;  %v4188_v60 = vsel %vm2499_vm0, 1.0, %v9527_v3 }
 0x305   : > { %vm2501_vm9 = vcmp.eq.s32.totalorder %v1864_v54, %v290_v31  ;;  %v1983_v54 = vshll.u32 %v1982_v0, 16 }
 0x306   : > { %v2145_v8 = vpop.xlane.xlu1 %2144  ;;  %v4190_v29 = vsel %vm2501_vm9, 1.0, %v9527_v3 }
 0x307   : > { %3691 = vperm.xlu1 %4535, %v4182_v41   ;;  %v2146_v56 = vcvt.f32.s32 %v2145_v8  ;;  %v1894_v41 = vadd.s32 %v1893_v27, %v1891_v34  ;;  %v292_v8 = vld [vmem:[%s8097_s29 + $0xb8] sm:$0xff]  ;;  %v9985_v34 = vld [vmem:[#allocation32_spill] sm:$0xff]  ;;  %v1984_v31 = vadd.s32 %v1983_v54, %v1981_v33 }
 0x309   : > { %v2149_v5 = vadd.s32 %v2148_v30, %v2146_v56  ;;  %v1923_v30 = vshll.u32 %v1922_v35, 16  ;;  %v9983_v56 = vld [vmem:[#allocation145_spill] sm:$0xff]  ;;  %vm2503_vm12 = vcmp.eq.s32.totalorder %v1894_v41, %v292_v8  ;;  %v2238_v35 = vshll.u32 %v2237_v21, 16 }
 0x30a   : > { %v8525_v22 = vpop.xlane.xlu1 %2159  ;;  %v1952_v48 = vcvt.f32.s32 %v9983_v56  ;;  %v4192_v52 = vsel %vm2503_vm12, 1.0, %v9527_v3  ;;  %v2041_v56 = vcvt.f32.s32 %v8474_v13  ;;  %v2071_v13 = vcvt.f32.s32 %v8485_v28 }
 0x30b   : > { %3701 = vperm.xlu1 %4535, %v4184_v39   ;;  %vm2520_vm7 = vcmp.eq.s32.totalorder %v2149_v5, %v309_v7  ;;  %v1924_v50 = vadd.s32 %v1923_v30, %v1921_v1  ;;  %v2208_v7 = vshll.u32 %v2207_v42, 16  ;;  %v294_v5 = vld [vmem:[%s8097_s29 + $0xc8] sm:$0xff]  ;;  %v315_v1 = vld [vmem:[%s8097_s29 + $0x170] sm:$0xff]  ;;  %v2297_v28 = vcvt.f32.s32 %v8325_v40 }
 0x30c   : > { %v4209_v62 = vsel %vm2520_vm7, 1.0, %v9527_v3  ;;  %v1953_v39 = vshll.u32 %v1952_v48, 16 }
 0x30d   : > { %3826 = vperm.xlu0 %4529, %v4209_v62   ;;  %vm2505_vm3 = vcmp.eq.s32.totalorder %v1924_v50, %v294_v5  ;;  %v9987_v50 = vld [vmem:[#allocation43_spill] sm:$0xff] }
 0x30e   : > { %v2175_v19 = vpop.xlane.xlu1 %2174  ;;  %v1954_v15 = vadd.s32 %v1953_v39, %v1951_v17  ;;  %v2072_v17 = vcvt.f32.s32 %v9987_v50  ;;  %v2268_v39 = vshll.u32 %v2267_v44, 16  ;;  %v9991_v50 = vld [vmem:[#allocation158_spill] sm:$0xff] }
 0x30f   : > { %3711 = vperm.xlu1 %4535, %v4186_v58   ;;  %v2176_v20 = vcvt.f32.s32 %v2175_v19  ;;  %v296_v58 = vld [vmem:[%s8097_s29 + $0xd8] sm:$0xff]  ;;  %v2012_v19 = vcvt.f32.s32 %v9985_v34 }
 0x310   : > { %vm2507_vm15 = vcmp.eq.s32.totalorder %v1954_v15, %v296_v58  ;;  %v2073_v0 = vshll.u32 %v2072_v17, 16  ;;  %v2101_v58 = vcvt.f32.s32 %v8496_v61  ;;  %v304_v34 = vld [vmem:[%s8097_s29 + $0x118] sm:$0xff]  ;;  %v2131_v61 = vcvt.f32.s32 %v8511_v47 }
 0x311   : > { %v2179_v25 = vadd.s32 %v2178_v57, %v2176_v20  ;;  %v4194_v20 = vsel %vm2505_vm3, 1.0, %v9527_v3  ;;  %v4196_v8 = vsel %vm2507_vm15, 1.0, %v9527_v3  ;;  %v2327_v47 = vcvt.f32.s32 %v8348_v14 }
 0x312   : > { %v2074_v21 = vadd.s32 %v2073_v0, %v2071_v13  ;;  %v2192_v17 = vcvt.f32.s32 %v9991_v50  ;;  %v318_v50 = vld [vmem:[%s8097_s29 + $0x188] sm:$0xff] }
 0x313   : > { %v8538_v32 = vpop.xlane.xlu1 %2189  ;;  %3721 = vperm.xlu1 %4535, %v4188_v60   ;;  %vm2522_vm10 = vcmp.eq.s32.totalorder %v2179_v25, %v311_v6  ;;  %v298_v6 = vld [vmem:[%s8097_s29 + $0xe8] sm:$0xff]  ;;  %v2013_v25 = vshll.u32 %v2012_v19, 16  ;;  %v9986_v60 = vld [vmem:[#allocation91_spill] sm:$0xff] }
 0x314   : > { %v4211_v36 = vsel %vm2522_vm10, 1.0, %v9527_v3  ;;  %v2042_v41 = vcvt.f32.s32 %v9986_v60  ;;  %vm2509_vm2 = vcmp.eq.s32.totalorder %v1984_v31, %v298_v6  ;;  %vm2515_vm8 = vcmp.eq.s32.totalorder %v2074_v21, %v304_v34  ;;  %v306_v6 = vld [vmem:[%s8097_s29 + $0x128] sm:$0xff]  ;;  %v9990_v60 = vld [vmem:[#allocation54_spill] sm:$0xff] }
 0x315   : > { %3836 = vperm.xlu0 %4529, %v4211_v36   ;;  %v2014_v30 = vadd.s32 %v2013_v25, %v2011_v11  ;;  %v300_v36 = vld [vmem:[%s8097_s29 + $0xf8] sm:$0xff]  ;;  %v9993_v34 = vld [vmem:[#allocation8_spill] sm:$0xff] }
 0x317   : > { %v2205_v45 = vpop.xlane.xlu1 %2204  ;;  %3731 = vperm.xlu1 %4535, %v4190_v29   ;;  %v2043_v29 = vshll.u32 %v2042_v41, 16  ;;  %vm2511_vm1 = vcmp.eq.s32.totalorder %v2014_v30, %v300_v36  ;;  %v2162_v41 = vcvt.f32.s32 %v9990_v60  ;;  %v308_v36 = vld [vmem:[%s8097_s29 + $0x138] sm:$0xff] }
 0x318   : > { %v2206_v53 = vcvt.f32.s32 %v2205_v45  ;;  %v4200_v33 = vsel %vm2511_vm1, 1.0, %v9527_v3 }
 0x31a   : > { %v2209_v23 = vadd.s32 %v2208_v7, %v2206_v53  ;;  %v4198_v7 = vsel %vm2509_vm2, 1.0, %v9527_v3  ;;  %v2044_v53 = vadd.s32 %v2043_v29, %v2041_v56  ;;  %v2161_v56 = vcvt.f32.s32 %v8525_v22 }
 0x31b   : > { %v8551_v62 = vpop.xlane.xlu1 %2219  ;;  %3741 = vperm.xlu1 %4535, %v4192_v52   ;;  %v317_v52 = vld [vmem:[%s8097_s29 + $0x180] sm:$0xff]  ;;  %v2163_v29 = vshll.u32 %v2162_v41, 16  ;;  %v2191_v22 = vcvt.f32.s32 %v8538_v32  ;;  %v2357_v32 = vcvt.f32.s32 %v8379_v46 }
 0x31c   : > { %vm2524_vm13 = vcmp.eq.s32.totalorder %v2209_v23, %v313_v24  ;;  %v9988_v24 = vld [vmem:[#allocation198_spill] sm:$0xff]  ;;  %vm2513_vm11 = vcmp.eq.s32.totalorder %v2044_v53, %v302_v38  ;;  %v9992_v38 = vld [vmem:[#allocation47_spill] sm:$0xff] }
 0x31d   : > { %v4213_v57 = vsel %vm2524_vm13, 1.0, %v9527_v3  ;;  %v2102_v23 = vcvt.f32.s32 %v9988_v24  ;;  %v4202_v11 = vsel %vm2513_vm11, 1.0, %v9527_v3  ;;  %v2164_v53 = vadd.s32 %v2163_v29, %v2161_v56  ;;  %v321_v24 = vld [vmem:[%s8097_s29 + $0x1a0] sm:$0xff] }
 0x31e   : > { %3846 = vperm.xlu0 %4529, %v4213_v57   ;;  %v9989_v57 = vld [vmem:[#allocation151_spill] sm:$0xff]  ;;  %v2222_v0 = vcvt.f32.s32 %v9992_v38 }
 0x31f   : > { %v2235_v27 = vpop.xlane.xlu1 %2234  ;;  %3751 = vperm.xlu1 %4535, %v4194_v20   ;;  %v2103_v19 = vshll.u32 %v2102_v23, 16  ;;  %v2132_v20 = vcvt.f32.s32 %v9989_v57 }
 0x320   : > { %v2236_v37 = vcvt.f32.s32 %v2235_v27 }
 0x321   : > { %v2104_v27 = vadd.s32 %v2103_v19, %v2101_v58  ;;  %v2133_v25 = vshll.u32 %v2132_v20, 16  ;;  %v312_v58 = vld [vmem:[%s8097_s29 + $0x158] sm:$0xff]  ;;  %v2252_v19 = vcvt.f32.s32 %v9993_v34 }
 0x322   : > { %v2239_v42 = vadd.s32 %v2238_v35, %v2236_v37  ;;  %v2298_v37 = vshll.u32 %v2297_v28, 16  ;;  %v2223_v28 = vshll.u32 %v2222_v0, 16 }
 0x323   : > { %v8564_v48 = vpop.xlane.xlu1 %2249  ;;  %3761 = vperm.xlu1 %4535, %v4196_v8   ;;  %v4204_v8 = vsel %vm2515_vm8, 1.0, %v9527_v3  ;;  %v2134_v30 = vadd.s32 %v2133_v25, %v2131_v61  ;;  %vm2517_vm5 = vcmp.eq.s32.totalorder %v2104_v27, %v306_v6  ;;  %v2358_v27 = vshll.u32 %v2357_v32, 16  ;;  %v314_v61 = vld [vmem:[%s8097_s29 + $0x168] sm:$0xff]  ;;  %v327_v32 = vld [vmem:[%s8097_s29 + $0x1d0] sm:$0xff] }
 0x324   : > { %vm2526_vm4 = vcmp.eq.s32.totalorder %v2239_v42, %v315_v1  ;;  %v319_v1 = vld [vmem:[%s8097_s29 + $0x190] sm:$0xff] }
 0x325   : > { %v4215_v45 = vsel %vm2526_vm4, 1.0, %v9527_v3  ;;  %vm2519_vm7 = vcmp.eq.s32.totalorder %v2134_v30, %v308_v36  ;;  %v2312_v30 = vcvt.f32.s32 %v8335_v26 }
 0x326   : > { %3856 = vperm.xlu0 %4529, %v4215_v45  }
 0x327   : > { %v2265_v5 = vpop.xlane.xlu1 %2264  ;;  %3771 = vperm.xlu1 %4535, %v4198_v7   ;;  %v4206_v7 = vsel %vm2517_vm5, 1.0, %v9527_v3 }
 0x328   : > { %v2266_v10 = vcvt.f32.s32 %v2265_v5  ;;  %v2328_v5 = vshll.u32 %v2327_v47, 16 }
 0x32a   : > { %v2269_v15 = vadd.s32 %v2268_v39, %v2266_v10  ;;  %v310_v39 = vld [vmem:[%s8097_s29 + $0x148] sm:$0xff]  ;;  %v2193_v10 = vshll.u32 %v2192_v17, 16  ;;  %v2313_v17 = vshll.u32 %v2312_v30, 16  ;;  %v328_v30 = vld [vmem:[%s8097_s29 + $0x1d8] sm:$0xff] }
 0x32b   : > { %v8577_v54 = vpop.xlane.xlu1 %2279  ;;  %3781 = vperm.xlu1 %4535, %v4200_v33   ;;  %v2221_v33 = vcvt.f32.s32 %v8551_v62  ;;  %vm2521_vm0 = vcmp.eq.s32.totalorder %v2164_v53, %v310_v39  ;;  %v2251_v62 = vcvt.f32.s32 %v8564_v48  ;;  %v2387_v48 = vcvt.f32.s32 %v8397_v16 }
 0x32c   : > { %vm2528_vm14 = vcmp.eq.s32.totalorder %v2269_v15, %v317_v52  ;;  %v4208_v52 = vsel %vm2519_vm7, 1.0, %v9527_v3  ;;  %v2194_v15 = vadd.s32 %v2193_v10, %v2191_v22  ;;  %v4210_v20 = vsel %vm2521_vm0, 1.0, %v9527_v3 }
 0x32d   : > { %v4217_v31 = vsel %vm2528_vm14, 1.0, %v9527_v3  ;;  %v2281_v41 = vcvt.f32.s32 %v8577_v54  ;;  %v2388_v29 = vshll.u32 %v2387_v48, 16  ;;  %v2372_v10 = vcvt.f32.s32 %v8390_v18 }
 0x32e   : > { %3866 = vperm.xlu0 %4529, %v4217_v31   ;;  %v2224_v31 = vadd.s32 %v2223_v28, %v2221_v33  ;;  %vm2523_vm10 = vcmp.eq.s32.totalorder %v2194_v15, %v312_v58 }
 0x32f   : > { %v2295_v35 = vpop.xlane.xlu1 %2294  ;;  %3791 = vperm.xlu1 %4535, %v4202_v11   ;;  %v4212_v25 = vsel %vm2523_vm10, 1.0, %v9527_v3  ;;  %v2373_v33 = vshll.u32 %v2372_v10, 16  ;;  %vm4074_vm10 = vcmask 1042432  }
 0x330   : > { %v2296_v40 = vcvt.f32.s32 %v2295_v35  ;;  %v2253_v35 = vshll.u32 %v2252_v19, 16  ;;  %vm2525_vm12 = vcmp.eq.s32.totalorder %v2224_v31, %v314_v61 }
 0x331   : > { %v4214_v56 = vsel %vm2525_vm12, 1.0, %v9527_v3 }
 0x332   : > { %v2299_v42 = vadd.s32 %v2298_v37, %v2296_v40  ;;  %v2282_v37 = vcvt.f32.s32 %v8311_v59  ;;  %v323_v40 = vld [vmem:[%s8097_s29 + $0x1b0] sm:$0xff]  ;;  %v2254_v60 = vadd.s32 %v2253_v35, %v2251_v62  ;;  %v2432_v62 = vcvt.f32.s32 %v8422_v49 }
 0x333   : > { %v8590_v44 = vpop.xlane.xlu1 %2309  ;;  %3801 = vperm.xlu1 %4535, %v4204_v8  }
 0x334   : > { %vm2530_vm6 = vcmp.eq.s32.totalorder %v2299_v42, %v319_v1  ;;  %v316_v42 = vld [vmem:[%s8097_s29 + $0x178] sm:$0xff]  ;;  %v2283_v8 = vshll.u32 %v2282_v37, 16  ;;  %v2311_v54 = vcvt.f32.s32 %v8590_v44  ;;  %v2417_v44 = vcvt.f32.s32 %v8412_v4  ;;  %v322_v4 = vld [vmem:[%s8097_s29 + $0x1a8] sm:$0xff] }
 0x335   : > { %v4219_v45 = vsel %vm2530_vm6, 1.0, %v9527_v3  ;;  %vm2527_vm13 = vcmp.eq.s32.totalorder %v2254_v60, %v316_v42  ;;  %v2477_v42 = vcvt.f32.s32 %v8444_v12  ;;  %v330_v12 = vld [vmem:[%s8097_s29 + $0x1e8] sm:$0xff] }
 0x336   : > { %3876 = vperm.xlu0 %4529, %v4219_v45   ;;  %v2284_v47 = vadd.s32 %v2283_v8, %v2281_v41  ;;  %v2342_v45 = vcvt.f32.s32 %v8362_v51  ;;  %v4216_v53 = vsel %vm2527_vm13, 1.0, %v9527_v3  ;;  %v2314_v22 = vadd.s32 %v2313_v17, %v2311_v54  ;;  %v4532_v41 = vpop.permute.xlu0 %4531  ;;  %v331_v17 = vld [vmem:[%s8097_s29 + $0x1f0] sm:$0xff] }
 0x337   : > { %v2325_v13 = vpop.xlane.xlu1 %2324  ;;  %3811 = vperm.xlu1 %4535, %v4206_v7   ;;  %v325_v7 = vld [vmem:[%s8097_s29 + $0x1c0] sm:$0xff] }
 0x338   : > { %v2326_v14 = vcvt.f32.s32 %v2325_v13  ;;  %vm2529_vm15 = vcmp.eq.s32.totalorder %v2284_v47, %v318_v50  ;;  %v2343_v39 = vshll.u32 %v2342_v45, 16  ;;  %v4533_v47 = vunpack.i.l.bf16 %v4532_v41  ;;  %v9994_v45 = vld [vmem:[#allocation160_spill] sm:$0xff] }
 0x339   : > { %v4218_v38 = vsel %vm2529_vm15, 1.0, %v9527_v3 }
 0x33a   : > { %v2329_v23 = vadd.s32 %v2328_v5, %v2326_v14  ;;  %v320_v14 = vld [vmem:[%s8097_s29 + $0x198] sm:$0xff] }
 0x33b   : > { %v8603_v21 = vpop.xlane.xlu1 %2339  ;;  %3821 = vperm.xlu1 %4535, %v4208_v52   ;;  %vm2531_vm4 = vcmp.eq.s32.totalorder %v2314_v22, %v320_v14  ;;  %v2418_v52 = vshll.u32 %v2417_v44, 16  ;;  %v9996_v44 = vld [vmem:[#allocation162_spill] sm:$0xff] }
 0x33c   : > { %vm2532_vm9 = vcmp.eq.s32.totalorder %v2329_v23, %v321_v24  ;;  %v2341_v13 = vcvt.f32.s32 %v8603_v21  ;;  %v2402_v21 = vcvt.f32.s32 %v8405_v55  ;;  %v4220_v18 = vsel %vm2531_vm4, 1.0, %v9527_v3 }
 0x33d   : > { %v4221_v57 = vsel %vm2532_vm9, 1.0, %v9527_v3  ;;  %vm4072_vm9 = vcmask 1041408  }
 0x33e   : > { %3886 = vperm.xlu0 %4529, %v4221_v57   ;;  %v2344_v0 = vadd.s32 %v2343_v39, %v2341_v13  ;;  %v2447_v57 = vcvt.f32.s32 %v8429_v9  ;;  %v2403_v31 = vshll.u32 %v2402_v21, 16  ;;  %v326_v9 = vld [vmem:[%s8097_s29 + $0x1c8] sm:$0xff] }
 0x33f   : > { %v2355_v11 = vpop.xlane.xlu1 %2354  ;;  %3831 = vperm.xlu1 %4535, %v4210_v20   ;;  %v324_v20 = vld [vmem:[%s8097_s29 + $0x1b8] sm:$0xff] }
 0x340   : > { %v2356_v46 = vcvt.f32.s32 %v2355_v11  ;;  %vm2533_vm1 = vcmp.eq.s32.totalorder %v2344_v0, %v322_v4  ;;  %v2448_v35 = vshll.u32 %v2447_v57, 16  ;;  %v9998_v4 = vld [vmem:[#allocation109_spill] sm:$0xff] }
 0x341   : > { %v4222_v11 = vsel %vm2533_vm1, 1.0, %v9527_v3 }
 0x342   : > { %v2359_v6 = vadd.s32 %v2358_v27, %v2356_v46 }
 0x343   : > { %v2370_v1 = vpop.xlane.xlu1 %2369  ;;  %3841 = vperm.xlu1 %4535, %v4212_v25   ;;  %v329_v25 = vld [vmem:[%s8097_s29 + $0x1e0] sm:$0xff] }
 0x344   : > { %vm2534_vm3 = vcmp.eq.s32.totalorder %v2359_v6, %v323_v40  ;;  %v2371_v24 = vcvt.f32.s32 %v2370_v1  ;;  %v2433_v40 = vshll.u32 %v2432_v62, 16  ;;  %v2462_v6 = vcvt.f32.s32 %v8437_v63 }
 0x345   : > { %v4223_v59 = vsel %vm2534_vm3, 1.0, %v9527_v3  ;;  %v4534_v63 = vunpack.i.h.bf16 %v4532_v41 }
 0x346   : > { %3896 = vperm.xlu0 %4529, %v4223_v59   ;;  %v2374_v28 = vadd.s32 %v2373_v33, %v2371_v24  ;;  %v2463_v59 = vshll.u32 %v2462_v6, 16  ;;  %v9997_v24 = vld [vmem:[#allocation167_spill] sm:$0xff] }
 0x347   : > { %v2385_v36 = vpop.xlane.xlu1 %2384  ;;  %3851 = vperm.xlu1 %4535, %v4214_v56   ;;  %v10004_v6 = vld [vmem:[#allocation15_spill] sm:$0xff] }
 0x348   : > { %v2386_v16 = vcvt.f32.s32 %v2385_v36  ;;  %vm2535_vm14 = vcmp.eq.s32.totalorder %v2374_v28, %v324_v20 }
 0x349   : > { %v4224_v49 = vsel %vm2535_vm14, 1.0, %v9527_v3 }
 0x34a   : > { %v2389_v26 = vadd.s32 %v2388_v29, %v2386_v16  ;;  %v2478_v16 = vshll.u32 %v2477_v42, 16 }
 0x34b   : > { %v2400_v5 = vpop.xlane.xlu1 %2399  ;;  %3861 = vperm.xlu1 %4535, %v4216_v53  }
 0x34c   : > { %vm2536_vm2 = vcmp.eq.s32.totalorder %v2389_v26, %v325_v7  ;;  %v2401_v34 = vcvt.f32.s32 %v2400_v5  ;;  %v3940_v7 = vmul.f32 %v4534_v63, %v9994_v45  ;;  %v9995_v26 = vld [vmem:[#allocation159_spill] sm:$0xff]  ;;  %v10009_v45 = vld [vmem:[#allocation18_spill] sm:$0xff] }
 0x34d   : > { %v4225_v51 = vsel %vm2536_vm2, 1.0, %v9527_v3  ;;  %v3939_v53 = vmul.f32 %v4533_v47, %v9995_v26  ;;  %v10007_v47 = vld [vmem:[#allocation116_spill] sm:$0xff] }
 0x34e   : > { %3906 = vperm.xlu0 %4529, %v4225_v51   ;;  %v2404_v27 = vadd.s32 %v2403_v31, %v2401_v34 }
 0x34f   : > { %v2415_v23 = vpop.xlane.xlu1 %2414  ;;  %3871 = vperm.xlu1 %4535, %v4218_v38   ;;  %v4002_v10 = vadd.f32 %v3940_v7, %v3939_v53  ;;  %v10010_v53 = vld [vmem:[#allocation23_spill] sm:$0xff] }
 0x350   : > { %v2416_v15 = vcvt.f32.s32 %v2415_v23  ;;  %vm2537_vm8 = vcmp.eq.s32.totalorder %v2404_v27, %v326_v9  ;;  %v10002_v27 = vld [vmem:[#allocation196_spill] sm:$0xff]  ;;  %v10003_v9 = vld [vmem:[#allocation35_spill] sm:$0xff] }
 0x351   : > { %v4226_v54 = vsel %vm2537_vm8, 1.0, %v9527_v3 }
 0x352   : > { %v2419_v58 = vadd.s32 %v2418_v52, %v2416_v15 }
 0x353   : > { %v2430_v19 = vpop.xlane.xlu1 %2429  ;;  %3881 = vperm.xlu1 %4535, %v4220_v18  }
 0x354   : > { %vm2538_vm11 = vcmp.eq.s32.totalorder %v2419_v58, %v327_v32  ;;  %v2431_v46 = vcvt.f32.s32 %v2430_v19  ;;  %v9999_v58 = vld [vmem:[#allocation34_spill] sm:$0xff]  ;;  %v10000_v19 = vld [vmem:[#allocation11_spill] sm:$0xff] }
 0x355   : > { %v4227_v55 = vsel %vm2538_vm11, 1.0, %v9527_v3 }
 0x356   : > { %3916 = vperm.xlu0 %4529, %v4227_v55   ;;  %v2434_v1 = vadd.s32 %v2433_v40, %v2431_v46 }
 0x357   : > { %v2445_v61 = vpop.xlane.xlu1 %2444  ;;  %3891 = vperm.xlu1 %4535, %v4222_v11  }
 0x358   : > { %v2446_v37 = vcvt.f32.s32 %v2445_v61  ;;  %vm2539_vm6 = vcmp.eq.s32.totalorder %v2434_v1, %v328_v30  ;;  %v3677_v61 = vpop.permute.xlu0 %3676  ;;  %v10005_v1 = vld [vmem:[#allocation16_spill] sm:$0xff] }
 0x359   : > { %v4228_v13 = vsel %vm2539_vm6, 1.0, %v9527_v3 }
 0x35a   : > { %v2449_v60 = vadd.s32 %v2448_v35, %v2446_v37 }
 0x35b   : > { %v2460_v48 = vpop.xlane.xlu1 %2459  ;;  %3901 = vperm.xlu1 %4535, %v4224_v49  }
 0x35c   : > { %v2461_v8 = vcvt.f32.s32 %v2460_v48  ;;  %vm2540_vm5 = vcmp.eq.s32.totalorder %v2449_v60, %v329_v25  ;;  %v3949_v25 = vmul.f32 %v10004_v6, %v3677_v61  ;;  %v3687_v49 = vpop.permute.xlu0 %3686 }
 0x35d   : > { %v4229_v56 = vsel %vm2540_vm5, 1.0, %v9527_v3 }
 0x35e   : > { %3926 = vperm.xlu0 %4529, %v4229_v56   ;;  %v2464_v36 = vadd.s32 %v2463_v59, %v2461_v8  ;;  %v10006_v8 = vld [vmem:[#allocation17_spill] sm:$0xff] }
 0x35f   : > { %3911 = vperm.xlu1 %4535, %v4226_v54   ;;  %v2475_v29 = vpop.xlane.xlu1 %2474  ;;  %v3951_v30 = vmul.f32 %v10006_v8, %v3687_v49 }
 0x360   : > { %v2476_v50 = vcvt.f32.s32 %v2475_v29  ;;  %vm2541_vm7 = vcmp.eq.s32.totalorder %v2464_v36, %v330_v12  ;;  %v3697_v56 = vpop.permute.xlu0 %3696  ;;  %v10008_v29 = vld [vmem:[#allocation20_spill] sm:$0xff] }
 0x361   : > { %v4230_v51 = vsel %vm2541_vm7, 1.0, %v9527_v3 }
 0x362   : > { %v2479_v22 = vadd.s32 %v2478_v16, %v2476_v50  ;;  %v3953_v16 = vmul.f32 %v10008_v29, %v3697_v56 }
 0x363   : > { %3921 = vperm.xlu1 %4535, %v4228_v13   ;;  %v3637_v5 = vpop.permute.xlu1 %3636 }
 0x364   : > { %v3941_v14 = vmul.f32 %v9996_v44, %v3637_v5  ;;  %vm2542_vm0 = vcmp.eq.s32.totalorder %v2479_v22, %v331_v17  ;;  %v3707_v12 = vpop.permute.xlu0 %3706 }
 0x365   : > { %v4231_v39 = vsel %vm2542_vm0, 1.0, %v9527_v3  ;;  %v10001_v3 = vld [vmem:[#allocation195_spill] sm:$0xff]  ;;  %v3955_v22 = vmul.f32 %v10010_v53, %v3707_v12 }
 0x366   : > { %3936 = vperm.xlu0 %4529, %v4231_v39   ;;  %v4003_v0 = vadd.f32 %v4002_v10, %v3941_v14  ;;  %v10011_v14 = vld [vmem:[#allocation21_spill] sm:$0xff] }
 0x367   : > { %3931 = vperm.xlu1 %4535, %v4230_v51   ;;  %v3642_v38 = vpop.permute.xlu1 %3641  ;;  %v10012_v51 = vld [vmem:[#allocation26_spill] sm:$0xff] }
 0x368   : > { %v3942_v23 = vmul.f32 %v9997_v24, %v3642_v38  ;;  %v3717_v5 = vpop.permute.xlu0 %3716 }
 0x369   : > { %v3957_v38 = vmul.f32 %v10012_v51, %v3717_v5 }
 0x36a   : > { %v4004_v52 = vadd.f32 %v4003_v0, %v3942_v23 }
 0x36b   : > { %v3647_v15 = vpop.permute.xlu1 %3646 }
 0x36c   : > { %v3943_v33 = vmul.f32 %v9998_v4, %v3647_v15  ;;  %v3727_v24 = vpop.permute.xlu0 %3726 }
 0x36e   : > { %v4005_v32 = vadd.f32 %v4004_v52, %v3943_v33  ;;  %v10013_v52 = vld [vmem:[#allocation118_spill] sm:$0xff]  ;;  %v10014_v33 = vld [vmem:[#allocation29_spill] sm:$0xff] }
 0x36f   : > { %v3652_v21 = vpop.permute.xlu1 %3651 }
 0x370   : > { %v3944_v18 = vmul.f32 %v9999_v58, %v3652_v21  ;;  %v3959_v21 = vmul.f32 %v10014_v33, %v3727_v24  ;;  %v3737_v58 = vpop.permute.xlu0 %3736 }
 0x372   : > { %v4006_v28 = vadd.f32 %v4005_v32, %v3944_v18 }
 0x373   : > { %v3657_v34 = vpop.permute.xlu1 %3656 }
 0x374   : > { %v3945_v57 = vmul.f32 %v10000_v19, %v3657_v34 }
 0x376   : > { %v4007_v31 = vadd.f32 %v4006_v28, %v3945_v57  ;;  %v10015_v28 = vld [vmem:[#allocation121_spill] sm:$0xff] }
 0x377   : > { %v3662_v20 = vpop.permute.xlu1 %3661  ;;  %v10016_v57 = vld [vmem:[#allocation13_spill] sm:$0xff] }
 0x378   : > { %v3946_v62 = vmul.f32 %v10001_v3, %v3662_v20  ;;  %v3961_v20 = vmul.f32 %v10016_v57, %v3737_v58  ;;  %v3747_v3 = vpop.permute.xlu0 %3746 }
 0x37a   : > { %v4008_v55 = vadd.f32 %v4007_v31, %v3946_v62 }
 0x37b   : > { %v3667_v11 = vpop.permute.xlu1 %3666 }
 0x37c   : > { %v3947_v46 = vmul.f32 %v10002_v27, %v3667_v11 }
 0x37e   : > { %v4009_v37 = vadd.f32 %v4008_v55, %v3947_v46  ;;  %v10017_v55 = vld [vmem:[#allocation24_spill] sm:$0xff]  ;;  %v10018_v46 = vld [vmem:[#allocation39_spill] sm:$0xff] }
 0x37f   : > { %v3672_v35 = vpop.permute.xlu1 %3671  ;;  %v3963_v61 = vmul.f32 %v10018_v46, %v3747_v3 }
 0x380   : > { %v3948_v40 = vmul.f32 %v10003_v9, %v3672_v35 }
 0x382   : > { %v4010_v60 = vadd.f32 %v4009_v37, %v3948_v40  ;;  %v3757_v37 = vpop.permute.xlu0 %3756  ;;  %v10019_v40 = vld [vmem:[#allocation105_spill] sm:$0xff] }
 0x383   : > { %v3682_v41 = vpop.permute.xlu1 %3681 }
 0x384   : > { %v3950_v48 = vmul.f32 %v10005_v1, %v3682_v41  ;;  %v4011_v42 = vadd.f32 %v4010_v60, %v3949_v25  ;;  %v10020_v60 = vld [vmem:[#allocation199_spill] sm:$0xff] }
 0x385   : > { %v3965_v49 = vmul.f32 %v10020_v60, %v3757_v37 }
 0x386   : > { %v4012_v59 = vadd.f32 %v4011_v42, %v3950_v48  ;;  %v3767_v1 = vpop.permute.xlu0 %3766  ;;  %v10021_v42 = vld [vmem:[#allocation46_spill] sm:$0xff] }
 0x387   : > { %v3692_v63 = vpop.permute.xlu1 %3691 }
 0x388   : > { %v3952_v54 = vmul.f32 %v10007_v47, %v3692_v63  ;;  %v4013_v36 = vadd.f32 %v4012_v59, %v3951_v30  ;;  %v10022_v59 = vld [vmem:[#allocation117_spill] sm:$0xff] }
 0x389   : > { %v3967_v56 = vmul.f32 %v10022_v59, %v3767_v1 }
 0x38a   : > { %v4014_v50 = vadd.f32 %v4013_v36, %v3952_v54  ;;  %v3777_v47 = vpop.permute.xlu0 %3776  ;;  %v10023_v36 = vld [vmem:[#allocation33_spill] sm:$0xff] }
 0x38b   : > { %v3702_v17 = vpop.permute.xlu1 %3701 }
 0x38c   : > { %v3954_v7 = vmul.f32 %v10009_v45, %v3702_v17  ;;  %v4015_v26 = vadd.f32 %v4014_v50, %v3953_v16  ;;  %v10024_v50 = vld [vmem:[#allocation94_spill] sm:$0xff] }
 0x38d   : > { %v3969_v12 = vmul.f32 %v10024_v50, %v3777_v47 }
 0x38e   : > { %v4016_v13 = vadd.f32 %v4015_v26, %v3954_v7  ;;  %v3787_v45 = vpop.permute.xlu0 %3786  ;;  %v10025_v26 = vld [vmem:[#allocation28_spill] sm:$0xff] }
 0x38f   : > { %v3712_v44 = vpop.permute.xlu1 %3711 }
 0x390   : > { %v3956_v39 = vmul.f32 %v10011_v14, %v3712_v44  ;;  %v4017_v10 = vadd.f32 %v4016_v13, %v3955_v22  ;;  %v10026_v13 = vld [vmem:[#allocation19_spill] sm:$0xff] }
 0x391   : > { %v3971_v5 = vmul.f32 %v10026_v13, %v3787_v45 }
 0x392   : > { %v4018_v0 = vadd.f32 %v4017_v10, %v3956_v39  ;;  %v3797_v14 = vpop.permute.xlu0 %3796  ;;  %v10027_v10 = vld [vmem:[#allocation139_spill] sm:$0xff] }
 0x393   : > { %v3722_v23 = vpop.permute.xlu1 %3721 }
 0x394   : > { %v3958_v15 = vmul.f32 %v10013_v52, %v3722_v23  ;;  %v4019_v4 = vadd.f32 %v4018_v0, %v3957_v38  ;;  %v10028_v0 = vld [vmem:[#allocation44_spill] sm:$0xff] }
 0x395   : > { %v3973_v24 = vmul.f32 %v10028_v0, %v3797_v14 }
 0x396   : > { %v4020_v32 = vadd.f32 %v4019_v4, %v3958_v15  ;;  %v3807_v52 = vpop.permute.xlu0 %3806  ;;  %v10029_v4 = vld [vmem:[#allocation141_spill] sm:$0xff] }
 0x397   : > { %v3732_v18 = vpop.permute.xlu1 %3731 }
 0x398   : > { %v3960_v34 = vmul.f32 %v10015_v28, %v3732_v18  ;;  %v4021_v19 = vadd.f32 %v4020_v32, %v3959_v21  ;;  %v10030_v32 = vld [vmem:[#allocation107_spill] sm:$0xff] }
 0x399   : > { %v3975_v58 = vmul.f32 %v10030_v32, %v3807_v52 }
 0x39a   : > { %v4022_v31 = vadd.f32 %v4021_v19, %v3960_v34  ;;  %v3817_v28 = vpop.permute.xlu0 %3816  ;;  %v10031_v19 = vld [vmem:[#allocation37_spill] sm:$0xff] }
 0x39b   : > { %v3742_v62 = vpop.permute.xlu1 %3741 }
 0x39c   : > { %v3962_v11 = vmul.f32 %v10017_v55, %v3742_v62  ;;  %v4023_v27 = vadd.f32 %v4022_v31, %v3961_v20  ;;  %v10032_v31 = vld [vmem:[#allocation52_spill] sm:$0xff] }
 0x39d   : > { %v3977_v3 = vmul.f32 %v10032_v31, %v3817_v28 }
 0x39e   : > { %v4024_v35 = vadd.f32 %v4023_v27, %v3962_v11  ;;  %v3827_v55 = vpop.permute.xlu0 %3826  ;;  %v10033_v27 = vld [vmem:[#allocation142_spill] sm:$0xff] }
 0x39f   : > { %v3752_v9 = vpop.permute.xlu1 %3751 }
 0x3a0   : > { %v3964_v6 = vmul.f32 %v10019_v40, %v3752_v9  ;;  %v4025_v25 = vadd.f32 %v4024_v35, %v3963_v61  ;;  %v10034_v35 = vld [vmem:[#allocation36_spill] sm:$0xff] }
 0x3a1   : > { %v3979_v37 = vmul.f32 %v10034_v35, %v3827_v55 }
 0x3a2   : > { %v4026_v41 = vadd.f32 %v4025_v25, %v3964_v6  ;;  %v3837_v40 = vpop.permute.xlu0 %3836  ;;  %v10035_v25 = vld [vmem:[#allocation40_spill] sm:$0xff] }
 0x3a3   : > { %v3762_v48 = vpop.permute.xlu1 %3761 }
 0x3a4   : > { %v3966_v8 = vmul.f32 %v10021_v42, %v3762_v48  ;;  %v4027_v30 = vadd.f32 %v4026_v41, %v3965_v49  ;;  %v10036_v41 = vld [vmem:[#allocation110_spill] sm:$0xff] }
 0x3a5   : > { %v3981_v1 = vmul.f32 %v10036_v41, %v3837_v40 }
 0x3a6   : > { %v4028_v63 = vadd.f32 %v4027_v30, %v3966_v8  ;;  %v3847_v42 = vpop.permute.xlu0 %3846  ;;  %v10037_v30 = vld [vmem:[#allocation14_spill] sm:$0xff] }
 0x3a7   : > { %v3772_v54 = vpop.permute.xlu1 %3771 }
 0x3a8   : > { %v3968_v29 = vmul.f32 %v10023_v36, %v3772_v54  ;;  %v4029_v16 = vadd.f32 %v4028_v63, %v3967_v56  ;;  %v10038_v63 = vld [vmem:[#allocation38_spill] sm:$0xff] }
 0x3a9   : > { %v3983_v47 = vmul.f32 %v10038_v63, %v3847_v42 }
 0x3aa   : > { %v4030_v17 = vadd.f32 %v4029_v16, %v3968_v29  ;;  %v3857_v36 = vpop.permute.xlu0 %3856  ;;  %v10039_v16 = vld [vmem:[#allocation87_spill] sm:$0xff] }
 0x3ab   : > { %v3782_v7 = vpop.permute.xlu1 %3781 }
 0x3ac   : > { %v3970_v53 = vmul.f32 %v10025_v26, %v3782_v7  ;;  %v4031_v22 = vadd.f32 %v4030_v17, %v3969_v12  ;;  %v10040_v17 = vld [vmem:[#allocation147_spill] sm:$0xff] }
 0x3ad   : > { %v3985_v45 = vmul.f32 %v10040_v17, %v3857_v36 }
 0x3ae   : > { %v4032_v44 = vadd.f32 %v4031_v22, %v3970_v53  ;;  %v3867_v26 = vpop.permute.xlu0 %3866  ;;  %v10041_v22 = vld [vmem:[#allocation12_spill] sm:$0xff] }
 0x3af   : > { %v3792_v39 = vpop.permute.xlu1 %3791 }
 0x3b0   : > { %v3972_v51 = vmul.f32 %v10027_v10, %v3792_v39  ;;  %v4033_v38 = vadd.f32 %v4032_v44, %v3971_v5  ;;  %v10042_v44 = vld [vmem:[#allocation98_spill] sm:$0xff] }
 0x3b1   : > { %v3987_v14 = vmul.f32 %v10042_v44, %v3867_v26 }
 0x3b2   : > { %v4034_v23 = vadd.f32 %v4033_v38, %v3972_v51  ;;  %v10043_v38 = vld [vmem:[#allocation45_spill] sm:$0xff] }
 0x3b3   : > { %v3802_v15 = vpop.permute.xlu1 %3801 }
 0x3b4   : > { %v3974_v33 = vmul.f32 %v10029_v4, %v3802_v15  ;;  %v4035_v21 = vadd.f32 %v4034_v23, %v3973_v24  ;;  %v10044_v23 = vld [vmem:[#allocation150_spill] sm:$0xff] }
 0x3b5   : > { %v3877_v10 = vpop.permute.xlu0 %3876 }
 0x3b6   : > { %v4036_v18 = vadd.f32 %v4035_v21, %v3974_v33  ;;  %v3989_v52 = vmul.f32 %v10044_v23, %v3877_v10  ;;  %v10045_v21 = vld [vmem:[#allocation99_spill] sm:$0xff] }
 0x3b7   : > { %v3812_v34 = vpop.permute.xlu1 %3811 }
 0x3b8   : > { %v3976_v57 = vmul.f32 %v10031_v19, %v3812_v34  ;;  %v4037_v20 = vadd.f32 %v4036_v18, %v3975_v58  ;;  %v10046_v18 = vld [vmem:[#allocation155_spill] sm:$0xff] }
 0x3ba   : > { %v4038_v62 = vadd.f32 %v4037_v20, %v3976_v57  ;;  %v10047_v20 = vld [vmem:[#allocation156_spill] sm:$0xff] }
 0x3bb   : > { %v3822_v11 = vpop.permute.xlu1 %3821 }
 0x3bc   : > { %v3978_v46 = vmul.f32 %v10033_v27, %v3822_v11  ;;  %v4039_v61 = vadd.f32 %v4038_v62, %v3977_v3  ;;  %v10048_v62 = vld [vmem:[#allocation135_spill] sm:$0xff] }
 0x3bd   : > { %v3887_v4 = vpop.permute.xlu0 %3886 }
 0x3be   : > { %v4040_v9 = vadd.f32 %v4039_v61, %v3978_v46  ;;  %v3991_v28 = vmul.f32 %v10046_v18, %v3887_v4  ;;  %v10049_v61 = vld [vmem:[#allocation136_spill] sm:$0xff] }
 0x3bf   : > { %v3832_v6 = vpop.permute.xlu1 %3831 }
 0x3c0   : > { %v3980_v60 = vmul.f32 %v10035_v25, %v3832_v6  ;;  %v4041_v49 = vadd.f32 %v4040_v9, %v3979_v37  ;;  %v10050_v9 = vld [vmem:[#allocation7_spill] sm:$0xff] }
 0x3c2   : > { %v4042_v48 = vadd.f32 %v4041_v49, %v3980_v60  ;;  %v10051_v49 = vld [vmem:[#allocation101_spill] sm:$0xff] }
 0x3c3   : > { %v3842_v8 = vpop.permute.xlu1 %3841 }
 0x3c4   : > { %v3982_v59 = vmul.f32 %v10037_v30, %v3842_v8  ;;  %v4043_v56 = vadd.f32 %v4042_v48, %v3981_v1 }
 0x3c5   : > { %v3897_v19 = vpop.permute.xlu0 %3896 }
 0x3c6   : > { %v4044_v54 = vadd.f32 %v4043_v56, %v3982_v59  ;;  %v3993_v55 = vmul.f32 %v10048_v62, %v3897_v19  ;;  %v10052_v59 = vld [vmem:[#allocation56_spill] sm:$0xff] }
 0x3c7   : > { %v3852_v29 = vpop.permute.xlu1 %3851 }
 0x3c8   : > { %v3984_v50 = vmul.f32 %v10039_v16, %v3852_v29  ;;  %v4045_v12 = vadd.f32 %v4044_v54, %v3983_v47  ;;  %v10053_v47 = vld [vmem:[#allocation50_spill] sm:$0xff] }
 0x3ca   : > { %v4046_v7 = vadd.f32 %v4045_v12, %v3984_v50  ;;  %v10054_v50 = vld [vmem:[#allocation168_spill] sm:$0xff] }
 0x3cb   : > { %v3862_v53 = vpop.permute.xlu1 %3861 }
 0x3cc   : > { %v3986_v13 = vmul.f32 %v10041_v22, %v3862_v53  ;;  %v4047_v5 = vadd.f32 %v4046_v7, %v3985_v45  ;;  %v10055_v45 = vld [vmem:[#allocation102_spill] sm:$0xff] }
 0x3cd   : > { %v3907_v27 = vpop.permute.xlu0 %3906 }
 0x3ce   : > { %v4048_v39 = vadd.f32 %v4047_v5, %v3986_v13  ;;  %v3995_v40 = vmul.f32 %v10050_v9, %v3907_v27 }
 0x3cf   : > { %v3872_v51 = vpop.permute.xlu1 %3871 }
 0x3d0   : > { %v3988_v0 = vmul.f32 %v10043_v38, %v3872_v51  ;;  %v4049_v24 = vadd.f32 %v4048_v39, %v3987_v14 }
 0x3d2   : > { %v4050_v15 = vadd.f32 %v4049_v24, %v3988_v0 }
 0x3d3   : > { %v3882_v33 = vpop.permute.xlu1 %3881 }
 0x3d4   : > { %v3990_v32 = vmul.f32 %v10045_v21, %v3882_v33  ;;  %v4051_v58 = vadd.f32 %v4050_v15, %v3989_v52 }
 0x3d5   : > { %v3917_v25 = vpop.permute.xlu0 %3916 }
 0x3d6   : > { %v4052_v34 = vadd.f32 %v4051_v58, %v3990_v32  ;;  %v3997_v48 = vmul.f32 %v8280_v43, %v3917_v25 }
 0x3d7   : > { %v3892_v57 = vpop.permute.xlu1 %3891 }
 0x3d8   : > { %v3992_v31 = vmul.f32 %v10047_v20, %v3892_v57  ;;  %v4053_v3 = vadd.f32 %v4052_v34, %v3991_v28 }
 0x3da   : > { %v4054_v11 = vadd.f32 %v4053_v3, %v3992_v31 }
 0x3db   : > { %v3902_v46 = vpop.permute.xlu1 %3901 }
 0x3dc   : > { %v3994_v35 = vmul.f32 %v10049_v61, %v3902_v46  ;;  %v4055_v37 = vadd.f32 %v4054_v11, %v3993_v55 }
 0x3dd   : > { %v3927_v8 = vpop.permute.xlu0 %3926 }
 0x3de   : > { %v4056_v6 = vadd.f32 %v4055_v37, %v3994_v35  ;;  %v3999_v54 = vmul.f32 %v10053_v47, %v3927_v8 }
 0x3df   : > { %v3912_v60 = vpop.permute.xlu1 %3911 }
 0x3e0   : > { %v3996_v41 = vmul.f32 %v10051_v49, %v3912_v60  ;;  %v4057_v1 = vadd.f32 %v4056_v6, %v3995_v40 }
 0x3e2   : > { %v4058_v42 = vadd.f32 %v4057_v1, %v3996_v41 }
 0x3e3   : > { %v3922_v30 = vpop.permute.xlu1 %3921 }
 0x3e4   : > { %v3998_v56 = vmul.f32 %v10052_v59, %v3922_v30  ;;  %v4059_v63 = vadd.f32 %v4058_v42, %v3997_v48 }
 0x3e5   : > { %v3937_v29 = vpop.permute.xlu0 %3936 }
 0x3e6   : > { %v4060_v36 = vadd.f32 %v4059_v63, %v3998_v56  ;;  %v4001_v7 = vmul.f32 %v10055_v45, %v3937_v29 }
 0x3e7   : > { %v3932_v16 = vpop.permute.xlu1 %3931 }
 0x3e8   : > { %v4000_v12 = vmul.f32 %v10054_v50, %v3932_v16  ;;  %v4061_v17 = vadd.f32 %v4060_v36, %v3999_v54 }
 0x3ea   : > { %v4062_v26 = vadd.f32 %v4061_v17, %v4000_v12 }
 0x3ec   : > { %v4063_v43 = vadd.f32 %v4062_v26, %v4001_v7 }
 0x3ee   : > { %v4064_v53 = vrot.slane %v4063_v43, 4 }
 0x3f0   : > { %v4065_v22 = vadd.f32 %v4064_v53, %v4063_v43 }
 0x3f2   : > { %v4066_v13 = vrot.slane %v4065_v22, 2 }
 0x3f4   : > { %v4067_v5 = vadd.f32 %v4066_v13, %v4065_v22 }
 0x3f6   : > { %v4068_v44 = vrot.slane %v4067_v5, 1 }
 0x3f8   : > { %v4069_v14 = vadd.f32 %v4068_v44, %v4067_v5 }
 0x3fa   : > { %v4073_v39 = vsel %vm4072_vm9, %v8418_v2, %v4069_v14 }
 0x3fb   : > { %v4075_v10 = vsel %vm4074_vm10, %v4073_v39, 0.0 }
 0x3fc   : > { %4076 = vst [vmem:[%s177_s5] sm:$0xff] %v4075_v10 }
 0x3fd   : > { %4801 = shalt.err (!%p4798_p3)
}
 0x3fe   : > { %s4802_s23 = scalar_lea.hbm %s8723_s14, 128  ;;  %s4806_s26 = scalar_lea.hbm %s8767_s2, 256 }
 0x3ff   : > { %p4803_p4 = scmp.ne.s32.totalorder %s8723_s14, %s4802_s23  ;;  %p4807_p9 = scmp.lt.u32.totalorder %s8723_s14, %s8767_s2 }
 0x400   : > { %p4808_p10 = scmp.lt.u32.totalorder %s4806_s26, %s4802_s23  ;;  %p4810_p12 = scmp.lt.u32.totalorder %s4802_s23, %s8723_s14 }
 0x401   : > { %p4804_p7 = pnand %p4803_p4, %p4908_p5 }
 0x402   : > { %p4809_p11 = por %p4808_p10, %p4807_p9 }
 0x403   : > { %p4805_p8 = pneg %p4804_p7 }
 0x404   : > { %p4811_p13 = por %p4810_p12, %p4809_p11 }
 0x406   : > { %p4812_p0 = pnand %p4811_p13, %p4805_p8 }
 0x408   : > { %4815 = shalt.err (!%p4812_p0)
}
 0x409   : > { %4488 = dma.vmem_to_hbm [thread:$0]  (%p4908_p5), %s8725_s6, 128, %s8723_s14, %s4078_s16  }
 0x40a PF: > { %p4494_p1 = scmp.ge.s32.totalorder %s4850_s12, 2  ;;  %s4103_s29 = sand.u32 1, %s4838_s9  }
 0x40b   : > { %s4104_s30 = scalar_lea.sflag [#allocation3], %s4103_s29 }
 0x40c   : > { %p4491_p2 = pnand %p4494_p1, %p4912_p6 }
 0x40e   : > { %4833 = dma.done.wait (!%p4491_p2), %s4104_s30, 128  }
 0x40f   : > { %4835 = vsyncadd (!%p4491_p2), %s4104_s30, 4294967168  ;;  %p12_p3 = scmp.ge.s32.totalorder %s4895_s15, 4   ;;  %s10056_s9 = smov %s4842_s10 }
 0x410   : > { %s10057_s10 = smov %s4846_s11  ;;  %s10058_s11 = smov %s4906_s18 }
 0x411   : > { %s10059_s12 = smov %s4895_s15  ;;  %14 = sbr.rel (!%p12_p3) target bundleno = 3 (0x3), region = 66 }
 0x418   :  { %4109 = vsyncpa [#allocation3], 1 }
 0x419   :  { %4111 = vsyncpa [#allocation3 + $0x1], 1 }

</bundles_post_ra>
